<compile_context>
chip_gen: v7x
topology: tpu7x:2x2x1
jax: 0.10.0
libtpu: 0.0.40
codegen_flags: <defaults>
</compile_context>

<pallas_src>
import functools
import math

import jax
import jax.numpy as jnp
from jax import lax
from jax.experimental import pallas as pl
from jax.experimental.pallas import tpu as pltpu

# Explicit scoped-VMEM budget: comfortably within v5e/v6e (128 MiB phys) and
# v7x (64 MiB phys / 32 MiB default scoped).
VMEM_LIMIT = 32 * 1024 * 1024


def _rup(x, m):
    return ((x + m - 1) // m) * m


def _pick_tile(dim, candidates):
    for c in candidates:
        if dim % c == 0:
            return c
    return dim


# ----------------------------------------------------------------------------
# Fused matmul kernel: out = act(A @ W + shift)   (bias / folded-BN / ReLU)
# ----------------------------------------------------------------------------

def _mm_kernel(a_ref, b_ref, s_ref, o_ref, acc_ref, *, apply_relu):
    @pl.when(pl.program_id(2) == 0)
    def _():
        acc_ref[...] = jnp.zeros_like(acc_ref)

    acc_ref[...] += jnp.dot(a_ref[...], b_ref[...],
                            preferred_element_type=jnp.float32)

    @pl.when(pl.program_id(2) == pl.num_programs(2) - 1)
    def _():
        y = acc_ref[...] + s_ref[...]
        if apply_relu:
            y = jnp.maximum(y, 0.0)
        o_ref[...] = y.astype(o_ref.dtype)


def make_dense(w, shift):
    """Pre-pad weight/shift to 128 multiples once (init-time); weights in bf16."""
    K, N = w.shape
    Kp, Np = _rup(K, 128), _rup(N, 128)
    wp = jnp.pad(w.astype(jnp.float32),
                 ((0, Kp - K), (0, Np - N))).astype(jnp.bfloat16)
    sp = jnp.pad(shift.astype(jnp.float32).reshape(1, N), ((0, 0), (0, Np - N)))
    return dict(w=wp, shift=sp, K=K, N=N)


def matmul_fused(A, dense, *, relu, out_dtype=jnp.float32):
    """act(A @ W + shift); bf16 MXU operands, f32 accumulation."""
    M, K = A.shape
    assert K == dense["K"], (K, dense["K"])
    Bw, sp = dense["w"], dense["shift"]
    Kp, Np = Bw.shape
    tm = min(_rup(M, 16), 256)                   # adaptive M tile (no 7x pad waste)
    Mp = _rup(M, tm)
    tk = _pick_tile(Kp, (512, 256, 128))
    tn = _pick_tile(Np, (256, 128))
    Ap = jnp.pad(A.astype(jnp.bfloat16), ((0, Mp - M), (0, Kp - K)))
    grid = (Mp // tm, Np // tn, Kp // tk)
    out = pl.pallas_call(
        functools.partial(_mm_kernel, apply_relu=relu),
        out_shape=jax.ShapeDtypeStruct((Mp, Np), out_dtype),
        grid=grid,
        in_specs=[pl.BlockSpec((tm, tk), lambda i, j, k: (i, k)),
                  pl.BlockSpec((tk, tn), lambda i, j, k: (k, j)),
                  pl.BlockSpec((1, tn), lambda i, j, k: (0, j))],
        out_specs=pl.BlockSpec((tm, tn), lambda i, j, k: (i, j)),
        scratch_shapes=[pltpu.VMEM((tm, tn), jnp.float32)],
        compiler_params=pltpu.CompilerParams(
            dimension_semantics=("parallel", "parallel", "arbitrary"),
            vmem_limit_bytes=VMEM_LIMIT),
    )(Ap, Bw, sp)
    return out[:M, :dense["N"]]


# ----------------------------------------------------------------------------
# Max-pool reduction kernel (gridded, lane-dense)
# ----------------------------------------------------------------------------

def _max4_kernel(a_ref, b_ref, c_ref, d_ref, o_ref):
    o_ref[...] = jnp.maximum(jnp.maximum(a_ref[...], b_ref[...]),
                             jnp.maximum(c_ref[...], d_ref[...]))


def pallas_max4(wins):
    a = wins[0]
    N, Ho, Wo, C = a.shape
    R, L = N * Ho, Wo * C                        # lane-dense flatten
    Rp = _rup(R, 8)
    br = math.gcd(Rp, 256)                       # multiple of 8 dividing Rp
    flats = [jnp.pad(w.reshape(R, L), ((0, Rp - R), (0, 0))) for w in wins]
    spec = pl.BlockSpec((br, L), lambda i: (i, 0))
    out = pl.pallas_call(
        _max4_kernel,
        out_shape=jax.ShapeDtypeStruct((Rp, L), a.dtype),
        grid=(Rp // br,),
        in_specs=[spec, spec, spec, spec],
        out_specs=spec,
        compiler_params=pltpu.CompilerParams(
            dimension_semantics=("parallel",),
            vmem_limit_bytes=VMEM_LIMIT),
    )(*flats)
    return out[:R].reshape(N, Ho, Wo, C)


# ----------------------------------------------------------------------------
# Bidirectional LSTM recurrence kernel (both directions in one call, grid=(2,))
# ----------------------------------------------------------------------------

def _bilstm_kernel(xg_ref, whh_ref, out_ref, h_scr, c_scr, *, T, H):
    """xg already holds x@Wih^T + b_ih + b_hh; PyTorch gate order i, f, g, o.

    grid axis 0 selects the direction (0 = forward, 1 = backward); the backward
    direction simply indexes t -> T-1-t (no HBM reversal copies).
    """
    d = pl.program_id(0)
    h_scr[...] = jnp.zeros_like(h_scr)
    c_scr[...] = jnp.zeros_like(c_scr)

    def body(s, carry):
        t = jnp.where(d == 0, s, T - 1 - s)
        g = xg_ref[t] + jnp.dot(h_scr[...], whh_ref[...],
                                preferred_element_type=jnp.float32)
        i_g = jax.nn.sigmoid(g[:, 0 * H:1 * H])
        f_g = jax.nn.sigmoid(g[:, 1 * H:2 * H])
        g_g = jnp.tanh(g[:, 2 * H:3 * H])
        o_g = jax.nn.sigmoid(g[:, 3 * H:4 * H])
        c = f_g * c_scr[...] + i_g * g_g
        h = o_g * jnp.tanh(c)
        c_scr[...] = c
        h_scr[...] = h
        out_ref[t] = h.astype(out_ref.dtype)
        return carry

    # T is small & static: full unroll gives the LLO scheduler visibility.
    lax.fori_loop(0, T, body, 0, unroll=True)


def bilstm_recurrence(xg, whh):
    """xg: (2, T, B, 4H) precomputed input gates; whh: (2, H, 4H)."""
    _, T, B, H4 = xg.shape
    H = H4 // 4
    return pl.pallas_call(
        functools.partial(_bilstm_kernel, T=T, H=H),
        out_shape=jax.ShapeDtypeStruct((2, T, B, H), jnp.float32),
        grid=(2,),
        in_specs=[pl.BlockSpec((None, T, B, H4), lambda d: (d, 0, 0, 0)),
                  pl.BlockSpec((None, H, H4), lambda d: (d, 0, 0))],
        out_specs=pl.BlockSpec((None, T, B, H), lambda d: (d, 0, 0, 0)),
        scratch_shapes=[pltpu.VMEM((B, H), jnp.float32),
                        pltpu.VMEM((B, H), jnp.float32)],
        compiler_params=pltpu.CompilerParams(
            dimension_semantics=("parallel",),      # one direction per TC on v7x
            vmem_limit_bytes=VMEM_LIMIT),
    )(xg.astype(jnp.float32), whh.astype(jnp.float32))


# ----------------------------------------------------------------------------
# Glue (im2col, pooling window extraction, sequence plumbing)
# ----------------------------------------------------------------------------

def conv2d_act(x, layer):
    """Stride-1 Conv2d (+ folded eval-mode BN) + ReLU via im2col + Pallas matmul."""
    k, p = layer["k"], layer["p"]
    N, H, W, C = x.shape
    xp = jnp.pad(x, ((0, 0), (p, p), (p, p), (0, 0)))
    Ho = H + 2 * p - k + 1
    Wo = W + 2 * p - k + 1
    # TODO(synk): im2col is still materialized (k*k read amplification); a
    # tap-accumulating matmul grid would remove it.
    cols = [lax.slice(xp, (0, di, dj, 0), (N, di + Ho, dj + Wo, C))
            for di in range(k) for dj in range(k)]
    A = jnp.concatenate(cols, axis=-1).reshape(N * Ho * Wo, k * k * C)
    y = matmul_fused(A, layer["dense"], relu=True, out_dtype=jnp.bfloat16)
    return y.reshape(N, Ho, Wo, layer["dense"]["N"])


def maxpool2d(x, stride, pad_w):
    """2x2 max pool, stride=(sh, sw), width padding pad_w (nn.MaxPool2d semantics)."""
    N, H, W, C = x.shape
    sh, sw = stride
    if pad_w:
        xp = jnp.pad(x, ((0, 0), (0, 0), (pad_w, pad_w), (0, 0)),
                     constant_values=-jnp.inf)
    else:
        xp = x
    Hp, Wp = H, W + 2 * pad_w
    Ho = (Hp - 2) // sh + 1
    Wo = (Wp - 2) // sw + 1
    wins = [lax.slice(xp, (0, di, dj, 0),
                      (N, di + sh * (Ho - 1) + 1, dj + sw * (Wo - 1) + 1, C),
                      (1, sh, sw, 1))
            for di in range(2) for dj in range(2)]
    return pallas_max4(wins)


def bilstm(x, p):
    """BidirectionalLSTM: bidirectional nn.LSTM + Linear(2H, nOut)."""
    T, B, n_in = x.shape
    H = p["H"]
    # One fused (T*B, nIn) x (nIn, 8H) gate matmul for both directions.
    xg = matmul_fused(x.reshape(T * B, n_in), p["gates"], relu=False)
    xg = xg.reshape(T, B, 2, 4 * H).transpose(2, 0, 1, 3)        # (2, T, B, 4H)
    hs = bilstm_recurrence(xg, p["whh"])                         # (2, T, B, H)
    rec = jnp.concatenate([hs[0], hs[1]], axis=-1)               # (T, B, 2H)
    out = matmul_fused(rec.reshape(T * B, 2 * H), p["emb"], relu=False)
    return out.reshape(T, B, -1)


def crnn_forward(x_nchw, params):
    x = jnp.transpose(x_nchw, (0, 2, 3, 1)).astype(jnp.bfloat16)  # NCHW -> NHWC
    conv = params["conv"]
    x = conv2d_act(x, conv[0]); x = maxpool2d(x, (2, 2), 0)       # pooling0
    x = conv2d_act(x, conv[1]); x = maxpool2d(x, (2, 2), 0)       # pooling1
    x = conv2d_act(x, conv[2])                                    # conv2 (+BN)
    x = conv2d_act(x, conv[3]); x = maxpool2d(x, (2, 1), 1)       # pooling2
    x = conv2d_act(x, conv[4])                                    # conv4 (+BN)
    x = conv2d_act(x, conv[5]); x = maxpool2d(x, (2, 1), 1)       # pooling3
    x = conv2d_act(x, conv[6])                                    # conv6 (+BN)
    N, H, W, C = x.shape
    assert H == 1, 'the height of conv must be 1'
    seq = jnp.transpose(x[:, 0, :, :], (1, 0, 2))                 # (T, B, 512)
    out = bilstm(seq, params["rnn1"])                             # (T, B, nh)
    out = bilstm(out, params["rnn2"])                             # (T, B, nclass)
    return out


# ----------------------------------------------------------------------------
# Deterministic parameter construction (mirrors CRNN.__init__ shapes)
# ----------------------------------------------------------------------------

def init_params(key, nc, nh, nclass):
    ks = [3, 3, 3, 3, 3, 3, 2]
    nm = [64, 128, 256, 256, 512, 512, 512]
    bn_layers = {2, 4, 6}
    params = {"conv": []}
    cin = nc
    for i, (k, cout) in enumerate(zip(ks, nm)):
        key, wk = jax.random.split(key)
        std = (2.0 / (cout * k * k)) ** 0.5          # kaiming_normal_, fan_out, relu
        w = std * jax.random.normal(wk, (k, k, cin, cout), jnp.float32)
        w = w.reshape(k * k * cin, cout)
        b = jnp.zeros((cout,), jnp.float32)          # nn.init.constant_(bias, 0)
        if i in bn_layers:
            # Eval-mode BatchNorm folded into the weights/shift:
            # gamma=1, beta=0, running_mean=0, running_var=1, eps=1e-5.
            # TODO(synk): training-mode BN (batch statistics) not implemented;
            # real checkpoints need shift = beta + scale*(bias - running_mean).
            eps = 1e-5
            s = jnp.full((cout,), 1.0 / (1.0 + eps) ** 0.5, jnp.float32)
        else:
            s = jnp.ones((cout,), jnp.float32)
        params["conv"].append(dict(dense=make_dense(w * s[None, :], b * s),
                                   k=k, p=(1 if k == 3 else 0)))
        cin = cout

    def lstm_dir_params(key, n_in, hid):
        bound = 1.0 / (hid ** 0.5)                   # nn.LSTM default init
        k1, k2, k3, k4 = jax.random.split(key, 4)
        wih = jax.random.uniform(k1, (n_in, 4 * hid), jnp.float32, -bound, bound)
        whh = jax.random.uniform(k2, (hid, 4 * hid), jnp.float32, -bound, bound)
        bih = jax.random.uniform(k3, (4 * hid,), jnp.float32, -bound, bound)
        bhh = jax.random.uniform(k4, (4 * hid,), jnp.float32, -bound, bound)
        return wih, whh, bih + bhh

    def bilstm_params(key, n_in, hid, n_out):
        kf, kb, kl = jax.random.split(key, 3)
        wih_f, whh_f, b_f = lstm_dir_params(kf, n_in, hid)
        wih_b, whh_b, b_b = lstm_dir_params(kb, n_in, hid)
        gates = make_dense(jnp.concatenate([wih_f, wih_b], axis=1),
                           jnp.concatenate([b_f, b_b]))
        wemb = 0.01 * jax.random.normal(kl, (2 * hid, n_out), jnp.float32)
        emb = make_dense(wemb, jnp.zeros((n_out,), jnp.float32))
        return dict(gates=gates, whh=jnp.stack([whh_f, whh_b]), emb=emb, H=hid)

    key, k1, k2 = jax.random.split(key, 3)
    params["rnn1"] = bilstm_params(k1, 512, nh, nh)
    params["rnn2"] = bilstm_params(k2, nh, nh, nclass)
    return params


if __name__ == "__main__":
    nc, nh, nclass = 1, 32, 8
    imgH, imgW, batch = 32, 32, 2      # imgH must be 32 so conv height ends at 1
    key = jax.random.PRNGKey(0)
    pkey, xkey = jax.random.split(key)
    params = init_params(pkey, nc, nh, nclass)
    x = jax.random.normal(xkey, (batch, nc, imgH, imgW), jnp.float32)

    fwd = jax.jit(lambda inp: crnn_forward(inp, params))
    out = jax.block_until_ready(fwd(x))

    assert out.shape == (9, batch, nclass), out.shape
    assert bool(jnp.all(jnp.isfinite(out)))
    print("KERNEL_OK")
</pallas_src>

<mosaic_0001>
module attributes {stable_mosaic.version = 11 : i64} {
  func.func @_mm_kernel(%arg0: i32, %arg1: i32, %arg2: i32, %arg3: memref<256x128xbf16, #tpu.memory_space<vmem>>, %arg4: memref<128x128xbf16, #tpu.memory_space<vmem>>, %arg5: memref<1x128xf32, #tpu.memory_space<vmem>>, %arg6: memref<256x128xbf16, #tpu.memory_space<vmem>>, %arg7: memref<256x128xf32, #tpu.memory_space<vmem>>) attributes {dimension_semantics = [#tpu.dimension_semantics<parallel>, #tpu.dimension_semantics<parallel>, #tpu.dimension_semantics<arbitrary>], iteration_bounds = array<i64: 8, 1, 1>, scalar_prefetch = 0 : i64, scratch_operands = 1 : i64, tpu.core_type = #tpu.core_type<tc>, window_params = [{transform_indices = @transform_0, window_bounds = array<i64: 256, 128>}, {transform_indices = @transform_1, window_bounds = array<i64: 128, 128>}, {transform_indices = @transform_2, window_bounds = array<i64: 1, 128>}, {transform_indices = @transform_3, window_bounds = array<i64: 256, 128>}]} {
    %c0_i32 = arith.constant 0 : i32
    %0 = arith.cmpi eq, %arg2, %c0_i32 : i32
    %1 = arith.extui %0 : i1 to i32
    %c0_i32_0 = arith.constant 0 : i32
    %2 = arith.cmpi ne, %1, %c0_i32_0 : i32
    scf.if %2 {
      %cst_10 = arith.constant 0.000000e+00 : f32
      %12 = vector.broadcast %cst_10 : f32 to vector<256x128xf32>
      %c0_11 = arith.constant 0 : index
      %c0_12 = arith.constant 0 : index
      %13 = vector.load %arg7[%c0_11, %c0_12] : memref<256x128xf32, #tpu.memory_space<vmem>>, vector<256x128xf32>
      tpu.vector_store %arg7[%c0_11, %c0_12], %12 {strides = array<i32>} : memref<256x128xf32, #tpu.memory_space<vmem>>, vector<256x128xf32>,
    } else {
    }
    %c0 = arith.constant 0 : index
    %c0_1 = arith.constant 0 : index
    %3 = vector.load %arg7[%c0, %c0_1] : memref<256x128xf32, #tpu.memory_space<vmem>>, vector<256x128xf32>
    %c0_2 = arith.constant 0 : index
    %c0_3 = arith.constant 0 : index
    %4 = vector.load %arg3[%c0_2, %c0_3] : memref<256x128xbf16, #tpu.memory_space<vmem>>, vector<256x128xbf16>
    %c0_4 = arith.constant 0 : index
    %c0_5 = arith.constant 0 : index
    %5 = vector.load %arg4[%c0_4, %c0_5] : memref<128x128xbf16, #tpu.memory_space<vmem>>, vector<128x128xbf16>
    %cst = arith.constant dense<0.000000e+00> : vector<256x128xf32>
    %6 = tpu.matmul %4, %5, %cst {dimension_numbers = #tpu.dot_dimension_numbers<[1], [0], [0], [1], [0, 0, 1, 1], [], []>} : vector<256x128xbf16>, vector<128x128xbf16>, vector<256x128xf32> -> vector<256x128xf32>
    %7 = arith.addf %3, %6 : vector<256x128xf32>
    %c0_6 = arith.constant 0 : index
    %c0_7 = arith.constant 0 : index
    %8 = vector.load %arg7[%c0_6, %c0_7] : memref<256x128xf32, #tpu.memory_space<vmem>>, vector<256x128xf32>
    tpu.vector_store %arg7[%c0_6, %c0_7], %7 {strides = array<i32>} : memref<256x128xf32, #tpu.memory_space<vmem>>, vector<256x128xf32>,
    %c0_i32_8 = arith.constant 0 : i32
    %9 = arith.cmpi eq, %arg2, %c0_i32_8 : i32
    %10 = arith.extui %9 : i1 to i32
    %c0_i32_9 = arith.constant 0 : i32
    %11 = arith.cmpi ne, %10, %c0_i32_9 : i32
    scf.if %11 {
      %c0_10 = arith.constant 0 : index
      %c0_11 = arith.constant 0 : index
      %12 = vector.load %arg7[%c0_10, %c0_11] : memref<256x128xf32, #tpu.memory_space<vmem>>, vector<256x128xf32>
      %c0_12 = arith.constant 0 : index
      %c0_13 = arith.constant 0 : index
      %13 = vector.load %arg5[%c0_12, %c0_13] : memref<1x128xf32, #tpu.memory_space<vmem>>, vector<1x128xf32>
      %14 = vector.broadcast %13 : vector<1x128xf32> to vector<256x128xf32>
      %15 = arith.addf %12, %14 : vector<256x128xf32>
      %cst_14 = arith.constant 0.000000e+00 : f32
      %16 = vector.broadcast %cst_14 : f32 to vector<256x128xf32>
      %17 = arith.maximumf %15, %16 : vector<256x128xf32>
      %18 = arith.truncf %17 : vector<256x128xf32> to vector<256x128xbf16>
      %c0_15 = arith.constant 0 : index
      %c0_16 = arith.constant 0 : index
      %19 = vector.load %arg6[%c0_15, %c0_16] : memref<256x128xbf16, #tpu.memory_space<vmem>>, vector<256x128xbf16>
      tpu.vector_store %arg6[%c0_15, %c0_16], %18 {strides = array<i32>} : memref<256x128xbf16, #tpu.memory_space<vmem>>, vector<256x128xbf16>,
    } else {
    }
    return
  }
  func.func @transform_0(%arg0: i32, %arg1: i32, %arg2: i32) -> (i32, i32) {
    %c0_i32 = arith.constant 0 : i32
    return %arg0, %arg2 : i32, i32
  }
  func.func @transform_1(%arg0: i32, %arg1: i32, %arg2: i32) -> (i32, i32) {
    %c0_i32 = arith.constant 0 : i32
    return %arg2, %arg1 : i32, i32
  }
  func.func @transform_2(%arg0: i32, %arg1: i32, %arg2: i32) -> (i32, i32) {
    %c0_i32 = arith.constant 0 : i32
    %c0_i32_0 = arith.constant 0 : i32
    return %c0_i32, %arg1 : i32, i32
  }
  func.func @transform_3(%arg0: i32, %arg1: i32, %arg2: i32) -> (i32, i32) {
    %c0_i32 = arith.constant 0 : i32
    return %arg0, %arg1 : i32, i32
  }
}

module attributes {stable_mosaic.version = 11 : i64} {
  func.func @_max4_kernel(%arg0: i32, %arg1: memref<32x1024xbf16, #tpu.memory_space<vmem>>, %arg2: memref<32x1024xbf16, #tpu.memory_space<vmem>>, %arg3: memref<32x1024xbf16, #tpu.memory_space<vmem>>, %arg4: memref<32x1024xbf16, #tpu.memory_space<vmem>>, %arg5: memref<32x1024xbf16, #tpu.memory_space<vmem>>) attributes {dimension_semantics = [#tpu.dimension_semantics<parallel>], iteration_bounds = array<i64: 1>, scalar_prefetch = 0 : i64, scratch_operands = 0 : i64, tpu.core_type = #tpu.core_type<tc>, window_params = [{transform_indices = @transform_0, window_bounds = array<i64: 32, 1024>}, {transform_indices = @transform_1, window_bounds = array<i64: 32, 1024>}, {transform_indices = @transform_2, window_bounds = array<i64: 32, 1024>}, {transform_indices = @transform_3, window_bounds = array<i64: 32, 1024>}, {transform_indices = @transform_4, window_bounds = array<i64: 32, 1024>}]} {
    %c0 = arith.constant 0 : index
    %c0_0 = arith.constant 0 : index
    %0 = vector.load %arg1[%c0, %c0_0] : memref<32x1024xbf16, #tpu.memory_space<vmem>>, vector<32x1024xbf16>
    %c0_1 = arith.constant 0 : index
    %c0_2 = arith.constant 0 : index
    %1 = vector.load %arg2[%c0_1, %c0_2] : memref<32x1024xbf16, #tpu.memory_space<vmem>>, vector<32x1024xbf16>
    %2 = arith.maximumf %0, %1 : vector<32x1024xbf16>
    %c0_3 = arith.constant 0 : index
    %c0_4 = arith.constant 0 : index
    %3 = vector.load %arg3[%c0_3, %c0_4] : memref<32x1024xbf16, #tpu.memory_space<vmem>>, vector<32x1024xbf16>
    %c0_5 = arith.constant 0 : index
    %c0_6 = arith.constant 0 : index
    %4 = vector.load %arg4[%c0_5, %c0_6] : memref<32x1024xbf16, #tpu.memory_space<vmem>>, vector<32x1024xbf16>
    %5 = arith.maximumf %3, %4 : vector<32x1024xbf16>
    %6 = arith.maximumf %2, %5 : vector<32x1024xbf16>
    %c0_7 = arith.constant 0 : index
    %c0_8 = arith.constant 0 : index
    %7 = vector.load %arg5[%c0_7, %c0_8] : memref<32x1024xbf16, #tpu.memory_space<vmem>>, vector<32x1024xbf16>
    tpu.vector_store %arg5[%c0_7, %c0_8], %6 {strides = array<i32>} : memref<32x1024xbf16, #tpu.memory_space<vmem>>, vector<32x1024xbf16>,
    return
  }
  func.func @transform_0(%arg0: i32) -> (i32, i32) {
    %c0_i32 = arith.constant 0 : i32
    %c0_i32_0 = arith.constant 0 : i32
    return %arg0, %c0_i32 : i32, i32
  }
  func.func @transform_1(%arg0: i32) -> (i32, i32) {
    %c0_i32 = arith.constant 0 : i32
    %c0_i32_0 = arith.constant 0 : i32
    return %arg0, %c0_i32 : i32, i32
  }
  func.func @transform_2(%arg0: i32) -> (i32, i32) {
    %c0_i32 = arith.constant 0 : i32
    %c0_i32_0 = arith.constant 0 : i32
    return %arg0, %c0_i32 : i32, i32
  }
  func.func @transform_3(%arg0: i32) -> (i32, i32) {
    %c0_i32 = arith.constant 0 : i32
    %c0_i32_0 = arith.constant 0 : i32
    return %arg0, %c0_i32 : i32, i32
  }
  func.func @transform_4(%arg0: i32) -> (i32, i32) {
    %c0_i32 = arith.constant 0 : i32
    %c0_i32_0 = arith.constant 0 : i32
    return %arg0, %c0_i32 : i32, i32
  }
}

module attributes {stable_mosaic.version = 11 : i64} {
  func.func @_mm_kernel(%arg0: i32, %arg1: i32, %arg2: i32, %arg3: memref<256x128xbf16, #tpu.memory_space<vmem>>, %arg4: memref<128x128xbf16, #tpu.memory_space<vmem>>, %arg5: memref<1x128xf32, #tpu.memory_space<vmem>>, %arg6: memref<256x128xbf16, #tpu.memory_space<vmem>>, %arg7: memref<256x128xf32, #tpu.memory_space<vmem>>) attributes {dimension_semantics = [#tpu.dimension_semantics<parallel>, #tpu.dimension_semantics<parallel>, #tpu.dimension_semantics<arbitrary>], iteration_bounds = array<i64: 2, 1, 5>, scalar_prefetch = 0 : i64, scratch_operands = 1 : i64, tpu.core_type = #tpu.core_type<tc>, window_params = [{transform_indices = @transform_0, window_bounds = array<i64: 256, 128>}, {transform_indices = @transform_1, window_bounds = array<i64: 128, 128>}, {transform_indices = @transform_2, window_bounds = array<i64: 1, 128>}, {transform_indices = @transform_3, window_bounds = array<i64: 256, 128>}]} {
    %c0_i32 = arith.constant 0 : i32
    %0 = arith.cmpi eq, %arg2, %c0_i32 : i32
    %1 = arith.extui %0 : i1 to i32
    %c0_i32_0 = arith.constant 0 : i32
    %2 = arith.cmpi ne, %1, %c0_i32_0 : i32
    scf.if %2 {
      %cst_9 = arith.constant 0.000000e+00 : f32
      %12 = vector.broadcast %cst_9 : f32 to vector<256x128xf32>
      %c0_10 = arith.constant 0 : index
      %c0_11 = arith.constant 0 : index
      %13 = vector.load %arg7[%c0_10, %c0_11] : memref<256x128xf32, #tpu.memory_space<vmem>>, vector<256x128xf32>
      tpu.vector_store %arg7[%c0_10, %c0_11], %12 {strides = array<i32>} : memref<256x128xf32, #tpu.memory_space<vmem>>, vector<256x128xf32>,
    } else {
    }
    %c0 = arith.constant 0 : index
    %c0_1 = arith.constant 0 : index
    %3 = vector.load %arg7[%c0, %c0_1] : memref<256x128xf32, #tpu.memory_space<vmem>>, vector<256x128xf32>
    %c0_2 = arith.constant 0 : index
    %c0_3 = arith.constant 0 : index
    %4 = vector.load %arg3[%c0_2, %c0_3] : memref<256x128xbf16, #tpu.memory_space<vmem>>, vector<256x128xbf16>
    %c0_4 = arith.constant 0 : index
    %c0_5 = arith.constant 0 : index
    %5 = vector.load %arg4[%c0_4, %c0_5] : memref<128x128xbf16, #tpu.memory_space<vmem>>, vector<128x128xbf16>
    %cst = arith.constant dense<0.000000e+00> : vector<256x128xf32>
    %6 = tpu.matmul %4, %5, %cst {dimension_numbers = #tpu.dot_dimension_numbers<[1], [0], [0], [1], [0, 0, 1, 1], [], []>} : vector<256x128xbf16>, vector<128x128xbf16>, vector<256x128xf32> -> vector<256x128xf32>
    %7 = arith.addf %3, %6 : vector<256x128xf32>
    %c0_6 = arith.constant 0 : index
    %c0_7 = arith.constant 0 : index
    %8 = vector.load %arg7[%c0_6, %c0_7] : memref<256x128xf32, #tpu.memory_space<vmem>>, vector<256x128xf32>
    tpu.vector_store %arg7[%c0_6, %c0_7], %7 {strides = array<i32>} : memref<256x128xf32, #tpu.memory_space<vmem>>, vector<256x128xf32>,
    %c4_i32 = arith.constant 4 : i32
    %9 = arith.cmpi eq, %arg2, %c4_i32 : i32
    %10 = arith.extui %9 : i1 to i32
    %c0_i32_8 = arith.constant 0 : i32
    %11 = arith.cmpi ne, %10, %c0_i32_8 : i32
    scf.if %11 {
      %c0_9 = arith.constant 0 : index
      %c0_10 = arith.constant 0 : index
      %12 = vector.load %arg7[%c0_9, %c0_10] : memref<256x128xf32, #tpu.memory_space<vmem>>, vector<256x128xf32>
      %c0_11 = arith.constant 0 : index
      %c0_12 = arith.constant 0 : index
      %13 = vector.load %arg5[%c0_11, %c0_12] : memref<1x128xf32, #tpu.memory_space<vmem>>, vector<1x128xf32>
      %14 = vector.broadcast %13 : vector<1x128xf32> to vector<256x128xf32>
      %15 = arith.addf %12, %14 : vector<256x128xf32>
      %cst_13 = arith.constant 0.000000e+00 : f32
      %16 = vector.broadcast %cst_13 : f32 to vector<256x128xf32>
      %17 = arith.maximumf %15, %16 : vector<256x128xf32>
      %18 = arith.truncf %17 : vector<256x128xf32> to vector<256x128xbf16>
      %c0_14 = arith.constant 0 : index
      %c0_15 = arith.constant 0 : index
      %19 = vector.load %arg6[%c0_14, %c0_15] : memref<256x128xbf16, #tpu.memory_space<vmem>>, vector<256x128xbf16>
      tpu.vector_store %arg6[%c0_14, %c0_15], %18 {strides = array<i32>} : memref<256x128xbf16, #tpu.memory_space<vmem>>, vector<256x128xbf16>,
    } else {
    }
    return
  }
  func.func @transform_0(%arg0: i32, %arg1: i32, %arg2: i32) -> (i32, i32) {
    %c0_i32 = arith.constant 0 : i32
    return %arg0, %arg2 : i32, i32
  }
  func.func @transform_1(%arg0: i32, %arg1: i32, %arg2: i32) -> (i32, i32) {
    %c0_i32 = arith.constant 0 : i32
    return %arg2, %arg1 : i32, i32
  }
  func.func @transform_2(%arg0: i32, %arg1: i32, %arg2: i32) -> (i32, i32) {
    %c0_i32 = arith.constant 0 : i32
    %c0_i32_0 = arith.constant 0 : i32
    return %c0_i32, %arg1 : i32, i32
  }
  func.func @transform_3(%arg0: i32, %arg1: i32, %arg2: i32) -> (i32, i32) {
    %c0_i32 = arith.constant 0 : i32
    return %arg0, %arg1 : i32, i32
  }
}

module attributes {stable_mosaic.version = 11 : i64} {
  func.func @_max4_kernel(%arg0: i32, %arg1: memref<16x1024xbf16, #tpu.memory_space<vmem>>, %arg2: memref<16x1024xbf16, #tpu.memory_space<vmem>>, %arg3: memref<16x1024xbf16, #tpu.memory_space<vmem>>, %arg4: memref<16x1024xbf16, #tpu.memory_space<vmem>>, %arg5: memref<16x1024xbf16, #tpu.memory_space<vmem>>) attributes {dimension_semantics = [#tpu.dimension_semantics<parallel>], iteration_bounds = array<i64: 1>, scalar_prefetch = 0 : i64, scratch_operands = 0 : i64, tpu.core_type = #tpu.core_type<tc>, window_params = [{transform_indices = @transform_0, window_bounds = array<i64: 16, 1024>}, {transform_indices = @transform_1, window_bounds = array<i64: 16, 1024>}, {transform_indices = @transform_2, window_bounds = array<i64: 16, 1024>}, {transform_indices = @transform_3, window_bounds = array<i64: 16, 1024>}, {transform_indices = @transform_4, window_bounds = array<i64: 16, 1024>}]} {
    %c0 = arith.constant 0 : index
    %c0_0 = arith.constant 0 : index
    %0 = vector.load %arg1[%c0, %c0_0] : memref<16x1024xbf16, #tpu.memory_space<vmem>>, vector<16x1024xbf16>
    %c0_1 = arith.constant 0 : index
    %c0_2 = arith.constant 0 : index
    %1 = vector.load %arg2[%c0_1, %c0_2] : memref<16x1024xbf16, #tpu.memory_space<vmem>>, vector<16x1024xbf16>
    %2 = arith.maximumf %0, %1 : vector<16x1024xbf16>
    %c0_3 = arith.constant 0 : index
    %c0_4 = arith.constant 0 : index
    %3 = vector.load %arg3[%c0_3, %c0_4] : memref<16x1024xbf16, #tpu.memory_space<vmem>>, vector<16x1024xbf16>
    %c0_5 = arith.constant 0 : index
    %c0_6 = arith.constant 0 : index
    %4 = vector.load %arg4[%c0_5, %c0_6] : memref<16x1024xbf16, #tpu.memory_space<vmem>>, vector<16x1024xbf16>
    %5 = arith.maximumf %3, %4 : vector<16x1024xbf16>
    %6 = arith.maximumf %2, %5 : vector<16x1024xbf16>
    %c0_7 = arith.constant 0 : index
    %c0_8 = arith.constant 0 : index
    %7 = vector.load %arg5[%c0_7, %c0_8] : memref<16x1024xbf16, #tpu.memory_space<vmem>>, vector<16x1024xbf16>
    tpu.vector_store %arg5[%c0_7, %c0_8], %6 {strides = array<i32>} : memref<16x1024xbf16, #tpu.memory_space<vmem>>, vector<16x1024xbf16>,
    return
  }
  func.func @transform_0(%arg0: i32) -> (i32, i32) {
    %c0_i32 = arith.constant 0 : i32
    %c0_i32_0 = arith.constant 0 : i32
    return %arg0, %c0_i32 : i32, i32
  }
  func.func @transform_1(%arg0: i32) -> (i32, i32) {
    %c0_i32 = arith.constant 0 : i32
    %c0_i32_0 = arith.constant 0 : i32
    return %arg0, %c0_i32 : i32, i32
  }
  func.func @transform_2(%arg0: i32) -> (i32, i32) {
    %c0_i32 = arith.constant 0 : i32
    %c0_i32_0 = arith.constant 0 : i32
    return %arg0, %c0_i32 : i32, i32
  }
  func.func @transform_3(%arg0: i32) -> (i32, i32) {
    %c0_i32 = arith.constant 0 : i32
    %c0_i32_0 = arith.constant 0 : i32
    return %arg0, %c0_i32 : i32, i32
  }
  func.func @transform_4(%arg0: i32) -> (i32, i32) {
    %c0_i32 = arith.constant 0 : i32
    %c0_i32_0 = arith.constant 0 : i32
    return %arg0, %c0_i32 : i32, i32
  }
}

module attributes {stable_mosaic.version = 11 : i64} {
  func.func @_mm_kernel(%arg0: i32, %arg1: i32, %arg2: i32, %arg3: memref<128x128xbf16, #tpu.memory_space<vmem>>, %arg4: memref<128x256xbf16, #tpu.memory_space<vmem>>, %arg5: memref<1x256xf32, #tpu.memory_space<vmem>>, %arg6: memref<128x256xbf16, #tpu.memory_space<vmem>>, %arg7: memref<128x256xf32, #tpu.memory_space<vmem>>) attributes {dimension_semantics = [#tpu.dimension_semantics<parallel>, #tpu.dimension_semantics<parallel>, #tpu.dimension_semantics<arbitrary>], iteration_bounds = array<i64: 1, 1, 9>, scalar_prefetch = 0 : i64, scratch_operands = 1 : i64, tpu.core_type = #tpu.core_type<tc>, window_params = [{transform_indices = @transform_0, window_bounds = array<i64: 128, 128>}, {transform_indices = @transform_1, window_bounds = array<i64: 128, 256>}, {transform_indices = @transform_2, window_bounds = array<i64: 1, 256>}, {transform_indices = @transform_3, window_bounds = array<i64: 128, 256>}]} {
    %c0_i32 = arith.constant 0 : i32
    %0 = arith.cmpi eq, %arg2, %c0_i32 : i32
    %1 = arith.extui %0 : i1 to i32
    %c0_i32_0 = arith.constant 0 : i32
    %2 = arith.cmpi ne, %1, %c0_i32_0 : i32
    scf.if %2 {
      %cst_9 = arith.constant 0.000000e+00 : f32
      %12 = vector.broadcast %cst_9 : f32 to vector<128x256xf32>
      %c0_10 = arith.constant 0 : index
      %c0_11 = arith.constant 0 : index
      %13 = vector.load %arg7[%c0_10, %c0_11] : memref<128x256xf32, #tpu.memory_space<vmem>>, vector<128x256xf32>
      tpu.vector_store %arg7[%c0_10, %c0_11], %12 {strides = array<i32>} : memref<128x256xf32, #tpu.memory_space<vmem>>, vector<128x256xf32>,
    } else {
    }
    %c0 = arith.constant 0 : index
    %c0_1 = arith.constant 0 : index
    %3 = vector.load %arg7[%c0, %c0_1] : memref<128x256xf32, #tpu.memory_space<vmem>>, vector<128x256xf32>
    %c0_2 = arith.constant 0 : index
    %c0_3 = arith.constant 0 : index
    %4 = vector.load %arg3[%c0_2, %c0_3] : memref<128x128xbf16, #tpu.memory_space<vmem>>, vector<128x128xbf16>
    %c0_4 = arith.constant 0 : index
    %c0_5 = arith.constant 0 : index
    %5 = vector.load %arg4[%c0_4, %c0_5] : memref<128x256xbf16, #tpu.memory_space<vmem>>, vector<128x256xbf16>
    %cst = arith.constant dense<0.000000e+00> : vector<128x256xf32>
    %6 = tpu.matmul %4, %5, %cst {dimension_numbers = #tpu.dot_dimension_numbers<[1], [0], [0], [1], [0, 0, 1, 1], [], []>} : vector<128x128xbf16>, vector<128x256xbf16>, vector<128x256xf32> -> vector<128x256xf32>
    %7 = arith.addf %3, %6 : vector<128x256xf32>
    %c0_6 = arith.constant 0 : index
    %c0_7 = arith.constant 0 : index
    %8 = vector.load %arg7[%c0_6, %c0_7] : memref<128x256xf32, #tpu.memory_space<vmem>>, vector<128x256xf32>
    tpu.vector_store %arg7[%c0_6, %c0_7], %7 {strides = array<i32>} : memref<128x256xf32, #tpu.memory_space<vmem>>, vector<128x256xf32>,
    %c8_i32 = arith.constant 8 : i32
    %9 = arith.cmpi eq, %arg2, %c8_i32 : i32
    %10 = arith.extui %9 : i1 to i32
    %c0_i32_8 = arith.constant 0 : i32
    %11 = arith.cmpi ne, %10, %c0_i32_8 : i32
    scf.if %11 {
      %c0_9 = arith.constant 0 : index
      %c0_10 = arith.constant 0 : index
      %12 = vector.load %arg7[%c0_9, %c0_10] : memref<128x256xf32, #tpu.memory_space<vmem>>, vector<128x256xf32>
      %c0_11 = arith.constant 0 : index
      %c0_12 = arith.constant 0 : index
      %13 = vector.load %arg5[%c0_11, %c0_12] : memref<1x256xf32, #tpu.memory_space<vmem>>, vector<1x256xf32>
      %14 = vector.broadcast %13 : vector<1x256xf32> to vector<128x256xf32>
      %15 = arith.addf %12, %14 : vector<128x256xf32>
      %cst_13 = arith.constant 0.000000e+00 : f32
      %16 = vector.broadcast %cst_13 : f32 to vector<128x256xf32>
      %17 = arith.maximumf %15, %16 : vector<128x256xf32>
      %18 = arith.truncf %17 : vector<128x256xf32> to vector<128x256xbf16>
      %c0_14 = arith.constant 0 : index
      %c0_15 = arith.constant 0 : index
      %19 = vector.load %arg6[%c0_14, %c0_15] : memref<128x256xbf16, #tpu.memory_space<vmem>>, vector<128x256xbf16>
      tpu.vector_store %arg6[%c0_14, %c0_15], %18 {strides = array<i32>} : memref<128x256xbf16, #tpu.memory_space<vmem>>, vector<128x256xbf16>,
    } else {
    }
    return
  }
  func.func @transform_0(%arg0: i32, %arg1: i32, %arg2: i32) -> (i32, i32) {
    %c0_i32 = arith.constant 0 : i32
    return %arg0, %arg2 : i32, i32
  }
  func.func @transform_1(%arg0: i32, %arg1: i32, %arg2: i32) -> (i32, i32) {
    %c0_i32 = arith.constant 0 : i32
    return %arg2, %arg1 : i32, i32
  }
  func.func @transform_2(%arg0: i32, %arg1: i32, %arg2: i32) -> (i32, i32) {
    %c0_i32 = arith.constant 0 : i32
    %c0_i32_0 = arith.constant 0 : i32
    return %c0_i32, %arg1 : i32, i32
  }
  func.func @transform_3(%arg0: i32, %arg1: i32, %arg2: i32) -> (i32, i32) {
    %c0_i32 = arith.constant 0 : i32
    return %arg0, %arg1 : i32, i32
  }
}

module attributes {stable_mosaic.version = 11 : i64} {
  func.func @_mm_kernel(%arg0: i32, %arg1: i32, %arg2: i32, %arg3: memref<128x256xbf16, #tpu.memory_space<vmem>>, %arg4: memref<256x256xbf16, #tpu.memory_space<vmem>>, %arg5: memref<1x256xf32, #tpu.memory_space<vmem>>, %arg6: memref<128x256xbf16, #tpu.memory_space<vmem>>, %arg7: memref<128x256xf32, #tpu.memory_space<vmem>>) attributes {dimension_semantics = [#tpu.dimension_semantics<parallel>, #tpu.dimension_semantics<parallel>, #tpu.dimension_semantics<arbitrary>], iteration_bounds = array<i64: 1, 1, 9>, scalar_prefetch = 0 : i64, scratch_operands = 1 : i64, tpu.core_type = #tpu.core_type<tc>, window_params = [{transform_indices = @transform_0, window_bounds = array<i64: 128, 256>}, {transform_indices = @transform_1, window_bounds = array<i64: 256, 256>}, {transform_indices = @transform_2, window_bounds = array<i64: 1, 256>}, {transform_indices = @transform_3, window_bounds = array<i64: 128, 256>}]} {
    %c0_i32 = arith.constant 0 : i32
    %0 = arith.cmpi eq, %arg2, %c0_i32 : i32
    %1 = arith.extui %0 : i1 to i32
    %c0_i32_0 = arith.constant 0 : i32
    %2 = arith.cmpi ne, %1, %c0_i32_0 : i32
    scf.if %2 {
      %cst_9 = arith.constant 0.000000e+00 : f32
      %12 = vector.broadcast %cst_9 : f32 to vector<128x256xf32>
      %c0_10 = arith.constant 0 : index
      %c0_11 = arith.constant 0 : index
      %13 = vector.load %arg7[%c0_10, %c0_11] : memref<128x256xf32, #tpu.memory_space<vmem>>, vector<128x256xf32>
      tpu.vector_store %arg7[%c0_10, %c0_11], %12 {strides = array<i32>} : memref<128x256xf32, #tpu.memory_space<vmem>>, vector<128x256xf32>,
    } else {
    }
    %c0 = arith.constant 0 : index
    %c0_1 = arith.constant 0 : index
    %3 = vector.load %arg7[%c0, %c0_1] : memref<128x256xf32, #tpu.memory_space<vmem>>, vector<128x256xf32>
    %c0_2 = arith.constant 0 : index
    %c0_3 = arith.constant 0 : index
    %4 = vector.load %arg3[%c0_2, %c0_3] : memref<128x256xbf16, #tpu.memory_space<vmem>>, vector<128x256xbf16>
    %c0_4 = arith.constant 0 : index
    %c0_5 = arith.constant 0 : index
    %5 = vector.load %arg4[%c0_4, %c0_5] : memref<256x256xbf16, #tpu.memory_space<vmem>>, vector<256x256xbf16>
    %cst = arith.constant dense<0.000000e+00> : vector<128x256xf32>
    %6 = tpu.matmul %4, %5, %cst {dimension_numbers = #tpu.dot_dimension_numbers<[1], [0], [0], [1], [0, 0, 1, 1], [], []>} : vector<128x256xbf16>, vector<256x256xbf16>, vector<128x256xf32> -> vector<128x256xf32>
    %7 = arith.addf %3, %6 : vector<128x256xf32>
    %c0_6 = arith.constant 0 : index
    %c0_7 = arith.constant 0 : index
    %8 = vector.load %arg7[%c0_6, %c0_7] : memref<128x256xf32, #tpu.memory_space<vmem>>, vector<128x256xf32>
    tpu.vector_store %arg7[%c0_6, %c0_7], %7 {strides = array<i32>} : memref<128x256xf32, #tpu.memory_space<vmem>>, vector<128x256xf32>,
    %c8_i32 = arith.constant 8 : i32
    %9 = arith.cmpi eq, %arg2, %c8_i32 : i32
    %10 = arith.extui %9 : i1 to i32
    %c0_i32_8 = arith.constant 0 : i32
    %11 = arith.cmpi ne, %10, %c0_i32_8 : i32
    scf.if %11 {
      %c0_9 = arith.constant 0 : index
      %c0_10 = arith.constant 0 : index
      %12 = vector.load %arg7[%c0_9, %c0_10] : memref<128x256xf32, #tpu.memory_space<vmem>>, vector<128x256xf32>
      %c0_11 = arith.constant 0 : index
      %c0_12 = arith.constant 0 : index
      %13 = vector.load %arg5[%c0_11, %c0_12] : memref<1x256xf32, #tpu.memory_space<vmem>>, vector<1x256xf32>
      %14 = vector.broadcast %13 : vector<1x256xf32> to vector<128x256xf32>
      %15 = arith.addf %12, %14 : vector<128x256xf32>
      %cst_13 = arith.constant 0.000000e+00 : f32
      %16 = vector.broadcast %cst_13 : f32 to vector<128x256xf32>
      %17 = arith.maximumf %15, %16 : vector<128x256xf32>
      %18 = arith.truncf %17 : vector<128x256xf32> to vector<128x256xbf16>
      %c0_14 = arith.constant 0 : index
      %c0_15 = arith.constant 0 : index
      %19 = vector.load %arg6[%c0_14, %c0_15] : memref<128x256xbf16, #tpu.memory_space<vmem>>, vector<128x256xbf16>
      tpu.vector_store %arg6[%c0_14, %c0_15], %18 {strides = array<i32>} : memref<128x256xbf16, #tpu.memory_space<vmem>>, vector<128x256xbf16>,
    } else {
    }
    return
  }
  func.func @transform_0(%arg0: i32, %arg1: i32, %arg2: i32) -> (i32, i32) {
    %c0_i32 = arith.constant 0 : i32
    return %arg0, %arg2 : i32, i32
  }
  func.func @transform_1(%arg0: i32, %arg1: i32, %arg2: i32) -> (i32, i32) {
    %c0_i32 = arith.constant 0 : i32
    return %arg2, %arg1 : i32, i32
  }
  func.func @transform_2(%arg0: i32, %arg1: i32, %arg2: i32) -> (i32, i32) {
    %c0_i32 = arith.constant 0 : i32
    %c0_i32_0 = arith.constant 0 : i32
    return %c0_i32, %arg1 : i32, i32
  }
  func.func @transform_3(%arg0: i32, %arg1: i32, %arg2: i32) -> (i32, i32) {
    %c0_i32 = arith.constant 0 : i32
    return %arg0, %arg1 : i32, i32
  }
}

module attributes {stable_mosaic.version = 11 : i64} {
  func.func @_max4_kernel(%arg0: i32, %arg1: memref<8x2304xbf16, #tpu.memory_space<vmem>>, %arg2: memref<8x2304xbf16, #tpu.memory_space<vmem>>, %arg3: memref<8x2304xbf16, #tpu.memory_space<vmem>>, %arg4: memref<8x2304xbf16, #tpu.memory_space<vmem>>, %arg5: memref<8x2304xbf16, #tpu.memory_space<vmem>>) attributes {dimension_semantics = [#tpu.dimension_semantics<parallel>], iteration_bounds = array<i64: 1>, scalar_prefetch = 0 : i64, scratch_operands = 0 : i64, tpu.core_type = #tpu.core_type<tc>, window_params = [{transform_indices = @transform_0, window_bounds = array<i64: 8, 2304>}, {transform_indices = @transform_1, window_bounds = array<i64: 8, 2304>}, {transform_indices = @transform_2, window_bounds = array<i64: 8, 2304>}, {transform_indices = @transform_3, window_bounds = array<i64: 8, 2304>}, {transform_indices = @transform_4, window_bounds = array<i64: 8, 2304>}]} {
    %c0 = arith.constant 0 : index
    %c0_0 = arith.constant 0 : index
    %0 = vector.load %arg1[%c0, %c0_0] : memref<8x2304xbf16, #tpu.memory_space<vmem>>, vector<8x2304xbf16>
    %c0_1 = arith.constant 0 : index
    %c0_2 = arith.constant 0 : index
    %1 = vector.load %arg2[%c0_1, %c0_2] : memref<8x2304xbf16, #tpu.memory_space<vmem>>, vector<8x2304xbf16>
    %2 = arith.maximumf %0, %1 : vector<8x2304xbf16>
    %c0_3 = arith.constant 0 : index
    %c0_4 = arith.constant 0 : index
    %3 = vector.load %arg3[%c0_3, %c0_4] : memref<8x2304xbf16, #tpu.memory_space<vmem>>, vector<8x2304xbf16>
    %c0_5 = arith.constant 0 : index
    %c0_6 = arith.constant 0 : index
    %4 = vector.load %arg4[%c0_5, %c0_6] : memref<8x2304xbf16, #tpu.memory_space<vmem>>, vector<8x2304xbf16>
    %5 = arith.maximumf %3, %4 : vector<8x2304xbf16>
    %6 = arith.maximumf %2, %5 : vector<8x2304xbf16>
    %c0_7 = arith.constant 0 : index
    %c0_8 = arith.constant 0 : index
    %7 = vector.load %arg5[%c0_7, %c0_8] : memref<8x2304xbf16, #tpu.memory_space<vmem>>, vector<8x2304xbf16>
    tpu.vector_store %arg5[%c0_7, %c0_8], %6 {strides = array<i32>} : memref<8x2304xbf16, #tpu.memory_space<vmem>>, vector<8x2304xbf16>,
    return
  }
  func.func @transform_0(%arg0: i32) -> (i32, i32) {
    %c0_i32 = arith.constant 0 : i32
    %c0_i32_0 = arith.constant 0 : i32
    return %arg0, %c0_i32 : i32, i32
  }
  func.func @transform_1(%arg0: i32) -> (i32, i32) {
    %c0_i32 = arith.constant 0 : i32
    %c0_i32_0 = arith.constant 0 : i32
    return %arg0, %c0_i32 : i32, i32
  }
  func.func @transform_2(%arg0: i32) -> (i32, i32) {
    %c0_i32 = arith.constant 0 : i32
    %c0_i32_0 = arith.constant 0 : i32
    return %arg0, %c0_i32 : i32, i32
  }
  func.func @transform_3(%arg0: i32) -> (i32, i32) {
    %c0_i32 = arith.constant 0 : i32
    %c0_i32_0 = arith.constant 0 : i32
    return %arg0, %c0_i32 : i32, i32
  }
  func.func @transform_4(%arg0: i32) -> (i32, i32) {
    %c0_i32 = arith.constant 0 : i32
    %c0_i32_0 = arith.constant 0 : i32
    return %arg0, %c0_i32 : i32, i32
  }
}

module attributes {stable_mosaic.version = 11 : i64} {
  func.func @_mm_kernel(%arg0: i32, %arg1: i32, %arg2: i32, %arg3: memref<80x256xbf16, #tpu.memory_space<vmem>>, %arg4: memref<256x256xbf16, #tpu.memory_space<vmem>>, %arg5: memref<1x256xf32, #tpu.memory_space<vmem>>, %arg6: memref<80x256xbf16, #tpu.memory_space<vmem>>, %arg7: memref<80x256xf32, #tpu.memory_space<vmem>>) attributes {dimension_semantics = [#tpu.dimension_semantics<parallel>, #tpu.dimension_semantics<parallel>, #tpu.dimension_semantics<arbitrary>], iteration_bounds = array<i64: 1, 2, 9>, scalar_prefetch = 0 : i64, scratch_operands = 1 : i64, tpu.core_type = #tpu.core_type<tc>, window_params = [{transform_indices = @transform_0, window_bounds = array<i64: 80, 256>}, {transform_indices = @transform_1, window_bounds = array<i64: 256, 256>}, {transform_indices = @transform_2, window_bounds = array<i64: 1, 256>}, {transform_indices = @transform_3, window_bounds = array<i64: 80, 256>}]} {
    %c0_i32 = arith.constant 0 : i32
    %0 = arith.cmpi eq, %arg2, %c0_i32 : i32
    %1 = arith.extui %0 : i1 to i32
    %c0_i32_0 = arith.constant 0 : i32
    %2 = arith.cmpi ne, %1, %c0_i32_0 : i32
    scf.if %2 {
      %cst_9 = arith.constant 0.000000e+00 : f32
      %12 = vector.broadcast %cst_9 : f32 to vector<80x256xf32>
      %c0_10 = arith.constant 0 : index
      %c0_11 = arith.constant 0 : index
      %13 = vector.load %arg7[%c0_10, %c0_11] : memref<80x256xf32, #tpu.memory_space<vmem>>, vector<80x256xf32>
      tpu.vector_store %arg7[%c0_10, %c0_11], %12 {strides = array<i32>} : memref<80x256xf32, #tpu.memory_space<vmem>>, vector<80x256xf32>,
    } else {
    }
    %c0 = arith.constant 0 : index
    %c0_1 = arith.constant 0 : index
    %3 = vector.load %arg7[%c0, %c0_1] : memref<80x256xf32, #tpu.memory_space<vmem>>, vector<80x256xf32>
    %c0_2 = arith.constant 0 : index
    %c0_3 = arith.constant 0 : index
    %4 = vector.load %arg3[%c0_2, %c0_3] : memref<80x256xbf16, #tpu.memory_space<vmem>>, vector<80x256xbf16>
    %c0_4 = arith.constant 0 : index
    %c0_5 = arith.constant 0 : index
    %5 = vector.load %arg4[%c0_4, %c0_5] : memref<256x256xbf16, #tpu.memory_space<vmem>>, vector<256x256xbf16>
    %cst = arith.constant dense<0.000000e+00> : vector<80x256xf32>
    %6 = tpu.matmul %4, %5, %cst {dimension_numbers = #tpu.dot_dimension_numbers<[1], [0], [0], [1], [0, 0, 1, 1], [], []>} : vector<80x256xbf16>, vector<256x256xbf16>, vector<80x256xf32> -> vector<80x256xf32>
    %7 = arith.addf %3, %6 : vector<80x256xf32>
    %c0_6 = arith.constant 0 : index
    %c0_7 = arith.constant 0 : index
    %8 = vector.load %arg7[%c0_6, %c0_7] : memref<80x256xf32, #tpu.memory_space<vmem>>, vector<80x256xf32>
    tpu.vector_store %arg7[%c0_6, %c0_7], %7 {strides = array<i32>} : memref<80x256xf32, #tpu.memory_space<vmem>>, vector<80x256xf32>,
    %c8_i32 = arith.constant 8 : i32
    %9 = arith.cmpi eq, %arg2, %c8_i32 : i32
    %10 = arith.extui %9 : i1 to i32
    %c0_i32_8 = arith.constant 0 : i32
    %11 = arith.cmpi ne, %10, %c0_i32_8 : i32
    scf.if %11 {
      %c0_9 = arith.constant 0 : index
      %c0_10 = arith.constant 0 : index
      %12 = vector.load %arg7[%c0_9, %c0_10] : memref<80x256xf32, #tpu.memory_space<vmem>>, vector<80x256xf32>
      %c0_11 = arith.constant 0 : index
      %c0_12 = arith.constant 0 : index
      %13 = vector.load %arg5[%c0_11, %c0_12] : memref<1x256xf32, #tpu.memory_space<vmem>>, vector<1x256xf32>
      %14 = vector.broadcast %13 : vector<1x256xf32> to vector<80x256xf32>
      %15 = arith.addf %12, %14 : vector<80x256xf32>
      %cst_13 = arith.constant 0.000000e+00 : f32
      %16 = vector.broadcast %cst_13 : f32 to vector<80x256xf32>
      %17 = arith.maximumf %15, %16 : vector<80x256xf32>
      %18 = arith.truncf %17 : vector<80x256xf32> to vector<80x256xbf16>
      %c0_14 = arith.constant 0 : index
      %c0_15 = arith.constant 0 : index
      %19 = vector.load %arg6[%c0_14, %c0_15] : memref<80x256xbf16, #tpu.memory_space<vmem>>, vector<80x256xbf16>
      tpu.vector_store %arg6[%c0_14, %c0_15], %18 {strides = array<i32>} : memref<80x256xbf16, #tpu.memory_space<vmem>>, vector<80x256xbf16>,
    } else {
    }
    return
  }
  func.func @transform_0(%arg0: i32, %arg1: i32, %arg2: i32) -> (i32, i32) {
    %c0_i32 = arith.constant 0 : i32
    return %arg0, %arg2 : i32, i32
  }
  func.func @transform_1(%arg0: i32, %arg1: i32, %arg2: i32) -> (i32, i32) {
    %c0_i32 = arith.constant 0 : i32
    return %arg2, %arg1 : i32, i32
  }
  func.func @transform_2(%arg0: i32, %arg1: i32, %arg2: i32) -> (i32, i32) {
    %c0_i32 = arith.constant 0 : i32
    %c0_i32_0 = arith.constant 0 : i32
    return %c0_i32, %arg1 : i32, i32
  }
  func.func @transform_3(%arg0: i32, %arg1: i32, %arg2: i32) -> (i32, i32) {
    %c0_i32 = arith.constant 0 : i32
    return %arg0, %arg1 : i32, i32
  }
}

module attributes {stable_mosaic.version = 11 : i64} {
  func.func @_mm_kernel(%arg0: i32, %arg1: i32, %arg2: i32, %arg3: memref<80x512xbf16, #tpu.memory_space<vmem>>, %arg4: memref<512x256xbf16, #tpu.memory_space<vmem>>, %arg5: memref<1x256xf32, #tpu.memory_space<vmem>>, %arg6: memref<80x256xbf16, #tpu.memory_space<vmem>>, %arg7: memref<80x256xf32, #tpu.memory_space<vmem>>) attributes {dimension_semantics = [#tpu.dimension_semantics<parallel>, #tpu.dimension_semantics<parallel>, #tpu.dimension_semantics<arbitrary>], iteration_bounds = array<i64: 1, 2, 9>, scalar_prefetch = 0 : i64, scratch_operands = 1 : i64, tpu.core_type = #tpu.core_type<tc>, window_params = [{transform_indices = @transform_0, window_bounds = array<i64: 80, 512>}, {transform_indices = @transform_1, window_bounds = array<i64: 512, 256>}, {transform_indices = @transform_2, window_bounds = array<i64: 1, 256>}, {transform_indices = @transform_3, window_bounds = array<i64: 80, 256>}]} {
    %c0_i32 = arith.constant 0 : i32
    %0 = arith.cmpi eq, %arg2, %c0_i32 : i32
    %1 = arith.extui %0 : i1 to i32
    %c0_i32_0 = arith.constant 0 : i32
    %2 = arith.cmpi ne, %1, %c0_i32_0 : i32
    scf.if %2 {
      %cst_9 = arith.constant 0.000000e+00 : f32
      %12 = vector.broadcast %cst_9 : f32 to vector<80x256xf32>
      %c0_10 = arith.constant 0 : index
      %c0_11 = arith.constant 0 : index
      %13 = vector.load %arg7[%c0_10, %c0_11] : memref<80x256xf32, #tpu.memory_space<vmem>>, vector<80x256xf32>
      tpu.vector_store %arg7[%c0_10, %c0_11], %12 {strides = array<i32>} : memref<80x256xf32, #tpu.memory_space<vmem>>, vector<80x256xf32>,
    } else {
    }
    %c0 = arith.constant 0 : index
    %c0_1 = arith.constant 0 : index
    %3 = vector.load %arg7[%c0, %c0_1] : memref<80x256xf32, #tpu.memory_space<vmem>>, vector<80x256xf32>
    %c0_2 = arith.constant 0 : index
    %c0_3 = arith.constant 0 : index
    %4 = vector.load %arg3[%c0_2, %c0_3] : memref<80x512xbf16, #tpu.memory_space<vmem>>, vector<80x512xbf16>
    %c0_4 = arith.constant 0 : index
    %c0_5 = arith.constant 0 : index
    %5 = vector.load %arg4[%c0_4, %c0_5] : memref<512x256xbf16, #tpu.memory_space<vmem>>, vector<512x256xbf16>
    %cst = arith.constant dense<0.000000e+00> : vector<80x256xf32>
    %6 = tpu.matmul %4, %5, %cst {dimension_numbers = #tpu.dot_dimension_numbers<[1], [0], [0], [1], [0, 0, 1, 1], [], []>} : vector<80x512xbf16>, vector<512x256xbf16>, vector<80x256xf32> -> vector<80x256xf32>
    %7 = arith.addf %3, %6 : vector<80x256xf32>
    %c0_6 = arith.constant 0 : index
    %c0_7 = arith.constant 0 : index
    %8 = vector.load %arg7[%c0_6, %c0_7] : memref<80x256xf32, #tpu.memory_space<vmem>>, vector<80x256xf32>
    tpu.vector_store %arg7[%c0_6, %c0_7], %7 {strides = array<i32>} : memref<80x256xf32, #tpu.memory_space<vmem>>, vector<80x256xf32>,
    %c8_i32 = arith.constant 8 : i32
    %9 = arith.cmpi eq, %arg2, %c8_i32 : i32
    %10 = arith.extui %9 : i1 to i32
    %c0_i32_8 = arith.constant 0 : i32
    %11 = arith.cmpi ne, %10, %c0_i32_8 : i32
    scf.if %11 {
      %c0_9 = arith.constant 0 : index
      %c0_10 = arith.constant 0 : index
      %12 = vector.load %arg7[%c0_9, %c0_10] : memref<80x256xf32, #tpu.memory_space<vmem>>, vector<80x256xf32>
      %c0_11 = arith.constant 0 : index
      %c0_12 = arith.constant 0 : index
      %13 = vector.load %arg5[%c0_11, %c0_12] : memref<1x256xf32, #tpu.memory_space<vmem>>, vector<1x256xf32>
      %14 = vector.broadcast %13 : vector<1x256xf32> to vector<80x256xf32>
      %15 = arith.addf %12, %14 : vector<80x256xf32>
      %cst_13 = arith.constant 0.000000e+00 : f32
      %16 = vector.broadcast %cst_13 : f32 to vector<80x256xf32>
      %17 = arith.maximumf %15, %16 : vector<80x256xf32>
      %18 = arith.truncf %17 : vector<80x256xf32> to vector<80x256xbf16>
      %c0_14 = arith.constant 0 : index
      %c0_15 = arith.constant 0 : index
      %19 = vector.load %arg6[%c0_14, %c0_15] : memref<80x256xbf16, #tpu.memory_space<vmem>>, vector<80x256xbf16>
      tpu.vector_store %arg6[%c0_14, %c0_15], %18 {strides = array<i32>} : memref<80x256xbf16, #tpu.memory_space<vmem>>, vector<80x256xbf16>,
    } else {
    }
    return
  }
  func.func @transform_0(%arg0: i32, %arg1: i32, %arg2: i32) -> (i32, i32) {
    %c0_i32 = arith.constant 0 : i32
    return %arg0, %arg2 : i32, i32
  }
  func.func @transform_1(%arg0: i32, %arg1: i32, %arg2: i32) -> (i32, i32) {
    %c0_i32 = arith.constant 0 : i32
    return %arg2, %arg1 : i32, i32
  }
  func.func @transform_2(%arg0: i32, %arg1: i32, %arg2: i32) -> (i32, i32) {
    %c0_i32 = arith.constant 0 : i32
    %c0_i32_0 = arith.constant 0 : i32
    return %c0_i32, %arg1 : i32, i32
  }
  func.func @transform_3(%arg0: i32, %arg1: i32, %arg2: i32) -> (i32, i32) {
    %c0_i32 = arith.constant 0 : i32
    return %arg0, %arg1 : i32, i32
  }
}

module attributes {stable_mosaic.version = 11 : i64} {
  func.func @_max4_kernel(%arg0: i32, %arg1: memref<8x5120xbf16, #tpu.memory_space<vmem>>, %arg2: memref<8x5120xbf16, #tpu.memory_space<vmem>>, %arg3: memref<8x5120xbf16, #tpu.memory_space<vmem>>, %arg4: memref<8x5120xbf16, #tpu.memory_space<vmem>>, %arg5: memref<8x5120xbf16, #tpu.memory_space<vmem>>) attributes {dimension_semantics = [#tpu.dimension_semantics<parallel>], iteration_bounds = array<i64: 1>, scalar_prefetch = 0 : i64, scratch_operands = 0 : i64, tpu.core_type = #tpu.core_type<tc>, window_params = [{transform_indices = @transform_0, window_bounds = array<i64: 8, 5120>}, {transform_indices = @transform_1, window_bounds = array<i64: 8, 5120>}, {transform_indices = @transform_2, window_bounds = array<i64: 8, 5120>}, {transform_indices = @transform_3, window_bounds = array<i64: 8, 5120>}, {transform_indices = @transform_4, window_bounds = array<i64: 8, 5120>}]} {
    %c0 = arith.constant 0 : index
    %c0_0 = arith.constant 0 : index
    %0 = vector.load %arg1[%c0, %c0_0] : memref<8x5120xbf16, #tpu.memory_space<vmem>>, vector<8x5120xbf16>
    %c0_1 = arith.constant 0 : index
    %c0_2 = arith.constant 0 : index
    %1 = vector.load %arg2[%c0_1, %c0_2] : memref<8x5120xbf16, #tpu.memory_space<vmem>>, vector<8x5120xbf16>
    %2 = arith.maximumf %0, %1 : vector<8x5120xbf16>
    %c0_3 = arith.constant 0 : index
    %c0_4 = arith.constant 0 : index
    %3 = vector.load %arg3[%c0_3, %c0_4] : memref<8x5120xbf16, #tpu.memory_space<vmem>>, vector<8x5120xbf16>
    %c0_5 = arith.constant 0 : index
    %c0_6 = arith.constant 0 : index
    %4 = vector.load %arg4[%c0_5, %c0_6] : memref<8x5120xbf16, #tpu.memory_space<vmem>>, vector<8x5120xbf16>
    %5 = arith.maximumf %3, %4 : vector<8x5120xbf16>
    %6 = arith.maximumf %2, %5 : vector<8x5120xbf16>
    %c0_7 = arith.constant 0 : index
    %c0_8 = arith.constant 0 : index
    %7 = vector.load %arg5[%c0_7, %c0_8] : memref<8x5120xbf16, #tpu.memory_space<vmem>>, vector<8x5120xbf16>
    tpu.vector_store %arg5[%c0_7, %c0_8], %6 {strides = array<i32>} : memref<8x5120xbf16, #tpu.memory_space<vmem>>, vector<8x5120xbf16>,
    return
  }
  func.func @transform_0(%arg0: i32) -> (i32, i32) {
    %c0_i32 = arith.constant 0 : i32
    %c0_i32_0 = arith.constant 0 : i32
    return %arg0, %c0_i32 : i32, i32
  }
  func.func @transform_1(%arg0: i32) -> (i32, i32) {
    %c0_i32 = arith.constant 0 : i32
    %c0_i32_0 = arith.constant 0 : i32
    return %arg0, %c0_i32 : i32, i32
  }
  func.func @transform_2(%arg0: i32) -> (i32, i32) {
    %c0_i32 = arith.constant 0 : i32
    %c0_i32_0 = arith.constant 0 : i32
    return %arg0, %c0_i32 : i32, i32
  }
  func.func @transform_3(%arg0: i32) -> (i32, i32) {
    %c0_i32 = arith.constant 0 : i32
    %c0_i32_0 = arith.constant 0 : i32
    return %arg0, %c0_i32 : i32, i32
  }
  func.func @transform_4(%arg0: i32) -> (i32, i32) {
    %c0_i32 = arith.constant 0 : i32
    %c0_i32_0 = arith.constant 0 : i32
    return %arg0, %c0_i32 : i32, i32
  }
}

module attributes {stable_mosaic.version = 11 : i64} {
  func.func @_mm_kernel(%arg0: i32, %arg1: i32, %arg2: i32, %arg3: memref<32x512xbf16, #tpu.memory_space<vmem>>, %arg4: memref<512x256xbf16, #tpu.memory_space<vmem>>, %arg5: memref<1x256xf32, #tpu.memory_space<vmem>>, %arg6: memref<32x256xbf16, #tpu.memory_space<vmem>>, %arg7: memref<32x256xf32, #tpu.memory_space<vmem>>) attributes {dimension_semantics = [#tpu.dimension_semantics<parallel>, #tpu.dimension_semantics<parallel>, #tpu.dimension_semantics<arbitrary>], iteration_bounds = array<i64: 1, 2, 4>, scalar_prefetch = 0 : i64, scratch_operands = 1 : i64, tpu.core_type = #tpu.core_type<tc>, window_params = [{transform_indices = @transform_0, window_bounds = array<i64: 32, 512>}, {transform_indices = @transform_1, window_bounds = array<i64: 512, 256>}, {transform_indices = @transform_2, window_bounds = array<i64: 1, 256>}, {transform_indices = @transform_3, window_bounds = array<i64: 32, 256>}]} {
    %c0_i32 = arith.constant 0 : i32
    %0 = arith.cmpi eq, %arg2, %c0_i32 : i32
    %1 = arith.extui %0 : i1 to i32
    %c0_i32_0 = arith.constant 0 : i32
    %2 = arith.cmpi ne, %1, %c0_i32_0 : i32
    scf.if %2 {
      %cst_9 = arith.constant 0.000000e+00 : f32
      %12 = vector.broadcast %cst_9 : f32 to vector<32x256xf32>
      %c0_10 = arith.constant 0 : index
      %c0_11 = arith.constant 0 : index
      %13 = vector.load %arg7[%c0_10, %c0_11] : memref<32x256xf32, #tpu.memory_space<vmem>>, vector<32x256xf32>
      tpu.vector_store %arg7[%c0_10, %c0_11], %12 {strides = array<i32>} : memref<32x256xf32, #tpu.memory_space<vmem>>, vector<32x256xf32>,
    } else {
    }
    %c0 = arith.constant 0 : index
    %c0_1 = arith.constant 0 : index
    %3 = vector.load %arg7[%c0, %c0_1] : memref<32x256xf32, #tpu.memory_space<vmem>>, vector<32x256xf32>
    %c0_2 = arith.constant 0 : index
    %c0_3 = arith.constant 0 : index
    %4 = vector.load %arg3[%c0_2, %c0_3] : memref<32x512xbf16, #tpu.memory_space<vmem>>, vector<32x512xbf16>
    %c0_4 = arith.constant 0 : index
    %c0_5 = arith.constant 0 : index
    %5 = vector.load %arg4[%c0_4, %c0_5] : memref<512x256xbf16, #tpu.memory_space<vmem>>, vector<512x256xbf16>
    %cst = arith.constant dense<0.000000e+00> : vector<32x256xf32>
    %6 = tpu.matmul %4, %5, %cst {dimension_numbers = #tpu.dot_dimension_numbers<[1], [0], [0], [1], [0, 0, 1, 1], [], []>} : vector<32x512xbf16>, vector<512x256xbf16>, vector<32x256xf32> -> vector<32x256xf32>
    %7 = arith.addf %3, %6 : vector<32x256xf32>
    %c0_6 = arith.constant 0 : index
    %c0_7 = arith.constant 0 : index
    %8 = vector.load %arg7[%c0_6, %c0_7] : memref<32x256xf32, #tpu.memory_space<vmem>>, vector<32x256xf32>
    tpu.vector_store %arg7[%c0_6, %c0_7], %7 {strides = array<i32>} : memref<32x256xf32, #tpu.memory_space<vmem>>, vector<32x256xf32>,
    %c3_i32 = arith.constant 3 : i32
    %9 = arith.cmpi eq, %arg2, %c3_i32 : i32
    %10 = arith.extui %9 : i1 to i32
    %c0_i32_8 = arith.constant 0 : i32
    %11 = arith.cmpi ne, %10, %c0_i32_8 : i32
    scf.if %11 {
      %c0_9 = arith.constant 0 : index
      %c0_10 = arith.constant 0 : index
      %12 = vector.load %arg7[%c0_9, %c0_10] : memref<32x256xf32, #tpu.memory_space<vmem>>, vector<32x256xf32>
      %c0_11 = arith.constant 0 : index
      %c0_12 = arith.constant 0 : index
      %13 = vector.load %arg5[%c0_11, %c0_12] : memref<1x256xf32, #tpu.memory_space<vmem>>, vector<1x256xf32>
      %14 = vector.broadcast %13 : vector<1x256xf32> to vector<32x256xf32>
      %15 = arith.addf %12, %14 : vector<32x256xf32>
      %cst_13 = arith.constant 0.000000e+00 : f32
      %16 = vector.broadcast %cst_13 : f32 to vector<32x256xf32>
      %17 = arith.maximumf %15, %16 : vector<32x256xf32>
      %18 = arith.truncf %17 : vector<32x256xf32> to vector<32x256xbf16>
      %c0_14 = arith.constant 0 : index
      %c0_15 = arith.constant 0 : index
      %19 = vector.load %arg6[%c0_14, %c0_15] : memref<32x256xbf16, #tpu.memory_space<vmem>>, vector<32x256xbf16>
      tpu.vector_store %arg6[%c0_14, %c0_15], %18 {strides = array<i32>} : memref<32x256xbf16, #tpu.memory_space<vmem>>, vector<32x256xbf16>,
    } else {
    }
    return
  }
  func.func @transform_0(%arg0: i32, %arg1: i32, %arg2: i32) -> (i32, i32) {
    %c0_i32 = arith.constant 0 : i32
    return %arg0, %arg2 : i32, i32
  }
  func.func @transform_1(%arg0: i32, %arg1: i32, %arg2: i32) -> (i32, i32) {
    %c0_i32 = arith.constant 0 : i32
    return %arg2, %arg1 : i32, i32
  }
  func.func @transform_2(%arg0: i32, %arg1: i32, %arg2: i32) -> (i32, i32) {
    %c0_i32 = arith.constant 0 : i32
    %c0_i32_0 = arith.constant 0 : i32
    return %c0_i32, %arg1 : i32, i32
  }
  func.func @transform_3(%arg0: i32, %arg1: i32, %arg2: i32) -> (i32, i32) {
    %c0_i32 = arith.constant 0 : i32
    return %arg0, %arg1 : i32, i32
  }
}

module attributes {stable_mosaic.version = 11 : i64} {
  func.func @_mm_kernel(%arg0: i32, %arg1: i32, %arg2: i32, %arg3: memref<32x512xbf16, #tpu.memory_space<vmem>>, %arg4: memref<512x256xbf16, #tpu.memory_space<vmem>>, %arg5: memref<1x256xf32, #tpu.memory_space<vmem>>, %arg6: memref<32x256xf32, #tpu.memory_space<vmem>>, %arg7: memref<32x256xf32, #tpu.memory_space<vmem>>) attributes {dimension_semantics = [#tpu.dimension_semantics<parallel>, #tpu.dimension_semantics<parallel>, #tpu.dimension_semantics<arbitrary>], iteration_bounds = array<i64: 1, 1, 1>, scalar_prefetch = 0 : i64, scratch_operands = 1 : i64, tpu.core_type = #tpu.core_type<tc>, window_params = [{transform_indices = @transform_0, window_bounds = array<i64: 32, 512>}, {transform_indices = @transform_1, window_bounds = array<i64: 512, 256>}, {transform_indices = @transform_2, window_bounds = array<i64: 1, 256>}, {transform_indices = @transform_3, window_bounds = array<i64: 32, 256>}]} {
    %c0_i32 = arith.constant 0 : i32
    %0 = arith.cmpi eq, %arg2, %c0_i32 : i32
    %1 = arith.extui %0 : i1 to i32
    %c0_i32_0 = arith.constant 0 : i32
    %2 = arith.cmpi ne, %1, %c0_i32_0 : i32
    scf.if %2 {
      %cst_10 = arith.constant 0.000000e+00 : f32
      %12 = vector.broadcast %cst_10 : f32 to vector<32x256xf32>
      %c0_11 = arith.constant 0 : index
      %c0_12 = arith.constant 0 : index
      %13 = vector.load %arg7[%c0_11, %c0_12] : memref<32x256xf32, #tpu.memory_space<vmem>>, vector<32x256xf32>
      tpu.vector_store %arg7[%c0_11, %c0_12], %12 {strides = array<i32>} : memref<32x256xf32, #tpu.memory_space<vmem>>, vector<32x256xf32>,
    } else {
    }
    %c0 = arith.constant 0 : index
    %c0_1 = arith.constant 0 : index
    %3 = vector.load %arg7[%c0, %c0_1] : memref<32x256xf32, #tpu.memory_space<vmem>>, vector<32x256xf32>
    %c0_2 = arith.constant 0 : index
    %c0_3 = arith.constant 0 : index
    %4 = vector.load %arg3[%c0_2, %c0_3] : memref<32x512xbf16, #tpu.memory_space<vmem>>, vector<32x512xbf16>
    %c0_4 = arith.constant 0 : index
    %c0_5 = arith.constant 0 : index
    %5 = vector.load %arg4[%c0_4, %c0_5] : memref<512x256xbf16, #tpu.memory_space<vmem>>, vector<512x256xbf16>
    %cst = arith.constant dense<0.000000e+00> : vector<32x256xf32>
    %6 = tpu.matmul %4, %5, %cst {dimension_numbers = #tpu.dot_dimension_numbers<[1], [0], [0], [1], [0, 0, 1, 1], [], []>} : vector<32x512xbf16>, vector<512x256xbf16>, vector<32x256xf32> -> vector<32x256xf32>
    %7 = arith.addf %3, %6 : vector<32x256xf32>
    %c0_6 = arith.constant 0 : index
    %c0_7 = arith.constant 0 : index
    %8 = vector.load %arg7[%c0_6, %c0_7] : memref<32x256xf32, #tpu.memory_space<vmem>>, vector<32x256xf32>
    tpu.vector_store %arg7[%c0_6, %c0_7], %7 {strides = array<i32>} : memref<32x256xf32, #tpu.memory_space<vmem>>, vector<32x256xf32>,
    %c0_i32_8 = arith.constant 0 : i32
    %9 = arith.cmpi eq, %arg2, %c0_i32_8 : i32
    %10 = arith.extui %9 : i1 to i32
    %c0_i32_9 = arith.constant 0 : i32
    %11 = arith.cmpi ne, %10, %c0_i32_9 : i32
    scf.if %11 {
      %c0_10 = arith.constant 0 : index
      %c0_11 = arith.constant 0 : index
      %12 = vector.load %arg7[%c0_10, %c0_11] : memref<32x256xf32, #tpu.memory_space<vmem>>, vector<32x256xf32>
      %c0_12 = arith.constant 0 : index
      %c0_13 = arith.constant 0 : index
      %13 = vector.load %arg5[%c0_12, %c0_13] : memref<1x256xf32, #tpu.memory_space<vmem>>, vector<1x256xf32>
      %14 = vector.broadcast %13 : vector<1x256xf32> to vector<32x256xf32>
      %15 = arith.addf %12, %14 : vector<32x256xf32>
      %c0_14 = arith.constant 0 : index
      %c0_15 = arith.constant 0 : index
      %16 = vector.load %arg6[%c0_14, %c0_15] : memref<32x256xf32, #tpu.memory_space<vmem>>, vector<32x256xf32>
      tpu.vector_store %arg6[%c0_14, %c0_15], %15 {strides = array<i32>} : memref<32x256xf32, #tpu.memory_space<vmem>>, vector<32x256xf32>,
    } else {
    }
    return
  }
  func.func @transform_0(%arg0: i32, %arg1: i32, %arg2: i32) -> (i32, i32) {
    %c0_i32 = arith.constant 0 : i32
    return %arg0, %arg2 : i32, i32
  }
  func.func @transform_1(%arg0: i32, %arg1: i32, %arg2: i32) -> (i32, i32) {
    %c0_i32 = arith.constant 0 : i32
    return %arg2, %arg1 : i32, i32
  }
  func.func @transform_2(%arg0: i32, %arg1: i32, %arg2: i32) -> (i32, i32) {
    %c0_i32 = arith.constant 0 : i32
    %c0_i32_0 = arith.constant 0 : i32
    return %c0_i32, %arg1 : i32, i32
  }
  func.func @transform_3(%arg0: i32, %arg1: i32, %arg2: i32) -> (i32, i32) {
    %c0_i32 = arith.constant 0 : i32
    return %arg0, %arg1 : i32, i32
  }
}

module attributes {stable_mosaic.version = 11 : i64} {
  func.func @_bilstm_kernel(%arg0: i32, %arg1: memref<1x9x2x128xf32, #tpu.memory_space<vmem>>, %arg2: memref<1x32x128xf32, #tpu.memory_space<vmem>>, %arg3: memref<1x9x2x32xf32, #tpu.memory_space<vmem>>, %arg4: memref<2x32xf32, #tpu.memory_space<vmem>>, %arg5: memref<2x32xf32, #tpu.memory_space<vmem>>) attributes {dimension_semantics = [#tpu.dimension_semantics<parallel>], iteration_bounds = array<i64: 2>, scalar_prefetch = 0 : i64, scratch_operands = 2 : i64, tpu.core_type = #tpu.core_type<tc>, window_params = [{transform_indices = @transform_0, window_bounds = array<i64: 1, 9, 2, 128>}, {transform_indices = @transform_1, window_bounds = array<i64: 1, 32, 128>}, {transform_indices = @transform_2, window_bounds = array<i64: 1, 9, 2, 32>}]} {
    %cst = arith.constant 0.000000e+00 : f32
    %0 = vector.broadcast %cst : f32 to vector<2x32xf32>
    %c0 = arith.constant 0 : index
    %c0_0 = arith.constant 0 : index
    %1 = vector.load %arg4[%c0, %c0_0] : memref<2x32xf32, #tpu.memory_space<vmem>>, vector<2x32xf32>
    tpu.vector_store %arg4[%c0, %c0_0], %0 {strides = array<i32>} : memref<2x32xf32, #tpu.memory_space<vmem>>, vector<2x32xf32>,
    %cst_1 = arith.constant 0.000000e+00 : f32
    %2 = vector.broadcast %cst_1 : f32 to vector<2x32xf32>
    %c0_2 = arith.constant 0 : index
    %c0_3 = arith.constant 0 : index
    %3 = vector.load %arg5[%c0_2, %c0_3] : memref<2x32xf32, #tpu.memory_space<vmem>>, vector<2x32xf32>
    tpu.vector_store %arg5[%c0_2, %c0_3], %2 {strides = array<i32>} : memref<2x32xf32, #tpu.memory_space<vmem>>, vector<2x32xf32>,
    %c0_i32 = arith.constant 0 : i32
    %c0_i32_4 = arith.constant 0 : i32
    %4 = arith.cmpi eq, %arg0, %c0_i32_4 : i32
    %c8_i32 = arith.constant 8 : i32
    %5 = arith.subi %c8_i32, %c0_i32 : i32
    %6 = arith.select %4, %c0_i32, %5 : i32
    %c0_5 = arith.constant 0 : index
    %7 = arith.index_cast %6 : i32 to index
    %c0_6 = arith.constant 0 : index
    %c0_7 = arith.constant 0 : index
    %8 = vector.load %arg1[%c0_5, %7, %c0_6, %c0_7] : memref<1x9x2x128xf32, #tpu.memory_space<vmem>>, vector<1x1x2x128xf32>
    %9 = vector.shape_cast %8 : vector<1x1x2x128xf32> to vector<2x128xf32>
    %c0_8 = arith.constant 0 : index
    %c0_9 = arith.constant 0 : index
    %10 = vector.load %arg4[%c0_8, %c0_9] : memref<2x32xf32, #tpu.memory_space<vmem>>, vector<2x32xf32>
    %c0_10 = arith.constant 0 : index
    %c0_11 = arith.constant 0 : index
    %c0_12 = arith.constant 0 : index
    %11 = vector.load %arg2[%c0_10, %c0_11, %c0_12] : memref<1x32x128xf32, #tpu.memory_space<vmem>>, vector<1x32x128xf32>
    %12 = vector.shape_cast %11 : vector<1x32x128xf32> to vector<32x128xf32>
    %cst_13 = arith.constant dense<0.000000e+00> : vector<2x128xf32>
    %13 = tpu.matmul %10, %12, %cst_13 {dimension_numbers = #tpu.dot_dimension_numbers<[1], [0], [0], [1], [0, 0, 1, 1], [], []>} : vector<2x32xf32>, vector<32x128xf32>, vector<2x128xf32> -> vector<2x128xf32>
    %14 = arith.addf %9, %13 : vector<2x128xf32>
    %15 = vector.extract_strided_slice %14 {offsets = [0, 0], sizes = [2, 32], strides = [1, 1]} : vector<2x128xf32> to vector<2x32xf32>
    %16 = arith.negf %15 : vector<2x32xf32>
    %17 = math.exp %16 : vector<2x32xf32>
    %cst_14 = arith.constant 1.000000e+00 : f32
    %18 = vector.broadcast %cst_14 : f32 to vector<2x32xf32>
    %19 = arith.addf %18, %17 : vector<2x32xf32>
    %20 = arith.divf %18, %19 : vector<2x32xf32>
    %21 = vector.extract_strided_slice %14 {offsets = [0, 32], sizes = [2, 32], strides = [1, 1]} : vector<2x128xf32> to vector<2x32xf32>
    %22 = arith.negf %21 : vector<2x32xf32>
    %23 = math.exp %22 : vector<2x32xf32>
    %cst_15 = arith.constant 1.000000e+00 : f32
    %24 = vector.broadcast %cst_15 : f32 to vector<2x32xf32>
    %25 = arith.addf %24, %23 : vector<2x32xf32>
    %26 = arith.divf %24, %25 : vector<2x32xf32>
    %27 = vector.extract_strided_slice %14 {offsets = [0, 64], sizes = [2, 32], strides = [1, 1]} : vector<2x128xf32> to vector<2x32xf32>
    %28 = math.tanh %27 : vector<2x32xf32>
    %29 = vector.extract_strided_slice %14 {offsets = [0, 96], sizes = [2, 32], strides = [1, 1]} : vector<2x128xf32> to vector<2x32xf32>
    %30 = arith.negf %29 : vector<2x32xf32>
    %31 = math.exp %30 : vector<2x32xf32>
    %cst_16 = arith.constant 1.000000e+00 : f32
    %32 = vector.broadcast %cst_16 : f32 to vector<2x32xf32>
    %33 = arith.addf %32, %31 : vector<2x32xf32>
    %34 = arith.divf %32, %33 : vector<2x32xf32>
    %c0_17 = arith.constant 0 : index
    %c0_18 = arith.constant 0 : index
    %35 = vector.load %arg5[%c0_17, %c0_18] : memref<2x32xf32, #tpu.memory_space<vmem>>, vector<2x32xf32>
    %36 = arith.mulf %26, %35 : vector<2x32xf32>
    %37 = arith.mulf %20, %28 : vector<2x32xf32>
    %38 = arith.addf %36, %37 : vector<2x32xf32>
    %39 = math.tanh %38 : vector<2x32xf32>
    %40 = arith.mulf %34, %39 : vector<2x32xf32>
    %c0_19 = arith.constant 0 : index
    %c0_20 = arith.constant 0 : index
    %41 = vector.load %arg5[%c0_19, %c0_20] : memref<2x32xf32, #tpu.memory_space<vmem>>, vector<2x32xf32>
    tpu.vector_store %arg5[%c0_19, %c0_20], %38 {strides = array<i32>} : memref<2x32xf32, #tpu.memory_space<vmem>>, vector<2x32xf32>,
    %c0_21 = arith.constant 0 : index
    %c0_22 = arith.constant 0 : index
    %42 = vector.load %arg4[%c0_21, %c0_22] : memref<2x32xf32, #tpu.memory_space<vmem>>, vector<2x32xf32>
    tpu.vector_store %arg4[%c0_21, %c0_22], %40 {strides = array<i32>} : memref<2x32xf32, #tpu.memory_space<vmem>>, vector<2x32xf32>,
    %c0_23 = arith.constant 0 : index
    %43 = arith.index_cast %6 : i32 to index
    %c0_24 = arith.constant 0 : index
    %c0_25 = arith.constant 0 : index
    %44 = vector.load %arg3[%c0_23, %43, %c0_24, %c0_25] : memref<1x9x2x32xf32, #tpu.memory_space<vmem>>, vector<1x1x2x32xf32>
    %45 = vector.shape_cast %44 : vector<1x1x2x32xf32> to vector<2x32xf32>
    %46 = vector.shape_cast %40 : vector<2x32xf32> to vector<1x1x2x32xf32>
    tpu.vector_store %arg3[%c0_23, %43, %c0_24, %c0_25], %46 {strides = array<i32>} : memref<1x9x2x32xf32, #tpu.memory_space<vmem>>, vector<1x1x2x32xf32>,
    %c1_i32 = arith.constant 1 : i32
    %c0_i32_26 = arith.constant 0 : i32
    %47 = arith.cmpi eq, %arg0, %c0_i32_26 : i32
    %c8_i32_27 = arith.constant 8 : i32
    %48 = arith.subi %c8_i32_27, %c1_i32 : i32
    %49 = arith.select %47, %c1_i32, %48 : i32
    %c0_28 = arith.constant 0 : index
    %50 = arith.index_cast %49 : i32 to index
    %c0_29 = arith.constant 0 : index
    %c0_30 = arith.constant 0 : index
    %51 = vector.load %arg1[%c0_28, %50, %c0_29, %c0_30] : memref<1x9x2x128xf32, #tpu.memory_space<vmem>>, vector<1x1x2x128xf32>
    %52 = vector.shape_cast %51 : vector<1x1x2x128xf32> to vector<2x128xf32>
    %c0_31 = arith.constant 0 : index
    %c0_32 = arith.constant 0 : index
    %53 = vector.load %arg4[%c0_31, %c0_32] : memref<2x32xf32, #tpu.memory_space<vmem>>, vector<2x32xf32>
    %c0_33 = arith.constant 0 : index
    %c0_34 = arith.constant 0 : index
    %c0_35 = arith.constant 0 : index
    %54 = vector.load %arg2[%c0_33, %c0_34, %c0_35] : memref<1x32x128xf32, #tpu.memory_space<vmem>>, vector<1x32x128xf32>
    %55 = vector.shape_cast %54 : vector<1x32x128xf32> to vector<32x128xf32>
    %cst_36 = arith.constant dense<0.000000e+00> : vector<2x128xf32>
    %56 = tpu.matmul %53, %55, %cst_36 {dimension_numbers = #tpu.dot_dimension_numbers<[1], [0], [0], [1], [0, 0, 1, 1], [], []>} : vector<2x32xf32>, vector<32x128xf32>, vector<2x128xf32> -> vector<2x128xf32>
    %57 = arith.addf %52, %56 : vector<2x128xf32>
    %58 = vector.extract_strided_slice %57 {offsets = [0, 0], sizes = [2, 32], strides = [1, 1]} : vector<2x128xf32> to vector<2x32xf32>
    %59 = arith.negf %58 : vector<2x32xf32>
    %60 = math.exp %59 : vector<2x32xf32>
    %cst_37 = arith.constant 1.000000e+00 : f32
    %61 = vector.broadcast %cst_37 : f32 to vector<2x32xf32>
    %62 = arith.addf %61, %60 : vector<2x32xf32>
    %63 = arith.divf %61, %62 : vector<2x32xf32>
    %64 = vector.extract_strided_slice %57 {offsets = [0, 32], sizes = [2, 32], strides = [1, 1]} : vector<2x128xf32> to vector<2x32xf32>
    %65 = arith.negf %64 : vector<2x32xf32>
    %66 = math.exp %65 : vector<2x32xf32>
    %cst_38 = arith.constant 1.000000e+00 : f32
    %67 = vector.broadcast %cst_38 : f32 to vector<2x32xf32>
    %68 = arith.addf %67, %66 : vector<2x32xf32>
    %69 = arith.divf %67, %68 : vector<2x32xf32>
    %70 = vector.extract_strided_slice %57 {offsets = [0, 64], sizes = [2, 32], strides = [1, 1]} : vector<2x128xf32> to vector<2x32xf32>
    %71 = math.tanh %70 : vector<2x32xf32>
    %72 = vector.extract_strided_slice %57 {offsets = [0, 96], sizes = [2, 32], strides = [1, 1]} : vector<2x128xf32> to vector<2x32xf32>
    %73 = arith.negf %72 : vector<2x32xf32>
    %74 = math.exp %73 : vector<2x32xf32>
    %cst_39 = arith.constant 1.000000e+00 : f32
    %75 = vector.broadcast %cst_39 : f32 to vector<2x32xf32>
    %76 = arith.addf %75, %74 : vector<2x32xf32>
    %77 = arith.divf %75, %76 : vector<2x32xf32>
    %c0_40 = arith.constant 0 : index
    %c0_41 = arith.constant 0 : index
    %78 = vector.load %arg5[%c0_40, %c0_41] : memref<2x32xf32, #tpu.memory_space<vmem>>, vector<2x32xf32>
    %79 = arith.mulf %69, %78 : vector<2x32xf32>
    %80 = arith.mulf %63, %71 : vector<2x32xf32>
    %81 = arith.addf %79, %80 : vector<2x32xf32>
    %82 = math.tanh %81 : vector<2x32xf32>
    %83 = arith.mulf %77, %82 : vector<2x32xf32>
    %c0_42 = arith.constant 0 : index
    %c0_43 = arith.constant 0 : index
    %84 = vector.load %arg5[%c0_42, %c0_43] : memref<2x32xf32, #tpu.memory_space<vmem>>, vector<2x32xf32>
    tpu.vector_store %arg5[%c0_42, %c0_43], %81 {strides = array<i32>} : memref<2x32xf32, #tpu.memory_space<vmem>>, vector<2x32xf32>,
    %c0_44 = arith.constant 0 : index
    %c0_45 = arith.constant 0 : index
    %85 = vector.load %arg4[%c0_44, %c0_45] : memref<2x32xf32, #tpu.memory_space<vmem>>, vector<2x32xf32>
    tpu.vector_store %arg4[%c0_44, %c0_45], %83 {strides = array<i32>} : memref<2x32xf32, #tpu.memory_space<vmem>>, vector<2x32xf32>,
    %c0_46 = arith.constant 0 : index
    %86 = arith.index_cast %49 : i32 to index
    %c0_47 = arith.constant 0 : index
    %c0_48 = arith.constant 0 : index
    %87 = vector.load %arg3[%c0_46, %86, %c0_47, %c0_48] : memref<1x9x2x32xf32, #tpu.memory_space<vmem>>, vector<1x1x2x32xf32>
    %88 = vector.shape_cast %87 : vector<1x1x2x32xf32> to vector<2x32xf32>
    %89 = vector.shape_cast %83 : vector<2x32xf32> to vector<1x1x2x32xf32>
    tpu.vector_store %arg3[%c0_46, %86, %c0_47, %c0_48], %89 {strides = array<i32>} : memref<1x9x2x32xf32, #tpu.memory_space<vmem>>, vector<1x1x2x32xf32>,
    %c2_i32 = arith.constant 2 : i32
    %c0_i32_49 = arith.constant 0 : i32
    %90 = arith.cmpi eq, %arg0, %c0_i32_49 : i32
    %c8_i32_50 = arith.constant 8 : i32
    %91 = arith.subi %c8_i32_50, %c2_i32 : i32
    %92 = arith.select %90, %c2_i32, %91 : i32
    %c0_51 = arith.constant 0 : index
    %93 = arith.index_cast %92 : i32 to index
    %c0_52 = arith.constant 0 : index
    %c0_53 = arith.constant 0 : index
    %94 = vector.load %arg1[%c0_51, %93, %c0_52, %c0_53] : memref<1x9x2x128xf32, #tpu.memory_space<vmem>>, vector<1x1x2x128xf32>
    %95 = vector.shape_cast %94 : vector<1x1x2x128xf32> to vector<2x128xf32>
    %c0_54 = arith.constant 0 : index
    %c0_55 = arith.constant 0 : index
    %96 = vector.load %arg4[%c0_54, %c0_55] : memref<2x32xf32, #tpu.memory_space<vmem>>, vector<2x32xf32>
    %c0_56 = arith.constant 0 : index
    %c0_57 = arith.constant 0 : index
    %c0_58 = arith.constant 0 : index
    %97 = vector.load %arg2[%c0_56, %c0_57, %c0_58] : memref<1x32x128xf32, #tpu.memory_space<vmem>>, vector<1x32x128xf32>
    %98 = vector.shape_cast %97 : vector<1x32x128xf32> to vector<32x128xf32>
    %cst_59 = arith.constant dense<0.000000e+00> : vector<2x128xf32>
    %99 = tpu.matmul %96, %98, %cst_59 {dimension_numbers = #tpu.dot_dimension_numbers<[1], [0], [0], [1], [0, 0, 1, 1], [], []>} : vector<2x32xf32>, vector<32x128xf32>, vector<2x128xf32> -> vector<2x128xf32>
    %100 = arith.addf %95, %99 : vector<2x128xf32>
    %101 = vector.extract_strided_slice %100 {offsets = [0, 0], sizes = [2, 32], strides = [1, 1]} : vector<2x128xf32> to vector<2x32xf32>
    %102 = arith.negf %101 : vector<2x32xf32>
    %103 = math.exp %102 : vector<2x32xf32>
    %cst_60 = arith.constant 1.000000e+00 : f32
    %104 = vector.broadcast %cst_60 : f32 to vector<2x32xf32>
    %105 = arith.addf %104, %103 : vector<2x32xf32>
    %106 = arith.divf %104, %105 : vector<2x32xf32>
    %107 = vector.extract_strided_slice %100 {offsets = [0, 32], sizes = [2, 32], strides = [1, 1]} : vector<2x128xf32> to vector<2x32xf32>
    %108 = arith.negf %107 : vector<2x32xf32>
    %109 = math.exp %108 : vector<2x32xf32>
    %cst_61 = arith.constant 1.000000e+00 : f32
    %110 = vector.broadcast %cst_61 : f32 to vector<2x32xf32>
    %111 = arith.addf %110, %109 : vector<2x32xf32>
    %112 = arith.divf %110, %111 : vector<2x32xf32>
    %113 = vector.extract_strided_slice %100 {offsets = [0, 64], sizes = [2, 32], strides = [1, 1]} : vector<2x128xf32> to vector<2x32xf32>
    %114 = math.tanh %113 : vector<2x32xf32>
    %115 = vector.extract_strided_slice %100 {offsets = [0, 96], sizes = [2, 32], strides = [1, 1]} : vector<2x128xf32> to vector<2x32xf32>
    %116 = arith.negf %115 : vector<2x32xf32>
    %117 = math.exp %116 : vector<2x32xf32>
    %cst_62 = arith.constant 1.000000e+00 : f32
    %118 = vector.broadcast %cst_62 : f32 to vector<2x32xf32>
    %119 = arith.addf %118, %117 : vector<2x32xf32>
    %120 = arith.divf %118, %119 : vector<2x32xf32>
    %c0_63 = arith.constant 0 : index
    %c0_64 = arith.constant 0 : index
    %121 = vector.load %arg5[%c0_63, %c0_64] : memref<2x32xf32, #tpu.memory_space<vmem>>, vector<2x32xf32>
    %122 = arith.mulf %112, %121 : vector<2x32xf32>
    %123 = arith.mulf %106, %114 : vector<2x32xf32>
    %124 = arith.addf %122, %123 : vector<2x32xf32>
    %125 = math.tanh %124 : vector<2x32xf32>
    %126 = arith.mulf %120, %125 : vector<2x32xf32>
    %c0_65 = arith.constant 0 : index
    %c0_66 = arith.constant 0 : index
    %127 = vector.load %arg5[%c0_65, %c0_66] : memref<2x32xf32, #tpu.memory_space<vmem>>, vector<2x32xf32>
    tpu.vector_store %arg5[%c0_65, %c0_66], %124 {strides = array<i32>} : memref<2x32xf32, #tpu.memory_space<vmem>>, vector<2x32xf32>,
    %c0_67 = arith.constant 0 : index
    %c0_68 = arith.constant 0 : index
    %128 = vector.load %arg4[%c0_67, %c0_68] : memref<2x32xf32, #tpu.memory_space<vmem>>, vector<2x32xf32>
    tpu.vector_store %arg4[%c0_67, %c0_68], %126 {strides = array<i32>} : memref<2x32xf32, #tpu.memory_space<vmem>>, vector<2x32xf32>,
    %c0_69 = arith.constant 0 : index
    %129 = arith.index_cast %92 : i32 to index
    %c0_70 = arith.constant 0 : index
    %c0_71 = arith.constant 0 : index
    %130 = vector.load %arg3[%c0_69, %129, %c0_70, %c0_71] : memref<1x9x2x32xf32, #tpu.memory_space<vmem>>, vector<1x1x2x32xf32>
    %131 = vector.shape_cast %130 : vector<1x1x2x32xf32> to vector<2x32xf32>
    %132 = vector.shape_cast %126 : vector<2x32xf32> to vector<1x1x2x32xf32>
    tpu.vector_store %arg3[%c0_69, %129, %c0_70, %c0_71], %132 {strides = array<i32>} : memref<1x9x2x32xf32, #tpu.memory_space<vmem>>, vector<1x1x2x32xf32>,
    %c3_i32 = arith.constant 3 : i32
    %c0_i32_72 = arith.constant 0 : i32
    %133 = arith.cmpi eq, %arg0, %c0_i32_72 : i32
    %c8_i32_73 = arith.constant 8 : i32
    %134 = arith.subi %c8_i32_73, %c3_i32 : i32
    %135 = arith.select %133, %c3_i32, %134 : i32
    %c0_74 = arith.constant 0 : index
    %136 = arith.index_cast %135 : i32 to index
    %c0_75 = arith.constant 0 : index
    %c0_76 = arith.constant 0 : index
    %137 = vector.load %arg1[%c0_74, %136, %c0_75, %c0_76] : memref<1x9x2x128xf32, #tpu.memory_space<vmem>>, vector<1x1x2x128xf32>
    %138 = vector.shape_cast %137 : vector<1x1x2x128xf32> to vector<2x128xf32>
    %c0_77 = arith.constant 0 : index
    %c0_78 = arith.constant 0 : index
    %139 = vector.load %arg4[%c0_77, %c0_78] : memref<2x32xf32, #tpu.memory_space<vmem>>, vector<2x32xf32>
    %c0_79 = arith.constant 0 : index
    %c0_80 = arith.constant 0 : index
    %c0_81 = arith.constant 0 : index
    %140 = vector.load %arg2[%c0_79, %c0_80, %c0_81] : memref<1x32x128xf32, #tpu.memory_space<vmem>>, vector<1x32x128xf32>
    %141 = vector.shape_cast %140 : vector<1x32x128xf32> to vector<32x128xf32>
    %cst_82 = arith.constant dense<0.000000e+00> : vector<2x128xf32>
    %142 = tpu.matmul %139, %141, %cst_82 {dimension_numbers = #tpu.dot_dimension_numbers<[1], [0], [0], [1], [0, 0, 1, 1], [], []>} : vector<2x32xf32>, vector<32x128xf32>, vector<2x128xf32> -> vector<2x128xf32>
    %143 = arith.addf %138, %142 : vector<2x128xf32>
    %144 = vector.extract_strided_slice %143 {offsets = [0, 0], sizes = [2, 32], strides = [1, 1]} : vector<2x128xf32> to vector<2x32xf32>
    %145 = arith.negf %144 : vector<2x32xf32>
    %146 = math.exp %145 : vector<2x32xf32>
    %cst_83 = arith.constant 1.000000e+00 : f32
    %147 = vector.broadcast %cst_83 : f32 to vector<2x32xf32>
    %148 = arith.addf %147, %146 : vector<2x32xf32>
    %149 = arith.divf %147, %148 : vector<2x32xf32>
    %150 = vector.extract_strided_slice %143 {offsets = [0, 32], sizes = [2, 32], strides = [1, 1]} : vector<2x128xf32> to vector<2x32xf32>
    %151 = arith.negf %150 : vector<2x32xf32>
    %152 = math.exp %151 : vector<2x32xf32>
    %cst_84 = arith.constant 1.000000e+00 : f32
    %153 = vector.broadcast %cst_84 : f32 to vector<2x32xf32>
    %154 = arith.addf %153, %152 : vector<2x32xf32>
    %155 = arith.divf %153, %154 : vector<2x32xf32>
    %156 = vector.extract_strided_slice %143 {offsets = [0, 64], sizes = [2, 32], strides = [1, 1]} : vector<2x128xf32> to vector<2x32xf32>
    %157 = math.tanh %156 : vector<2x32xf32>
    %158 = vector.extract_strided_slice %143 {offsets = [0, 96], sizes = [2, 32], strides = [1, 1]} : vector<2x128xf32> to vector<2x32xf32>
    %159 = arith.negf %158 : vector<2x32xf32>
    %160 = math.exp %159 : vector<2x32xf32>
    %cst_85 = arith.constant 1.000000e+00 : f32
    %161 = vector.broadcast %cst_85 : f32 to vector<2x32xf32>
    %162 = arith.addf %161, %160 : vector<2x32xf32>
    %163 = arith.divf %161, %162 : vector<2x32xf32>
    %c0_86 = arith.constant 0 : index
    %c0_87 = arith.constant 0 : index
    %164 = vector.load %arg5[%c0_86, %c0_87] : memref<2x32xf32, #tpu.memory_space<vmem>>, vector<2x32xf32>
    %165 = arith.mulf %155, %164 : vector<2x32xf32>
    %166 = arith.mulf %149, %157 : vector<2x32xf32>
    %167 = arith.addf %165, %166 : vector<2x32xf32>
    %168 = math.tanh %167 : vector<2x32xf32>
    %169 = arith.mulf %163, %168 : vector<2x32xf32>
    %c0_88 = arith.constant 0 : index
    %c0_89 = arith.constant 0 : index
    %170 = vector.load %arg5[%c0_88, %c0_89] : memref<2x32xf32, #tpu.memory_space<vmem>>, vector<2x32xf32>
    tpu.vector_store %arg5[%c0_88, %c0_89], %167 {strides = array<i32>} : memref<2x32xf32, #tpu.memory_space<vmem>>, vector<2x32xf32>,
    %c0_90 = arith.constant 0 : index
    %c0_91 = arith.constant 0 : index
    %171 = vector.load %arg4[%c0_90, %c0_91] : memref<2x32xf32, #tpu.memory_space<vmem>>, vector<2x32xf32>
    tpu.vector_store %arg4[%c0_90, %c0_91], %169 {strides = array<i32>} : memref<2x32xf32, #tpu.memory_space<vmem>>, vector<2x32xf32>,
    %c0_92 = arith.constant 0 : index
    %172 = arith.index_cast %135 : i32 to index
    %c0_93 = arith.constant 0 : index
    %c0_94 = arith.constant 0 : index
    %173 = vector.load %arg3[%c0_92, %172, %c0_93, %c0_94] : memref<1x9x2x32xf32, #tpu.memory_space<vmem>>, vector<1x1x2x32xf32>
    %174 = vector.shape_cast %173 : vector<1x1x2x32xf32> to vector<2x32xf32>
    %175 = vector.shape_cast %169 : vector<2x32xf32> to vector<1x1x2x32xf32>
    tpu.vector_store %arg3[%c0_92, %172, %c0_93, %c0_94], %175 {strides = array<i32>} : memref<1x9x2x32xf32, #tpu.memory_space<vmem>>, vector<1x1x2x32xf32>,
    %c4_i32 = arith.constant 4 : i32
    %c0_i32_95 = arith.constant 0 : i32
    %176 = arith.cmpi eq, %arg0, %c0_i32_95 : i32
    %c8_i32_96 = arith.constant 8 : i32
    %177 = arith.subi %c8_i32_96, %c4_i32 : i32
    %178 = arith.select %176, %c4_i32, %177 : i32
    %c0_97 = arith.constant 0 : index
    %179 = arith.index_cast %178 : i32 to index
    %c0_98 = arith.constant 0 : index
    %c0_99 = arith.constant 0 : index
    %180 = vector.load %arg1[%c0_97, %179, %c0_98, %c0_99] : memref<1x9x2x128xf32, #tpu.memory_space<vmem>>, vector<1x1x2x128xf32>
    %181 = vector.shape_cast %180 : vector<1x1x2x128xf32> to vector<2x128xf32>
    %c0_100 = arith.constant 0 : index
    %c0_101 = arith.constant 0 : index
    %182 = vector.load %arg4[%c0_100, %c0_101] : memref<2x32xf32, #tpu.memory_space<vmem>>, vector<2x32xf32>
    %c0_102 = arith.constant 0 : index
    %c0_103 = arith.constant 0 : index
    %c0_104 = arith.constant 0 : index
    %183 = vector.load %arg2[%c0_102, %c0_103, %c0_104] : memref<1x32x128xf32, #tpu.memory_space<vmem>>, vector<1x32x128xf32>
    %184 = vector.shape_cast %183 : vector<1x32x128xf32> to vector<32x128xf32>
    %cst_105 = arith.constant dense<0.000000e+00> : vector<2x128xf32>
    %185 = tpu.matmul %182, %184, %cst_105 {dimension_numbers = #tpu.dot_dimension_numbers<[1], [0], [0], [1], [0, 0, 1, 1], [], []>} : vector<2x32xf32>, vector<32x128xf32>, vector<2x128xf32> -> vector<2x128xf32>
    %186 = arith.addf %181, %185 : vector<2x128xf32>
    %187 = vector.extract_strided_slice %186 {offsets = [0, 0], sizes = [2, 32], strides = [1, 1]} : vector<2x128xf32> to vector<2x32xf32>
    %188 = arith.negf %187 : vector<2x32xf32>
    %189 = math.exp %188 : vector<2x32xf32>
    %cst_106 = arith.constant 1.000000e+00 : f32
    %190 = vector.broadcast %cst_106 : f32 to vector<2x32xf32>
    %191 = arith.addf %190, %189 : vector<2x32xf32>
    %192 = arith.divf %190, %191 : vector<2x32xf32>
    %193 = vector.extract_strided_slice %186 {offsets = [0, 32], sizes = [2, 32], strides = [1, 1]} : vector<2x128xf32> to vector<2x32xf32>
    %194 = arith.negf %193 : vector<2x32xf32>
    %195 = math.exp %194 : vector<2x32xf32>
    %cst_107 = arith.constant 1.000000e+00 : f32
    %196 = vector.broadcast %cst_107 : f32 to vector<2x32xf32>
    %197 = arith.addf %196, %195 : vector<2x32xf32>
    %198 = arith.divf %196, %197 : vector<2x32xf32>
    %199 = vector.extract_strided_slice %186 {offsets = [0, 64], sizes = [2, 32], strides = [1, 1]} : vector<2x128xf32> to vector<2x32xf32>
    %200 = math.tanh %199 : vector<2x32xf32>
    %201 = vector.extract_strided_slice %186 {offsets = [0, 96], sizes = [2, 32], strides = [1, 1]} : vector<2x128xf32> to vector<2x32xf32>
    %202 = arith.negf %201 : vector<2x32xf32>
    %203 = math.exp %202 : vector<2x32xf32>
    %cst_108 = arith.constant 1.000000e+00 : f32
    %204 = vector.broadcast %cst_108 : f32 to vector<2x32xf32>
    %205 = arith.addf %204, %203 : vector<2x32xf32>
    %206 = arith.divf %204, %205 : vector<2x32xf32>
    %c0_109 = arith.constant 0 : index
    %c0_110 = arith.constant 0 : index
    %207 = vector.load %arg5[%c0_109, %c0_110] : memref<2x32xf32, #tpu.memory_space<vmem>>, vector<2x32xf32>
    %208 = arith.mulf %198, %207 : vector<2x32xf32>
    %209 = arith.mulf %192, %200 : vector<2x32xf32>
    %210 = arith.addf %208, %209 : vector<2x32xf32>
    %211 = math.tanh %210 : vector<2x32xf32>
    %212 = arith.mulf %206, %211 : vector<2x32xf32>
    %c0_111 = arith.constant 0 : index
    %c0_112 = arith.constant 0 : index
    %213 = vector.load %arg5[%c0_111, %c0_112] : memref<2x32xf32, #tpu.memory_space<vmem>>, vector<2x32xf32>
    tpu.vector_store %arg5[%c0_111, %c0_112], %210 {strides = array<i32>} : memref<2x32xf32, #tpu.memory_space<vmem>>, vector<2x32xf32>,
    %c0_113 = arith.constant 0 : index
    %c0_114 = arith.constant 0 : index
    %214 = vector.load %arg4[%c0_113, %c0_114] : memref<2x32xf32, #tpu.memory_space<vmem>>, vector<2x32xf32>
    tpu.vector_store %arg4[%c0_113, %c0_114], %212 {strides = array<i32>} : memref<2x32xf32, #tpu.memory_space<vmem>>, vector<2x32xf32>,
    %c0_115 = arith.constant 0 : index
    %215 = arith.index_cast %178 : i32 to index
    %c0_116 = arith.constant 0 : index
    %c0_117 = arith.constant 0 : index
    %216 = vector.load %arg3[%c0_115, %215, %c0_116, %c0_117] : memref<1x9x2x32xf32, #tpu.memory_space<vmem>>, vector<1x1x2x32xf32>
    %217 = vector.shape_cast %216 : vector<1x1x2x32xf32> to vector<2x32xf32>
    %218 = vector.shape_cast %212 : vector<2x32xf32> to vector<1x1x2x32xf32>
    tpu.vector_store %arg3[%c0_115, %215, %c0_116, %c0_117], %218 {strides = array<i32>} : memref<1x9x2x32xf32, #tpu.memory_space<vmem>>, vector<1x1x2x32xf32>,
    %c5_i32 = arith.constant 5 : i32
    %c0_i32_118 = arith.constant 0 : i32
    %219 = arith.cmpi eq, %arg0, %c0_i32_118 : i32
    %c8_i32_119 = arith.constant 8 : i32
    %220 = arith.subi %c8_i32_119, %c5_i32 : i32
    %221 = arith.select %219, %c5_i32, %220 : i32
    %c0_120 = arith.constant 0 : index
    %222 = arith.index_cast %221 : i32 to index
    %c0_121 = arith.constant 0 : index
    %c0_122 = arith.constant 0 : index
    %223 = vector.load %arg1[%c0_120, %222, %c0_121, %c0_122] : memref<1x9x2x128xf32, #tpu.memory_space<vmem>>, vector<1x1x2x128xf32>
    %224 = vector.shape_cast %223 : vector<1x1x2x128xf32> to vector<2x128xf32>
    %c0_123 = arith.constant 0 : index
    %c0_124 = arith.constant 0 : index
    %225 = vector.load %arg4[%c0_123, %c0_124] : memref<2x32xf32, #tpu.memory_space<vmem>>, vector<2x32xf32>
    %c0_125 = arith.constant 0 : index
    %c0_126 = arith.constant 0 : index
    %c0_127 = arith.constant 0 : index
    %226 = vector.load %arg2[%c0_125, %c0_126, %c0_127] : memref<1x32x128xf32, #tpu.memory_space<vmem>>, vector<1x32x128xf32>
    %227 = vector.shape_cast %226 : vector<1x32x128xf32> to vector<32x128xf32>
    %cst_128 = arith.constant dense<0.000000e+00> : vector<2x128xf32>
    %228 = tpu.matmul %225, %227, %cst_128 {dimension_numbers = #tpu.dot_dimension_numbers<[1], [0], [0], [1], [0, 0, 1, 1], [], []>} : vector<2x32xf32>, vector<32x128xf32>, vector<2x128xf32> -> vector<2x128xf32>
    %229 = arith.addf %224, %228 : vector<2x128xf32>
    %230 = vector.extract_strided_slice %229 {offsets = [0, 0], sizes = [2, 32], strides = [1, 1]} : vector<2x128xf32> to vector<2x32xf32>
    %231 = arith.negf %230 : vector<2x32xf32>
    %232 = math.exp %231 : vector<2x32xf32>
    %cst_129 = arith.constant 1.000000e+00 : f32
    %233 = vector.broadcast %cst_129 : f32 to vector<2x32xf32>
    %234 = arith.addf %233, %232 : vector<2x32xf32>
    %235 = arith.divf %233, %234 : vector<2x32xf32>
    %236 = vector.extract_strided_slice %229 {offsets = [0, 32], sizes = [2, 32], strides = [1, 1]} : vector<2x128xf32> to vector<2x32xf32>
    %237 = arith.negf %236 : vector<2x32xf32>
    %238 = math.exp %237 : vector<2x32xf32>
    %cst_130 = arith.constant 1.000000e+00 : f32
    %239 = vector.broadcast %cst_130 : f32 to vector<2x32xf32>
    %240 = arith.addf %239, %238 : vector<2x32xf32>
    %241 = arith.divf %239, %240 : vector<2x32xf32>
    %242 = vector.extract_strided_slice %229 {offsets = [0, 64], sizes = [2, 32], strides = [1, 1]} : vector<2x128xf32> to vector<2x32xf32>
    %243 = math.tanh %242 : vector<2x32xf32>
    %244 = vector.extract_strided_slice %229 {offsets = [0, 96], sizes = [2, 32], strides = [1, 1]} : vector<2x128xf32> to vector<2x32xf32>
    %245 = arith.negf %244 : vector<2x32xf32>
    %246 = math.exp %245 : vector<2x32xf32>
    %cst_131 = arith.constant 1.000000e+00 : f32
    %247 = vector.broadcast %cst_131 : f32 to vector<2x32xf32>
    %248 = arith.addf %247, %246 : vector<2x32xf32>
    %249 = arith.divf %247, %248 : vector<2x32xf32>
    %c0_132 = arith.constant 0 : index
    %c0_133 = arith.constant 0 : index
    %250 = vector.load %arg5[%c0_132, %c0_133] : memref<2x32xf32, #tpu.memory_space<vmem>>, vector<2x32xf32>
    %251 = arith.mulf %241, %250 : vector<2x32xf32>
    %252 = arith.mulf %235, %243 : vector<2x32xf32>
    %253 = arith.addf %251, %252 : vector<2x32xf32>
    %254 = math.tanh %253 : vector<2x32xf32>
    %255 = arith.mulf %249, %254 : vector<2x32xf32>
    %c0_134 = arith.constant 0 : index
    %c0_135 = arith.constant 0 : index
    %256 = vector.load %arg5[%c0_134, %c0_135] : memref<2x32xf32, #tpu.memory_space<vmem>>, vector<2x32xf32>
    tpu.vector_store %arg5[%c0_134, %c0_135], %253 {strides = array<i32>} : memref<2x32xf32, #tpu.memory_space<vmem>>, vector<2x32xf32>,
    %c0_136 = arith.constant 0 : index
    %c0_137 = arith.constant 0 : index
    %257 = vector.load %arg4[%c0_136, %c0_137] : memref<2x32xf32, #tpu.memory_space<vmem>>, vector<2x32xf32>
    tpu.vector_store %arg4[%c0_136, %c0_137], %255 {strides = array<i32>} : memref<2x32xf32, #tpu.memory_space<vmem>>, vector<2x32xf32>,
    %c0_138 = arith.constant 0 : index
    %258 = arith.index_cast %221 : i32 to index
    %c0_139 = arith.constant 0 : index
    %c0_140 = arith.constant 0 : index
    %259 = vector.load %arg3[%c0_138, %258, %c0_139, %c0_140] : memref<1x9x2x32xf32, #tpu.memory_space<vmem>>, vector<1x1x2x32xf32>
    %260 = vector.shape_cast %259 : vector<1x1x2x32xf32> to vector<2x32xf32>
    %261 = vector.shape_cast %255 : vector<2x32xf32> to vector<1x1x2x32xf32>
    tpu.vector_store %arg3[%c0_138, %258, %c0_139, %c0_140], %261 {strides = array<i32>} : memref<1x9x2x32xf32, #tpu.memory_space<vmem>>, vector<1x1x2x32xf32>,
    %c6_i32 = arith.constant 6 : i32
    %c0_i32_141 = arith.constant 0 : i32
    %262 = arith.cmpi eq, %arg0, %c0_i32_141 : i32
    %c8_i32_142 = arith.constant 8 : i32
    %263 = arith.subi %c8_i32_142, %c6_i32 : i32
    %264 = arith.select %262, %c6_i32, %263 : i32
    %c0_143 = arith.constant 0 : index
    %265 = arith.index_cast %264 : i32 to index
    %c0_144 = arith.constant 0 : index
    %c0_145 = arith.constant 0 : index
    %266 = vector.load %arg1[%c0_143, %265, %c0_144, %c0_145] : memref<1x9x2x128xf32, #tpu.memory_space<vmem>>, vector<1x1x2x128xf32>
    %267 = vector.shape_cast %266 : vector<1x1x2x128xf32> to vector<2x128xf32>
    %c0_146 = arith.constant 0 : index
    %c0_147 = arith.constant 0 : index
    %268 = vector.load %arg4[%c0_146, %c0_147] : memref<2x32xf32, #tpu.memory_space<vmem>>, vector<2x32xf32>
    %c0_148 = arith.constant 0 : index
    %c0_149 = arith.constant 0 : index
    %c0_150 = arith.constant 0 : index
    %269 = vector.load %arg2[%c0_148, %c0_149, %c0_150] : memref<1x32x128xf32, #tpu.memory_space<vmem>>, vector<1x32x128xf32>
    %270 = vector.shape_cast %269 : vector<1x32x128xf32> to vector<32x128xf32>
    %cst_151 = arith.constant dense<0.000000e+00> : vector<2x128xf32>
    %271 = tpu.matmul %268, %270, %cst_151 {dimension_numbers = #tpu.dot_dimension_numbers<[1], [0], [0], [1], [0, 0, 1, 1], [], []>} : vector<2x32xf32>, vector<32x128xf32>, vector<2x128xf32> -> vector<2x128xf32>
    %272 = arith.addf %267, %271 : vector<2x128xf32>
    %273 = vector.extract_strided_slice %272 {offsets = [0, 0], sizes = [2, 32], strides = [1, 1]} : vector<2x128xf32> to vector<2x32xf32>
    %274 = arith.negf %273 : vector<2x32xf32>
    %275 = math.exp %274 : vector<2x32xf32>
    %cst_152 = arith.constant 1.000000e+00 : f32
    %276 = vector.broadcast %cst_152 : f32 to vector<2x32xf32>
    %277 = arith.addf %276, %275 : vector<2x32xf32>
    %278 = arith.divf %276, %277 : vector<2x32xf32>
    %279 = vector.extract_strided_slice %272 {offsets = [0, 32], sizes = [2, 32], strides = [1, 1]} : vector<2x128xf32> to vector<2x32xf32>
    %280 = arith.negf %279 : vector<2x32xf32>
    %281 = math.exp %280 : vector<2x32xf32>
    %cst_153 = arith.constant 1.000000e+00 : f32
    %282 = vector.broadcast %cst_153 : f32 to vector<2x32xf32>
    %283 = arith.addf %282, %281 : vector<2x32xf32>
    %284 = arith.divf %282, %283 : vector<2x32xf32>
    %285 = vector.extract_strided_slice %272 {offsets = [0, 64], sizes = [2, 32], strides = [1, 1]} : vector<2x128xf32> to vector<2x32xf32>
    %286 = math.tanh %285 : vector<2x32xf32>
    %287 = vector.extract_strided_slice %272 {offsets = [0, 96], sizes = [2, 32], strides = [1, 1]} : vector<2x128xf32> to vector<2x32xf32>
    %288 = arith.negf %287 : vector<2x32xf32>
    %289 = math.exp %288 : vector<2x32xf32>
    %cst_154 = arith.constant 1.000000e+00 : f32
    %290 = vector.broadcast %cst_154 : f32 to vector<2x32xf32>
    %291 = arith.addf %290, %289 : vector<2x32xf32>
    %292 = arith.divf %290, %291 : vector<2x32xf32>
    %c0_155 = arith.constant 0 : index
    %c0_156 = arith.constant 0 : index
    %293 = vector.load %arg5[%c0_155, %c0_156] : memref<2x32xf32, #tpu.memory_space<vmem>>, vector<2x32xf32>
    %294 = arith.mulf %284, %293 : vector<2x32xf32>
    %295 = arith.mulf %278, %286 : vector<2x32xf32>
    %296 = arith.addf %294, %295 : vector<2x32xf32>
    %297 = math.tanh %296 : vector<2x32xf32>
    %298 = arith.mulf %292, %297 : vector<2x32xf32>
    %c0_157 = arith.constant 0 : index
    %c0_158 = arith.constant 0 : index
    %299 = vector.load %arg5[%c0_157, %c0_158] : memref<2x32xf32, #tpu.memory_space<vmem>>, vector<2x32xf32>
    tpu.vector_store %arg5[%c0_157, %c0_158], %296 {strides = array<i32>} : memref<2x32xf32, #tpu.memory_space<vmem>>, vector<2x32xf32>,
    %c0_159 = arith.constant 0 : index
    %c0_160 = arith.constant 0 : index
    %300 = vector.load %arg4[%c0_159, %c0_160] : memref<2x32xf32, #tpu.memory_space<vmem>>, vector<2x32xf32>
    tpu.vector_store %arg4[%c0_159, %c0_160], %298 {strides = array<i32>} : memref<2x32xf32, #tpu.memory_space<vmem>>, vector<2x32xf32>,
    %c0_161 = arith.constant 0 : index
    %301 = arith.index_cast %264 : i32 to index
    %c0_162 = arith.constant 0 : index
    %c0_163 = arith.constant 0 : index
    %302 = vector.load %arg3[%c0_161, %301, %c0_162, %c0_163] : memref<1x9x2x32xf32, #tpu.memory_space<vmem>>, vector<1x1x2x32xf32>
    %303 = vector.shape_cast %302 : vector<1x1x2x32xf32> to vector<2x32xf32>
    %304 = vector.shape_cast %298 : vector<2x32xf32> to vector<1x1x2x32xf32>
    tpu.vector_store %arg3[%c0_161, %301, %c0_162, %c0_163], %304 {strides = array<i32>} : memref<1x9x2x32xf32, #tpu.memory_space<vmem>>, vector<1x1x2x32xf32>,
    %c7_i32 = arith.constant 7 : i32
    %c0_i32_164 = arith.constant 0 : i32
    %305 = arith.cmpi eq, %arg0, %c0_i32_164 : i32
    %c8_i32_165 = arith.constant 8 : i32
    %306 = arith.subi %c8_i32_165, %c7_i32 : i32
    %307 = arith.select %305, %c7_i32, %306 : i32
    %c0_166 = arith.constant 0 : index
    %308 = arith.index_cast %307 : i32 to index
    %c0_167 = arith.constant 0 : index
    %c0_168 = arith.constant 0 : index
    %309 = vector.load %arg1[%c0_166, %308, %c0_167, %c0_168] : memref<1x9x2x128xf32, #tpu.memory_space<vmem>>, vector<1x1x2x128xf32>
    %310 = vector.shape_cast %309 : vector<1x1x2x128xf32> to vector<2x128xf32>
    %c0_169 = arith.constant 0 : index
    %c0_170 = arith.constant 0 : index
    %311 = vector.load %arg4[%c0_169, %c0_170] : memref<2x32xf32, #tpu.memory_space<vmem>>, vector<2x32xf32>
    %c0_171 = arith.constant 0 : index
    %c0_172 = arith.constant 0 : index
    %c0_173 = arith.constant 0 : index
    %312 = vector.load %arg2[%c0_171, %c0_172, %c0_173] : memref<1x32x128xf32, #tpu.memory_space<vmem>>, vector<1x32x128xf32>
    %313 = vector.shape_cast %312 : vector<1x32x128xf32> to vector<32x128xf32>
    %cst_174 = arith.constant dense<0.000000e+00> : vector<2x128xf32>
    %314 = tpu.matmul %311, %313, %cst_174 {dimension_numbers = #tpu.dot_dimension_numbers<[1], [0], [0], [1], [0, 0, 1, 1], [], []>} : vector<2x32xf32>, vector<32x128xf32>, vector<2x128xf32> -> vector<2x128xf32>
    %315 = arith.addf %310, %314 : vector<2x128xf32>
    %316 = vector.extract_strided_slice %315 {offsets = [0, 0], sizes = [2, 32], strides = [1, 1]} : vector<2x128xf32> to vector<2x32xf32>
    %317 = arith.negf %316 : vector<2x32xf32>
    %318 = math.exp %317 : vector<2x32xf32>
    %cst_175 = arith.constant 1.000000e+00 : f32
    %319 = vector.broadcast %cst_175 : f32 to vector<2x32xf32>
    %320 = arith.addf %319, %318 : vector<2x32xf32>
    %321 = arith.divf %319, %320 : vector<2x32xf32>
    %322 = vector.extract_strided_slice %315 {offsets = [0, 32], sizes = [2, 32], strides = [1, 1]} : vector<2x128xf32> to vector<2x32xf32>
    %323 = arith.negf %322 : vector<2x32xf32>
    %324 = math.exp %323 : vector<2x32xf32>
    %cst_176 = arith.constant 1.000000e+00 : f32
    %325 = vector.broadcast %cst_176 : f32 to vector<2x32xf32>
    %326 = arith.addf %325, %324 : vector<2x32xf32>
    %327 = arith.divf %325, %326 : vector<2x32xf32>
    %328 = vector.extract_strided_slice %315 {offsets = [0, 64], sizes = [2, 32], strides = [1, 1]} : vector<2x128xf32> to vector<2x32xf32>
    %329 = math.tanh %328 : vector<2x32xf32>
    %330 = vector.extract_strided_slice %315 {offsets = [0, 96], sizes = [2, 32], strides = [1, 1]} : vector<2x128xf32> to vector<2x32xf32>
    %331 = arith.negf %330 : vector<2x32xf32>
    %332 = math.exp %331 : vector<2x32xf32>
    %cst_177 = arith.constant 1.000000e+00 : f32
    %333 = vector.broadcast %cst_177 : f32 to vector<2x32xf32>
    %334 = arith.addf %333, %332 : vector<2x32xf32>
    %335 = arith.divf %333, %334 : vector<2x32xf32>
    %c0_178 = arith.constant 0 : index
    %c0_179 = arith.constant 0 : index
    %336 = vector.load %arg5[%c0_178, %c0_179] : memref<2x32xf32, #tpu.memory_space<vmem>>, vector<2x32xf32>
    %337 = arith.mulf %327, %336 : vector<2x32xf32>
    %338 = arith.mulf %321, %329 : vector<2x32xf32>
    %339 = arith.addf %337, %338 : vector<2x32xf32>
    %340 = math.tanh %339 : vector<2x32xf32>
    %341 = arith.mulf %335, %340 : vector<2x32xf32>
    %c0_180 = arith.constant 0 : index
    %c0_181 = arith.constant 0 : index
    %342 = vector.load %arg5[%c0_180, %c0_181] : memref<2x32xf32, #tpu.memory_space<vmem>>, vector<2x32xf32>
    tpu.vector_store %arg5[%c0_180, %c0_181], %339 {strides = array<i32>} : memref<2x32xf32, #tpu.memory_space<vmem>>, vector<2x32xf32>,
    %c0_182 = arith.constant 0 : index
    %c0_183 = arith.constant 0 : index
    %343 = vector.load %arg4[%c0_182, %c0_183] : memref<2x32xf32, #tpu.memory_space<vmem>>, vector<2x32xf32>
    tpu.vector_store %arg4[%c0_182, %c0_183], %341 {strides = array<i32>} : memref<2x32xf32, #tpu.memory_space<vmem>>, vector<2x32xf32>,
    %c0_184 = arith.constant 0 : index
    %344 = arith.index_cast %307 : i32 to index
    %c0_185 = arith.constant 0 : index
    %c0_186 = arith.constant 0 : index
    %345 = vector.load %arg3[%c0_184, %344, %c0_185, %c0_186] : memref<1x9x2x32xf32, #tpu.memory_space<vmem>>, vector<1x1x2x32xf32>
    %346 = vector.shape_cast %345 : vector<1x1x2x32xf32> to vector<2x32xf32>
    %347 = vector.shape_cast %341 : vector<2x32xf32> to vector<1x1x2x32xf32>
    tpu.vector_store %arg3[%c0_184, %344, %c0_185, %c0_186], %347 {strides = array<i32>} : memref<1x9x2x32xf32, #tpu.memory_space<vmem>>, vector<1x1x2x32xf32>,
    %c8_i32_187 = arith.constant 8 : i32
    %c0_i32_188 = arith.constant 0 : i32
    %348 = arith.cmpi eq, %arg0, %c0_i32_188 : i32
    %c8_i32_189 = arith.constant 8 : i32
    %349 = arith.subi %c8_i32_189, %c8_i32_187 : i32
    %350 = arith.select %348, %c8_i32_187, %349 : i32
    %c0_190 = arith.constant 0 : index
    %351 = arith.index_cast %350 : i32 to index
    %c0_191 = arith.constant 0 : index
    %c0_192 = arith.constant 0 : index
    %352 = vector.load %arg1[%c0_190, %351, %c0_191, %c0_192] : memref<1x9x2x128xf32, #tpu.memory_space<vmem>>, vector<1x1x2x128xf32>
    %353 = vector.shape_cast %352 : vector<1x1x2x128xf32> to vector<2x128xf32>
    %c0_193 = arith.constant 0 : index
    %c0_194 = arith.constant 0 : index
    %354 = vector.load %arg4[%c0_193, %c0_194] : memref<2x32xf32, #tpu.memory_space<vmem>>, vector<2x32xf32>
    %c0_195 = arith.constant 0 : index
    %c0_196 = arith.constant 0 : index
    %c0_197 = arith.constant 0 : index
    %355 = vector.load %arg2[%c0_195, %c0_196, %c0_197] : memref<1x32x128xf32, #tpu.memory_space<vmem>>, vector<1x32x128xf32>
    %356 = vector.shape_cast %355 : vector<1x32x128xf32> to vector<32x128xf32>
    %cst_198 = arith.constant dense<0.000000e+00> : vector<2x128xf32>
    %357 = tpu.matmul %354, %356, %cst_198 {dimension_numbers = #tpu.dot_dimension_numbers<[1], [0], [0], [1], [0, 0, 1, 1], [], []>} : vector<2x32xf32>, vector<32x128xf32>, vector<2x128xf32> -> vector<2x128xf32>
    %358 = arith.addf %353, %357 : vector<2x128xf32>
    %359 = vector.extract_strided_slice %358 {offsets = [0, 0], sizes = [2, 32], strides = [1, 1]} : vector<2x128xf32> to vector<2x32xf32>
    %360 = arith.negf %359 : vector<2x32xf32>
    %361 = math.exp %360 : vector<2x32xf32>
    %cst_199 = arith.constant 1.000000e+00 : f32
    %362 = vector.broadcast %cst_199 : f32 to vector<2x32xf32>
    %363 = arith.addf %362, %361 : vector<2x32xf32>
    %364 = arith.divf %362, %363 : vector<2x32xf32>
    %365 = vector.extract_strided_slice %358 {offsets = [0, 32], sizes = [2, 32], strides = [1, 1]} : vector<2x128xf32> to vector<2x32xf32>
    %366 = arith.negf %365 : vector<2x32xf32>
    %367 = math.exp %366 : vector<2x32xf32>
    %cst_200 = arith.constant 1.000000e+00 : f32
    %368 = vector.broadcast %cst_200 : f32 to vector<2x32xf32>
    %369 = arith.addf %368, %367 : vector<2x32xf32>
    %370 = arith.divf %368, %369 : vector<2x32xf32>
    %371 = vector.extract_strided_slice %358 {offsets = [0, 64], sizes = [2, 32], strides = [1, 1]} : vector<2x128xf32> to vector<2x32xf32>
    %372 = math.tanh %371 : vector<2x32xf32>
    %373 = vector.extract_strided_slice %358 {offsets = [0, 96], sizes = [2, 32], strides = [1, 1]} : vector<2x128xf32> to vector<2x32xf32>
    %374 = arith.negf %373 : vector<2x32xf32>
    %375 = math.exp %374 : vector<2x32xf32>
    %cst_201 = arith.constant 1.000000e+00 : f32
    %376 = vector.broadcast %cst_201 : f32 to vector<2x32xf32>
    %377 = arith.addf %376, %375 : vector<2x32xf32>
    %378 = arith.divf %376, %377 : vector<2x32xf32>
    %c0_202 = arith.constant 0 : index
    %c0_203 = arith.constant 0 : index
    %379 = vector.load %arg5[%c0_202, %c0_203] : memref<2x32xf32, #tpu.memory_space<vmem>>, vector<2x32xf32>
    %380 = arith.mulf %370, %379 : vector<2x32xf32>
    %381 = arith.mulf %364, %372 : vector<2x32xf32>
    %382 = arith.addf %380, %381 : vector<2x32xf32>
    %383 = math.tanh %382 : vector<2x32xf32>
    %384 = arith.mulf %378, %383 : vector<2x32xf32>
    %c0_204 = arith.constant 0 : index
    %c0_205 = arith.constant 0 : index
    %385 = vector.load %arg5[%c0_204, %c0_205] : memref<2x32xf32, #tpu.memory_space<vmem>>, vector<2x32xf32>
    tpu.vector_store %arg5[%c0_204, %c0_205], %382 {strides = array<i32>} : memref<2x32xf32, #tpu.memory_space<vmem>>, vector<2x32xf32>,
    %c0_206 = arith.constant 0 : index
    %c0_207 = arith.constant 0 : index
    %386 = vector.load %arg4[%c0_206, %c0_207] : memref<2x32xf32, #tpu.memory_space<vmem>>, vector<2x32xf32>
    tpu.vector_store %arg4[%c0_206, %c0_207], %384 {strides = array<i32>} : memref<2x32xf32, #tpu.memory_space<vmem>>, vector<2x32xf32>,
    %c0_208 = arith.constant 0 : index
    %387 = arith.index_cast %350 : i32 to index
    %c0_209 = arith.constant 0 : index
    %c0_210 = arith.constant 0 : index
    %388 = vector.load %arg3[%c0_208, %387, %c0_209, %c0_210] : memref<1x9x2x32xf32, #tpu.memory_space<vmem>>, vector<1x1x2x32xf32>
    %389 = vector.shape_cast %388 : vector<1x1x2x32xf32> to vector<2x32xf32>
    %390 = vector.shape_cast %384 : vector<2x32xf32> to vector<1x1x2x32xf32>
    tpu.vector_store %arg3[%c0_208, %387, %c0_209, %c0_210], %390 {strides = array<i32>} : memref<1x9x2x32xf32, #tpu.memory_space<vmem>>, vector<1x1x2x32xf32>,
    %c9_i32 = arith.constant 9 : i32
    return
  }
  func.func @transform_0(%arg0: i32) -> (i32, i32, i32, i32) {
    %c0_i32 = arith.constant 0 : i32
    %c0_i32_0 = arith.constant 0 : i32
    %c0_i32_1 = arith.constant 0 : i32
    %c0_i32_2 = arith.constant 0 : i32
    return %arg0, %c0_i32, %c0_i32_0, %c0_i32_1 : i32, i32, i32, i32
  }
  func.func @transform_1(%arg0: i32) -> (i32, i32, i32) {
    %c0_i32 = arith.constant 0 : i32
    %c0_i32_0 = arith.constant 0 : i32
    %c0_i32_1 = arith.constant 0 : i32
    return %arg0, %c0_i32, %c0_i32_0 : i32, i32, i32
  }
  func.func @transform_2(%arg0: i32) -> (i32, i32, i32, i32) {
    %c0_i32 = arith.constant 0 : i32
    %c0_i32_0 = arith.constant 0 : i32
    %c0_i32_1 = arith.constant 0 : i32
    %c0_i32_2 = arith.constant 0 : i32
    return %arg0, %c0_i32, %c0_i32_0, %c0_i32_1 : i32, i32, i32, i32
  }
}

module attributes {stable_mosaic.version = 11 : i64} {
  func.func @_mm_kernel(%arg0: i32, %arg1: i32, %arg2: i32, %arg3: memref<32x128xbf16, #tpu.memory_space<vmem>>, %arg4: memref<128x128xbf16, #tpu.memory_space<vmem>>, %arg5: memref<1x128xf32, #tpu.memory_space<vmem>>, %arg6: memref<32x128xf32, #tpu.memory_space<vmem>>, %arg7: memref<32x128xf32, #tpu.memory_space<vmem>>) attributes {dimension_semantics = [#tpu.dimension_semantics<parallel>, #tpu.dimension_semantics<parallel>, #tpu.dimension_semantics<arbitrary>], iteration_bounds = array<i64: 1, 1, 1>, scalar_prefetch = 0 : i64, scratch_operands = 1 : i64, tpu.core_type = #tpu.core_type<tc>, window_params = [{transform_indices = @transform_0, window_bounds = array<i64: 32, 128>}, {transform_indices = @transform_1, window_bounds = array<i64: 128, 128>}, {transform_indices = @transform_2, window_bounds = array<i64: 1, 128>}, {transform_indices = @transform_3, window_bounds = array<i64: 32, 128>}]} {
    %c0_i32 = arith.constant 0 : i32
    %0 = arith.cmpi eq, %arg2, %c0_i32 : i32
    %1 = arith.extui %0 : i1 to i32
    %c0_i32_0 = arith.constant 0 : i32
    %2 = arith.cmpi ne, %1, %c0_i32_0 : i32
    scf.if %2 {
      %cst_10 = arith.constant 0.000000e+00 : f32
      %12 = vector.broadcast %cst_10 : f32 to vector<32x128xf32>
      %c0_11 = arith.constant 0 : index
      %c0_12 = arith.constant 0 : index
      %13 = vector.load %arg7[%c0_11, %c0_12] : memref<32x128xf32, #tpu.memory_space<vmem>>, vector<32x128xf32>
      tpu.vector_store %arg7[%c0_11, %c0_12], %12 {strides = array<i32>} : memref<32x128xf32, #tpu.memory_space<vmem>>, vector<32x128xf32>,
    } else {
    }
    %c0 = arith.constant 0 : index
    %c0_1 = arith.constant 0 : index
    %3 = vector.load %arg7[%c0, %c0_1] : memref<32x128xf32, #tpu.memory_space<vmem>>, vector<32x128xf32>
    %c0_2 = arith.constant 0 : index
    %c0_3 = arith.constant 0 : index
    %4 = vector.load %arg3[%c0_2, %c0_3] : memref<32x128xbf16, #tpu.memory_space<vmem>>, vector<32x128xbf16>
    %c0_4 = arith.constant 0 : index
    %c0_5 = arith.constant 0 : index
    %5 = vector.load %arg4[%c0_4, %c0_5] : memref<128x128xbf16, #tpu.memory_space<vmem>>, vector<128x128xbf16>
    %cst = arith.constant dense<0.000000e+00> : vector<32x128xf32>
    %6 = tpu.matmul %4, %5, %cst {dimension_numbers = #tpu.dot_dimension_numbers<[1], [0], [0], [1], [0, 0, 1, 1], [], []>} : vector<32x128xbf16>, vector<128x128xbf16>, vector<32x128xf32> -> vector<32x128xf32>
    %7 = arith.addf %3, %6 : vector<32x128xf32>
    %c0_6 = arith.constant 0 : index
    %c0_7 = arith.constant 0 : index
    %8 = vector.load %arg7[%c0_6, %c0_7] : memref<32x128xf32, #tpu.memory_space<vmem>>, vector<32x128xf32>
    tpu.vector_store %arg7[%c0_6, %c0_7], %7 {strides = array<i32>} : memref<32x128xf32, #tpu.memory_space<vmem>>, vector<32x128xf32>,
    %c0_i32_8 = arith.constant 0 : i32
    %9 = arith.cmpi eq, %arg2, %c0_i32_8 : i32
    %10 = arith.extui %9 : i1 to i32
    %c0_i32_9 = arith.constant 0 : i32
    %11 = arith.cmpi ne, %10, %c0_i32_9 : i32
    scf.if %11 {
      %c0_10 = arith.constant 0 : index
      %c0_11 = arith.constant 0 : index
      %12 = vector.load %arg7[%c0_10, %c0_11] : memref<32x128xf32, #tpu.memory_space<vmem>>, vector<32x128xf32>
      %c0_12 = arith.constant 0 : index
      %c0_13 = arith.constant 0 : index
      %13 = vector.load %arg5[%c0_12, %c0_13] : memref<1x128xf32, #tpu.memory_space<vmem>>, vector<1x128xf32>
      %14 = vector.broadcast %13 : vector<1x128xf32> to vector<32x128xf32>
      %15 = arith.addf %12, %14 : vector<32x128xf32>
      %c0_14 = arith.constant 0 : index
      %c0_15 = arith.constant 0 : index
      %16 = vector.load %arg6[%c0_14, %c0_15] : memref<32x128xf32, #tpu.memory_space<vmem>>, vector<32x128xf32>
      tpu.vector_store %arg6[%c0_14, %c0_15], %15 {strides = array<i32>} : memref<32x128xf32, #tpu.memory_space<vmem>>, vector<32x128xf32>,
    } else {
    }
    return
  }
  func.func @transform_0(%arg0: i32, %arg1: i32, %arg2: i32) -> (i32, i32) {
    %c0_i32 = arith.constant 0 : i32
    return %arg0, %arg2 : i32, i32
  }
  func.func @transform_1(%arg0: i32, %arg1: i32, %arg2: i32) -> (i32, i32) {
    %c0_i32 = arith.constant 0 : i32
    return %arg2, %arg1 : i32, i32
  }
  func.func @transform_2(%arg0: i32, %arg1: i32, %arg2: i32) -> (i32, i32) {
    %c0_i32 = arith.constant 0 : i32
    %c0_i32_0 = arith.constant 0 : i32
    return %c0_i32, %arg1 : i32, i32
  }
  func.func @transform_3(%arg0: i32, %arg1: i32, %arg2: i32) -> (i32, i32) {
    %c0_i32 = arith.constant 0 : i32
    return %arg0, %arg1 : i32, i32
  }
}

module attributes {stable_mosaic.version = 11 : i64} {
  func.func @_mm_kernel(%arg0: i32, %arg1: i32, %arg2: i32, %arg3: memref<32x128xbf16, #tpu.memory_space<vmem>>, %arg4: memref<128x256xbf16, #tpu.memory_space<vmem>>, %arg5: memref<1x256xf32, #tpu.memory_space<vmem>>, %arg6: memref<32x256xf32, #tpu.memory_space<vmem>>, %arg7: memref<32x256xf32, #tpu.memory_space<vmem>>) attributes {dimension_semantics = [#tpu.dimension_semantics<parallel>, #tpu.dimension_semantics<parallel>, #tpu.dimension_semantics<arbitrary>], iteration_bounds = array<i64: 1, 1, 1>, scalar_prefetch = 0 : i64, scratch_operands = 1 : i64, tpu.core_type = #tpu.core_type<tc>, window_params = [{transform_indices = @transform_0, window_bounds = array<i64: 32, 128>}, {transform_indices = @transform_1, window_bounds = array<i64: 128, 256>}, {transform_indices = @transform_2, window_bounds = array<i64: 1, 256>}, {transform_indices = @transform_3, window_bounds = array<i64: 32, 256>}]} {
    %c0_i32 = arith.constant 0 : i32
    %0 = arith.cmpi eq, %arg2, %c0_i32 : i32
    %1 = arith.extui %0 : i1 to i32
    %c0_i32_0 = arith.constant 0 : i32
    %2 = arith.cmpi ne, %1, %c0_i32_0 : i32
    scf.if %2 {
      %cst_10 = arith.constant 0.000000e+00 : f32
      %12 = vector.broadcast %cst_10 : f32 to vector<32x256xf32>
      %c0_11 = arith.constant 0 : index
      %c0_12 = arith.constant 0 : index
      %13 = vector.load %arg7[%c0_11, %c0_12] : memref<32x256xf32, #tpu.memory_space<vmem>>, vector<32x256xf32>
      tpu.vector_store %arg7[%c0_11, %c0_12], %12 {strides = array<i32>} : memref<32x256xf32, #tpu.memory_space<vmem>>, vector<32x256xf32>,
    } else {
    }
    %c0 = arith.constant 0 : index
    %c0_1 = arith.constant 0 : index
    %3 = vector.load %arg7[%c0, %c0_1] : memref<32x256xf32, #tpu.memory_space<vmem>>, vector<32x256xf32>
    %c0_2 = arith.constant 0 : index
    %c0_3 = arith.constant 0 : index
    %4 = vector.load %arg3[%c0_2, %c0_3] : memref<32x128xbf16, #tpu.memory_space<vmem>>, vector<32x128xbf16>
    %c0_4 = arith.constant 0 : index
    %c0_5 = arith.constant 0 : index
    %5 = vector.load %arg4[%c0_4, %c0_5] : memref<128x256xbf16, #tpu.memory_space<vmem>>, vector<128x256xbf16>
    %cst = arith.constant dense<0.000000e+00> : vector<32x256xf32>
    %6 = tpu.matmul %4, %5, %cst {dimension_numbers = #tpu.dot_dimension_numbers<[1], [0], [0], [1], [0, 0, 1, 1], [], []>} : vector<32x128xbf16>, vector<128x256xbf16>, vector<32x256xf32> -> vector<32x256xf32>
    %7 = arith.addf %3, %6 : vector<32x256xf32>
    %c0_6 = arith.constant 0 : index
    %c0_7 = arith.constant 0 : index
    %8 = vector.load %arg7[%c0_6, %c0_7] : memref<32x256xf32, #tpu.memory_space<vmem>>, vector<32x256xf32>
    tpu.vector_store %arg7[%c0_6, %c0_7], %7 {strides = array<i32>} : memref<32x256xf32, #tpu.memory_space<vmem>>, vector<32x256xf32>,
    %c0_i32_8 = arith.constant 0 : i32
    %9 = arith.cmpi eq, %arg2, %c0_i32_8 : i32
    %10 = arith.extui %9 : i1 to i32
    %c0_i32_9 = arith.constant 0 : i32
    %11 = arith.cmpi ne, %10, %c0_i32_9 : i32
    scf.if %11 {
      %c0_10 = arith.constant 0 : index
      %c0_11 = arith.constant 0 : index
      %12 = vector.load %arg7[%c0_10, %c0_11] : memref<32x256xf32, #tpu.memory_space<vmem>>, vector<32x256xf32>
      %c0_12 = arith.constant 0 : index
      %c0_13 = arith.constant 0 : index
      %13 = vector.load %arg5[%c0_12, %c0_13] : memref<1x256xf32, #tpu.memory_space<vmem>>, vector<1x256xf32>
      %14 = vector.broadcast %13 : vector<1x256xf32> to vector<32x256xf32>
      %15 = arith.addf %12, %14 : vector<32x256xf32>
      %c0_14 = arith.constant 0 : index
      %c0_15 = arith.constant 0 : index
      %16 = vector.load %arg6[%c0_14, %c0_15] : memref<32x256xf32, #tpu.memory_space<vmem>>, vector<32x256xf32>
      tpu.vector_store %arg6[%c0_14, %c0_15], %15 {strides = array<i32>} : memref<32x256xf32, #tpu.memory_space<vmem>>, vector<32x256xf32>,
    } else {
    }
    return
  }
  func.func @transform_0(%arg0: i32, %arg1: i32, %arg2: i32) -> (i32, i32) {
    %c0_i32 = arith.constant 0 : i32
    return %arg0, %arg2 : i32, i32
  }
  func.func @transform_1(%arg0: i32, %arg1: i32, %arg2: i32) -> (i32, i32) {
    %c0_i32 = arith.constant 0 : i32
    return %arg2, %arg1 : i32, i32
  }
  func.func @transform_2(%arg0: i32, %arg1: i32, %arg2: i32) -> (i32, i32) {
    %c0_i32 = arith.constant 0 : i32
    %c0_i32_0 = arith.constant 0 : i32
    return %c0_i32, %arg1 : i32, i32
  }
  func.func @transform_3(%arg0: i32, %arg1: i32, %arg2: i32) -> (i32, i32) {
    %c0_i32 = arith.constant 0 : i32
    return %arg0, %arg1 : i32, i32
  }
}

</mosaic_0001>

<bundles_post_ra>
// kernel: _lambda_.17
= control target key start
LH: loop header
LB: loop body
LE: loop exit
PB: predicated region body
PF: predicated region fallthrough
CT: control target
= control target key end

     0   :  { %8 = vsyncpa [#allocation4], 0  ;;  %s1540_s12 = smov 0   ;;  %s1542_s13 = smov 0   ;;  %s1695_s0 = inlined_call_operand.vmem [shape: bf16[2048,128], index: 0, kind: input, shape index: {}]   ;;  %s1696_s1 = inlined_call_operand.hbm [shape: bf16[128,128], index: 1, kind: input, shape index: {}]   ;;  %s1697_s2 = inlined_call_operand.vmem [shape: f32[1,128], index: 2, kind: input, shape index: {}]   ;;  %s1698_s3 = inlined_call_operand.vmem [shape: bf16[2048,128], index: 3, kind: output, shape index: {}]  }
   0x1   :  { %s1544_s14 = smov 0  }
   0x2 LB: > { %s1114_s15 = sadd.s32 4294967295, %s1515_s14   ;;  %s33_s16 = sadd.s32 1, %s1511_s13  ;;  %s1515_s14 = sphi %s1544_s14, %s14_s14   ;;  %s1511_s13 = sphi %s1542_s13, %s1708_s13   ;;  %s1507_s12 = sphi %s1540_s12, %s1707_s12  }
   0x3   : > { %p35_p0 = scmp.ge.s32.totalorder %s33_s16, 8  ;;  %p1116_p1 = scmp.ge.s32.totalorder %s1515_s14, 1 }
   0x4   : > { %p148_p2 = scmp.lt.s32.totalorder %s1515_s14, 9  ;;  %p1565_p4 = scmp.eq.s32.totalorder %s1114_s15, 0 }
   0x5   : > { %s1710_s16 = smov (%p35_p0, %s33_s16), 0  ;;  %s1517_s19 = smov [#allocation3]  }
   0x6   : > { %p1561_p3 = pnand %p1116_p1, %p148_p2  ;;  %s164_s20 = sshll.u32 %s1517_s19, 4  ;;  %s165_s20 = int_to_ptr.vmem [resolvable:$true] %s164_s20 }
   0x7   : > { %s1703_s18 = scalar_select %p1565_p4, 1, 0 }
   0x8   : > { %s1702_s17 = scalar_select %p1561_p3, 1, 0 }
   0x9   : > { %p1404_p5 = pneg %p1561_p3  ;;  %s1461_s24 = scalar_lea.hbm %s1696_s1, 1024 }
   0xa   : > { %p1462_p7 = scmp.ne.s32.totalorder %s1696_s1, %s1461_s24  ;;  %p1468_p11 = scmp.lt.u32.totalorder %s1461_s24, %s1696_s1 }
   0xb   : > { %p1573_p6 = pnand %p1565_p4, %p1404_p5 }
   0xd   : > { %p1463_p8 = pneg %p1573_p6 }
   0xf   : > { %p1464_p9 = pnand %p1463_p8, %p1462_p7 }
  0x11   : > { %p1465_p10 = pneg %p1464_p9 }
  0x13   : > { %p1470_p12 = pnand %p1468_p11, %p1465_p10 }
  0x15   : > { %1473 = shalt.err (!%p1470_p12)
}
  0x16   : > { %s1474_s29 = scalar_lea.vmem %s165_s20, 1024  ;;  %p1482_p2 = scmp.lt.s32.totalorder %s165_s20, %s165_s20 }
  0x17   : > { %p1475_p13 = scmp.ne.s32.totalorder %s165_s20, %s1474_s29  ;;  %p1483_p5 = scmp.lt.s32.totalorder %s1474_s29, %s1474_s29 }
  0x19   : > { %p1477_p0 = pnand %p1475_p13, %p1463_p8  ;;  %p1484_p4 = por %p1483_p5, %p1482_p2 }
  0x1b   : > { %p1478_p1 = pneg %p1477_p0 }
  0x1d   : > { %p1485_p3 = pnand %p1484_p4, %p1478_p1 }
  0x1f   : > { %1488 = shalt.err (!%p1485_p3)
}
  0x20   : > { %s1518_s30 = smov 64   ;;  %s1519_s4 = smov 4  }
  0x21   : > { %1407 = dma.hbm_to_vmem [thread:$0]  (!%p1573_p6), %s1696_s1, 1024, %s165_s20, [#allocation4], %s1518_s30, %s1518_s30, %s1519_s4  }
  0x22   : > { %p1705_p7 = scmp.ne.s32.totalorder %s1702_s17, 0 }
  0x23   : > { %p1706_p9 = scmp.ne.s32.totalorder (!%p1705_p7), %s1703_s18, 0 }
  0x24   : > { %198 = sbr.rel (%p1705_p7) target bundleno = 323 (0x143), region = 32 }
  0x2b   : > { %1502 = dma.done.wait (%p1706_p9), [#allocation4], 1024  }
  0x2c   : > { %1504 = vsyncadd (%p1706_p9), [#allocation4], 4294966272  ;;  %s1122_s7 = sshll.u32 %s1507_s12, 5  ;;  %v1437_v0 = vld [vmem:[#allocation3] sm:$0xff]   ;;  %v1438_v1 = vld [vmem:[#allocation3 + $0x8] sm:$0xff]  }
  0x2d   : > { %p232_p3 = scmp.lt.s32.totalorder %s1122_s7, 255  ;;  %1336 = vmatprep.subr.bf16.mxu0 %v1437_v0  ;;  %1384 = vmatprep.subr.bf16.mxu1 %v1437_v0  ;;  %v1439_v2 = vld [vmem:[#allocation3 + $0x10] sm:$0xff]   ;;  %v1440_v3 = vld [vmem:[#allocation3 + $0x18] sm:$0xff]   ;;  %v1441_v6 = vld [vmem:[#allocation3 + $0x20] sm:$0xff]  }
  0x2e   : > { %1337 = vmatpush3.bf16.msra.mxu0 %v1437_v0  ;;  %1392 = vmatpush3.bf16.msra.mxu1 %v1437_v0  ;;  %v1442_v7 = vld [vmem:[#allocation3 + $0x28] sm:$0xff]   ;;  %v1443_v8 = vld [vmem:[#allocation3 + $0x30] sm:$0xff]   ;;  %v1444_v9 = vld [vmem:[#allocation3 + $0x38] sm:$0xff]  }
  0x2f   : > { %s1712_s7 = smov (!%p232_p3, %s1122_s7), 255  ;;  %1338 = vmatprep.subr.bf16.mxu0 %v1438_v1  ;;  %1385 = vmatprep.subr.bf16.mxu1 %v1438_v1  ;;  %v1629_v24 = vld [vmem:[%s1697_s2] ss:$0 sm:$0xff] }
  0x30   : > { %s1123_s8 = sshll.u32 %s1712_s7, 2 }
  0x31   : > { %s1608_s11 = scalar_lea.vmem %s1695_s0, %s1123_s8  ;;  %s1644_s19 = scalar_lea.vmem %s1698_s3, %s1123_s8 }
  0x32   : > { %1339 = vmatpush3.bf16.msra.mxu0 %v1438_v1  ;;  %1393 = vmatpush3.bf16.msra.mxu1 %v1438_v1  ;;  %v1445_v4 = vld [vmem:[%s1608_s11] sm:$0xff]   ;;  %v1447_v10 = vld [vmem:[%s1608_s11 + $0x8] sm:$0xff]   ;;  %v1449_v12 = vld [vmem:[%s1608_s11 + $0x10] sm:$0xff]  }
  0x33   : > { %1340 = vmatprep.subr.bf16.mxu0 %v1439_v2  ;;  %1386 = vmatprep.subr.bf16.mxu1 %v1439_v2  ;;  %v1446_v5 = vld [vmem:[%s1608_s11 + $0x40] sm:$0xff]   ;;  %v1448_v11 = vld [vmem:[%s1608_s11 + $0x48] sm:$0xff]   ;;  %v1450_v13 = vld [vmem:[%s1608_s11 + $0x50] sm:$0xff]  }
  0x34   : > { %1352 = vmatprep.mubr.bf16.mxu0 %v1445_v4  ;;  %1368 = vmatprep.mubr.bf16.mxu1 %v1446_v5  ;;  %v1451_v14 = vld [vmem:[%s1608_s11 + $0x18] sm:$0xff]   ;;  %v1453_v16 = vld [vmem:[%s1608_s11 + $0x20] sm:$0xff]   ;;  %v1455_v18 = vld [vmem:[%s1608_s11 + $0x28] sm:$0xff]  }
  0x35   : > { %v1452_v15 = vld [vmem:[%s1608_s11 + $0x58] sm:$0xff]   ;;  %v1454_v17 = vld [vmem:[%s1608_s11 + $0x60] sm:$0xff]   ;;  %v1456_v19 = vld [vmem:[%s1608_s11 + $0x68] sm:$0xff]  }
  0x36   : > { %1341 = vmatpush3.bf16.msra.mxu0 %v1439_v2  ;;  %1394 = vmatpush3.bf16.msra.mxu1 %v1439_v2  ;;  %v1457_v20 = vld [vmem:[%s1608_s11 + $0x30] sm:$0xff]   ;;  %v1459_v22 = vld [vmem:[%s1608_s11 + $0x38] sm:$0xff]  }
  0x37   : > { %1342 = vmatprep.subr.bf16.mxu0 %v1440_v3  ;;  %1387 = vmatprep.subr.bf16.mxu1 %v1440_v3  ;;  %v1458_v21 = vld [vmem:[%s1608_s11 + $0x70] sm:$0xff]   ;;  %v1460_v23 = vld [vmem:[%s1608_s11 + $0x78] sm:$0xff]  }
  0x3a   : > { %1343 = vmatpush3.bf16.msra.mxu0 %v1440_v3  ;;  %1395 = vmatpush3.bf16.msra.mxu1 %v1440_v3 }
  0x3b   : > { %1344 = vmatprep.subr.bf16.mxu0 %v1441_v6  ;;  %1388 = vmatprep.subr.bf16.mxu1 %v1441_v6 }
  0x3e   : > { %1345 = vmatpush3.bf16.msra.mxu0 %v1441_v6  ;;  %1396 = vmatpush3.bf16.msra.mxu1 %v1441_v6 }
  0x3f   : > { %1346 = vmatprep.subr.bf16.mxu0 %v1442_v7  ;;  %1389 = vmatprep.subr.bf16.mxu1 %v1442_v7 }
  0x42   : > { %1347 = vmatpush3.bf16.msra.mxu0 %v1442_v7  ;;  %1397 = vmatpush3.bf16.msra.mxu1 %v1442_v7 }
  0x43   : > { %1348 = vmatprep.subr.bf16.mxu0 %v1443_v8  ;;  %1390 = vmatprep.subr.bf16.mxu1 %v1443_v8 }
  0x46   : > { %1349 = vmatpush3.bf16.msra.mxu0 %v1443_v8  ;;  %1398 = vmatpush3.bf16.msra.mxu1 %v1443_v8 }
  0x47   : > { %1350 = vmatprep.subr.bf16.mxu0 %v1444_v9  ;;  %1391 = vmatprep.subr.bf16.mxu1 %v1444_v9 }
  0x4a   : > { %1351 = vmatpush3.bf16.msra.mxu0 %v1444_v9  ;;  %1399 = vmatpush3.bf16.msra.mxu1 %v1444_v9 }
  0x4d   : > { %1353 = vmatmul.mubr.bf16.vlgmr.msra.gmra.mrb[0].mxu0 %v1447_v10  ;;  %1369 = vmatmul.mubr.bf16.vlgmr.msra.gmra.mrb[0].mxu1 %v1448_v11 }
  0x4e   : > { %1356 = vmatprep.mubr.bf16.mxu0 %v1449_v12  ;;  %1372 = vmatprep.mubr.bf16.mxu1 %v1450_v13 }
  0x55   : > { %1357 = vmatmul.mubr.bf16.gmra.mrb[4].mxu0 %v1451_v14  ;;  %1373 = vmatmul.mubr.bf16.gmra.mrb[4].mxu1 %v1452_v15 }
  0x56   : > { %1360 = vmatprep.mubr.bf16.mxu0 %v1453_v16  ;;  %1376 = vmatprep.mubr.bf16.mxu1 %v1454_v17 }
  0x5d   : > { %1361 = vmatmul.mubr.bf16.gmra.mrb[8].mxu0 %v1455_v18  ;;  %1377 = vmatmul.mubr.bf16.gmra.mrb[8].mxu1 %v1456_v19 }
  0x5e   : > { %1364 = vmatprep.mubr.bf16.mxu0 %v1457_v20  ;;  %1380 = vmatprep.mubr.bf16.mxu1 %v1458_v21 }
  0x65   : > { %1365 = vmatmul.mubr.bf16.gmra.mrb[12].mxu0 %v1459_v22  ;;  %1381 = vmatmul.mubr.bf16.gmra.mrb[12].mxu1 %v1460_v23 }
 0x120   : > { %v1354_v25 = vpop.f32.mrb[0].mxu0  ;;  %v1370_v26 = vpop.f32.mrb[0].mxu1 }
 0x121   : > { %v783_v27 = vadd.f32 %v1354_v25, %v1629_v24  ;;  %v799_v28 = vadd.f32 %v1370_v26, %v1629_v24  ;;  %v548_v29 = vpop.f32.mrb[1].mxu0  ;;  %v612_v30 = vpop.f32.mrb[1].mxu1 }
 0x122   : > { %v781_v31 = vadd.f32 %v1629_v24, %v548_v29  ;;  %v797_v32 = vadd.f32 %v1629_v24, %v612_v30  ;;  %v1355_v33 = vpop.f32.mrb[2].mxu0  ;;  %v1371_v34 = vpop.f32.mrb[2].mxu1 }
 0x123   : > { %v784_v35 = vadd.f32 %v1355_v33, %v1629_v24  ;;  %v800_v36 = vadd.f32 %v1371_v34, %v1629_v24  ;;  %v551_v37 = vpop.f32.mrb[3].mxu0  ;;  %v615_v38 = vpop.f32.mrb[3].mxu1  ;;  %v815_v41 = vmax.f32 %v783_v27, 0.0  ;;  %v831_v42 = vmax.f32 %v799_v28, 0.0 }
 0x124   : > { %v782_v39 = vadd.f32 %v1629_v24, %v551_v37  ;;  %v798_v40 = vadd.f32 %v1629_v24, %v615_v38  ;;  %v813_v45 = vmax.f32 %v781_v31, 0.0  ;;  %v829_v46 = vmax.f32 %v797_v32, 0.0 }
 0x125   : > { %v816_v43 = vmax.f32 %v784_v35, 0.0  ;;  %v832_v44 = vmax.f32 %v800_v36, 0.0 }
 0x126   : > { %v814_v47 = vmax.f32 %v782_v39, 0.0  ;;  %v830_v48 = vmax.f32 %v798_v40, 0.0 }
 0x127   : > { %v1225_v49 = vpack.c.bf16 %v816_v43, %v815_v41  ;;  %v1265_v50 = vpack.c.bf16 %v832_v44, %v831_v42 }
 0x128   : > { %v1220_v51 = vpack.c.bf16 %v814_v47, %v813_v45  ;;  %v1260_v52 = vpack.c.bf16 %v830_v48, %v829_v46  ;;  %v1358_v53 = vpop.f32.mrb[4].mxu0  ;;  %v1374_v54 = vpop.f32.mrb[4].mxu1 }
 0x129   : > { %1297 = vst [vmem:[%s1644_s19 + $0x8] sm:$0xff] %v1225_v49   ;;  %1305 = vst [vmem:[%s1644_s19 + $0x48] sm:$0xff] %v1265_v50   ;;  %v787_v55 = vadd.f32 %v1358_v53, %v1629_v24  ;;  %v803_v56 = vadd.f32 %v1374_v54, %v1629_v24  ;;  %v564_v57 = vpop.f32.mrb[5].mxu0  ;;  %v628_v58 = vpop.f32.mrb[5].mxu1 }
 0x12a   : > { %1221 = vst [vmem:[%s1644_s19] sm:$0xff] %v1220_v51   ;;  %1304 = vst [vmem:[%s1644_s19 + $0x40] sm:$0xff] %v1260_v52   ;;  %v785_v59 = vadd.f32 %v1629_v24, %v564_v57  ;;  %v801_v60 = vadd.f32 %v1629_v24, %v628_v58  ;;  %v1359_v61 = vpop.f32.mrb[6].mxu0  ;;  %v1375_v62 = vpop.f32.mrb[6].mxu1 }
 0x12b   : > { %v788_v63 = vadd.f32 %v1359_v61, %v1629_v24  ;;  %v804_v0 = vadd.f32 %v1375_v62, %v1629_v24  ;;  %v567_v1 = vpop.f32.mrb[7].mxu0  ;;  %v631_v2 = vpop.f32.mrb[7].mxu1  ;;  %v819_v5 = vmax.f32 %v787_v55, 0.0  ;;  %v835_v6 = vmax.f32 %v803_v56, 0.0 }
 0x12c   : > { %v786_v3 = vadd.f32 %v1629_v24, %v567_v1  ;;  %v802_v4 = vadd.f32 %v1629_v24, %v631_v2  ;;  %v817_v9 = vmax.f32 %v785_v59, 0.0  ;;  %v833_v10 = vmax.f32 %v801_v60, 0.0 }
 0x12d   : > { %v820_v7 = vmax.f32 %v788_v63, 0.0  ;;  %v836_v8 = vmax.f32 %v804_v0, 0.0 }
 0x12e   : > { %v818_v11 = vmax.f32 %v786_v3, 0.0  ;;  %v834_v12 = vmax.f32 %v802_v4, 0.0 }
 0x12f   : > { %v1235_v13 = vpack.c.bf16 %v820_v7, %v819_v5  ;;  %v1275_v14 = vpack.c.bf16 %v836_v8, %v835_v6 }
 0x130   : > { %v1230_v15 = vpack.c.bf16 %v818_v11, %v817_v9  ;;  %v1270_v16 = vpack.c.bf16 %v834_v12, %v833_v10  ;;  %v1362_v17 = vpop.f32.mrb[8].mxu0  ;;  %v1378_v18 = vpop.f32.mrb[8].mxu1 }
 0x131   : > { %1299 = vst [vmem:[%s1644_s19 + $0x18] sm:$0xff] %v1235_v13   ;;  %1307 = vst [vmem:[%s1644_s19 + $0x58] sm:$0xff] %v1275_v14   ;;  %v791_v19 = vadd.f32 %v1362_v17, %v1629_v24  ;;  %v807_v20 = vadd.f32 %v1378_v18, %v1629_v24  ;;  %v580_v21 = vpop.f32.mrb[9].mxu0  ;;  %v644_v22 = vpop.f32.mrb[9].mxu1 }
 0x132   : > { %1298 = vst [vmem:[%s1644_s19 + $0x10] sm:$0xff] %v1230_v15   ;;  %1306 = vst [vmem:[%s1644_s19 + $0x50] sm:$0xff] %v1270_v16   ;;  %v789_v23 = vadd.f32 %v1629_v24, %v580_v21  ;;  %v805_v25 = vadd.f32 %v1629_v24, %v644_v22  ;;  %v1363_v26 = vpop.f32.mrb[10].mxu0  ;;  %v1379_v27 = vpop.f32.mrb[10].mxu1 }
 0x133   : > { %v792_v28 = vadd.f32 %v1363_v26, %v1629_v24  ;;  %v808_v29 = vadd.f32 %v1379_v27, %v1629_v24  ;;  %v583_v30 = vpop.f32.mrb[11].mxu0  ;;  %v647_v31 = vpop.f32.mrb[11].mxu1  ;;  %v823_v34 = vmax.f32 %v791_v19, 0.0  ;;  %v839_v35 = vmax.f32 %v807_v20, 0.0 }
 0x134   : > { %v790_v32 = vadd.f32 %v1629_v24, %v583_v30  ;;  %v806_v33 = vadd.f32 %v1629_v24, %v647_v31  ;;  %v821_v38 = vmax.f32 %v789_v23, 0.0  ;;  %v837_v39 = vmax.f32 %v805_v25, 0.0 }
 0x135   : > { %v824_v36 = vmax.f32 %v792_v28, 0.0  ;;  %v840_v37 = vmax.f32 %v808_v29, 0.0 }
 0x136   : > { %v822_v40 = vmax.f32 %v790_v32, 0.0  ;;  %v838_v41 = vmax.f32 %v806_v33, 0.0 }
 0x137   : > { %v1245_v42 = vpack.c.bf16 %v824_v36, %v823_v34  ;;  %v1285_v43 = vpack.c.bf16 %v840_v37, %v839_v35 }
 0x138   : > { %v1240_v44 = vpack.c.bf16 %v822_v40, %v821_v38  ;;  %v1280_v45 = vpack.c.bf16 %v838_v41, %v837_v39  ;;  %v1366_v46 = vpop.f32.mrb[12].mxu0  ;;  %v1382_v47 = vpop.f32.mrb[12].mxu1 }
 0x139   : > { %1301 = vst [vmem:[%s1644_s19 + $0x28] sm:$0xff] %v1245_v42   ;;  %1309 = vst [vmem:[%s1644_s19 + $0x68] sm:$0xff] %v1285_v43   ;;  %v795_v48 = vadd.f32 %v1366_v46, %v1629_v24  ;;  %v811_v49 = vadd.f32 %v1382_v47, %v1629_v24  ;;  %v596_v50 = vpop.f32.mrb[13].mxu0  ;;  %v660_v51 = vpop.f32.mrb[13].mxu1 }
 0x13a   : > { %1300 = vst [vmem:[%s1644_s19 + $0x20] sm:$0xff] %v1240_v44   ;;  %1308 = vst [vmem:[%s1644_s19 + $0x60] sm:$0xff] %v1280_v45   ;;  %v793_v52 = vadd.f32 %v1629_v24, %v596_v50  ;;  %v809_v53 = vadd.f32 %v1629_v24, %v660_v51  ;;  %v1367_v54 = vpop.f32.mrb[14].mxu0  ;;  %v1383_v55 = vpop.f32.mrb[14].mxu1 }
 0x13b   : > { %v796_v56 = vadd.f32 %v1367_v54, %v1629_v24  ;;  %v812_v57 = vadd.f32 %v1383_v55, %v1629_v24  ;;  %v599_v58 = vpop.f32.mrb[15].mxu0  ;;  %v663_v59 = vpop.f32.mrb[15].mxu1  ;;  %v827_v62 = vmax.f32 %v795_v48, 0.0  ;;  %v843_v63 = vmax.f32 %v811_v49, 0.0 }
 0x13c   : > { %v794_v60 = vadd.f32 %v1629_v24, %v599_v58  ;;  %v810_v61 = vadd.f32 %v1629_v24, %v663_v59  ;;  %v825_v2 = vmax.f32 %v793_v52, 0.0  ;;  %v841_v3 = vmax.f32 %v809_v53, 0.0 }
 0x13d   : > { %v828_v0 = vmax.f32 %v796_v56, 0.0  ;;  %v844_v1 = vmax.f32 %v812_v57, 0.0 }
 0x13e   : > { %v826_v4 = vmax.f32 %v794_v60, 0.0  ;;  %v842_v5 = vmax.f32 %v810_v61, 0.0 }
 0x13f   : > { %v1255_v6 = vpack.c.bf16 %v828_v0, %v827_v62  ;;  %v1295_v7 = vpack.c.bf16 %v844_v1, %v843_v63 }
 0x140   : > { %v1250_v8 = vpack.c.bf16 %v826_v4, %v825_v2  ;;  %v1290_v9 = vpack.c.bf16 %v842_v5, %v841_v3 }
 0x141   : > { %1303 = vst [vmem:[%s1644_s19 + $0x38] sm:$0xff] %v1255_v6   ;;  %1311 = vst [vmem:[%s1644_s19 + $0x78] sm:$0xff] %v1295_v7  }
 0x142   : > { %1302 = vst [vmem:[%s1644_s19 + $0x30] sm:$0xff] %v1250_v8   ;;  %1310 = vst [vmem:[%s1644_s19 + $0x70] sm:$0xff] %v1290_v9  }
 0x143 PF: > { %s14_s14 = sadd.s32 1, %s1515_s14   ;;  %s1707_s12 = smov %s1511_s13 }
 0x144   : > { %p11_p4 = scmp.ge.s32.totalorder %s14_s14, 10   ;;  %s1708_s13 = smov %s1710_s16 }
 0x146   :  { %13 = sbr.rel (!%p11_p4) target bundleno = 2 (0x2), region = 79 }
 0x14d   :  { %1033 = vsyncpa [#allocation4], 1 }
 0x14e   :  { %1035 = vsyncpa [#allocation4 + $0x1], 1 }

// kernel: _lambda_.18
= control target key start
LH: loop header
LB: loop body
LE: loop exit
PB: predicated region body
PF: predicated region fallthrough
CT: control target
= control target key end

     0   :  { %s414_s0 = inlined_call_operand.vmem [shape: bf16[32,1024], index: 0, kind: input, shape index: {}]   ;;  %s415_s1 = inlined_call_operand.vmem [shape: bf16[32,1024], index: 1, kind: input, shape index: {}]   ;;  %s416_s2 = inlined_call_operand.vmem [shape: bf16[32,1024], index: 2, kind: input, shape index: {}]   ;;  %s417_s3 = inlined_call_operand.vmem [shape: bf16[32,1024], index: 3, kind: input, shape index: {}]   ;;  %s418_s4 = inlined_call_operand.vmem [shape: bf16[32,1024], index: 4, kind: output, shape index: {}]  }
   0x1   :  { %v17_v0 = vld [vmem:[%s414_s0] sm:$0xff]  ;;  %v18_v5 = vld [vmem:[%s414_s0 + $0x8] sm:$0xff]  ;;  %v19_v11 = vld [vmem:[%s414_s0 + $0x10] sm:$0xff] }
   0x2   :  { %v33_v1 = vld [vmem:[%s415_s1] sm:$0xff]  ;;  %v34_v6 = vld [vmem:[%s415_s1 + $0x8] sm:$0xff]  ;;  %v35_v13 = vld [vmem:[%s415_s1 + $0x10] sm:$0xff] }
   0x3   :  { %v65_v2 = vld [vmem:[%s416_s2] sm:$0xff]  ;;  %v49_v3 = vmax.bf16 %v33_v1, %v17_v0  ;;  %v50_v8 = vmax.bf16 %v34_v6, %v18_v5  ;;  %v66_v9 = vld [vmem:[%s416_s2 + $0x8] sm:$0xff]  ;;  %v67_v14 = vld [vmem:[%s416_s2 + $0x10] sm:$0xff]  ;;  %v51_v17 = vmax.bf16 %v35_v13, %v19_v11 }
   0x4   :  { %v81_v4 = vld [vmem:[%s417_s3] sm:$0xff]  ;;  %v82_v10 = vld [vmem:[%s417_s3 + $0x8] sm:$0xff]  ;;  %v83_v15 = vld [vmem:[%s417_s3 + $0x10] sm:$0xff] }
   0x5   :  { %v97_v7 = vmax.bf16 %v81_v4, %v65_v2  ;;  %v98_v12 = vmax.bf16 %v82_v10, %v66_v9  ;;  %v99_v18 = vmax.bf16 %v83_v15, %v67_v14  ;;  %v20_v19 = vld [vmem:[%s414_s0 + $0x18] sm:$0xff]  ;;  %v21_v25 = vld [vmem:[%s414_s0 + $0x20] sm:$0xff]  ;;  %v22_v32 = vld [vmem:[%s414_s0 + $0x28] sm:$0xff] }
   0x6   :  { %v36_v20 = vld [vmem:[%s415_s1 + $0x18] sm:$0xff]  ;;  %v37_v26 = vld [vmem:[%s415_s1 + $0x20] sm:$0xff]  ;;  %v38_v34 = vld [vmem:[%s415_s1 + $0x28] sm:$0xff] }
   0x7   :  { %v113_v16 = vmax.bf16 %v97_v7, %v49_v3  ;;  %v68_v21 = vld [vmem:[%s416_s2 + $0x18] sm:$0xff]  ;;  %v114_v22 = vmax.bf16 %v98_v12, %v50_v8  ;;  %v52_v23 = vmax.bf16 %v36_v20, %v20_v19  ;;  %v115_v27 = vmax.bf16 %v99_v18, %v51_v17  ;;  %v69_v30 = vld [vmem:[%s416_s2 + $0x20] sm:$0xff]  ;;  %v70_v35 = vld [vmem:[%s416_s2 + $0x28] sm:$0xff] }
   0x8   :  { %v84_v24 = vld [vmem:[%s417_s3 + $0x18] sm:$0xff]  ;;  %v53_v29 = vmax.bf16 %v37_v26, %v21_v25  ;;  %v85_v31 = vld [vmem:[%s417_s3 + $0x20] sm:$0xff]  ;;  %v86_v36 = vld [vmem:[%s417_s3 + $0x28] sm:$0xff]  ;;  %v54_v38 = vmax.bf16 %v38_v34, %v22_v32 }
   0x9   :  { %129 = vst [vmem:[%s418_s4] sm:$0xff] %v113_v16  ;;  %v100_v28 = vmax.bf16 %v84_v24, %v68_v21  ;;  %130 = vst [vmem:[%s418_s4 + $0x8] sm:$0xff] %v114_v22  ;;  %v101_v33 = vmax.bf16 %v85_v31, %v69_v30  ;;  %v102_v39 = vmax.bf16 %v86_v36, %v70_v35  ;;  %v23_v40 = vld [vmem:[%s414_s0 + $0x30] sm:$0xff]  ;;  %v24_v46 = vld [vmem:[%s414_s0 + $0x38] sm:$0xff] }
   0xa   :  { %131 = vst [vmem:[%s418_s4 + $0x10] sm:$0xff] %v115_v27  ;;  %v39_v41 = vld [vmem:[%s415_s1 + $0x30] sm:$0xff]  ;;  %v40_v47 = vld [vmem:[%s415_s1 + $0x38] sm:$0xff]  ;;  %v25_v53 = vld [vmem:[%s414_s0 + $0x40] sm:$0xff] }
   0xb   :  { %v116_v37 = vmax.bf16 %v100_v28, %v52_v23  ;;  %v71_v42 = vld [vmem:[%s416_s2 + $0x30] sm:$0xff]  ;;  %v117_v43 = vmax.bf16 %v101_v33, %v53_v29  ;;  %v55_v44 = vmax.bf16 %v39_v41, %v23_v40  ;;  %v118_v48 = vmax.bf16 %v102_v39, %v54_v38  ;;  %v72_v51 = vld [vmem:[%s416_s2 + $0x38] sm:$0xff]  ;;  %v41_v55 = vld [vmem:[%s415_s1 + $0x40] sm:$0xff] }
   0xc   :  { %v87_v45 = vld [vmem:[%s417_s3 + $0x30] sm:$0xff]  ;;  %v56_v50 = vmax.bf16 %v40_v47, %v24_v46  ;;  %v88_v52 = vld [vmem:[%s417_s3 + $0x38] sm:$0xff]  ;;  %v73_v56 = vld [vmem:[%s416_s2 + $0x40] sm:$0xff]  ;;  %v57_v59 = vmax.bf16 %v41_v55, %v25_v53 }
   0xd   :  { %132 = vst [vmem:[%s418_s4 + $0x18] sm:$0xff] %v116_v37  ;;  %v103_v49 = vmax.bf16 %v87_v45, %v71_v42  ;;  %133 = vst [vmem:[%s418_s4 + $0x20] sm:$0xff] %v117_v43  ;;  %v104_v54 = vmax.bf16 %v88_v52, %v72_v51  ;;  %v89_v57 = vld [vmem:[%s417_s3 + $0x40] sm:$0xff]  ;;  %v26_v61 = vld [vmem:[%s414_s0 + $0x48] sm:$0xff] }
   0xe   :  { %134 = vst [vmem:[%s418_s4 + $0x28] sm:$0xff] %v118_v48  ;;  %v105_v60 = vmax.bf16 %v89_v57, %v73_v56  ;;  %v42_v62 = vld [vmem:[%s415_s1 + $0x48] sm:$0xff]  ;;  %v27_v3 = vld [vmem:[%s414_s0 + $0x50] sm:$0xff]  ;;  %v28_v10 = vld [vmem:[%s414_s0 + $0x58] sm:$0xff] }
   0xf   :  { %v119_v58 = vmax.bf16 %v103_v49, %v55_v44  ;;  %v74_v63 = vld [vmem:[%s416_s2 + $0x48] sm:$0xff]  ;;  %v120_v0 = vmax.bf16 %v104_v54, %v56_v50  ;;  %v58_v1 = vmax.bf16 %v42_v62, %v26_v61  ;;  %v43_v4 = vld [vmem:[%s415_s1 + $0x50] sm:$0xff]  ;;  %v44_v12 = vld [vmem:[%s415_s1 + $0x58] sm:$0xff] }
  0x10   :  { %v90_v2 = vld [vmem:[%s417_s3 + $0x48] sm:$0xff]  ;;  %v121_v5 = vmax.bf16 %v105_v60, %v57_v59  ;;  %v59_v7 = vmax.bf16 %v43_v4, %v27_v3  ;;  %v75_v8 = vld [vmem:[%s416_s2 + $0x50] sm:$0xff]  ;;  %v76_v13 = vld [vmem:[%s416_s2 + $0x58] sm:$0xff]  ;;  %v60_v16 = vmax.bf16 %v44_v12, %v28_v10 }
  0x11   :  { %135 = vst [vmem:[%s418_s4 + $0x30] sm:$0xff] %v119_v58  ;;  %v106_v6 = vmax.bf16 %v90_v2, %v74_v63  ;;  %v91_v9 = vld [vmem:[%s417_s3 + $0x50] sm:$0xff]  ;;  %136 = vst [vmem:[%s418_s4 + $0x38] sm:$0xff] %v120_v0  ;;  %v92_v14 = vld [vmem:[%s417_s3 + $0x58] sm:$0xff] }
  0x12   :  { %v107_v11 = vmax.bf16 %v91_v9, %v75_v8  ;;  %137 = vst [vmem:[%s418_s4 + $0x40] sm:$0xff] %v121_v5  ;;  %v108_v17 = vmax.bf16 %v92_v14, %v76_v13  ;;  %v29_v18 = vld [vmem:[%s414_s0 + $0x60] sm:$0xff]  ;;  %v30_v24 = vld [vmem:[%s414_s0 + $0x68] sm:$0xff]  ;;  %v31_v31 = vld [vmem:[%s414_s0 + $0x70] sm:$0xff] }
  0x13   :  { %v122_v15 = vmax.bf16 %v106_v6, %v58_v1  ;;  %v45_v19 = vld [vmem:[%s415_s1 + $0x60] sm:$0xff]  ;;  %v46_v25 = vld [vmem:[%s415_s1 + $0x68] sm:$0xff]  ;;  %v47_v33 = vld [vmem:[%s415_s1 + $0x70] sm:$0xff] }
  0x14   :  { %v77_v20 = vld [vmem:[%s416_s2 + $0x60] sm:$0xff]  ;;  %v123_v21 = vmax.bf16 %v107_v11, %v59_v7  ;;  %v61_v22 = vmax.bf16 %v45_v19, %v29_v18  ;;  %v124_v26 = vmax.bf16 %v108_v17, %v60_v16  ;;  %v62_v28 = vmax.bf16 %v46_v25, %v30_v24  ;;  %v78_v29 = vld [vmem:[%s416_s2 + $0x68] sm:$0xff]  ;;  %v79_v34 = vld [vmem:[%s416_s2 + $0x70] sm:$0xff] }
  0x15   :  { %v93_v23 = vld [vmem:[%s417_s3 + $0x60] sm:$0xff]  ;;  %138 = vst [vmem:[%s418_s4 + $0x48] sm:$0xff] %v122_v15  ;;  %v94_v30 = vld [vmem:[%s417_s3 + $0x68] sm:$0xff]  ;;  %v95_v35 = vld [vmem:[%s417_s3 + $0x70] sm:$0xff]  ;;  %v63_v37 = vmax.bf16 %v47_v33, %v31_v31 }
  0x16   :  { %v109_v27 = vmax.bf16 %v93_v23, %v77_v20  ;;  %139 = vst [vmem:[%s418_s4 + $0x50] sm:$0xff] %v123_v21  ;;  %v110_v32 = vmax.bf16 %v94_v30, %v78_v29  ;;  %140 = vst [vmem:[%s418_s4 + $0x58] sm:$0xff] %v124_v26  ;;  %v111_v38 = vmax.bf16 %v95_v35, %v79_v34  ;;  %v32_v39 = vld [vmem:[%s414_s0 + $0x78] sm:$0xff] }
  0x17   :  { %v48_v40 = vld [vmem:[%s415_s1 + $0x78] sm:$0xff] }
  0x18   :  { %v125_v36 = vmax.bf16 %v109_v27, %v61_v22  ;;  %v80_v41 = vld [vmem:[%s416_s2 + $0x78] sm:$0xff]  ;;  %v126_v42 = vmax.bf16 %v110_v32, %v62_v28  ;;  %v64_v43 = vmax.bf16 %v48_v40, %v32_v39  ;;  %v127_v45 = vmax.bf16 %v111_v38, %v63_v37 }
  0x19   :  { %v96_v44 = vld [vmem:[%s417_s3 + $0x78] sm:$0xff] }
  0x1a   :  { %141 = vst [vmem:[%s418_s4 + $0x60] sm:$0xff] %v125_v36  ;;  %v112_v46 = vmax.bf16 %v96_v44, %v80_v41  ;;  %142 = vst [vmem:[%s418_s4 + $0x68] sm:$0xff] %v126_v42 }
  0x1b   :  { %143 = vst [vmem:[%s418_s4 + $0x70] sm:$0xff] %v127_v45 }
  0x1c   :  { %v128_v47 = vmax.bf16 %v112_v46, %v64_v43 }
  0x1e   :  { %144 = vst [vmem:[%s418_s4 + $0x78] sm:$0xff] %v128_v47 }

// kernel: _lambda_.19
= control target key start
LH: loop header
LB: loop body
LE: loop exit
PB: predicated region body
PF: predicated region fallthrough
CT: control target
= control target key end

     0   :  { %s1736_s12 = smov 0   ;;  %s1738_s13 = smov 0   ;;  %s1981_s0 = inlined_call_operand.vmem [shape: bf16[512,640], index: 0, kind: input, shape index: {}]   ;;  %s1982_s1 = inlined_call_operand.vmem [shape: bf16[640,128], index: 1, kind: input, shape index: {}]   ;;  %s1983_s2 = inlined_call_operand.vmem [shape: f32[1,128], index: 2, kind: input, shape index: {}]   ;;  %s1984_s3 = inlined_call_operand.vmem [shape: bf16[512,128], index: 3, kind: output, shape index: {}]  }
   0x1   :  { %s1740_s14 = smov 0   ;;  %s1742_s15 = smov 0  }
   0x2   :  { %s1744_s16 = smov 0   ;;  %s1746_s17 = smov 0  }
   0x3   :  { %s1748_s18 = smov 0  }
   0x4 LB: > { %s25_s19 = sadd.s32 1, %s1705_s16  ;;  %s32_s20 = sadd.s32 1, %s1709_s17  ;;  %s1713_s18 = sphi %s1748_s18, %s13_s18   ;;  %s1709_s17 = sphi %s1746_s17, %s1990_s17   ;;  %s1705_s16 = sphi %s1744_s16, %s1989_s16   ;;  %s1701_s15 = sphi %s1742_s15, %s1988_s15   ;;  %s1697_s14 = sphi %s1740_s14, %s1987_s14   ;;  %s1693_s13 = sphi %s1738_s13, %s1986_s13   ;;  %s1689_s12 = sphi %s1736_s12, %s1985_s12  }
   0x5   : > { %p26_p0 = scmp.ge.s32.totalorder %s25_s19, 5  ;;  %p48_p1 = scmp.ne.s32.totalorder %s1693_s13, %s1689_s12 }
   0x6   : > { %p49_p2 = scmp.eq.s32.totalorder %s1713_s18, 0  ;;  %s41_s24 = sadd.s32 1, %s1693_s13 }
   0x7   : > { %s1992_s19 = smov (%p26_p0, %s25_s19), 0  ;;  %s1994_s20 = smov (!%p26_p0, %s32_s20), %s1709_s17 }
   0x8   : > { %p50_p3 = por %p49_p2, %p48_p1  ;;  %p34_p4 = scmp.ge.s32.totalorder %s1994_s20, 2 }
   0x9   : > { %s37_s21 = ssub.s32 %s1705_s16, %s1992_s19  ;;  %p1290_p6 = scmp.ge.s32.totalorder %s1713_s18, 10 }
   0xa   : > { %s1996_s20 = smov (%p34_p4, %s1994_s20), 0 }
   0xb   : > { %s36_s22 = ssub.s32 %s1709_s17, %s1996_s20  ;;  %162 = sbr.rel (%p1290_p6) target bundleno = 46 (0x2e), region = 20 }
   0xc   : > { %s38_s23 = sor.u32 %s37_s21, %s36_s22 }
   0xd   : > { %p39_p5 = scmp.eq.s32.totalorder %s38_s23, 0 }
   0xf   : > { %s1787_s25 = scalar_select %p39_p5, %s1693_s13, %s41_s24  }
  0x12   : > { %165 = sbr.rel (!%p50_p3) target bundleno = 46 (0x2e), region = 24  ;;  %s167_s26 = sand.u32 (%p50_p3), 1, %s1693_s13  }
  0x13   : > { %s1577_s27 = smul.u32 (%p50_p3), 160, %s1709_s17  ;;  %s1291_s28 = sshll.u32 (%p50_p3), %s167_s26, 7 }
  0x14   : > { %s1801_s7 = scalar_lea.vmem (%p50_p3), [#allocation3], %s1291_s28 }
  0x15   : > { %s172_s29 = sadd.s32 (%p50_p3), %s1705_s16, %s1577_s27 }
  0x16   : > { %s1294_s30 = sshll.u32 (%p50_p3), %s172_s29, 2 }
  0x17   : > { %s1796_s6 = scalar_lea.vmem (%p50_p3), %s1981_s0, %s1294_s30 }
  0x18   : > { %v190_v0 = vld [vmem:[%s1796_s6] sm:$0xf] (%p50_p3)  ;;  %v192_v1 = vld [vmem:[%s1796_s6 + $0x14] sm:$0xf] (%p50_p3)  ;;  %v194_v2 = vld [vmem:[%s1796_s6 + $0x28] sm:$0xf] (%p50_p3) }
  0x19   : > { %191 = vst [vmem:[%s1801_s7] sm:$0xf] %v190_v0  ;;  %193 = vst [vmem:[%s1801_s7 + $0x4] sm:$0xf] %v192_v1  ;;  %v196_v3 = vld [vmem:[%s1796_s6 + $0x3c] sm:$0xf] }
  0x1a   : > { %195 = vst [vmem:[%s1801_s7 + $0x8] sm:$0xf] %v194_v2  ;;  %v198_v4 = vld [vmem:[%s1796_s6 + $0x50] sm:$0xf]  ;;  %v200_v5 = vld [vmem:[%s1796_s6 + $0x64] sm:$0xf] }
  0x1b   : > { %197 = vst [vmem:[%s1801_s7 + $0xc] sm:$0xf] %v196_v3  ;;  %199 = vst [vmem:[%s1801_s7 + $0x10] sm:$0xf] %v198_v4  ;;  %v202_v6 = vld [vmem:[%s1796_s6 + $0x78] sm:$0xf] }
  0x1c   : > { %201 = vst [vmem:[%s1801_s7 + $0x14] sm:$0xf] %v200_v5  ;;  %v204_v7 = vld [vmem:[%s1796_s6 + $0x8c] sm:$0xf]  ;;  %v206_v8 = vld [vmem:[%s1796_s6 + $0xa0] sm:$0xf] }
  0x1d   : > { %203 = vst [vmem:[%s1801_s7 + $0x18] sm:$0xf] %v202_v6  ;;  %205 = vst [vmem:[%s1801_s7 + $0x1c] sm:$0xf] %v204_v7  ;;  %v208_v9 = vld [vmem:[%s1796_s6 + $0xb4] sm:$0xf] }
  0x1e   : > { %207 = vst [vmem:[%s1801_s7 + $0x20] sm:$0xf] %v206_v8  ;;  %v210_v10 = vld [vmem:[%s1796_s6 + $0xc8] sm:$0xf]  ;;  %v212_v11 = vld [vmem:[%s1796_s6 + $0xdc] sm:$0xf] }
  0x1f   : > { %209 = vst [vmem:[%s1801_s7 + $0x24] sm:$0xf] %v208_v9  ;;  %211 = vst [vmem:[%s1801_s7 + $0x28] sm:$0xf] %v210_v10  ;;  %v214_v12 = vld [vmem:[%s1796_s6 + $0xf0] sm:$0xf] }
  0x20   : > { %213 = vst [vmem:[%s1801_s7 + $0x2c] sm:$0xf] %v212_v11  ;;  %v216_v13 = vld [vmem:[%s1796_s6 + $0x104] sm:$0xf]  ;;  %v218_v14 = vld [vmem:[%s1796_s6 + $0x118] sm:$0xf] }
  0x21   : > { %215 = vst [vmem:[%s1801_s7 + $0x30] sm:$0xf] %v214_v12  ;;  %217 = vst [vmem:[%s1801_s7 + $0x34] sm:$0xf] %v216_v13  ;;  %v220_v15 = vld [vmem:[%s1796_s6 + $0x12c] sm:$0xf] }
  0x22   : > { %219 = vst [vmem:[%s1801_s7 + $0x38] sm:$0xf] %v218_v14  ;;  %v222_v16 = vld [vmem:[%s1796_s6 + $0x140] sm:$0xf]  ;;  %v224_v17 = vld [vmem:[%s1796_s6 + $0x154] sm:$0xf] }
  0x23   : > { %221 = vst [vmem:[%s1801_s7 + $0x3c] sm:$0xf] %v220_v15  ;;  %223 = vst [vmem:[%s1801_s7 + $0x40] sm:$0xf] %v222_v16  ;;  %v226_v18 = vld [vmem:[%s1796_s6 + $0x168] sm:$0xf] }
  0x24   : > { %225 = vst [vmem:[%s1801_s7 + $0x44] sm:$0xf] %v224_v17  ;;  %v228_v19 = vld [vmem:[%s1796_s6 + $0x17c] sm:$0xf]  ;;  %v230_v20 = vld [vmem:[%s1796_s6 + $0x190] sm:$0xf] }
  0x25   : > { %227 = vst [vmem:[%s1801_s7 + $0x48] sm:$0xf] %v226_v18  ;;  %229 = vst [vmem:[%s1801_s7 + $0x4c] sm:$0xf] %v228_v19  ;;  %v232_v21 = vld [vmem:[%s1796_s6 + $0x1a4] sm:$0xf] }
  0x26   : > { %231 = vst [vmem:[%s1801_s7 + $0x50] sm:$0xf] %v230_v20  ;;  %v234_v22 = vld [vmem:[%s1796_s6 + $0x1b8] sm:$0xf]  ;;  %v236_v23 = vld [vmem:[%s1796_s6 + $0x1cc] sm:$0xf] }
  0x27   : > { %233 = vst [vmem:[%s1801_s7 + $0x54] sm:$0xf] %v232_v21  ;;  %235 = vst [vmem:[%s1801_s7 + $0x58] sm:$0xf] %v234_v22  ;;  %v238_v24 = vld [vmem:[%s1796_s6 + $0x1e0] sm:$0xf] }
  0x28   : > { %237 = vst [vmem:[%s1801_s7 + $0x5c] sm:$0xf] %v236_v23  ;;  %v240_v25 = vld [vmem:[%s1796_s6 + $0x1f4] sm:$0xf]  ;;  %v242_v26 = vld [vmem:[%s1796_s6 + $0x208] sm:$0xf] }
  0x29   : > { %239 = vst [vmem:[%s1801_s7 + $0x60] sm:$0xf] %v238_v24  ;;  %241 = vst [vmem:[%s1801_s7 + $0x64] sm:$0xf] %v240_v25  ;;  %v244_v27 = vld [vmem:[%s1796_s6 + $0x21c] sm:$0xf] }
  0x2a   : > { %243 = vst [vmem:[%s1801_s7 + $0x68] sm:$0xf] %v242_v26  ;;  %v246_v28 = vld [vmem:[%s1796_s6 + $0x230] sm:$0xf]  ;;  %v248_v29 = vld [vmem:[%s1796_s6 + $0x244] sm:$0xf] }
  0x2b   : > { %245 = vst [vmem:[%s1801_s7 + $0x6c] sm:$0xf] %v244_v27  ;;  %247 = vst [vmem:[%s1801_s7 + $0x70] sm:$0xf] %v246_v28  ;;  %v250_v30 = vld [vmem:[%s1796_s6 + $0x258] sm:$0xf] }
  0x2c   : > { %249 = vst [vmem:[%s1801_s7 + $0x74] sm:$0xf] %v248_v29  ;;  %v252_v31 = vld [vmem:[%s1796_s6 + $0x26c] sm:$0xf]  ;;  %251 = vst [vmem:[%s1801_s7 + $0x78] sm:$0xf] %v250_v30 }
  0x2d   : > { %253 = vst [vmem:[%s1801_s7 + $0x7c] sm:$0xf] %v252_v31 }
  0x2e PF: > { %p1295_p7 = scmp.ge.s32.totalorder %s1713_s18, 1  ;;  %p351_p8 = scmp.lt.s32.totalorder %s1713_s18, 11 }
  0x30   : > { %p352_p9 = pnand %p1295_p7, %p351_p8 }
  0x31   : > { %s358_s8 = sand.u32 (!%p352_p9), 1, %s1689_s12   ;;  %s1297_s9 = sshll.u32 (!%p352_p9), %s1697_s14, 4 }
  0x32   : > { %355 = sbr.rel (%p352_p9) target bundleno = 366 (0x16e), region = 69  ;;  %s1296_s10 = sshll.u32 (!%p352_p9), %s358_s8, 7 }
  0x33   : > { %p397_p10 = scmp.lt.s32.totalorder (!%p352_p9), %s1297_s9, 79  ;;  %s1299_s11 = sshll.u32 (!%p352_p9), %s1701_s15, 5 }
  0x34   : > { %p409_p11 = scmp.lt.s32.totalorder (!%p352_p9), %s1299_s11, 63  ;;  %s1879_s12 = scalar_lea.vmem (!%p352_p9), [#allocation3], %s1296_s10 }
  0x35   : > { %p1301_p12 = scmp.ne.s32.totalorder (!%p352_p9), %s1697_s14, 0 }
  0x39   : > { %s1998_s9 = smov (!%p397_p10, %s1297_s9), 79  ;;  %s2000_s11 = smov (!%p409_p11, %s1299_s11), 63 }
  0x3a   : > { %s1298_s21 = sshll.u32 %s1998_s9, 2  ;;  %s1300_s26 = sshll.u32 %s2000_s11, 2  ;;  %v1715_v32 = vmov (!%p1301_p12), 0.0  }
  0x3b   : > { %s1872_s24 = scalar_lea.vmem %s1982_s1, %s1298_s21  ;;  %s1877_s29 = scalar_lea.vmem %s1984_s3, %s1300_s26  ;;  %422 = vst [vmem:[#allocation2] sm:$0xff] (!%p1301_p12), %v1715_v32  ;;  %423 = vst [vmem:[#allocation2 + $0x8] sm:$0xff] (!%p1301_p12), %v1715_v32 }
  0x3c   : > { %421 = sbr.rel (%p1301_p12) target bundleno = 75 (0x4b), region = 77  ;;  %424 = vst [vmem:[#allocation2 + $0x10] sm:$0xff] (!%p1301_p12), %v1715_v32  ;;  %425 = vst [vmem:[#allocation2 + $0x18] sm:$0xff] (!%p1301_p12), %v1715_v32 }
  0x3d   : > { %426 = vst [vmem:[#allocation2 + $0x20] sm:$0xff] (!%p1301_p12), %v1715_v32  ;;  %427 = vst [vmem:[#allocation2 + $0x28] sm:$0xff] (!%p1301_p12), %v1715_v32 }
  0x3e   : > { %428 = vst [vmem:[#allocation2 + $0x30] sm:$0xff] (!%p1301_p12), %v1715_v32  ;;  %429 = vst [vmem:[#allocation2 + $0x38] sm:$0xff] (!%p1301_p12), %v1715_v32 }
  0x3f   : > { %430 = vst [vmem:[#allocation2 + $0x40] sm:$0xff] (!%p1301_p12), %v1715_v32  ;;  %431 = vst [vmem:[#allocation2 + $0x48] sm:$0xff] (!%p1301_p12), %v1715_v32 }
  0x40   : > { %432 = vst [vmem:[#allocation2 + $0x50] sm:$0xff] (!%p1301_p12), %v1715_v32  ;;  %433 = vst [vmem:[#allocation2 + $0x58] sm:$0xff] (!%p1301_p12), %v1715_v32 }
  0x41   : > { %434 = vst [vmem:[#allocation2 + $0x60] sm:$0xff] (!%p1301_p12), %v1715_v32  ;;  %435 = vst [vmem:[#allocation2 + $0x68] sm:$0xff] (!%p1301_p12), %v1715_v32 }
  0x42   : > { %436 = vst [vmem:[#allocation2 + $0x70] sm:$0xff] (!%p1301_p12), %v1715_v32  ;;  %437 = vst [vmem:[#allocation2 + $0x78] sm:$0xff] (!%p1301_p12), %v1715_v32 }
  0x43   : > { %438 = vst [vmem:[#allocation2 + $0x80] sm:$0xff] %v1715_v32  ;;  %439 = vst [vmem:[#allocation2 + $0x88] sm:$0xff] %v1715_v32 }
  0x44   : > { %440 = vst [vmem:[#allocation2 + $0x90] sm:$0xff] %v1715_v32  ;;  %441 = vst [vmem:[#allocation2 + $0x98] sm:$0xff] %v1715_v32 }
  0x45   : > { %442 = vst [vmem:[#allocation2 + $0xa0] sm:$0xff] %v1715_v32  ;;  %443 = vst [vmem:[#allocation2 + $0xa8] sm:$0xff] %v1715_v32 }
  0x46   : > { %444 = vst [vmem:[#allocation2 + $0xb0] sm:$0xff] %v1715_v32  ;;  %445 = vst [vmem:[#allocation2 + $0xb8] sm:$0xff] %v1715_v32 }
  0x47   : > { %446 = vst [vmem:[#allocation2 + $0xc0] sm:$0xff] %v1715_v32  ;;  %447 = vst [vmem:[#allocation2 + $0xc8] sm:$0xff] %v1715_v32 }
  0x48   : > { %448 = vst [vmem:[#allocation2 + $0xd0] sm:$0xff] %v1715_v32  ;;  %449 = vst [vmem:[#allocation2 + $0xd8] sm:$0xff] %v1715_v32 }
  0x49   : > { %450 = vst [vmem:[#allocation2 + $0xe0] sm:$0xff] %v1715_v32  ;;  %451 = vst [vmem:[#allocation2 + $0xe8] sm:$0xff] %v1715_v32 }
  0x4a   : > { %452 = vst [vmem:[#allocation2 + $0xf0] sm:$0xff] %v1715_v32  ;;  %453 = vst [vmem:[#allocation2 + $0xf8] sm:$0xff] %v1715_v32 }
  0x4b PF: > { %v1635_v33 = vld [vmem:[%s1872_s24] sm:$0xff]   ;;  %v1636_v34 = vld [vmem:[%s1872_s24 + $0x8] sm:$0xff]   ;;  %v1637_v35 = vld [vmem:[%s1872_s24 + $0x10] sm:$0xff]   ;;  %p1326_p13 = scmp.ne.s32.totalorder %s1697_s14, 4 }
  0x4c   : > { %1513 = vmatprep.subr.bf16.mxu0 %v1635_v33  ;;  %1561 = vmatprep.subr.bf16.mxu1 %v1635_v33  ;;  %v1638_v36 = vld [vmem:[%s1872_s24 + $0x18] sm:$0xff]   ;;  %v1643_v37 = vld [vmem:[%s1879_s12] sm:$0xff]   ;;  %v1640_v40 = vld [vmem:[%s1872_s24 + $0x28] sm:$0xff]  }
  0x4d   : > { %1514 = vmatpush3.bf16.msra.mxu0 %v1635_v33  ;;  %1569 = vmatpush3.bf16.msra.mxu1 %v1635_v33  ;;  %v1644_v38 = vld [vmem:[%s1879_s12 + $0x40] sm:$0xff]   ;;  %v1641_v41 = vld [vmem:[%s1872_s24 + $0x30] sm:$0xff]   ;;  %v1642_v42 = vld [vmem:[%s1872_s24 + $0x38] sm:$0xff]  }
  0x4e   : > { %1515 = vmatprep.subr.bf16.mxu0 %v1636_v34  ;;  %1562 = vmatprep.subr.bf16.mxu1 %v1636_v34  ;;  %v1639_v39 = vld [vmem:[%s1872_s24 + $0x20] sm:$0xff]   ;;  %v1645_v43 = vld [vmem:[%s1879_s12 + $0x8] sm:$0xff]   ;;  %v1647_v45 = vld [vmem:[%s1879_s12 + $0x10] sm:$0xff]  }
  0x4f   : > { %1529 = vmatprep.mubr.bf16.mxu0 %v1643_v37  ;;  %1545 = vmatprep.mubr.bf16.mxu1 %v1644_v38  ;;  %v1646_v44 = vld [vmem:[%s1879_s12 + $0x48] sm:$0xff]   ;;  %v1648_v46 = vld [vmem:[%s1879_s12 + $0x50] sm:$0xff]   ;;  %v1649_v47 = vld [vmem:[%s1879_s12 + $0x18] sm:$0xff]  }
  0x50   : > { %v1650_v48 = vld [vmem:[%s1879_s12 + $0x58] sm:$0xff]   ;;  %v1651_v49 = vld [vmem:[%s1879_s12 + $0x20] sm:$0xff]   ;;  %v1653_v51 = vld [vmem:[%s1879_s12 + $0x28] sm:$0xff]  }
  0x51   : > { %1516 = vmatpush3.bf16.msra.mxu0 %v1636_v34  ;;  %1570 = vmatpush3.bf16.msra.mxu1 %v1636_v34  ;;  %v1652_v50 = vld [vmem:[%s1879_s12 + $0x60] sm:$0xff]   ;;  %v1654_v52 = vld [vmem:[%s1879_s12 + $0x68] sm:$0xff]   ;;  %v1655_v53 = vld [vmem:[%s1879_s12 + $0x30] sm:$0xff]  }
  0x52   : > { %1517 = vmatprep.subr.bf16.mxu0 %v1637_v35  ;;  %1563 = vmatprep.subr.bf16.mxu1 %v1637_v35  ;;  %v1656_v54 = vld [vmem:[%s1879_s12 + $0x70] sm:$0xff]   ;;  %v1657_v55 = vld [vmem:[%s1879_s12 + $0x38] sm:$0xff]   ;;  %v454_v59 = vld [vmem:[#allocation2] sm:$0xff] }
  0x53   : > { %v1658_v56 = vld [vmem:[%s1879_s12 + $0x78] sm:$0xff]   ;;  %v456_v57 = vld [vmem:[#allocation2 + $0x10] sm:$0xff]  ;;  %v470_v60 = vld [vmem:[#allocation2 + $0x80] sm:$0xff] }
  0x54   : > { %v472_v58 = vld [vmem:[#allocation2 + $0x90] sm:$0xff]  ;;  %v457_v63 = vld [vmem:[#allocation2 + $0x18] sm:$0xff]  ;;  %v455_v5 = vld [vmem:[#allocation2 + $0x8] sm:$0xff] }
  0x55   : > { %1518 = vmatpush3.bf16.msra.mxu0 %v1637_v35  ;;  %1571 = vmatpush3.bf16.msra.mxu1 %v1637_v35  ;;  %v473_v0 = vld [vmem:[#allocation2 + $0x98] sm:$0xff]  ;;  %v471_v6 = vld [vmem:[#allocation2 + $0x88] sm:$0xff]  ;;  %v460_v17 = vld [vmem:[#allocation2 + $0x30] sm:$0xff] }
  0x56   : > { %1519 = vmatprep.subr.bf16.mxu0 %v1638_v36  ;;  %1564 = vmatprep.subr.bf16.mxu1 %v1638_v36  ;;  %v476_v18 = vld [vmem:[#allocation2 + $0xb0] sm:$0xff]  ;;  %v458_v19 = vld [vmem:[#allocation2 + $0x20] sm:$0xff]  ;;  %v461_v23 = vld [vmem:[#allocation2 + $0x38] sm:$0xff] }
  0x57   : > { %v474_v20 = vld [vmem:[#allocation2 + $0xa0] sm:$0xff]  ;;  %v477_v24 = vld [vmem:[#allocation2 + $0xb8] sm:$0xff]  ;;  %v459_v29 = vld [vmem:[#allocation2 + $0x28] sm:$0xff] }
  0x58   : > { %v475_v30 = vld [vmem:[#allocation2 + $0xa8] sm:$0xff] }
  0x59   : > { %1520 = vmatpush3.bf16.msra.mxu0 %v1638_v36  ;;  %1572 = vmatpush3.bf16.msra.mxu1 %v1638_v36 }
  0x5a   : > { %1521 = vmatprep.subr.bf16.mxu0 %v1639_v39  ;;  %1565 = vmatprep.subr.bf16.mxu1 %v1639_v39 }
  0x5d   : > { %1522 = vmatpush3.bf16.msra.mxu0 %v1639_v39  ;;  %1573 = vmatpush3.bf16.msra.mxu1 %v1639_v39 }
  0x5e   : > { %1523 = vmatprep.subr.bf16.mxu0 %v1640_v40  ;;  %1566 = vmatprep.subr.bf16.mxu1 %v1640_v40 }
  0x61   : > { %1524 = vmatpush3.bf16.msra.mxu0 %v1640_v40  ;;  %1574 = vmatpush3.bf16.msra.mxu1 %v1640_v40 }
  0x62   : > { %1525 = vmatprep.subr.bf16.mxu0 %v1641_v41  ;;  %1567 = vmatprep.subr.bf16.mxu1 %v1641_v41 }
  0x65   : > { %1526 = vmatpush3.bf16.msra.mxu0 %v1641_v41  ;;  %1575 = vmatpush3.bf16.msra.mxu1 %v1641_v41  ;;  %v464_v41 = vld [vmem:[#allocation2 + $0x50] sm:$0xff] }
  0x66   : > { %1527 = vmatprep.subr.bf16.mxu0 %v1642_v42  ;;  %1568 = vmatprep.subr.bf16.mxu1 %v1642_v42 }
  0x69   : > { %1528 = vmatpush3.bf16.msra.mxu0 %v1642_v42  ;;  %1576 = vmatpush3.bf16.msra.mxu1 %v1642_v42  ;;  %v480_v42 = vld [vmem:[#allocation2 + $0xd0] sm:$0xff] }
  0x6c   : > { %1530 = vmatmul.mubr.bf16.vlgmr.msra.gmra.mrb[0].mxu0 %v1645_v43  ;;  %1546 = vmatmul.mubr.bf16.vlgmr.msra.gmra.mrb[0].mxu1 %v1646_v44  ;;  %v462_v43 = vld [vmem:[#allocation2 + $0x40] sm:$0xff] }
  0x6d   : > { %1533 = vmatprep.mubr.bf16.mxu0 %v1647_v45  ;;  %1549 = vmatprep.mubr.bf16.mxu1 %v1648_v46  ;;  %v478_v44 = vld [vmem:[#allocation2 + $0xc0] sm:$0xff] }
  0x74   : > { %1534 = vmatmul.mubr.bf16.gmra.mrb[4].mxu0 %v1649_v47  ;;  %1550 = vmatmul.mubr.bf16.gmra.mrb[4].mxu1 %v1650_v48  ;;  %v465_v47 = vld [vmem:[#allocation2 + $0x58] sm:$0xff] }
  0x75   : > { %1537 = vmatprep.mubr.bf16.mxu0 %v1651_v49  ;;  %1553 = vmatprep.mubr.bf16.mxu1 %v1652_v50  ;;  %v481_v48 = vld [vmem:[#allocation2 + $0xd8] sm:$0xff] }
  0x7c   : > { %1538 = vmatmul.mubr.bf16.gmra.mrb[8].mxu0 %v1653_v51  ;;  %1554 = vmatmul.mubr.bf16.gmra.mrb[8].mxu1 %v1654_v52 }
  0x7d   : > { %1541 = vmatprep.mubr.bf16.mxu0 %v1655_v53  ;;  %1557 = vmatprep.mubr.bf16.mxu1 %v1656_v54  ;;  %v463_v53 = vld [vmem:[#allocation2 + $0x48] sm:$0xff] }
  0x7e   : > { %v479_v54 = vld [vmem:[#allocation2 + $0xc8] sm:$0xff] }
  0x84   : > { %1542 = vmatmul.mubr.bf16.gmra.mrb[12].mxu0 %v1657_v55  ;;  %1558 = vmatmul.mubr.bf16.gmra.mrb[12].mxu1 %v1658_v56 }
 0x13f   : > { %v1531_v61 = vpop.f32.mrb[0].mxu0  ;;  %v1547_v62 = vpop.f32.mrb[0].mxu1 }
 0x140   : > { %v841_v1 = vadd.f32 %v1531_v61, %v456_v57  ;;  %v857_v2 = vadd.f32 %v1547_v62, %v472_v58  ;;  %v712_v3 = vpop.f32.mrb[1].mxu0  ;;  %v776_v4 = vpop.f32.mrb[1].mxu1 }
 0x141   : > { %v839_v7 = vadd.f32 %v712_v3, %v454_v59  ;;  %v855_v8 = vadd.f32 %v776_v4, %v470_v60  ;;  %v1532_v9 = vpop.f32.mrb[2].mxu0  ;;  %v1548_v10 = vpop.f32.mrb[2].mxu1  ;;  %v466_v3 = vld [vmem:[#allocation2 + $0x60] sm:$0xff] }
 0x142   : > { %873 = vst [vmem:[#allocation2 + $0x10] sm:$0xff] %v841_v1  ;;  %889 = vst [vmem:[#allocation2 + $0x90] sm:$0xff] %v857_v2  ;;  %v842_v11 = vadd.f32 %v1532_v9, %v457_v63  ;;  %v858_v12 = vadd.f32 %v1548_v10, %v473_v0  ;;  %v715_v13 = vpop.f32.mrb[3].mxu0  ;;  %v779_v14 = vpop.f32.mrb[3].mxu1  ;;  %v468_v1 = vld [vmem:[#allocation2 + $0x70] sm:$0xff]  ;;  %v482_v4 = vld [vmem:[#allocation2 + $0xe0] sm:$0xff] }
 0x143   : > { %871 = vst [vmem:[#allocation2] sm:$0xff] %v839_v7  ;;  %887 = vst [vmem:[#allocation2 + $0x80] sm:$0xff] %v855_v8  ;;  %v840_v15 = vadd.f32 %v715_v13, %v455_v5  ;;  %v856_v16 = vadd.f32 %v779_v14, %v471_v6  ;;  %v484_v2 = vld [vmem:[#allocation2 + $0xf0] sm:$0xff]  ;;  %v469_v7 = vld [vmem:[#allocation2 + $0x78] sm:$0xff] }
 0x144   : > { %874 = vst [vmem:[#allocation2 + $0x18] sm:$0xff] %v842_v11  ;;  %890 = vst [vmem:[#allocation2 + $0x98] sm:$0xff] %v858_v12  ;;  %v485_v8 = vld [vmem:[#allocation2 + $0xf8] sm:$0xff]  ;;  %v467_v13 = vld [vmem:[#allocation2 + $0x68] sm:$0xff] }
 0x145   : > { %872 = vst [vmem:[#allocation2 + $0x8] sm:$0xff] %v840_v15  ;;  %888 = vst [vmem:[#allocation2 + $0x88] sm:$0xff] %v856_v16  ;;  %v483_v14 = vld [vmem:[#allocation2 + $0xe8] sm:$0xff] }
 0x147   : > { %v1535_v21 = vpop.f32.mrb[4].mxu0  ;;  %v1551_v22 = vpop.f32.mrb[4].mxu1 }
 0x148   : > { %v845_v25 = vadd.f32 %v1535_v21, %v460_v17  ;;  %v861_v26 = vadd.f32 %v1551_v22, %v476_v18  ;;  %v728_v27 = vpop.f32.mrb[5].mxu0  ;;  %v792_v28 = vpop.f32.mrb[5].mxu1 }
 0x149   : > { %v843_v31 = vadd.f32 %v728_v27, %v458_v19  ;;  %v859_v32 = vadd.f32 %v792_v28, %v474_v20  ;;  %v1536_v33 = vpop.f32.mrb[6].mxu0  ;;  %v1552_v34 = vpop.f32.mrb[6].mxu1  ;;  %v1910_v27 = vld [vmem:[%s1983_s2] ss:$0 sm:$0xff] (!%p1326_p13) }
 0x14a   : > { %877 = vst [vmem:[#allocation2 + $0x30] sm:$0xff] %v845_v25  ;;  %893 = vst [vmem:[#allocation2 + $0xb0] sm:$0xff] %v861_v26  ;;  %v846_v35 = vadd.f32 %v1536_v33, %v461_v23  ;;  %v862_v36 = vadd.f32 %v1552_v34, %v477_v24  ;;  %v731_v37 = vpop.f32.mrb[7].mxu0  ;;  %v795_v38 = vpop.f32.mrb[7].mxu1  ;;  %v907_v25 = vld [vmem:[#allocation2] sm:$0xff] (!%p1326_p13) }
 0x14b   : > { %875 = vst [vmem:[#allocation2 + $0x20] sm:$0xff] %v843_v31  ;;  %891 = vst [vmem:[#allocation2 + $0xa0] sm:$0xff] %v859_v32  ;;  %v844_v39 = vadd.f32 %v731_v37, %v459_v29  ;;  %v860_v40 = vadd.f32 %v795_v38, %v475_v30  ;;  %v946_v28 = vadd.f32 (!%p1326_p13), %v1910_v27, %v907_v25  ;;  %v909_v30 = vld [vmem:[#allocation2 + $0x10] sm:$0xff] (!%p1326_p13)  ;;  %v910_v31 = vld [vmem:[#allocation2 + $0x18] sm:$0xff] (!%p1326_p13) }
 0x14c   : > { %878 = vst [vmem:[#allocation2 + $0x38] sm:$0xff] %v846_v35  ;;  %894 = vst [vmem:[#allocation2 + $0xb8] sm:$0xff] %v862_v36  ;;  %v908_v26 = vld [vmem:[#allocation2 + $0x8] sm:$0xff] (!%p1326_p13)  ;;  %v948_v33 = vadd.f32 (!%p1326_p13), %v1910_v27, %v909_v30  ;;  %v949_v34 = vadd.f32 (!%p1326_p13), %v1910_v27, %v910_v31 }
 0x14d   : > { %876 = vst [vmem:[#allocation2 + $0x28] sm:$0xff] %v844_v39  ;;  %892 = vst [vmem:[#allocation2 + $0xa8] sm:$0xff] %v860_v40  ;;  %v947_v29 = vadd.f32 (!%p1326_p13), %v1910_v27, %v908_v26  ;;  %v978_v39 = vmax.f32 (!%p1326_p13), %v946_v28, 0.0 }
 0x14f   : > { %v1539_v45 = vpop.f32.mrb[8].mxu0  ;;  %v1555_v46 = vpop.f32.mrb[8].mxu1  ;;  %v979_v40 = vmax.f32 (!%p1326_p13), %v947_v29, 0.0 }
 0x150   : > { %v849_v49 = vadd.f32 %v1539_v45, %v464_v41  ;;  %v865_v50 = vadd.f32 %v1555_v46, %v480_v42  ;;  %v744_v51 = vpop.f32.mrb[9].mxu0  ;;  %v808_v52 = vpop.f32.mrb[9].mxu1  ;;  %v980_v46 = vmax.f32 (!%p1326_p13), %v948_v33, 0.0 }
 0x151   : > { %v847_v55 = vadd.f32 %v744_v51, %v462_v43  ;;  %v863_v56 = vadd.f32 %v808_v52, %v478_v44  ;;  %v1540_v57 = vpop.f32.mrb[10].mxu0  ;;  %v1556_v58 = vpop.f32.mrb[10].mxu1  ;;  %v913_v37 = vld [vmem:[#allocation2 + $0x30] sm:$0xff] (!%p1326_p13)  ;;  %v1397_v52 = vpack.c.bf16 (!%p1326_p13), %v979_v40, %v978_v39 }
 0x152   : > { %881 = vst [vmem:[#allocation2 + $0x50] sm:$0xff] %v849_v49  ;;  %897 = vst [vmem:[#allocation2 + $0xd0] sm:$0xff] %v865_v50  ;;  %v850_v59 = vadd.f32 %v1540_v57, %v465_v47  ;;  %v866_v60 = vadd.f32 %v1556_v58, %v481_v48  ;;  %v747_v61 = vpop.f32.mrb[11].mxu0  ;;  %v811_v62 = vpop.f32.mrb[11].mxu1  ;;  %v911_v32 = vld [vmem:[#allocation2 + $0x20] sm:$0xff] (!%p1326_p13)  ;;  %v952_v42 = vadd.f32 (!%p1326_p13), %v1910_v27, %v913_v37  ;;  %v981_v47 = vmax.f32 (!%p1326_p13), %v949_v34, 0.0 }
 0x153   : > { %879 = vst [vmem:[#allocation2 + $0x40] sm:$0xff] %v847_v55  ;;  %895 = vst [vmem:[#allocation2 + $0xc0] sm:$0xff] %v863_v56  ;;  %v848_v63 = vadd.f32 %v747_v61, %v463_v53  ;;  %v864_v0 = vadd.f32 %v811_v62, %v479_v54  ;;  %v950_v36 = vadd.f32 (!%p1326_p13), %v1910_v27, %v911_v32  ;;  %v914_v38 = vld [vmem:[#allocation2 + $0x38] sm:$0xff] (!%p1326_p13)  ;;  %v929_v25 = vld [vmem:[#allocation2 + $0xb0] sm:$0xff] (!%p1326_p13) }
 0x154   : > { %882 = vst [vmem:[#allocation2 + $0x58] sm:$0xff] %v850_v59  ;;  %898 = vst [vmem:[#allocation2 + $0xd8] sm:$0xff] %v866_v60  ;;  %v912_v35 = vld [vmem:[#allocation2 + $0x28] sm:$0xff] (!%p1326_p13)  ;;  %v953_v49 = vadd.f32 (!%p1326_p13), %v1910_v27, %v914_v38  ;;  %v984_v54 = vmax.f32 (!%p1326_p13), %v952_v42, 0.0  ;;  %v1402_v57 = vpack.c.bf16 (!%p1326_p13), %v981_v47, %v980_v46  ;;  %v930_v26 = vld [vmem:[#allocation2 + $0xb8] sm:$0xff] (!%p1326_p13) }
 0x155   : > { %880 = vst [vmem:[#allocation2 + $0x48] sm:$0xff] %v848_v63  ;;  %896 = vst [vmem:[#allocation2 + $0xc8] sm:$0xff] %v864_v0  ;;  %v951_v41 = vadd.f32 (!%p1326_p13), %v1910_v27, %v912_v35  ;;  %v982_v48 = vmax.f32 (!%p1326_p13), %v950_v36, 0.0  ;;  %v969_v42 = vadd.f32 (!%p1326_p13), %v1910_v27, %v930_v26 }
 0x156   : > { %v985_v58 = vmax.f32 (!%p1326_p13), %v953_v49, 0.0  ;;  %1398 = vst [vmem:[%s1877_s29] sm:$0xff] (!%p1326_p13), %v1397_v52   ;;  %1474 = vst [vmem:[%s1877_s29 + $0x8] sm:$0xff] (!%p1326_p13), %v1402_v57  }
 0x157   : > { %v1543_v5 = vpop.f32.mrb[12].mxu0  ;;  %v1559_v6 = vpop.f32.mrb[12].mxu1  ;;  %906 = sbr.rel (%p1326_p13) target bundleno = 366 (0x16e), region = 81  ;;  %v983_v53 = vmax.f32 (!%p1326_p13), %v951_v41, 0.0  ;;  %v968_v41 = vadd.f32 (!%p1326_p13), %v1910_v27, %v929_v25  ;;  %v1001_v52 = vmax.f32 (!%p1326_p13), %v969_v42, 0.0 }
 0x158   : > { %v853_v9 = vadd.f32 %v1543_v5, %v468_v1  ;;  %v869_v10 = vadd.f32 %v1559_v6, %v484_v2  ;;  %v760_v11 = vpop.f32.mrb[13].mxu0  ;;  %v824_v12 = vpop.f32.mrb[13].mxu1  ;;  %v1412_v5 = vpack.c.bf16 (!%p1326_p13), %v985_v58, %v984_v54 }
 0x159   : > { %v851_v15 = vadd.f32 %v760_v11, %v466_v3  ;;  %v867_v16 = vadd.f32 %v824_v12, %v482_v4  ;;  %v1544_v17 = vpop.f32.mrb[14].mxu0  ;;  %v1560_v18 = vpop.f32.mrb[14].mxu1  ;;  %v917_v45 = vld [vmem:[#allocation2 + $0x50] sm:$0xff] (!%p1326_p13)  ;;  %v1407_v63 = vpack.c.bf16 (!%p1326_p13), %v983_v53, %v982_v48  ;;  %v923_v3 = vld [vmem:[#allocation2 + $0x80] sm:$0xff] (!%p1326_p13)  ;;  %v924_v4 = vld [vmem:[#allocation2 + $0x88] sm:$0xff] (!%p1326_p13) }
 0x15a   : > { %885 = vst [vmem:[#allocation2 + $0x70] sm:$0xff] %v853_v9  ;;  %901 = vst [vmem:[#allocation2 + $0xf0] sm:$0xff] %v869_v10  ;;  %v854_v19 = vadd.f32 %v1544_v17, %v469_v7  ;;  %v870_v20 = vadd.f32 %v1560_v18, %v485_v8  ;;  %v763_v21 = vpop.f32.mrb[15].mxu0  ;;  %v827_v22 = vpop.f32.mrb[15].mxu1  ;;  %v915_v43 = vld [vmem:[#allocation2 + $0x40] sm:$0xff] (!%p1326_p13)  ;;  %v956_v60 = vadd.f32 (!%p1326_p13), %v1910_v27, %v917_v45  ;;  %v925_v9 = vld [vmem:[#allocation2 + $0x90] sm:$0xff] (!%p1326_p13) }
 0x15b   : > { %883 = vst [vmem:[#allocation2 + $0x60] sm:$0xff] %v851_v15  ;;  %899 = vst [vmem:[#allocation2 + $0xe0] sm:$0xff] %v867_v16  ;;  %v852_v23 = vadd.f32 %v763_v21, %v467_v13  ;;  %v868_v24 = vadd.f32 %v827_v22, %v483_v14  ;;  %v918_v50 = vld [vmem:[#allocation2 + $0x58] sm:$0xff] (!%p1326_p13)  ;;  %v954_v55 = vadd.f32 (!%p1326_p13), %v1910_v27, %v915_v43  ;;  %v931_v32 = vld [vmem:[#allocation2 + $0xc0] sm:$0xff] (!%p1326_p13) }
 0x15c   : > { %886 = vst [vmem:[#allocation2 + $0x78] sm:$0xff] %v854_v19  ;;  %902 = vst [vmem:[#allocation2 + $0xf8] sm:$0xff] %v870_v20  ;;  %v916_v44 = vld [vmem:[#allocation2 + $0x48] sm:$0xff] (!%p1326_p13)  ;;  %v957_v1 = vadd.f32 (!%p1326_p13), %v1910_v27, %v918_v50  ;;  %v988_v7 = vmax.f32 (!%p1326_p13), %v956_v60, 0.0  ;;  %v926_v14 = vld [vmem:[#allocation2 + $0x98] sm:$0xff] (!%p1326_p13)  ;;  %v962_v17 = vadd.f32 (!%p1326_p13), %v1910_v27, %v923_v3  ;;  %v963_v18 = vadd.f32 (!%p1326_p13), %v1910_v27, %v924_v4 }
 0x15d   : > { %884 = vst [vmem:[#allocation2 + $0x68] sm:$0xff] %v852_v23  ;;  %900 = vst [vmem:[#allocation2 + $0xe8] sm:$0xff] %v868_v24  ;;  %v955_v59 = vadd.f32 (!%p1326_p13), %v1910_v27, %v916_v44  ;;  %v986_v0 = vmax.f32 (!%p1326_p13), %v954_v55, 0.0  ;;  %v927_v19 = vld [vmem:[#allocation2 + $0xa0] sm:$0xff] (!%p1326_p13)  ;;  %v928_v20 = vld [vmem:[#allocation2 + $0xa8] sm:$0xff] (!%p1326_p13)  ;;  %v964_v24 = vadd.f32 (!%p1326_p13), %v1910_v27, %v925_v9  ;;  %v965_v31 = vadd.f32 (!%p1326_p13), %v1910_v27, %v926_v14 }
 0x15e   : > { %1475 = vst [vmem:[%s1877_s29 + $0x10] sm:$0xff] %v1407_v63   ;;  %v989_v10 = vmax.f32 %v957_v1, 0.0  ;;  %1476 = vst [vmem:[%s1877_s29 + $0x18] sm:$0xff] %v1412_v5   ;;  %v994_v29 = vmax.f32 %v962_v17, 0.0  ;;  %v995_v30 = vmax.f32 %v963_v18, 0.0  ;;  %v932_v33 = vld [vmem:[#allocation2 + $0xc8] sm:$0xff]  ;;  %v966_v36 = vadd.f32 %v1910_v27, %v927_v19 }
 0x15f   : > { %v987_v6 = vmax.f32 %v955_v59, 0.0  ;;  %v996_v35 = vmax.f32 %v964_v24, 0.0  ;;  %v967_v37 = vadd.f32 %v1910_v27, %v928_v20  ;;  %v933_v38 = vld [vmem:[#allocation2 + $0xd0] sm:$0xff]  ;;  %v997_v40 = vmax.f32 %v965_v31, 0.0  ;;  %v934_v43 = vld [vmem:[#allocation2 + $0xd8] sm:$0xff] }
 0x160   : > { %v1422_v21 = vpack.c.bf16 %v989_v10, %v988_v7  ;;  %v1437_v39 = vpack.c.bf16 %v995_v30, %v994_v29  ;;  %v998_v44 = vmax.f32 %v966_v36, 0.0  ;;  %v970_v46 = vadd.f32 %v1910_v27, %v931_v32 }
 0x161   : > { %v921_v61 = vld [vmem:[#allocation2 + $0x70] sm:$0xff]  ;;  %v1417_v15 = vpack.c.bf16 %v987_v6, %v986_v0  ;;  %v999_v45 = vmax.f32 %v967_v37, 0.0  ;;  %v971_v47 = vadd.f32 %v1910_v27, %v932_v33  ;;  %v1442_v50 = vpack.c.bf16 %v997_v40, %v996_v35 }
 0x162   : > { %v919_v51 = vld [vmem:[#allocation2 + $0x60] sm:$0xff]  ;;  %v960_v12 = vadd.f32 %v1910_v27, %v921_v61  ;;  %1478 = vst [vmem:[%s1877_s29 + $0x28] sm:$0xff] %v1422_v21   ;;  %1481 = vst [vmem:[%s1877_s29 + $0x40] sm:$0xff] %v1437_v39   ;;  %v972_v53 = vadd.f32 %v1910_v27, %v933_v38  ;;  %v937_v54 = vld [vmem:[#allocation2 + $0xf0] sm:$0xff]  ;;  %v1002_v57 = vmax.f32 %v970_v46, 0.0  ;;  %v973_v59 = vadd.f32 %v1910_v27, %v934_v43 }
 0x163   : > { %v922_v62 = vld [vmem:[#allocation2 + $0x78] sm:$0xff]  ;;  %v958_v2 = vadd.f32 %v1910_v27, %v919_v51  ;;  %1477 = vst [vmem:[%s1877_s29 + $0x20] sm:$0xff] %v1417_v15   ;;  %v935_v48 = vld [vmem:[#allocation2 + $0xe0] sm:$0xff]  ;;  %v1000_v51 = vmax.f32 %v968_v41, 0.0  ;;  %v1003_v58 = vmax.f32 %v971_v47, 0.0  ;;  %1482 = vst [vmem:[%s1877_s29 + $0x48] sm:$0xff] %v1442_v50  }
 0x164   : > { %v920_v56 = vld [vmem:[#allocation2 + $0x68] sm:$0xff]  ;;  %v961_v13 = vadd.f32 %v1910_v27, %v922_v62  ;;  %v992_v22 = vmax.f32 %v960_v12, 0.0  ;;  %v938_v55 = vld [vmem:[#allocation2 + $0xf8] sm:$0xff]  ;;  %v1004_v61 = vmax.f32 %v972_v53, 0.0  ;;  %v974_v62 = vadd.f32 %v1910_v27, %v935_v48 }
 0x165   : > { %v959_v8 = vadd.f32 %v1910_v27, %v920_v56  ;;  %v990_v11 = vmax.f32 %v958_v2, 0.0  ;;  %v936_v49 = vld [vmem:[#allocation2 + $0xe8] sm:$0xff]  ;;  %v1447_v56 = vpack.c.bf16 %v999_v45, %v998_v44  ;;  %v1452_v60 = vpack.c.bf16 %v1001_v52, %v1000_v51 }
 0x166   : > { %v993_v23 = vmax.f32 %v961_v13, 0.0  ;;  %v975_v63 = vadd.f32 %v1910_v27, %v936_v49  ;;  %v1457_v0 = vpack.c.bf16 %v1003_v58, %v1002_v57  ;;  %v1005_v1 = vmax.f32 %v973_v59, 0.0 }
 0x167   : > { %v991_v16 = vmax.f32 %v959_v8, 0.0  ;;  %1483 = vst [vmem:[%s1877_s29 + $0x50] sm:$0xff] %v1447_v56   ;;  %v976_v2 = vadd.f32 %v1910_v27, %v937_v54  ;;  %v977_v3 = vadd.f32 %v1910_v27, %v938_v55  ;;  %1484 = vst [vmem:[%s1877_s29 + $0x58] sm:$0xff] %v1452_v60   ;;  %v1006_v4 = vmax.f32 %v974_v62, 0.0 }
 0x168   : > { %v1432_v34 = vpack.c.bf16 %v993_v23, %v992_v22  ;;  %v1007_v5 = vmax.f32 %v975_v63, 0.0  ;;  %1485 = vst [vmem:[%s1877_s29 + $0x60] sm:$0xff] %v1457_v0   ;;  %v1462_v6 = vpack.c.bf16 %v1005_v1, %v1004_v61 }
 0x169   : > { %v1427_v28 = vpack.c.bf16 %v991_v16, %v990_v11  ;;  %v1008_v7 = vmax.f32 %v976_v2, 0.0  ;;  %v1009_v8 = vmax.f32 %v977_v3, 0.0 }
 0x16a   : > { %1480 = vst [vmem:[%s1877_s29 + $0x38] sm:$0xff] %v1432_v34   ;;  %v1467_v9 = vpack.c.bf16 %v1007_v5, %v1006_v4  ;;  %1486 = vst [vmem:[%s1877_s29 + $0x68] sm:$0xff] %v1462_v6  }
 0x16b   : > { %1479 = vst [vmem:[%s1877_s29 + $0x30] sm:$0xff] %v1427_v28   ;;  %v1472_v10 = vpack.c.bf16 %v1009_v8, %v1008_v7 }
 0x16c   : > { %1487 = vst [vmem:[%s1877_s29 + $0x70] sm:$0xff] %v1467_v9  }
 0x16d   : > { %1488 = vst [vmem:[%s1877_s29 + $0x78] sm:$0xff] %v1472_v10  }
 0x16e PF: > { %s13_s18 = sadd.s32 1, %s1713_s18   ;;  %s1985_s12 = smov %s1693_s13 }
 0x16f   : > { %p10_p0 = scmp.ge.s32.totalorder %s13_s18, 12   ;;  %s1986_s13 = smov %s1787_s25 }
 0x170   : > { %s1987_s14 = smov %s1705_s16  ;;  %s1988_s15 = smov %s1709_s17 }
 0x171   : > { %s1989_s16 = smov %s1992_s19  ;;  %s1990_s17 = smov %s1996_s20 }
 0x172   :  { %12 = sbr.rel (!%p10_p0) target bundleno = 4 (0x4), region = 122 }

// kernel: _lambda_.20
= control target key start
LH: loop header
LB: loop body
LE: loop exit
PB: predicated region body
PF: predicated region fallthrough
CT: control target
= control target key end

     0   :  { %s230_s0 = inlined_call_operand.vmem [shape: bf16[16,1024], index: 0, kind: input, shape index: {}]   ;;  %s231_s1 = inlined_call_operand.vmem [shape: bf16[16,1024], index: 1, kind: input, shape index: {}]   ;;  %s232_s2 = inlined_call_operand.vmem [shape: bf16[16,1024], index: 2, kind: input, shape index: {}]   ;;  %s233_s3 = inlined_call_operand.vmem [shape: bf16[16,1024], index: 3, kind: input, shape index: {}]   ;;  %s234_s4 = inlined_call_operand.vmem [shape: bf16[16,1024], index: 4, kind: output, shape index: {}]  }
   0x1   :  { %v17_v0 = vld [vmem:[%s230_s0] sm:$0xff]  ;;  %v18_v5 = vld [vmem:[%s230_s0 + $0x8] sm:$0xff]  ;;  %v19_v11 = vld [vmem:[%s230_s0 + $0x10] sm:$0xff] }
   0x2   :  { %v25_v1 = vld [vmem:[%s231_s1] sm:$0xff]  ;;  %v26_v6 = vld [vmem:[%s231_s1 + $0x8] sm:$0xff]  ;;  %v27_v13 = vld [vmem:[%s231_s1 + $0x10] sm:$0xff] }
   0x3   :  { %v41_v2 = vld [vmem:[%s232_s2] sm:$0xff]  ;;  %v33_v3 = vmax.bf16 %v25_v1, %v17_v0  ;;  %v34_v8 = vmax.bf16 %v26_v6, %v18_v5  ;;  %v42_v9 = vld [vmem:[%s232_s2 + $0x8] sm:$0xff]  ;;  %v43_v14 = vld [vmem:[%s232_s2 + $0x10] sm:$0xff]  ;;  %v35_v17 = vmax.bf16 %v27_v13, %v19_v11 }
   0x4   :  { %v49_v4 = vld [vmem:[%s233_s3] sm:$0xff]  ;;  %v50_v10 = vld [vmem:[%s233_s3 + $0x8] sm:$0xff]  ;;  %v51_v15 = vld [vmem:[%s233_s3 + $0x10] sm:$0xff] }
   0x5   :  { %v57_v7 = vmax.bf16 %v49_v4, %v41_v2  ;;  %v58_v12 = vmax.bf16 %v50_v10, %v42_v9  ;;  %v59_v18 = vmax.bf16 %v51_v15, %v43_v14  ;;  %v20_v19 = vld [vmem:[%s230_s0 + $0x18] sm:$0xff]  ;;  %v21_v25 = vld [vmem:[%s230_s0 + $0x20] sm:$0xff]  ;;  %v22_v32 = vld [vmem:[%s230_s0 + $0x28] sm:$0xff] }
   0x6   :  { %v28_v20 = vld [vmem:[%s231_s1 + $0x18] sm:$0xff]  ;;  %v29_v26 = vld [vmem:[%s231_s1 + $0x20] sm:$0xff]  ;;  %v30_v34 = vld [vmem:[%s231_s1 + $0x28] sm:$0xff] }
   0x7   :  { %v65_v16 = vmax.bf16 %v57_v7, %v33_v3  ;;  %v44_v21 = vld [vmem:[%s232_s2 + $0x18] sm:$0xff]  ;;  %v66_v22 = vmax.bf16 %v58_v12, %v34_v8  ;;  %v36_v23 = vmax.bf16 %v28_v20, %v20_v19  ;;  %v67_v27 = vmax.bf16 %v59_v18, %v35_v17  ;;  %v45_v30 = vld [vmem:[%s232_s2 + $0x20] sm:$0xff]  ;;  %v46_v35 = vld [vmem:[%s232_s2 + $0x28] sm:$0xff] }
   0x8   :  { %v52_v24 = vld [vmem:[%s233_s3 + $0x18] sm:$0xff]  ;;  %v37_v29 = vmax.bf16 %v29_v26, %v21_v25  ;;  %v53_v31 = vld [vmem:[%s233_s3 + $0x20] sm:$0xff]  ;;  %v54_v36 = vld [vmem:[%s233_s3 + $0x28] sm:$0xff]  ;;  %v38_v38 = vmax.bf16 %v30_v34, %v22_v32 }
   0x9   :  { %73 = vst [vmem:[%s234_s4] sm:$0xff] %v65_v16  ;;  %v60_v28 = vmax.bf16 %v52_v24, %v44_v21  ;;  %74 = vst [vmem:[%s234_s4 + $0x8] sm:$0xff] %v66_v22  ;;  %v61_v33 = vmax.bf16 %v53_v31, %v45_v30  ;;  %v62_v39 = vmax.bf16 %v54_v36, %v46_v35  ;;  %v23_v40 = vld [vmem:[%s230_s0 + $0x30] sm:$0xff]  ;;  %v24_v46 = vld [vmem:[%s230_s0 + $0x38] sm:$0xff] }
   0xa   :  { %75 = vst [vmem:[%s234_s4 + $0x10] sm:$0xff] %v67_v27  ;;  %v31_v41 = vld [vmem:[%s231_s1 + $0x30] sm:$0xff]  ;;  %v32_v47 = vld [vmem:[%s231_s1 + $0x38] sm:$0xff] }
   0xb   :  { %v68_v37 = vmax.bf16 %v60_v28, %v36_v23  ;;  %v47_v42 = vld [vmem:[%s232_s2 + $0x30] sm:$0xff]  ;;  %v69_v43 = vmax.bf16 %v61_v33, %v37_v29  ;;  %v39_v44 = vmax.bf16 %v31_v41, %v23_v40  ;;  %v70_v48 = vmax.bf16 %v62_v39, %v38_v38  ;;  %v48_v51 = vld [vmem:[%s232_s2 + $0x38] sm:$0xff] }
   0xc   :  { %v55_v45 = vld [vmem:[%s233_s3 + $0x30] sm:$0xff]  ;;  %v40_v50 = vmax.bf16 %v32_v47, %v24_v46  ;;  %v56_v52 = vld [vmem:[%s233_s3 + $0x38] sm:$0xff] }
   0xd   :  { %76 = vst [vmem:[%s234_s4 + $0x18] sm:$0xff] %v68_v37  ;;  %v63_v49 = vmax.bf16 %v55_v45, %v47_v42  ;;  %77 = vst [vmem:[%s234_s4 + $0x20] sm:$0xff] %v69_v43  ;;  %v64_v53 = vmax.bf16 %v56_v52, %v48_v51 }
   0xe   :  { %78 = vst [vmem:[%s234_s4 + $0x28] sm:$0xff] %v70_v48 }
   0xf   :  { %v71_v54 = vmax.bf16 %v63_v49, %v39_v44  ;;  %v72_v55 = vmax.bf16 %v64_v53, %v40_v50 }
  0x11   :  { %79 = vst [vmem:[%s234_s4 + $0x30] sm:$0xff] %v71_v54  ;;  %80 = vst [vmem:[%s234_s4 + $0x38] sm:$0xff] %v72_v55 }

// kernel: _lambda_.21
= control target key start
LH: loop header
LB: loop body
LE: loop exit
PB: predicated region body
PF: predicated region fallthrough
CT: control target
= control target key end

     0   :  { %s1349_s12 = smov 0   ;;  %s1351_s13 = smov 0   ;;  %s1557_s0 = inlined_call_operand.vmem [shape: bf16[128,1152], index: 0, kind: input, shape index: {}]   ;;  %s1558_s1 = inlined_call_operand.vmem [shape: bf16[1152,256], index: 1, kind: input, shape index: {}]   ;;  %s1559_s2 = inlined_call_operand.vmem [shape: f32[1,256], index: 2, kind: input, shape index: {}]   ;;  %s1560_s3 = inlined_call_operand.vmem [shape: bf16[128,256], index: 3, kind: output, shape index: {}]  }
   0x1   :  { %s1353_s14 = smov 0   ;;  %s1355_s15 = smov 0  }
   0x2   :  { %s1357_s16 = smov 0  }
   0x3 LB: > { %s25_s17 = sadd.s32 1, %s1321_s15  ;;  %p48_p1 = scmp.ne.s32.totalorder %s1313_s13, %s1309_s12  ;;  %s1325_s16 = sphi %s1357_s16, %s13_s16   ;;  %s1321_s15 = sphi %s1355_s15, %s1564_s15   ;;  %s1317_s14 = sphi %s1353_s14, %s1563_s14   ;;  %s1313_s13 = sphi %s1351_s13, %s1562_s13   ;;  %s1309_s12 = sphi %s1349_s12, %s1561_s12  }
   0x4   : > { %p26_p0 = scmp.ge.s32.totalorder %s25_s17, 9  ;;  %p49_p2 = scmp.eq.s32.totalorder %s1325_s16, 0 }
   0x5   : > { %s41_s19 = sadd.s32 1, %s1313_s13  ;;  %p1126_p5 = scmp.ge.s32.totalorder %s1325_s16, 9 }
   0x6   : > { %s1566_s17 = smov (%p26_p0, %s25_s17), 0  ;;  %p50_p3 = por %p49_p2, %p48_p1 }
   0x7   : > { %s37_s18 = ssub.s32 %s1321_s15, %s1566_s17  ;;  %164 = sbr.rel (%p1126_p5) target bundleno = 28 (0x1c), region = 20 }
   0x8   : > { %p39_p4 = scmp.eq.s32.totalorder %s37_s18, 0 }
   0xa   : > { %s1384_s20 = scalar_select %p39_p4, %s1313_s13, %s41_s19  }
   0xe   : > { %167 = sbr.rel (!%p50_p3) target bundleno = 28 (0x1c), region = 24  ;;  %s169_s21 = sand.u32 (%p50_p3), 1, %s1313_s13  }
   0xf   : > { %s1128_s22 = sshll.u32 (%p50_p3), %s1321_s15, 2  ;;  %s1127_s23 = sshll.u32 (%p50_p3), %s169_s21, 6 }
  0x10   : > { %s1392_s26 = scalar_lea.vmem (%p50_p3), %s1557_s0, %s1128_s22  ;;  %s171_s27 = scalar_lea.vmem (%p50_p3), [#allocation3], %s1127_s23 }
  0x11   : > { %v192_v0 = vld [vmem:[%s1392_s26] sm:$0xf] (%p50_p3)  ;;  %v194_v1 = vld [vmem:[%s1392_s26 + $0x24] sm:$0xf] (%p50_p3)  ;;  %v196_v2 = vld [vmem:[%s1392_s26 + $0x48] sm:$0xf] (%p50_p3) }
  0x12   : > { %193 = vst [vmem:[%s171_s27] sm:$0xf] (%p50_p3), %v192_v0  ;;  %195 = vst [vmem:[%s171_s27 + $0x4] sm:$0xf] (%p50_p3), %v194_v1  ;;  %v198_v3 = vld [vmem:[%s1392_s26 + $0x6c] sm:$0xf] (%p50_p3) }
  0x13   : > { %v200_v4 = vld [vmem:[%s1392_s26 + $0x90] sm:$0xf] (%p50_p3)  ;;  %197 = vst [vmem:[%s171_s27 + $0x8] sm:$0xf] (%p50_p3), %v196_v2  ;;  %199 = vst [vmem:[%s171_s27 + $0xc] sm:$0xf] (%p50_p3), %v198_v3 }
  0x14   : > { %201 = vst [vmem:[%s171_s27 + $0x10] sm:$0xf] (%p50_p3), %v200_v4  ;;  %v202_v5 = vld [vmem:[%s1392_s26 + $0xb4] sm:$0xf] (%p50_p3)  ;;  %v204_v6 = vld [vmem:[%s1392_s26 + $0xd8] sm:$0xf] (%p50_p3) }
  0x15   : > { %v206_v7 = vld [vmem:[%s1392_s26 + $0xfc] sm:$0xf]  ;;  %203 = vst [vmem:[%s171_s27 + $0x14] sm:$0xf] %v202_v5  ;;  %205 = vst [vmem:[%s171_s27 + $0x18] sm:$0xf] %v204_v6 }
  0x16   : > { %207 = vst [vmem:[%s171_s27 + $0x1c] sm:$0xf] %v206_v7  ;;  %v208_v8 = vld [vmem:[%s1392_s26 + $0x120] sm:$0xf]  ;;  %v210_v9 = vld [vmem:[%s1392_s26 + $0x144] sm:$0xf] }
  0x17   : > { %v212_v10 = vld [vmem:[%s1392_s26 + $0x168] sm:$0xf]  ;;  %209 = vst [vmem:[%s171_s27 + $0x20] sm:$0xf] %v208_v8  ;;  %211 = vst [vmem:[%s171_s27 + $0x24] sm:$0xf] %v210_v9 }
  0x18   : > { %213 = vst [vmem:[%s171_s27 + $0x28] sm:$0xf] %v212_v10  ;;  %v214_v11 = vld [vmem:[%s1392_s26 + $0x18c] sm:$0xf]  ;;  %v216_v12 = vld [vmem:[%s1392_s26 + $0x1b0] sm:$0xf] }
  0x19   : > { %v218_v13 = vld [vmem:[%s1392_s26 + $0x1d4] sm:$0xf]  ;;  %215 = vst [vmem:[%s171_s27 + $0x2c] sm:$0xf] %v214_v11  ;;  %217 = vst [vmem:[%s171_s27 + $0x30] sm:$0xf] %v216_v12 }
  0x1a   : > { %219 = vst [vmem:[%s171_s27 + $0x34] sm:$0xf] %v218_v13  ;;  %v220_v14 = vld [vmem:[%s1392_s26 + $0x1f8] sm:$0xf]  ;;  %v222_v15 = vld [vmem:[%s1392_s26 + $0x21c] sm:$0xf] }
  0x1b   : > { %221 = vst [vmem:[%s171_s27 + $0x38] sm:$0xf] %v220_v14  ;;  %223 = vst [vmem:[%s171_s27 + $0x3c] sm:$0xf] %v222_v15 }
  0x1c PF: > { %p1129_p6 = scmp.ge.s32.totalorder %s1325_s16, 1  ;;  %p292_p7 = scmp.lt.s32.totalorder %s1325_s16, 10 }
  0x1e   : > { %p293_p8 = pnand %p1129_p6, %p292_p7 }
  0x1f   : > { %s299_s28 = sand.u32 (!%p293_p8), 1, %s1309_s12   ;;  %s1131_s29 = sshll.u32 (!%p293_p8), %s1317_s14, 4 }
  0x20   : > { %296 = sbr.rel (%p293_p8) target bundleno = 349 (0x15d), region = 69  ;;  %s1130_s30 = sshll.u32 (!%p293_p8), %s299_s28, 6 }
  0x21   : > { %p344_p9 = scmp.lt.s32.totalorder (!%p293_p8), %s1131_s29, 143  ;;  %s1419_s8 = scalar_lea.vmem (!%p293_p8), [#allocation3], %s1130_s30 }
  0x22   : > { %p1134_p10 = scmp.ne.s32.totalorder (!%p293_p8), %s1317_s14, 0 }
  0x27   : > { %s1568_s29 = smov (!%p344_p9, %s1131_s29), 143  ;;  %375 = sbr.rel (%p1134_p10) target bundleno = 57 (0x39), region = 77 }
  0x28   : > { %s1180_s4 = sshll.u32 %s1568_s29, 3  ;;  %v1327_v16 = vmov (!%p1134_p10), 0.0  }
  0x29   : > { %s1417_s7 = scalar_lea.vmem %s1558_s1, %s1180_s4  ;;  %376 = vst [vmem:[#allocation2] sm:$0xff] (!%p1134_p10), %v1327_v16  ;;  %377 = vst [vmem:[#allocation2 + $0x8] sm:$0xff] (!%p1134_p10), %v1327_v16 }
  0x2a   : > { %378 = vst [vmem:[#allocation2 + $0x10] sm:$0xff] (!%p1134_p10), %v1327_v16  ;;  %379 = vst [vmem:[#allocation2 + $0x18] sm:$0xff] (!%p1134_p10), %v1327_v16 }
  0x2b   : > { %380 = vst [vmem:[#allocation2 + $0x20] sm:$0xff] (!%p1134_p10), %v1327_v16  ;;  %381 = vst [vmem:[#allocation2 + $0x28] sm:$0xff] (!%p1134_p10), %v1327_v16 }
  0x2c   : > { %382 = vst [vmem:[#allocation2 + $0x30] sm:$0xff] (!%p1134_p10), %v1327_v16  ;;  %383 = vst [vmem:[#allocation2 + $0x38] sm:$0xff] (!%p1134_p10), %v1327_v16 }
  0x2d   : > { %384 = vst [vmem:[#allocation2 + $0x40] sm:$0xff] (!%p1134_p10), %v1327_v16  ;;  %385 = vst [vmem:[#allocation2 + $0x48] sm:$0xff] (!%p1134_p10), %v1327_v16 }
  0x2e   : > { %386 = vst [vmem:[#allocation2 + $0x50] sm:$0xff] %v1327_v16  ;;  %387 = vst [vmem:[#allocation2 + $0x58] sm:$0xff] %v1327_v16 }
  0x2f   : > { %388 = vst [vmem:[#allocation2 + $0x60] sm:$0xff] %v1327_v16  ;;  %389 = vst [vmem:[#allocation2 + $0x68] sm:$0xff] %v1327_v16 }
  0x30   : > { %390 = vst [vmem:[#allocation2 + $0x70] sm:$0xff] %v1327_v16  ;;  %391 = vst [vmem:[#allocation2 + $0x78] sm:$0xff] %v1327_v16 }
  0x31   : > { %392 = vst [vmem:[#allocation2 + $0x80] sm:$0xff] %v1327_v16  ;;  %393 = vst [vmem:[#allocation2 + $0x88] sm:$0xff] %v1327_v16 }
  0x32   : > { %394 = vst [vmem:[#allocation2 + $0x90] sm:$0xff] %v1327_v16  ;;  %395 = vst [vmem:[#allocation2 + $0x98] sm:$0xff] %v1327_v16 }
  0x33   : > { %396 = vst [vmem:[#allocation2 + $0xa0] sm:$0xff] %v1327_v16  ;;  %397 = vst [vmem:[#allocation2 + $0xa8] sm:$0xff] %v1327_v16 }
  0x34   : > { %398 = vst [vmem:[#allocation2 + $0xb0] sm:$0xff] %v1327_v16  ;;  %399 = vst [vmem:[#allocation2 + $0xb8] sm:$0xff] %v1327_v16 }
  0x35   : > { %400 = vst [vmem:[#allocation2 + $0xc0] sm:$0xff] %v1327_v16  ;;  %401 = vst [vmem:[#allocation2 + $0xc8] sm:$0xff] %v1327_v16 }
  0x36   : > { %402 = vst [vmem:[#allocation2 + $0xd0] sm:$0xff] %v1327_v16  ;;  %403 = vst [vmem:[#allocation2 + $0xd8] sm:$0xff] %v1327_v16 }
  0x37   : > { %404 = vst [vmem:[#allocation2 + $0xe0] sm:$0xff] %v1327_v16  ;;  %405 = vst [vmem:[#allocation2 + $0xe8] sm:$0xff] %v1327_v16 }
  0x38   : > { %406 = vst [vmem:[#allocation2 + $0xf0] sm:$0xff] %v1327_v16  ;;  %407 = vst [vmem:[#allocation2 + $0xf8] sm:$0xff] %v1327_v16 }
  0x39 PF: > { %v1255_v17 = vld [vmem:[%s1417_s7 + $0x4] ss:$8 sps:$4 sm:$0xff]   ;;  %v1257_v18 = vld [vmem:[%s1417_s7] ss:$8 sps:$4 sm:$0xff]   ;;  %v1328_v19 = vmov 0   ;;  %v1283_v38 = vld [vmem:[%s1419_s8 + $0x10] sm:$0xff]  }
  0x3a   : > { %632 = vmatprep.mubr.bf16.mxu0 %v1328_v19  ;;  %672 = vmatprep.mubr.bf16.mxu1 %v1328_v19  ;;  %v1258_v20 = vld [vmem:[%s1417_s7 + $0x14] ss:$8 sps:$4 sm:$0xff]   ;;  %v1260_v21 = vld [vmem:[%s1417_s7 + $0x10] ss:$8 sps:$4 sm:$0xff]   ;;  %v1261_v22 = vld [vmem:[%s1417_s7 + $0x24] ss:$8 sps:$4 sm:$0xff]  }
  0x3b   : > { %600 = vmatprep.subr.bf16.mxu0 %v1255_v17  ;;  %1197 = vmatprep.subr.bf16.mxu1 %v1255_v17  ;;  %v1263_v23 = vld [vmem:[%s1417_s7 + $0x20] ss:$8 sps:$4 sm:$0xff]   ;;  %v1264_v24 = vld [vmem:[%s1417_s7 + $0x34] ss:$8 sps:$4 sm:$0xff]   ;;  %v1266_v25 = vld [vmem:[%s1417_s7 + $0x30] ss:$8 sps:$4 sm:$0xff]  }
  0x3c   : > { %601 = vmatpush1.bf16.msra.mxu0 %v1257_v18  ;;  %1205 = vmatpush1.bf16.msra.mxu1 %v1257_v18  ;;  %v1267_v26 = vld [vmem:[%s1417_s7 + $0x44] ss:$8 sps:$4 sm:$0xff]   ;;  %v1269_v27 = vld [vmem:[%s1417_s7 + $0x40] ss:$8 sps:$4 sm:$0xff]   ;;  %v1270_v28 = vld [vmem:[%s1417_s7 + $0x54] ss:$8 sps:$4 sm:$0xff]  }
  0x3d   : > { %602 = vmatprep.subr.bf16.mxu0 %v1258_v20  ;;  %1198 = vmatprep.subr.bf16.mxu1 %v1258_v20  ;;  %v1272_v29 = vld [vmem:[%s1417_s7 + $0x50] ss:$8 sps:$4 sm:$0xff]   ;;  %v1273_v30 = vld [vmem:[%s1417_s7 + $0x64] ss:$8 sps:$4 sm:$0xff]   ;;  %v1275_v31 = vld [vmem:[%s1417_s7 + $0x60] ss:$8 sps:$4 sm:$0xff]  }
  0x3e   : > { %v1276_v32 = vld [vmem:[%s1417_s7 + $0x74] ss:$8 sps:$4 sm:$0xff]   ;;  %v1278_v33 = vld [vmem:[%s1417_s7 + $0x70] ss:$8 sps:$4 sm:$0xff]   ;;  %v1279_v34 = vld [vmem:[%s1419_s8] sm:$0xff]   ;;  %p1159_p11 = scmp.ne.s32.totalorder %s1317_s14, 8 }
  0x3f   : > { %v1280_v35 = vld [vmem:[%s1419_s8 + $0x20] sm:$0xff]   ;;  %v1281_v36 = vld [vmem:[%s1419_s8 + $0x8] sm:$0xff]   ;;  %v1284_v39 = vld [vmem:[%s1419_s8 + $0x30] sm:$0xff]  }
  0x40   : > { %603 = vmatpush1.bf16.msra.mxu0 %v1260_v21  ;;  %1206 = vmatpush1.bf16.msra.mxu1 %v1260_v21  ;;  %v1282_v37 = vld [vmem:[%s1419_s8 + $0x28] sm:$0xff]   ;;  %v1285_v40 = vld [vmem:[%s1419_s8 + $0x18] sm:$0xff]   ;;  %v408_v42 = vld [vmem:[#allocation2] sm:$0xff] }
  0x41   : > { %604 = vmatprep.subr.bf16.mxu0 %v1261_v22  ;;  %1199 = vmatprep.subr.bf16.mxu1 %v1261_v22  ;;  %v1286_v41 = vld [vmem:[%s1419_s8 + $0x38] sm:$0xff]   ;;  %v424_v43 = vld [vmem:[#allocation2 + $0x80] sm:$0xff]  ;;  %v409_v44 = vld [vmem:[#allocation2 + $0x8] sm:$0xff] }
  0x42   : > { %v425_v45 = vld [vmem:[#allocation2 + $0x88] sm:$0xff]  ;;  %v410_v48 = vld [vmem:[#allocation2 + $0x10] sm:$0xff]  ;;  %v411_v54 = vld [vmem:[#allocation2 + $0x18] sm:$0xff] }
  0x43   : > { %v426_v49 = vld [vmem:[#allocation2 + $0x90] sm:$0xff]  ;;  %v427_v55 = vld [vmem:[#allocation2 + $0x98] sm:$0xff]  ;;  %v412_v2 = vld [vmem:[#allocation2 + $0x20] sm:$0xff] }
  0x44   : > { %605 = vmatpush1.bf16.msra.mxu0 %v1263_v23  ;;  %1207 = vmatpush1.bf16.msra.mxu1 %v1263_v23  ;;  %v428_v3 = vld [vmem:[#allocation2 + $0xa0] sm:$0xff]  ;;  %v413_v4 = vld [vmem:[#allocation2 + $0x28] sm:$0xff]  ;;  %v414_v8 = vld [vmem:[#allocation2 + $0x30] sm:$0xff] }
  0x45   : > { %606 = vmatprep.subr.bf16.mxu0 %v1264_v24  ;;  %1200 = vmatprep.subr.bf16.mxu1 %v1264_v24  ;;  %v429_v5 = vld [vmem:[#allocation2 + $0xa8] sm:$0xff]  ;;  %v430_v9 = vld [vmem:[#allocation2 + $0xb0] sm:$0xff]  ;;  %v415_v14 = vld [vmem:[#allocation2 + $0x38] sm:$0xff] }
  0x46   : > { %v431_v15 = vld [vmem:[#allocation2 + $0xb8] sm:$0xff] }
  0x48   : > { %607 = vmatpush1.bf16.msra.mxu0 %v1266_v25  ;;  %1208 = vmatpush1.bf16.msra.mxu1 %v1266_v25 }
  0x49   : > { %608 = vmatprep.subr.bf16.mxu0 %v1267_v26  ;;  %1201 = vmatprep.subr.bf16.mxu1 %v1267_v26  ;;  %v416_v26 = vld [vmem:[#allocation2 + $0x40] sm:$0xff] }
  0x4c   : > { %609 = vmatpush1.bf16.msra.mxu0 %v1269_v27  ;;  %1209 = vmatpush1.bf16.msra.mxu1 %v1269_v27  ;;  %v432_v27 = vld [vmem:[#allocation2 + $0xc0] sm:$0xff] }
  0x4d   : > { %610 = vmatprep.subr.bf16.mxu0 %v1270_v28  ;;  %1202 = vmatprep.subr.bf16.mxu1 %v1270_v28  ;;  %v417_v28 = vld [vmem:[#allocation2 + $0x48] sm:$0xff] }
  0x50   : > { %611 = vmatpush1.bf16.msra.mxu0 %v1272_v29  ;;  %1210 = vmatpush1.bf16.msra.mxu1 %v1272_v29  ;;  %v433_v29 = vld [vmem:[#allocation2 + $0xc8] sm:$0xff] }
  0x51   : > { %612 = vmatprep.subr.bf16.mxu0 %v1273_v30  ;;  %1203 = vmatprep.subr.bf16.mxu1 %v1273_v30 }
  0x54   : > { %613 = vmatpush1.bf16.msra.mxu0 %v1275_v31  ;;  %1211 = vmatpush1.bf16.msra.mxu1 %v1275_v31 }
  0x55   : > { %614 = vmatprep.subr.bf16.mxu0 %v1276_v32  ;;  %1204 = vmatprep.subr.bf16.mxu1 %v1276_v32  ;;  %v418_v32 = vld [vmem:[#allocation2 + $0x50] sm:$0xff] }
  0x58   : > { %615 = vmatpush1.bf16.msra.mxu0 %v1278_v33  ;;  %1212 = vmatpush1.bf16.msra.mxu1 %v1278_v33  ;;  %v434_v33 = vld [vmem:[#allocation2 + $0xd0] sm:$0xff] }
  0x5b   : > { %633 = vmatmul.mubr.bf16.vlgmr.msra.gmra.mrb[0].mxu0 %v1279_v34  ;;  %673 = vmatmul.mubr.bf16.vlgmr.msra.gmra.mrb[0].mxu1 %v1280_v35 }
  0x5c   : > { %642 = vmatprep.mubr.bf16.mxu0 %v1328_v19  ;;  %682 = vmatprep.mubr.bf16.mxu1 %v1328_v19 }
  0x63   : > { %643 = vmatmul.mubr.bf16.gmra.mrb[4].mxu0 %v1281_v36  ;;  %683 = vmatmul.mubr.bf16.gmra.mrb[4].mxu1 %v1282_v37 }
  0x64   : > { %652 = vmatprep.mubr.bf16.mxu0 %v1328_v19  ;;  %692 = vmatprep.mubr.bf16.mxu1 %v1328_v19 }
  0x6b   : > { %653 = vmatmul.mubr.bf16.gmra.mrb[8].mxu0 %v1283_v38  ;;  %693 = vmatmul.mubr.bf16.gmra.mrb[8].mxu1 %v1284_v39  ;;  %v419_v38 = vld [vmem:[#allocation2 + $0x58] sm:$0xff] }
  0x6c   : > { %662 = vmatprep.mubr.bf16.mxu0 %v1328_v19  ;;  %702 = vmatprep.mubr.bf16.mxu1 %v1328_v19  ;;  %v435_v39 = vld [vmem:[#allocation2 + $0xd8] sm:$0xff] }
  0x73   : > { %663 = vmatmul.mubr.bf16.gmra.mrb[12].mxu0 %v1285_v40  ;;  %703 = vmatmul.mubr.bf16.gmra.mrb[12].mxu1 %v1286_v41 }
 0x12e   : > { %v634_v46 = vpop.f32.mrb[0].mxu0  ;;  %v674_v47 = vpop.f32.mrb[0].mxu1 }
 0x12f   : > { %v713_v50 = vadd.f32 %v634_v46, %v408_v42  ;;  %v729_v51 = vadd.f32 %v674_v47, %v424_v43  ;;  %v636_v52 = vpop.f32.mrb[1].mxu0  ;;  %v676_v53 = vpop.f32.mrb[1].mxu1 }
 0x130   : > { %v714_v56 = vadd.f32 %v636_v52, %v409_v44  ;;  %v730_v57 = vadd.f32 %v676_v53, %v425_v45  ;;  %v638_v58 = vpop.f32.mrb[2].mxu0  ;;  %v678_v59 = vpop.f32.mrb[2].mxu1  ;;  %v421_v52 = vld [vmem:[#allocation2 + $0x68] sm:$0xff] }
 0x131   : > { %745 = vst [vmem:[#allocation2] sm:$0xff] %v713_v50  ;;  %761 = vst [vmem:[#allocation2 + $0x80] sm:$0xff] %v729_v51  ;;  %v715_v60 = vadd.f32 %v638_v58, %v410_v48  ;;  %v731_v61 = vadd.f32 %v678_v59, %v426_v49  ;;  %v640_v62 = vpop.f32.mrb[3].mxu0  ;;  %v680_v63 = vpop.f32.mrb[3].mxu1  ;;  %v420_v50 = vld [vmem:[#allocation2 + $0x60] sm:$0xff]  ;;  %v437_v53 = vld [vmem:[#allocation2 + $0xe8] sm:$0xff] }
 0x132   : > { %746 = vst [vmem:[#allocation2 + $0x8] sm:$0xff] %v714_v56  ;;  %762 = vst [vmem:[#allocation2 + $0x88] sm:$0xff] %v730_v57  ;;  %v716_v0 = vadd.f32 %v640_v62, %v411_v54  ;;  %v732_v1 = vadd.f32 %v680_v63, %v427_v55  ;;  %v436_v51 = vld [vmem:[#allocation2 + $0xe0] sm:$0xff]  ;;  %v422_v56 = vld [vmem:[#allocation2 + $0x70] sm:$0xff] }
 0x133   : > { %747 = vst [vmem:[#allocation2 + $0x10] sm:$0xff] %v715_v60  ;;  %763 = vst [vmem:[#allocation2 + $0x90] sm:$0xff] %v731_v61  ;;  %v438_v57 = vld [vmem:[#allocation2 + $0xf0] sm:$0xff]  ;;  %v423_v62 = vld [vmem:[#allocation2 + $0x78] sm:$0xff] }
 0x134   : > { %748 = vst [vmem:[#allocation2 + $0x18] sm:$0xff] %v716_v0  ;;  %764 = vst [vmem:[#allocation2 + $0x98] sm:$0xff] %v732_v1  ;;  %v439_v63 = vld [vmem:[#allocation2 + $0xf8] sm:$0xff] }
 0x136   : > { %v644_v6 = vpop.f32.mrb[4].mxu0  ;;  %v684_v7 = vpop.f32.mrb[4].mxu1 }
 0x137   : > { %v717_v10 = vadd.f32 %v644_v6, %v412_v2  ;;  %v733_v11 = vadd.f32 %v684_v7, %v428_v3  ;;  %v646_v12 = vpop.f32.mrb[5].mxu0  ;;  %v686_v13 = vpop.f32.mrb[5].mxu1 }
 0x138   : > { %v718_v16 = vadd.f32 %v646_v12, %v413_v4  ;;  %v734_v17 = vadd.f32 %v686_v13, %v429_v5  ;;  %v648_v18 = vpop.f32.mrb[6].mxu0  ;;  %v688_v19 = vpop.f32.mrb[6].mxu1  ;;  %v813_v12 = vld [vmem:[%s1559_s2] sm:$0x3] (!%p1159_p11) }
 0x139   : > { %749 = vst [vmem:[#allocation2 + $0x20] sm:$0xff] %v717_v10  ;;  %765 = vst [vmem:[#allocation2 + $0xa0] sm:$0xff] %v733_v11  ;;  %v719_v20 = vadd.f32 %v648_v18, %v414_v8  ;;  %v735_v21 = vadd.f32 %v688_v19, %v430_v9  ;;  %v650_v22 = vpop.f32.mrb[7].mxu0  ;;  %v690_v23 = vpop.f32.mrb[7].mxu1  ;;  %v815_v10 = vlaneseq (!%p1159_p11)  ;;  %v781_v13 = vld [vmem:[#allocation2] sm:$0xff] (!%p1159_p11) }
 0x13a   : > { %750 = vst [vmem:[#allocation2 + $0x28] sm:$0xff] %v718_v16  ;;  %766 = vst [vmem:[#allocation2 + $0xa8] sm:$0xff] %v734_v17  ;;  %v720_v24 = vadd.f32 %v650_v22, %v415_v14  ;;  %v736_v25 = vadd.f32 %v690_v23, %v431_v15  ;;  %v782_v14 = vld [vmem:[#allocation2 + $0x8] sm:$0xff] (!%p1159_p11)  ;;  %v783_v17 = vld [vmem:[#allocation2 + $0x10] sm:$0xff] (!%p1159_p11) }
 0x13b   : > { %751 = vst [vmem:[#allocation2 + $0x30] sm:$0xff] %v719_v20  ;;  %767 = vst [vmem:[#allocation2 + $0xb0] sm:$0xff] %v735_v21  ;;  %v816_v11 = vshrl.u32 (!%p1159_p11), %v815_v10, 7  ;;  %v784_v18 = vld [vmem:[#allocation2 + $0x18] sm:$0xff] (!%p1159_p11) }
 0x13c   : > { %752 = vst [vmem:[#allocation2 + $0x38] sm:$0xff] %v720_v24  ;;  %768 = vst [vmem:[#allocation2 + $0xb8] sm:$0xff] %v736_v25 }
 0x13d   : > { %v817_v15 = vsub.s32 (!%p1159_p11), 0, %v816_v11  ;;  %v821_v16 = vsub.s32 (!%p1159_p11), 1, %v816_v11 }
 0x13e   : > { %v654_v30 = vpop.f32.mrb[8].mxu0  ;;  %v694_v31 = vpop.f32.mrb[8].mxu1 }
 0x13f   : > { %v721_v34 = vadd.f32 %v654_v30, %v416_v26  ;;  %v737_v35 = vadd.f32 %v694_v31, %v432_v27  ;;  %v656_v36 = vpop.f32.mrb[9].mxu0  ;;  %v696_v37 = vpop.f32.mrb[9].mxu1  ;;  %v1458_v20 = vrot.slane (!%p1159_p11), %v813_v12, %v817_v15  ;;  %v1460_v21 = vrot.slane (!%p1159_p11), %v813_v12, %v821_v16 }
 0x140   : > { %v722_v40 = vadd.f32 %v656_v36, %v417_v28  ;;  %v738_v41 = vadd.f32 %v696_v37, %v433_v29  ;;  %v658_v42 = vpop.f32.mrb[10].mxu0  ;;  %v698_v43 = vpop.f32.mrb[10].mxu1  ;;  %v785_v19 = vld [vmem:[#allocation2 + $0x20] sm:$0xff] (!%p1159_p11) }
 0x141   : > { %753 = vst [vmem:[#allocation2 + $0x40] sm:$0xff] %v721_v34  ;;  %769 = vst [vmem:[#allocation2 + $0xc0] sm:$0xff] %v737_v35  ;;  %v723_v44 = vadd.f32 %v658_v42, %v418_v32  ;;  %v739_v45 = vadd.f32 %v698_v43, %v434_v33  ;;  %v660_v46 = vpop.f32.mrb[11].mxu0  ;;  %v700_v47 = vpop.f32.mrb[11].mxu1  ;;  %v786_v22 = vld [vmem:[#allocation2 + $0x28] sm:$0xff] (!%p1159_p11)  ;;  %v825_v25 = vadd.f32 (!%p1159_p11), %v1458_v20, %v781_v13 }
 0x142   : > { %754 = vst [vmem:[#allocation2 + $0x48] sm:$0xff] %v722_v40  ;;  %770 = vst [vmem:[#allocation2 + $0xc8] sm:$0xff] %v738_v41  ;;  %v724_v48 = vadd.f32 %v660_v46, %v419_v38  ;;  %v740_v49 = vadd.f32 %v700_v47, %v435_v39  ;;  %v787_v23 = vld [vmem:[#allocation2 + $0x30] sm:$0xff] (!%p1159_p11)  ;;  %v826_v26 = vadd.f32 (!%p1159_p11), %v1460_v21, %v782_v14  ;;  %v802_v10 = vld [vmem:[#allocation2 + $0xa8] sm:$0xff] (!%p1159_p11) }
 0x143   : > { %755 = vst [vmem:[#allocation2 + $0x50] sm:$0xff] %v723_v44  ;;  %771 = vst [vmem:[#allocation2 + $0xd0] sm:$0xff] %v739_v45  ;;  %v788_v24 = vld [vmem:[#allocation2 + $0x38] sm:$0xff] (!%p1159_p11)  ;;  %v827_v27 = vadd.f32 (!%p1159_p11), %v1458_v20, %v783_v17  ;;  %v828_v28 = vadd.f32 (!%p1159_p11), %v1460_v21, %v784_v18  ;;  %v829_v29 = vadd.f32 (!%p1159_p11), %v1458_v20, %v785_v19  ;;  %v857_v35 = vmax.f32 (!%p1159_p11), %v825_v25, 0.0  ;;  %v803_v15 = vld [vmem:[#allocation2 + $0xb0] sm:$0xff] (!%p1159_p11) }
 0x144   : > { %756 = vst [vmem:[#allocation2 + $0x58] sm:$0xff] %v724_v48  ;;  %772 = vst [vmem:[#allocation2 + $0xd8] sm:$0xff] %v740_v49  ;;  %v830_v30 = vadd.f32 (!%p1159_p11), %v1460_v21, %v786_v22  ;;  %v831_v31 = vadd.f32 (!%p1159_p11), %v1458_v20, %v787_v23  ;;  %v832_v32 = vadd.f32 (!%p1159_p11), %v1460_v21, %v788_v24  ;;  %v858_v36 = vmax.f32 (!%p1159_p11), %v826_v26, 0.0  ;;  %v804_v16 = vld [vmem:[#allocation2 + $0xb8] sm:$0xff] (!%p1159_p11) }
 0x145   : > { %v859_v37 = vmax.f32 (!%p1159_p11), %v827_v27, 0.0  ;;  %v860_v38 = vmax.f32 (!%p1159_p11), %v828_v28, 0.0  ;;  %v861_v41 = vmax.f32 (!%p1159_p11), %v829_v29, 0.0  ;;  %v846_v27 = vadd.f32 (!%p1159_p11), %v1460_v21, %v802_v10 }
 0x146   : > { %v664_v54 = vpop.f32.mrb[12].mxu0  ;;  %v704_v55 = vpop.f32.mrb[12].mxu1  ;;  %780 = sbr.rel (%p1159_p11) target bundleno = 349 (0x15d), region = 81  ;;  %v862_v42 = vmax.f32 (!%p1159_p11), %v830_v30, 0.0  ;;  %v863_v43 = vmax.f32 (!%p1159_p11), %v831_v31, 0.0  ;;  %v864_v44 = vmax.f32 (!%p1159_p11), %v832_v32, 0.0  ;;  %v1181_v47 = vpack.c.bf16 (!%p1159_p11), %v858_v36, %v857_v35 }
 0x147   : > { %v725_v58 = vadd.f32 %v664_v54, %v420_v50  ;;  %v741_v59 = vadd.f32 %v704_v55, %v436_v51  ;;  %v666_v60 = vpop.f32.mrb[13].mxu0  ;;  %v706_v61 = vpop.f32.mrb[13].mxu1  ;;  %v1182_v48 = vpack.c.bf16 (!%p1159_p11), %v860_v38, %v859_v37  ;;  %v847_v31 = vadd.f32 (!%p1159_p11), %v1458_v20, %v803_v15 }
 0x148   : > { %v726_v0 = vadd.f32 %v666_v60, %v421_v52  ;;  %v742_v1 = vadd.f32 %v706_v61, %v437_v53  ;;  %v668_v2 = vpop.f32.mrb[14].mxu0  ;;  %v708_v3 = vpop.f32.mrb[14].mxu1  ;;  %v789_v33 = vld [vmem:[#allocation2 + $0x40] sm:$0xff] (!%p1159_p11)  ;;  %v1183_v53 = vpack.c.bf16 (!%p1159_p11), %v862_v42, %v861_v41  ;;  %v1184_v54 = vpack.c.bf16 (!%p1159_p11), %v864_v44, %v863_v43  ;;  %985 = vst [vmem:[%s1560_s3] sm:$0xff] (!%p1159_p11), %v1181_v47 }
 0x149   : > { %757 = vst [vmem:[#allocation2 + $0x60] sm:$0xff] %v725_v58  ;;  %773 = vst [vmem:[#allocation2 + $0xe0] sm:$0xff] %v741_v59  ;;  %v727_v4 = vadd.f32 %v668_v2, %v422_v56  ;;  %v743_v5 = vadd.f32 %v708_v3, %v438_v57  ;;  %v670_v6 = vpop.f32.mrb[15].mxu0  ;;  %v710_v7 = vpop.f32.mrb[15].mxu1  ;;  %v790_v34 = vld [vmem:[#allocation2 + $0x48] sm:$0xff] (!%p1159_p11)  ;;  %v833_v49 = vadd.f32 (!%p1159_p11), %v1458_v20, %v789_v33  ;;  %v797_v57 = vld [vmem:[#allocation2 + $0x80] sm:$0xff] (!%p1159_p11) }
 0x14a   : > { %758 = vst [vmem:[#allocation2 + $0x68] sm:$0xff] %v726_v0  ;;  %774 = vst [vmem:[#allocation2 + $0xe8] sm:$0xff] %v742_v1  ;;  %v728_v8 = vadd.f32 %v670_v6, %v423_v62  ;;  %v744_v9 = vadd.f32 %v710_v7, %v439_v63  ;;  %v791_v39 = vld [vmem:[#allocation2 + $0x50] sm:$0xff] (!%p1159_p11)  ;;  %v834_v50 = vadd.f32 (!%p1159_p11), %v1460_v21, %v790_v34  ;;  %v798_v62 = vld [vmem:[#allocation2 + $0x88] sm:$0xff] (!%p1159_p11)  ;;  %v878_v37 = vmax.f32 (!%p1159_p11), %v846_v27, 0.0 }
 0x14b   : > { %759 = vst [vmem:[#allocation2 + $0x70] sm:$0xff] %v727_v4  ;;  %775 = vst [vmem:[#allocation2 + $0xf0] sm:$0xff] %v743_v5  ;;  %v792_v40 = vld [vmem:[#allocation2 + $0x58] sm:$0xff] (!%p1159_p11)  ;;  %v835_v55 = vadd.f32 (!%p1159_p11), %v1458_v20, %v791_v39  ;;  %v865_v58 = vmax.f32 (!%p1159_p11), %v833_v49, 0.0  ;;  %v799_v3 = vld [vmem:[#allocation2 + $0x90] sm:$0xff] (!%p1159_p11)  ;;  %v842_v14 = vadd.f32 (!%p1159_p11), %v1460_v21, %v798_v62  ;;  %v848_v32 = vadd.f32 (!%p1159_p11), %v1460_v21, %v804_v16 }
 0x14c   : > { %760 = vst [vmem:[#allocation2 + $0x78] sm:$0xff] %v728_v8  ;;  %776 = vst [vmem:[#allocation2 + $0xf8] sm:$0xff] %v744_v9  ;;  %v836_v56 = vadd.f32 (!%p1159_p11), %v1460_v21, %v792_v40  ;;  %v866_v59 = vmax.f32 (!%p1159_p11), %v834_v50, 0.0  ;;  %v800_v4 = vld [vmem:[#allocation2 + $0x98] sm:$0xff] (!%p1159_p11)  ;;  %v841_v8 = vadd.f32 (!%p1159_p11), %v1458_v20, %v797_v57  ;;  %v801_v9 = vld [vmem:[#allocation2 + $0xa0] sm:$0xff] (!%p1159_p11)  ;;  %v843_v19 = vadd.f32 (!%p1159_p11), %v1458_v20, %v799_v3 }
 0x14d   : > { %986 = vst [vmem:[%s1560_s3 + $0x8] sm:$0xff] %v1182_v48  ;;  %987 = vst [vmem:[%s1560_s3 + $0x10] sm:$0xff] %v1183_v53  ;;  %v867_v63 = vmax.f32 %v835_v55, 0.0  ;;  %v844_v22 = vadd.f32 %v1460_v21, %v800_v4  ;;  %v805_v23 = vld [vmem:[#allocation2 + $0xc0] sm:$0xff]  ;;  %v874_v25 = vmax.f32 %v842_v14, 0.0  ;;  %v845_v26 = vadd.f32 %v1458_v20, %v801_v9  ;;  %v806_v28 = vld [vmem:[#allocation2 + $0xc8] sm:$0xff] }
 0x14e   : > { %988 = vst [vmem:[%s1560_s3 + $0x18] sm:$0xff] %v1184_v54  ;;  %v868_v0 = vmax.f32 %v836_v56, 0.0  ;;  %v1185_v5 = vpack.c.bf16 %v866_v59, %v865_v58  ;;  %v873_v18 = vmax.f32 %v841_v8, 0.0  ;;  %v875_v29 = vmax.f32 %v843_v19, 0.0  ;;  %v807_v33 = vld [vmem:[#allocation2 + $0xd0] sm:$0xff]  ;;  %v808_v34 = vld [vmem:[#allocation2 + $0xd8] sm:$0xff] }
 0x14f   : > { %v876_v30 = vmax.f32 %v844_v22, 0.0  ;;  %v877_v36 = vmax.f32 %v845_v26, 0.0  ;;  %v849_v38 = vadd.f32 %v1458_v20, %v805_v23  ;;  %v879_v42 = vmax.f32 %v847_v31, 0.0 }
 0x150   : > { %v793_v45 = vld [vmem:[#allocation2 + $0x60] sm:$0xff]  ;;  %v1186_v11 = vpack.c.bf16 %v868_v0, %v867_v63  ;;  %989 = vst [vmem:[%s1560_s3 + $0x20] sm:$0xff] %v1185_v5  ;;  %v1189_v35 = vpack.c.bf16 %v874_v25, %v873_v18  ;;  %v880_v43 = vmax.f32 %v848_v32, 0.0  ;;  %v850_v44 = vadd.f32 %v1460_v21, %v806_v28 }
 0x151   : > { %v794_v46 = vld [vmem:[#allocation2 + $0x68] sm:$0xff]  ;;  %v837_v60 = vadd.f32 %v1458_v20, %v793_v45  ;;  %v809_v39 = vld [vmem:[#allocation2 + $0xe0] sm:$0xff]  ;;  %v1190_v41 = vpack.c.bf16 %v876_v30, %v875_v29  ;;  %v1191_v47 = vpack.c.bf16 %v878_v37, %v877_v36  ;;  %v881_v48 = vmax.f32 %v849_v38, 0.0 }
 0x152   : > { %v795_v51 = vld [vmem:[#allocation2 + $0x70] sm:$0xff]  ;;  %v838_v61 = vadd.f32 %v1460_v21, %v794_v46  ;;  %990 = vst [vmem:[%s1560_s3 + $0x28] sm:$0xff] %v1186_v11  ;;  %v810_v40 = vld [vmem:[#allocation2 + $0xe8] sm:$0xff]  ;;  %993 = vst [vmem:[%s1560_s3 + $0x40] sm:$0xff] %v1189_v35  ;;  %v851_v49 = vadd.f32 %v1458_v20, %v807_v33  ;;  %v852_v50 = vadd.f32 %v1460_v21, %v808_v34 }
 0x153   : > { %v796_v52 = vld [vmem:[#allocation2 + $0x78] sm:$0xff]  ;;  %v839_v1 = vadd.f32 %v1458_v20, %v795_v51  ;;  %v869_v6 = vmax.f32 %v837_v60, 0.0  ;;  %v811_v45 = vld [vmem:[#allocation2 + $0xf0] sm:$0xff]  ;;  %994 = vst [vmem:[%s1560_s3 + $0x48] sm:$0xff] %v1190_v41  ;;  %v1192_v51 = vpack.c.bf16 %v880_v43, %v879_v42  ;;  %v853_v53 = vadd.f32 %v1458_v20, %v809_v39  ;;  %995 = vst [vmem:[%s1560_s3 + $0x50] sm:$0xff] %v1191_v47 }
 0x154   : > { %v840_v2 = vadd.f32 %v1460_v21, %v796_v52  ;;  %v870_v7 = vmax.f32 %v838_v61, 0.0  ;;  %v812_v46 = vld [vmem:[#allocation2 + $0xf8] sm:$0xff]  ;;  %v882_v52 = vmax.f32 %v850_v44, 0.0  ;;  %v854_v54 = vadd.f32 %v1460_v21, %v810_v40 }
 0x155   : > { %v871_v12 = vmax.f32 %v839_v1, 0.0  ;;  %v883_v55 = vmax.f32 %v851_v49, 0.0  ;;  %v884_v56 = vmax.f32 %v852_v50, 0.0  ;;  %v855_v57 = vadd.f32 %v1458_v20, %v811_v45  ;;  %996 = vst [vmem:[%s1560_s3 + $0x58] sm:$0xff] %v1192_v51 }
 0x156   : > { %v872_v13 = vmax.f32 %v840_v2, 0.0  ;;  %v1187_v17 = vpack.c.bf16 %v870_v7, %v869_v6  ;;  %v856_v58 = vadd.f32 %v1460_v21, %v812_v46  ;;  %v1193_v59 = vpack.c.bf16 %v882_v52, %v881_v48 }
 0x157   : > { %v885_v60 = vmax.f32 %v853_v53, 0.0  ;;  %v886_v61 = vmax.f32 %v854_v54, 0.0  ;;  %v1194_v62 = vpack.c.bf16 %v884_v56, %v883_v55  ;;  %v887_v63 = vmax.f32 %v855_v57, 0.0 }
 0x158   : > { %v1188_v24 = vpack.c.bf16 %v872_v13, %v871_v12  ;;  %991 = vst [vmem:[%s1560_s3 + $0x30] sm:$0xff] %v1187_v17  ;;  %v888_v0 = vmax.f32 %v856_v58, 0.0  ;;  %997 = vst [vmem:[%s1560_s3 + $0x60] sm:$0xff] %v1193_v59 }
 0x159   : > { %v1195_v1 = vpack.c.bf16 %v886_v61, %v885_v60  ;;  %998 = vst [vmem:[%s1560_s3 + $0x68] sm:$0xff] %v1194_v62 }
 0x15a   : > { %992 = vst [vmem:[%s1560_s3 + $0x38] sm:$0xff] %v1188_v24  ;;  %v1196_v20 = vpack.c.bf16 %v888_v0, %v887_v63 }
 0x15b   : > { %999 = vst [vmem:[%s1560_s3 + $0x70] sm:$0xff] %v1195_v1 }
 0x15c   : > { %1000 = vst [vmem:[%s1560_s3 + $0x78] sm:$0xff] %v1196_v20 }
 0x15d PF: > { %s13_s16 = sadd.s32 1, %s1325_s16   ;;  %s1561_s12 = smov %s1313_s13 }
 0x15e   : > { %p10_p12 = scmp.ge.s32.totalorder %s13_s16, 11   ;;  %s1562_s13 = smov %s1384_s20 }
 0x15f   : > { %s1563_s14 = smov %s1321_s15  ;;  %s1564_s15 = smov %s1566_s17 }
 0x160   :  { %12 = sbr.rel (!%p10_p12) target bundleno = 3 (0x3), region = 122 }

// kernel: _lambda_.22
= control target key start
LH: loop header
LB: loop body
LE: loop exit
PB: predicated region body
PF: predicated region fallthrough
CT: control target
= control target key end

     0   :  { %s1552_s12 = smov 0   ;;  %s1554_s13 = smov 0   ;;  %s1776_s0 = inlined_call_operand.vmem [shape: bf16[128,2304], index: 0, kind: input, shape index: {}]   ;;  %s1777_s1 = inlined_call_operand.vmem [shape: bf16[2304,256], index: 1, kind: input, shape index: {}]   ;;  %s1778_s2 = inlined_call_operand.vmem [shape: f32[1,256], index: 2, kind: input, shape index: {}]   ;;  %s1779_s3 = inlined_call_operand.vmem [shape: bf16[128,256], index: 3, kind: output, shape index: {}]  }
   0x1   :  { %s1556_s14 = smov 0   ;;  %s1558_s15 = smov 0  }
   0x2   :  { %s1560_s16 = smov 0  }
   0x3 LB: > { %s25_s17 = sadd.s32 1, %s1525_s15  ;;  %p48_p1 = scmp.ne.s32.totalorder %s1517_s13, %s1513_s12  ;;  %s1529_s16 = sphi %s1560_s16, %s13_s16   ;;  %s1525_s15 = sphi %s1558_s15, %s1783_s15   ;;  %s1521_s14 = sphi %s1556_s14, %s1782_s14   ;;  %s1517_s13 = sphi %s1554_s13, %s1781_s13   ;;  %s1513_s12 = sphi %s1552_s12, %s1780_s12  }
   0x4   : > { %p26_p0 = scmp.ge.s32.totalorder %s25_s17, 9  ;;  %p49_p2 = scmp.eq.s32.totalorder %s1529_s16, 0 }
   0x5   : > { %s41_s19 = sadd.s32 1, %s1517_s13  ;;  %p1249_p5 = scmp.ge.s32.totalorder %s1529_s16, 9 }
   0x6   : > { %s1785_s17 = smov (%p26_p0, %s25_s17), 0  ;;  %p50_p3 = por %p49_p2, %p48_p1 }
   0x7   : > { %s37_s18 = ssub.s32 %s1525_s15, %s1785_s17  ;;  %164 = sbr.rel (%p1249_p5) target bundleno = 26 (0x1a), region = 20 }
   0x8   : > { %p39_p4 = scmp.eq.s32.totalorder %s37_s18, 0 }
   0xa   : > { %s1587_s20 = scalar_select %p39_p4, %s1517_s13, %s41_s19  }
   0xe   : > { %167 = sbr.rel (!%p50_p3) target bundleno = 26 (0x1a), region = 24  ;;  %s169_s21 = sand.u32 (%p50_p3), 1, %s1517_s13  }
   0xf   : > { %s1328_s22 = sshll.u32 (%p50_p3), %s1525_s15, 3  ;;  %s1250_s23 = sshll.u32 (%p50_p3), %s169_s21, 7 }
  0x10   : > { %s1595_s26 = scalar_lea.vmem (%p50_p3), %s1776_s0, %s1328_s22  ;;  %s171_s27 = scalar_lea.vmem (%p50_p3), [#allocation3], %s1250_s23 }
  0x11   : > { %v235_v0 = vld [vmem:[%s1595_s26] sm:$0xff] (%p50_p3)  ;;  %v237_v1 = vld [vmem:[%s1595_s26 + $0x48] sm:$0xff] (%p50_p3)  ;;  %v239_v2 = vld [vmem:[%s1595_s26 + $0x90] sm:$0xff] (%p50_p3) }
  0x12   : > { %236 = vst [vmem:[%s171_s27] sm:$0xff] (%p50_p3), %v235_v0  ;;  %238 = vst [vmem:[%s171_s27 + $0x8] sm:$0xff] (%p50_p3), %v237_v1  ;;  %v241_v3 = vld [vmem:[%s1595_s26 + $0xd8] sm:$0xff] (%p50_p3)  ;;  %v243_v4 = vld [vmem:[%s1595_s26 + $0x120] sm:$0xff] (%p50_p3) }
  0x13   : > { %240 = vst [vmem:[%s171_s27 + $0x10] sm:$0xff] (%p50_p3), %v239_v2  ;;  %v245_v5 = vld [vmem:[%s1595_s26 + $0x168] sm:$0xff] (%p50_p3)  ;;  %242 = vst [vmem:[%s171_s27 + $0x18] sm:$0xff] (%p50_p3), %v241_v3  ;;  %v247_v6 = vld [vmem:[%s1595_s26 + $0x1b0] sm:$0xff] (%p50_p3) }
  0x14   : > { %244 = vst [vmem:[%s171_s27 + $0x20] sm:$0xff] (%p50_p3), %v243_v4  ;;  %246 = vst [vmem:[%s171_s27 + $0x28] sm:$0xff] (%p50_p3), %v245_v5  ;;  %v249_v7 = vld [vmem:[%s1595_s26 + $0x1f8] sm:$0xff] (%p50_p3)  ;;  %v251_v8 = vld [vmem:[%s1595_s26 + $0x240] sm:$0xff] (%p50_p3) }
  0x15   : > { %248 = vst [vmem:[%s171_s27 + $0x30] sm:$0xff] %v247_v6  ;;  %250 = vst [vmem:[%s171_s27 + $0x38] sm:$0xff] %v249_v7  ;;  %v253_v9 = vld [vmem:[%s1595_s26 + $0x288] sm:$0xff]  ;;  %v255_v10 = vld [vmem:[%s1595_s26 + $0x2d0] sm:$0xff] }
  0x16   : > { %252 = vst [vmem:[%s171_s27 + $0x40] sm:$0xff] %v251_v8  ;;  %v257_v11 = vld [vmem:[%s1595_s26 + $0x318] sm:$0xff]  ;;  %254 = vst [vmem:[%s171_s27 + $0x48] sm:$0xff] %v253_v9  ;;  %v259_v12 = vld [vmem:[%s1595_s26 + $0x360] sm:$0xff] }
  0x17   : > { %256 = vst [vmem:[%s171_s27 + $0x50] sm:$0xff] %v255_v10  ;;  %258 = vst [vmem:[%s171_s27 + $0x58] sm:$0xff] %v257_v11  ;;  %v261_v13 = vld [vmem:[%s1595_s26 + $0x3a8] sm:$0xff]  ;;  %v263_v14 = vld [vmem:[%s1595_s26 + $0x3f0] sm:$0xff] }
  0x18   : > { %260 = vst [vmem:[%s171_s27 + $0x60] sm:$0xff] %v259_v12  ;;  %262 = vst [vmem:[%s171_s27 + $0x68] sm:$0xff] %v261_v13  ;;  %v265_v15 = vld [vmem:[%s1595_s26 + $0x438] sm:$0xff] }
  0x19   : > { %264 = vst [vmem:[%s171_s27 + $0x70] sm:$0xff] %v263_v14  ;;  %266 = vst [vmem:[%s171_s27 + $0x78] sm:$0xff] %v265_v15 }
  0x1a PF: > { %p1253_p6 = scmp.ge.s32.totalorder %s1529_s16, 1  ;;  %p286_p7 = scmp.lt.s32.totalorder %s1529_s16, 10 }
  0x1c   : > { %p287_p8 = pnand %p1253_p6, %p286_p7 }
  0x1d   : > { %s293_s28 = sand.u32 (!%p287_p8), 1, %s1513_s12   ;;  %s1255_s29 = sshll.u32 (!%p287_p8), %s1521_s14, 5 }
  0x1e   : > { %290 = sbr.rel (%p287_p8) target bundleno = 378 (0x17a), region = 66  ;;  %s1254_s30 = sshll.u32 (!%p287_p8), %s293_s28, 7 }
  0x1f   : > { %p339_p9 = scmp.lt.s32.totalorder (!%p287_p8), %s1255_s29, 287  ;;  %s1622_s8 = scalar_lea.vmem (!%p287_p8), [#allocation3], %s1254_s30 }
  0x20   : > { %p1258_p10 = scmp.ne.s32.totalorder (!%p287_p8), %s1521_s14, 0 }
  0x25   : > { %s1787_s29 = smov (!%p339_p9, %s1255_s29), 287  ;;  %369 = sbr.rel (%p1258_p10) target bundleno = 55 (0x37), region = 74 }
  0x26   : > { %s1329_s4 = sshll.u32 %s1787_s29, 3  ;;  %v1531_v16 = vmov (!%p1258_p10), 0.0  }
  0x27   : > { %s1620_s7 = scalar_lea.vmem %s1777_s1, %s1329_s4  ;;  %370 = vst [vmem:[#allocation2] sm:$0xff] (!%p1258_p10), %v1531_v16  ;;  %371 = vst [vmem:[#allocation2 + $0x8] sm:$0xff] (!%p1258_p10), %v1531_v16 }
  0x28   : > { %372 = vst [vmem:[#allocation2 + $0x10] sm:$0xff] (!%p1258_p10), %v1531_v16  ;;  %373 = vst [vmem:[#allocation2 + $0x18] sm:$0xff] (!%p1258_p10), %v1531_v16 }
  0x29   : > { %374 = vst [vmem:[#allocation2 + $0x20] sm:$0xff] (!%p1258_p10), %v1531_v16  ;;  %375 = vst [vmem:[#allocation2 + $0x28] sm:$0xff] (!%p1258_p10), %v1531_v16 }
  0x2a   : > { %376 = vst [vmem:[#allocation2 + $0x30] sm:$0xff] (!%p1258_p10), %v1531_v16  ;;  %377 = vst [vmem:[#allocation2 + $0x38] sm:$0xff] (!%p1258_p10), %v1531_v16 }
  0x2b   : > { %378 = vst [vmem:[#allocation2 + $0x40] sm:$0xff] (!%p1258_p10), %v1531_v16  ;;  %379 = vst [vmem:[#allocation2 + $0x48] sm:$0xff] (!%p1258_p10), %v1531_v16 }
  0x2c   : > { %380 = vst [vmem:[#allocation2 + $0x50] sm:$0xff] %v1531_v16  ;;  %381 = vst [vmem:[#allocation2 + $0x58] sm:$0xff] %v1531_v16 }
  0x2d   : > { %382 = vst [vmem:[#allocation2 + $0x60] sm:$0xff] %v1531_v16  ;;  %383 = vst [vmem:[#allocation2 + $0x68] sm:$0xff] %v1531_v16 }
  0x2e   : > { %384 = vst [vmem:[#allocation2 + $0x70] sm:$0xff] %v1531_v16  ;;  %385 = vst [vmem:[#allocation2 + $0x78] sm:$0xff] %v1531_v16 }
  0x2f   : > { %386 = vst [vmem:[#allocation2 + $0x80] sm:$0xff] %v1531_v16  ;;  %387 = vst [vmem:[#allocation2 + $0x88] sm:$0xff] %v1531_v16 }
  0x30   : > { %388 = vst [vmem:[#allocation2 + $0x90] sm:$0xff] %v1531_v16  ;;  %389 = vst [vmem:[#allocation2 + $0x98] sm:$0xff] %v1531_v16 }
  0x31   : > { %390 = vst [vmem:[#allocation2 + $0xa0] sm:$0xff] %v1531_v16  ;;  %391 = vst [vmem:[#allocation2 + $0xa8] sm:$0xff] %v1531_v16 }
  0x32   : > { %392 = vst [vmem:[#allocation2 + $0xb0] sm:$0xff] %v1531_v16  ;;  %393 = vst [vmem:[#allocation2 + $0xb8] sm:$0xff] %v1531_v16 }
  0x33   : > { %394 = vst [vmem:[#allocation2 + $0xc0] sm:$0xff] %v1531_v16  ;;  %395 = vst [vmem:[#allocation2 + $0xc8] sm:$0xff] %v1531_v16 }
  0x34   : > { %396 = vst [vmem:[#allocation2 + $0xd0] sm:$0xff] %v1531_v16  ;;  %397 = vst [vmem:[#allocation2 + $0xd8] sm:$0xff] %v1531_v16 }
  0x35   : > { %398 = vst [vmem:[#allocation2 + $0xe0] sm:$0xff] %v1531_v16  ;;  %399 = vst [vmem:[#allocation2 + $0xe8] sm:$0xff] %v1531_v16 }
  0x36   : > { %400 = vst [vmem:[#allocation2 + $0xf0] sm:$0xff] %v1531_v16  ;;  %401 = vst [vmem:[#allocation2 + $0xf8] sm:$0xff] %v1531_v16 }
  0x37 PF: > { %v1419_v17 = vld [vmem:[%s1620_s7 + $0x4] ss:$8 sps:$4 sm:$0xff]   ;;  %v1421_v18 = vld [vmem:[%s1620_s7] ss:$8 sps:$4 sm:$0xff]   ;;  %v1422_v19 = vld [vmem:[%s1620_s7 + $0x14] ss:$8 sps:$4 sm:$0xff]  }
  0x38   : > { %722 = vmatprep.subr.bf16.mxu0 %v1419_v17  ;;  %1346 = vmatprep.subr.bf16.mxu1 %v1419_v17  ;;  %v1424_v20 = vld [vmem:[%s1620_s7 + $0x10] ss:$8 sps:$4 sm:$0xff]   ;;  %v1425_v21 = vld [vmem:[%s1620_s7 + $0x24] ss:$8 sps:$4 sm:$0xff]   ;;  %v1427_v22 = vld [vmem:[%s1620_s7 + $0x20] ss:$8 sps:$4 sm:$0xff]  }
  0x39   : > { %723 = vmatpush1.bf16.msra.mxu0 %v1421_v18  ;;  %1362 = vmatpush1.bf16.msra.mxu1 %v1421_v18  ;;  %v1428_v23 = vld [vmem:[%s1620_s7 + $0x34] ss:$8 sps:$4 sm:$0xff]   ;;  %v1430_v24 = vld [vmem:[%s1620_s7 + $0x30] ss:$8 sps:$4 sm:$0xff]   ;;  %v1431_v25 = vld [vmem:[%s1620_s7 + $0x44] ss:$8 sps:$4 sm:$0xff]  }
  0x3a   : > { %724 = vmatprep.subr.bf16.mxu0 %v1422_v19  ;;  %1347 = vmatprep.subr.bf16.mxu1 %v1422_v19  ;;  %v1433_v26 = vld [vmem:[%s1620_s7 + $0x40] ss:$8 sps:$4 sm:$0xff]   ;;  %v1434_v27 = vld [vmem:[%s1620_s7 + $0x54] ss:$8 sps:$4 sm:$0xff]   ;;  %v1436_v28 = vld [vmem:[%s1620_s7 + $0x50] ss:$8 sps:$4 sm:$0xff]  }
  0x3b   : > { %v1437_v29 = vld [vmem:[%s1620_s7 + $0x64] ss:$8 sps:$4 sm:$0xff]   ;;  %v1439_v31 = vld [vmem:[%s1620_s7 + $0x60] ss:$8 sps:$4 sm:$0xff]   ;;  %v1440_v33 = vld [vmem:[%s1620_s7 + $0x74] ss:$8 sps:$4 sm:$0xff]  }
  0x3c   : > { %v1469_v30 = vld [vmem:[%s1622_s8 + $0x4] ss:$8 sps:$4 sm:$0xff]   ;;  %v1442_v34 = vld [vmem:[%s1620_s7 + $0x70] ss:$8 sps:$4 sm:$0xff]   ;;  %v1445_v36 = vld [vmem:[%s1620_s7 + $0x80] ss:$8 sps:$4 sm:$0xff]  }
  0x3d   : > { %725 = vmatpush1.bf16.msra.mxu0 %v1424_v20  ;;  %1363 = vmatpush1.bf16.msra.mxu1 %v1424_v20  ;;  %v1472_v32 = vld [vmem:[%s1622_s8 + $0x44] ss:$8 sps:$4 sm:$0xff]   ;;  %v1446_v37 = vld [vmem:[%s1620_s7 + $0x94] ss:$8 sps:$4 sm:$0xff]   ;;  %v1448_v38 = vld [vmem:[%s1620_s7 + $0x90] ss:$8 sps:$4 sm:$0xff]  }
  0x3e   : > { %726 = vmatprep.subr.bf16.mxu0 %v1425_v21  ;;  %1348 = vmatprep.subr.bf16.mxu1 %v1425_v21  ;;  %v1443_v35 = vld [vmem:[%s1620_s7 + $0x84] ss:$8 sps:$4 sm:$0xff]   ;;  %v1451_v40 = vld [vmem:[%s1620_s7 + $0xa0] ss:$8 sps:$4 sm:$0xff]   ;;  %v1452_v41 = vld [vmem:[%s1620_s7 + $0xb4] ss:$8 sps:$4 sm:$0xff]  }
  0x3f   : > { %754 = vmatprep.mubr.bf16.mxu0 %v1469_v30  ;;  %794 = vmatprep.mubr.bf16.mxu1 %v1472_v32  ;;  %v1449_v39 = vld [vmem:[%s1620_s7 + $0xa4] ss:$8 sps:$4 sm:$0xff]   ;;  %v1454_v42 = vld [vmem:[%s1620_s7 + $0xb0] ss:$8 sps:$4 sm:$0xff]   ;;  %v1457_v44 = vld [vmem:[%s1620_s7 + $0xc0] ss:$8 sps:$4 sm:$0xff]  }
  0x40   : > { %v1455_v43 = vld [vmem:[%s1620_s7 + $0xc4] ss:$8 sps:$4 sm:$0xff]   ;;  %v1458_v45 = vld [vmem:[%s1620_s7 + $0xd4] ss:$8 sps:$4 sm:$0xff]   ;;  %v1460_v46 = vld [vmem:[%s1620_s7 + $0xd0] ss:$8 sps:$4 sm:$0xff]  }
  0x41   : > { %727 = vmatpush1.bf16.msra.mxu0 %v1427_v22  ;;  %1364 = vmatpush1.bf16.msra.mxu1 %v1427_v22  ;;  %v1461_v47 = vld [vmem:[%s1620_s7 + $0xe4] ss:$8 sps:$4 sm:$0xff]   ;;  %v1463_v48 = vld [vmem:[%s1620_s7 + $0xe0] ss:$8 sps:$4 sm:$0xff]   ;;  %v1464_v49 = vld [vmem:[%s1620_s7 + $0xf4] ss:$8 sps:$4 sm:$0xff]  }
  0x42   : > { %728 = vmatprep.subr.bf16.mxu0 %v1428_v23  ;;  %1349 = vmatprep.subr.bf16.mxu1 %v1428_v23  ;;  %v1466_v50 = vld [vmem:[%s1620_s7 + $0xf0] ss:$8 sps:$4 sm:$0xff]   ;;  %v1467_v51 = vld [vmem:[%s1622_s8] ss:$8 sps:$4 sm:$0xff]   ;;  %v1473_v53 = vld [vmem:[%s1622_s8 + $0x14] ss:$8 sps:$4 sm:$0xff]  }
  0x43   : > { %v1470_v52 = vld [vmem:[%s1622_s8 + $0x40] ss:$8 sps:$4 sm:$0xff]   ;;  %v1475_v54 = vld [vmem:[%s1622_s8 + $0x54] ss:$8 sps:$4 sm:$0xff]   ;;  %v1477_v55 = vld [vmem:[%s1622_s8 + $0x10] ss:$8 sps:$4 sm:$0xff]  }
  0x44   : > { %v1478_v56 = vld [vmem:[%s1622_s8 + $0x50] ss:$8 sps:$4 sm:$0xff]   ;;  %v1479_v57 = vld [vmem:[%s1622_s8 + $0x24] ss:$8 sps:$4 sm:$0xff]   ;;  %v1483_v59 = vld [vmem:[%s1622_s8 + $0x20] ss:$8 sps:$4 sm:$0xff]  }
  0x45   : > { %729 = vmatpush1.bf16.msra.mxu0 %v1430_v24  ;;  %1365 = vmatpush1.bf16.msra.mxu1 %v1430_v24  ;;  %v1481_v58 = vld [vmem:[%s1622_s8 + $0x64] ss:$8 sps:$4 sm:$0xff]   ;;  %v1484_v60 = vld [vmem:[%s1622_s8 + $0x60] ss:$8 sps:$4 sm:$0xff]   ;;  %v1485_v61 = vld [vmem:[%s1622_s8 + $0x34] ss:$8 sps:$4 sm:$0xff]  }
  0x46   : > { %730 = vmatprep.subr.bf16.mxu0 %v1431_v25  ;;  %1350 = vmatprep.subr.bf16.mxu1 %v1431_v25  ;;  %v1487_v62 = vld [vmem:[%s1622_s8 + $0x74] ss:$8 sps:$4 sm:$0xff]   ;;  %v1489_v63 = vld [vmem:[%s1622_s8 + $0x30] ss:$8 sps:$4 sm:$0xff]   ;;  %v402_v1 = vld [vmem:[#allocation2] sm:$0xff]  ;;  %p1307_p11 = scmp.ne.s32.totalorder %s1521_s14, 8 }
  0x47   : > { %v1490_v0 = vld [vmem:[%s1622_s8 + $0x70] ss:$8 sps:$4 sm:$0xff]   ;;  %v418_v2 = vld [vmem:[#allocation2 + $0x80] sm:$0xff]  ;;  %v403_v3 = vld [vmem:[#allocation2 + $0x8] sm:$0xff] }
  0x48   : > { %v419_v4 = vld [vmem:[#allocation2 + $0x88] sm:$0xff]  ;;  %v404_v7 = vld [vmem:[#allocation2 + $0x10] sm:$0xff]  ;;  %v405_v13 = vld [vmem:[#allocation2 + $0x18] sm:$0xff] }
  0x49   : > { %731 = vmatpush1.bf16.msra.mxu0 %v1433_v26  ;;  %1366 = vmatpush1.bf16.msra.mxu1 %v1433_v26  ;;  %v420_v8 = vld [vmem:[#allocation2 + $0x90] sm:$0xff]  ;;  %v421_v14 = vld [vmem:[#allocation2 + $0x98] sm:$0xff]  ;;  %v406_v25 = vld [vmem:[#allocation2 + $0x20] sm:$0xff] }
  0x4a   : > { %732 = vmatprep.subr.bf16.mxu0 %v1434_v27  ;;  %1351 = vmatprep.subr.bf16.mxu1 %v1434_v27  ;;  %v422_v26 = vld [vmem:[#allocation2 + $0xa0] sm:$0xff]  ;;  %v407_v27 = vld [vmem:[#allocation2 + $0x28] sm:$0xff]  ;;  %v424_v32 = vld [vmem:[#allocation2 + $0xb0] sm:$0xff] }
  0x4d   : > { %733 = vmatpush1.bf16.msra.mxu0 %v1436_v28  ;;  %1367 = vmatpush1.bf16.msra.mxu1 %v1436_v28  ;;  %v423_v28 = vld [vmem:[#allocation2 + $0xa8] sm:$0xff] }
  0x4e   : > { %734 = vmatprep.subr.bf16.mxu0 %v1437_v29  ;;  %1352 = vmatprep.subr.bf16.mxu1 %v1437_v29 }
  0x51   : > { %735 = vmatpush1.bf16.msra.mxu0 %v1439_v31  ;;  %1368 = vmatpush1.bf16.msra.mxu1 %v1439_v31  ;;  %v408_v31 = vld [vmem:[#allocation2 + $0x30] sm:$0xff] }
  0x52   : > { %736 = vmatprep.subr.bf16.mxu0 %v1440_v33  ;;  %1353 = vmatprep.subr.bf16.mxu1 %v1440_v33 }
  0x55   : > { %737 = vmatpush1.bf16.msra.mxu0 %v1442_v34  ;;  %1369 = vmatpush1.bf16.msra.mxu1 %v1442_v34 }
  0x56   : > { %738 = vmatprep.subr.bf16.mxu0 %v1443_v35  ;;  %1354 = vmatprep.subr.bf16.mxu1 %v1443_v35 }
  0x59   : > { %739 = vmatpush1.bf16.msra.mxu0 %v1445_v36  ;;  %1370 = vmatpush1.bf16.msra.mxu1 %v1445_v36 }
  0x5a   : > { %740 = vmatprep.subr.bf16.mxu0 %v1446_v37  ;;  %1355 = vmatprep.subr.bf16.mxu1 %v1446_v37  ;;  %v409_v37 = vld [vmem:[#allocation2 + $0x38] sm:$0xff] }
  0x5d   : > { %741 = vmatpush1.bf16.msra.mxu0 %v1448_v38  ;;  %1371 = vmatpush1.bf16.msra.mxu1 %v1448_v38  ;;  %v425_v38 = vld [vmem:[#allocation2 + $0xb8] sm:$0xff] }
  0x5e   : > { %742 = vmatprep.subr.bf16.mxu0 %v1449_v39  ;;  %1356 = vmatprep.subr.bf16.mxu1 %v1449_v39 }
  0x61   : > { %743 = vmatpush1.bf16.msra.mxu0 %v1451_v40  ;;  %1372 = vmatpush1.bf16.msra.mxu1 %v1451_v40 }
  0x62   : > { %744 = vmatprep.subr.bf16.mxu0 %v1452_v41  ;;  %1357 = vmatprep.subr.bf16.mxu1 %v1452_v41 }
  0x65   : > { %745 = vmatpush1.bf16.msra.mxu0 %v1454_v42  ;;  %1373 = vmatpush1.bf16.msra.mxu1 %v1454_v42 }
  0x66   : > { %746 = vmatprep.subr.bf16.mxu0 %v1455_v43  ;;  %1358 = vmatprep.subr.bf16.mxu1 %v1455_v43 }
  0x69   : > { %747 = vmatpush1.bf16.msra.mxu0 %v1457_v44  ;;  %1374 = vmatpush1.bf16.msra.mxu1 %v1457_v44 }
  0x6a   : > { %748 = vmatprep.subr.bf16.mxu0 %v1458_v45  ;;  %1359 = vmatprep.subr.bf16.mxu1 %v1458_v45 }
  0x6d   : > { %749 = vmatpush1.bf16.msra.mxu0 %v1460_v46  ;;  %1375 = vmatpush1.bf16.msra.mxu1 %v1460_v46 }
  0x6e   : > { %750 = vmatprep.subr.bf16.mxu0 %v1461_v47  ;;  %1360 = vmatprep.subr.bf16.mxu1 %v1461_v47 }
  0x71   : > { %751 = vmatpush1.bf16.msra.mxu0 %v1463_v48  ;;  %1376 = vmatpush1.bf16.msra.mxu1 %v1463_v48 }
  0x72   : > { %752 = vmatprep.subr.bf16.mxu0 %v1464_v49  ;;  %1361 = vmatprep.subr.bf16.mxu1 %v1464_v49  ;;  %v410_v49 = vld [vmem:[#allocation2 + $0x40] sm:$0xff] }
  0x75   : > { %753 = vmatpush1.bf16.msra.mxu0 %v1466_v50  ;;  %1377 = vmatpush1.bf16.msra.mxu1 %v1466_v50  ;;  %v426_v50 = vld [vmem:[#allocation2 + $0xc0] sm:$0xff] }
  0x78   : > { %755 = vmatmul.mubr.bf16.vlgmr.msra.gmra.mrb[0].mxu0 %v1467_v51  ;;  %795 = vmatmul.mubr.bf16.vlgmr.msra.gmra.mrb[0].mxu1 %v1470_v52  ;;  %v411_v51 = vld [vmem:[#allocation2 + $0x48] sm:$0xff] }
  0x79   : > { %764 = vmatprep.mubr.bf16.mxu0 %v1473_v53  ;;  %804 = vmatprep.mubr.bf16.mxu1 %v1475_v54  ;;  %v427_v52 = vld [vmem:[#allocation2 + $0xc8] sm:$0xff] }
  0x80   : > { %765 = vmatmul.mubr.bf16.gmra.mrb[4].mxu0 %v1477_v55  ;;  %805 = vmatmul.mubr.bf16.gmra.mrb[4].mxu1 %v1478_v56  ;;  %v412_v55 = vld [vmem:[#allocation2 + $0x50] sm:$0xff] }
  0x81   : > { %774 = vmatprep.mubr.bf16.mxu0 %v1479_v57  ;;  %814 = vmatprep.mubr.bf16.mxu1 %v1481_v58  ;;  %v428_v56 = vld [vmem:[#allocation2 + $0xd0] sm:$0xff] }
  0x88   : > { %775 = vmatmul.mubr.bf16.gmra.mrb[8].mxu0 %v1483_v59  ;;  %815 = vmatmul.mubr.bf16.gmra.mrb[8].mxu1 %v1484_v60 }
  0x89   : > { %784 = vmatprep.mubr.bf16.mxu0 %v1485_v61  ;;  %824 = vmatprep.mubr.bf16.mxu1 %v1487_v62  ;;  %v413_v61 = vld [vmem:[#allocation2 + $0x58] sm:$0xff] }
  0x8a   : > { %v429_v62 = vld [vmem:[#allocation2 + $0xd8] sm:$0xff] }
  0x90   : > { %785 = vmatmul.mubr.bf16.gmra.mrb[12].mxu0 %v1489_v63  ;;  %825 = vmatmul.mubr.bf16.gmra.mrb[12].mxu1 %v1490_v0 }
 0x14b   : > { %v756_v5 = vpop.f32.mrb[0].mxu0  ;;  %v796_v6 = vpop.f32.mrb[0].mxu1 }
 0x14c   : > { %v835_v9 = vadd.f32 %v756_v5, %v402_v1  ;;  %v851_v10 = vadd.f32 %v796_v6, %v418_v2  ;;  %v758_v11 = vpop.f32.mrb[1].mxu0  ;;  %v798_v12 = vpop.f32.mrb[1].mxu1 }
 0x14d   : > { %v836_v15 = vadd.f32 %v758_v11, %v403_v3  ;;  %v852_v16 = vadd.f32 %v798_v12, %v419_v4  ;;  %v760_v17 = vpop.f32.mrb[2].mxu0  ;;  %v800_v18 = vpop.f32.mrb[2].mxu1  ;;  %v415_v11 = vld [vmem:[#allocation2 + $0x68] sm:$0xff] }
 0x14e   : > { %867 = vst [vmem:[#allocation2] sm:$0xff] %v835_v9  ;;  %883 = vst [vmem:[#allocation2 + $0x80] sm:$0xff] %v851_v10  ;;  %v837_v19 = vadd.f32 %v760_v17, %v404_v7  ;;  %v853_v20 = vadd.f32 %v800_v18, %v420_v8  ;;  %v762_v21 = vpop.f32.mrb[3].mxu0  ;;  %v802_v22 = vpop.f32.mrb[3].mxu1  ;;  %v414_v9 = vld [vmem:[#allocation2 + $0x60] sm:$0xff]  ;;  %v431_v12 = vld [vmem:[#allocation2 + $0xe8] sm:$0xff] }
 0x14f   : > { %868 = vst [vmem:[#allocation2 + $0x8] sm:$0xff] %v836_v15  ;;  %884 = vst [vmem:[#allocation2 + $0x88] sm:$0xff] %v852_v16  ;;  %v838_v23 = vadd.f32 %v762_v21, %v405_v13  ;;  %v854_v24 = vadd.f32 %v802_v22, %v421_v14  ;;  %v430_v10 = vld [vmem:[#allocation2 + $0xe0] sm:$0xff]  ;;  %v416_v15 = vld [vmem:[#allocation2 + $0x70] sm:$0xff] }
 0x150   : > { %869 = vst [vmem:[#allocation2 + $0x10] sm:$0xff] %v837_v19  ;;  %885 = vst [vmem:[#allocation2 + $0x90] sm:$0xff] %v853_v20  ;;  %v432_v16 = vld [vmem:[#allocation2 + $0xf0] sm:$0xff]  ;;  %v417_v21 = vld [vmem:[#allocation2 + $0x78] sm:$0xff] }
 0x151   : > { %870 = vst [vmem:[#allocation2 + $0x18] sm:$0xff] %v838_v23  ;;  %886 = vst [vmem:[#allocation2 + $0x98] sm:$0xff] %v854_v24  ;;  %v433_v22 = vld [vmem:[#allocation2 + $0xf8] sm:$0xff] }
 0x153   : > { %v766_v29 = vpop.f32.mrb[4].mxu0  ;;  %v806_v30 = vpop.f32.mrb[4].mxu1 }
 0x154   : > { %v839_v33 = vadd.f32 %v766_v29, %v406_v25  ;;  %v855_v34 = vadd.f32 %v806_v30, %v422_v26  ;;  %v768_v35 = vpop.f32.mrb[5].mxu0  ;;  %v808_v36 = vpop.f32.mrb[5].mxu1 }
 0x155   : > { %v840_v39 = vadd.f32 %v768_v35, %v407_v27  ;;  %v856_v40 = vadd.f32 %v808_v36, %v423_v28  ;;  %v770_v41 = vpop.f32.mrb[6].mxu0  ;;  %v810_v42 = vpop.f32.mrb[6].mxu1  ;;  %v935_v35 = vld [vmem:[%s1778_s2] sm:$0x3] (!%p1307_p11) }
 0x156   : > { %871 = vst [vmem:[#allocation2 + $0x20] sm:$0xff] %v839_v33  ;;  %887 = vst [vmem:[#allocation2 + $0xa0] sm:$0xff] %v855_v34  ;;  %v841_v43 = vadd.f32 %v770_v41, %v408_v31  ;;  %v857_v44 = vadd.f32 %v810_v42, %v424_v32  ;;  %v772_v45 = vpop.f32.mrb[7].mxu0  ;;  %v812_v46 = vpop.f32.mrb[7].mxu1  ;;  %v937_v33 = vlaneseq (!%p1307_p11)  ;;  %v903_v36 = vld [vmem:[#allocation2] sm:$0xff] (!%p1307_p11) }
 0x157   : > { %872 = vst [vmem:[#allocation2 + $0x28] sm:$0xff] %v840_v39  ;;  %888 = vst [vmem:[#allocation2 + $0xa8] sm:$0xff] %v856_v40  ;;  %v842_v47 = vadd.f32 %v772_v45, %v409_v37  ;;  %v858_v48 = vadd.f32 %v812_v46, %v425_v38  ;;  %v904_v37 = vld [vmem:[#allocation2 + $0x8] sm:$0xff] (!%p1307_p11)  ;;  %v905_v40 = vld [vmem:[#allocation2 + $0x10] sm:$0xff] (!%p1307_p11) }
 0x158   : > { %873 = vst [vmem:[#allocation2 + $0x30] sm:$0xff] %v841_v43  ;;  %889 = vst [vmem:[#allocation2 + $0xb0] sm:$0xff] %v857_v44  ;;  %v938_v34 = vshrl.u32 (!%p1307_p11), %v937_v33, 7  ;;  %v906_v41 = vld [vmem:[#allocation2 + $0x18] sm:$0xff] (!%p1307_p11) }
 0x159   : > { %874 = vst [vmem:[#allocation2 + $0x38] sm:$0xff] %v842_v47  ;;  %890 = vst [vmem:[#allocation2 + $0xb8] sm:$0xff] %v858_v48 }
 0x15a   : > { %v939_v38 = vsub.s32 (!%p1307_p11), 0, %v938_v34  ;;  %v943_v39 = vsub.s32 (!%p1307_p11), 1, %v938_v34 }
 0x15b   : > { %v776_v53 = vpop.f32.mrb[8].mxu0  ;;  %v816_v54 = vpop.f32.mrb[8].mxu1 }
 0x15c   : > { %v843_v57 = vadd.f32 %v776_v53, %v410_v49  ;;  %v859_v58 = vadd.f32 %v816_v54, %v426_v50  ;;  %v778_v59 = vpop.f32.mrb[9].mxu0  ;;  %v818_v60 = vpop.f32.mrb[9].mxu1  ;;  %v1677_v43 = vrot.slane (!%p1307_p11), %v935_v35, %v939_v38  ;;  %v1679_v44 = vrot.slane (!%p1307_p11), %v935_v35, %v943_v39 }
 0x15d   : > { %v844_v63 = vadd.f32 %v778_v59, %v411_v51  ;;  %v860_v0 = vadd.f32 %v818_v60, %v427_v52  ;;  %v780_v1 = vpop.f32.mrb[10].mxu0  ;;  %v820_v2 = vpop.f32.mrb[10].mxu1  ;;  %v907_v42 = vld [vmem:[#allocation2 + $0x20] sm:$0xff] (!%p1307_p11) }
 0x15e   : > { %875 = vst [vmem:[#allocation2 + $0x40] sm:$0xff] %v843_v57  ;;  %891 = vst [vmem:[#allocation2 + $0xc0] sm:$0xff] %v859_v58  ;;  %v845_v3 = vadd.f32 %v780_v1, %v412_v55  ;;  %v861_v4 = vadd.f32 %v820_v2, %v428_v56  ;;  %v782_v5 = vpop.f32.mrb[11].mxu0  ;;  %v822_v6 = vpop.f32.mrb[11].mxu1  ;;  %v908_v45 = vld [vmem:[#allocation2 + $0x28] sm:$0xff] (!%p1307_p11)  ;;  %v947_v48 = vadd.f32 (!%p1307_p11), %v1677_v43, %v903_v36 }
 0x15f   : > { %876 = vst [vmem:[#allocation2 + $0x48] sm:$0xff] %v844_v63  ;;  %892 = vst [vmem:[#allocation2 + $0xc8] sm:$0xff] %v860_v0  ;;  %v846_v7 = vadd.f32 %v782_v5, %v413_v61  ;;  %v862_v8 = vadd.f32 %v822_v6, %v429_v62  ;;  %v909_v46 = vld [vmem:[#allocation2 + $0x30] sm:$0xff] (!%p1307_p11)  ;;  %v948_v49 = vadd.f32 (!%p1307_p11), %v1679_v44, %v904_v37  ;;  %v924_v33 = vld [vmem:[#allocation2 + $0xa8] sm:$0xff] (!%p1307_p11) }
 0x160   : > { %877 = vst [vmem:[#allocation2 + $0x50] sm:$0xff] %v845_v3  ;;  %893 = vst [vmem:[#allocation2 + $0xd0] sm:$0xff] %v861_v4  ;;  %v910_v47 = vld [vmem:[#allocation2 + $0x38] sm:$0xff] (!%p1307_p11)  ;;  %v949_v50 = vadd.f32 (!%p1307_p11), %v1677_v43, %v905_v40  ;;  %v950_v51 = vadd.f32 (!%p1307_p11), %v1679_v44, %v906_v41  ;;  %v951_v52 = vadd.f32 (!%p1307_p11), %v1677_v43, %v907_v42  ;;  %v979_v58 = vmax.f32 (!%p1307_p11), %v947_v48, 0.0  ;;  %v925_v38 = vld [vmem:[#allocation2 + $0xb0] sm:$0xff] (!%p1307_p11) }
 0x161   : > { %878 = vst [vmem:[#allocation2 + $0x58] sm:$0xff] %v846_v7  ;;  %894 = vst [vmem:[#allocation2 + $0xd8] sm:$0xff] %v862_v8  ;;  %v952_v53 = vadd.f32 (!%p1307_p11), %v1679_v44, %v908_v45  ;;  %v953_v54 = vadd.f32 (!%p1307_p11), %v1677_v43, %v909_v46  ;;  %v954_v55 = vadd.f32 (!%p1307_p11), %v1679_v44, %v910_v47  ;;  %v980_v59 = vmax.f32 (!%p1307_p11), %v948_v49, 0.0  ;;  %v926_v39 = vld [vmem:[#allocation2 + $0xb8] sm:$0xff] (!%p1307_p11) }
 0x162   : > { %v981_v60 = vmax.f32 (!%p1307_p11), %v949_v50, 0.0  ;;  %v982_v61 = vmax.f32 (!%p1307_p11), %v950_v51, 0.0  ;;  %v983_v0 = vmax.f32 (!%p1307_p11), %v951_v52, 0.0  ;;  %v968_v50 = vadd.f32 (!%p1307_p11), %v1679_v44, %v924_v33 }
 0x163   : > { %v786_v13 = vpop.f32.mrb[12].mxu0  ;;  %v826_v14 = vpop.f32.mrb[12].mxu1  ;;  %902 = sbr.rel (%p1307_p11) target bundleno = 378 (0x17a), region = 78  ;;  %v984_v1 = vmax.f32 (!%p1307_p11), %v952_v53, 0.0  ;;  %v985_v2 = vmax.f32 (!%p1307_p11), %v953_v54, 0.0  ;;  %v986_v3 = vmax.f32 (!%p1307_p11), %v954_v55, 0.0  ;;  %v1330_v6 = vpack.c.bf16 (!%p1307_p11), %v980_v59, %v979_v58 }
 0x164   : > { %v847_v17 = vadd.f32 %v786_v13, %v414_v9  ;;  %v863_v18 = vadd.f32 %v826_v14, %v430_v10  ;;  %v788_v19 = vpop.f32.mrb[13].mxu0  ;;  %v828_v20 = vpop.f32.mrb[13].mxu1  ;;  %v1331_v7 = vpack.c.bf16 (!%p1307_p11), %v982_v61, %v981_v60  ;;  %v969_v54 = vadd.f32 (!%p1307_p11), %v1677_v43, %v925_v38 }
 0x165   : > { %v848_v23 = vadd.f32 %v788_v19, %v415_v11  ;;  %v864_v24 = vadd.f32 %v828_v20, %v431_v12  ;;  %v790_v25 = vpop.f32.mrb[14].mxu0  ;;  %v830_v26 = vpop.f32.mrb[14].mxu1  ;;  %v911_v56 = vld [vmem:[#allocation2 + $0x40] sm:$0xff] (!%p1307_p11)  ;;  %v1332_v12 = vpack.c.bf16 (!%p1307_p11), %v984_v1, %v983_v0  ;;  %v1333_v13 = vpack.c.bf16 (!%p1307_p11), %v986_v3, %v985_v2  ;;  %1107 = vst [vmem:[%s1779_s3] sm:$0xff] (!%p1307_p11), %v1330_v6 }
 0x166   : > { %879 = vst [vmem:[#allocation2 + $0x60] sm:$0xff] %v847_v17  ;;  %895 = vst [vmem:[#allocation2 + $0xe0] sm:$0xff] %v863_v18  ;;  %v849_v27 = vadd.f32 %v790_v25, %v416_v15  ;;  %v865_v28 = vadd.f32 %v830_v26, %v432_v16  ;;  %v792_v29 = vpop.f32.mrb[15].mxu0  ;;  %v832_v30 = vpop.f32.mrb[15].mxu1  ;;  %v912_v57 = vld [vmem:[#allocation2 + $0x48] sm:$0xff] (!%p1307_p11)  ;;  %v955_v8 = vadd.f32 (!%p1307_p11), %v1677_v43, %v911_v56  ;;  %v919_v16 = vld [vmem:[#allocation2 + $0x80] sm:$0xff] (!%p1307_p11) }
 0x167   : > { %880 = vst [vmem:[#allocation2 + $0x68] sm:$0xff] %v848_v23  ;;  %896 = vst [vmem:[#allocation2 + $0xe8] sm:$0xff] %v864_v24  ;;  %v850_v31 = vadd.f32 %v792_v29, %v417_v21  ;;  %v866_v32 = vadd.f32 %v832_v30, %v433_v22  ;;  %v913_v62 = vld [vmem:[#allocation2 + $0x50] sm:$0xff] (!%p1307_p11)  ;;  %v956_v9 = vadd.f32 (!%p1307_p11), %v1679_v44, %v912_v57  ;;  %v920_v21 = vld [vmem:[#allocation2 + $0x88] sm:$0xff] (!%p1307_p11)  ;;  %v1000_v60 = vmax.f32 (!%p1307_p11), %v968_v50, 0.0 }
 0x168   : > { %881 = vst [vmem:[#allocation2 + $0x70] sm:$0xff] %v849_v27  ;;  %897 = vst [vmem:[#allocation2 + $0xf0] sm:$0xff] %v865_v28  ;;  %v914_v63 = vld [vmem:[#allocation2 + $0x58] sm:$0xff] (!%p1307_p11)  ;;  %v957_v14 = vadd.f32 (!%p1307_p11), %v1677_v43, %v913_v62  ;;  %v987_v17 = vmax.f32 (!%p1307_p11), %v955_v8, 0.0  ;;  %v921_v26 = vld [vmem:[#allocation2 + $0x90] sm:$0xff] (!%p1307_p11)  ;;  %v964_v37 = vadd.f32 (!%p1307_p11), %v1679_v44, %v920_v21  ;;  %v970_v55 = vadd.f32 (!%p1307_p11), %v1679_v44, %v926_v39 }
 0x169   : > { %882 = vst [vmem:[#allocation2 + $0x78] sm:$0xff] %v850_v31  ;;  %898 = vst [vmem:[#allocation2 + $0xf8] sm:$0xff] %v866_v32  ;;  %v958_v15 = vadd.f32 (!%p1307_p11), %v1679_v44, %v914_v63  ;;  %v988_v18 = vmax.f32 (!%p1307_p11), %v956_v9, 0.0  ;;  %v922_v27 = vld [vmem:[#allocation2 + $0x98] sm:$0xff] (!%p1307_p11)  ;;  %v963_v31 = vadd.f32 (!%p1307_p11), %v1677_v43, %v919_v16  ;;  %v923_v32 = vld [vmem:[#allocation2 + $0xa0] sm:$0xff] (!%p1307_p11)  ;;  %v965_v42 = vadd.f32 (!%p1307_p11), %v1677_v43, %v921_v26 }
 0x16a   : > { %1108 = vst [vmem:[%s1779_s3 + $0x8] sm:$0xff] %v1331_v7  ;;  %1109 = vst [vmem:[%s1779_s3 + $0x10] sm:$0xff] %v1332_v12  ;;  %v989_v22 = vmax.f32 %v957_v14, 0.0  ;;  %v966_v45 = vadd.f32 %v1679_v44, %v922_v27  ;;  %v927_v46 = vld [vmem:[#allocation2 + $0xc0] sm:$0xff]  ;;  %v996_v48 = vmax.f32 %v964_v37, 0.0  ;;  %v967_v49 = vadd.f32 %v1677_v43, %v923_v32  ;;  %v928_v51 = vld [vmem:[#allocation2 + $0xc8] sm:$0xff] }
 0x16b   : > { %1110 = vst [vmem:[%s1779_s3 + $0x18] sm:$0xff] %v1333_v13  ;;  %v990_v23 = vmax.f32 %v958_v15, 0.0  ;;  %v1334_v28 = vpack.c.bf16 %v988_v18, %v987_v17  ;;  %v995_v41 = vmax.f32 %v963_v31, 0.0  ;;  %v997_v52 = vmax.f32 %v965_v42, 0.0  ;;  %v929_v56 = vld [vmem:[#allocation2 + $0xd0] sm:$0xff]  ;;  %v930_v57 = vld [vmem:[#allocation2 + $0xd8] sm:$0xff] }
 0x16c   : > { %v998_v53 = vmax.f32 %v966_v45, 0.0  ;;  %v999_v59 = vmax.f32 %v967_v49, 0.0  ;;  %v971_v61 = vadd.f32 %v1677_v43, %v927_v46  ;;  %v1001_v1 = vmax.f32 %v969_v54, 0.0 }
 0x16d   : > { %v915_v4 = vld [vmem:[#allocation2 + $0x60] sm:$0xff]  ;;  %v1335_v34 = vpack.c.bf16 %v990_v23, %v989_v22  ;;  %1111 = vst [vmem:[%s1779_s3 + $0x20] sm:$0xff] %v1334_v28  ;;  %v1338_v58 = vpack.c.bf16 %v996_v48, %v995_v41  ;;  %v1002_v2 = vmax.f32 %v970_v55, 0.0  ;;  %v972_v3 = vadd.f32 %v1679_v44, %v928_v51 }
 0x16e   : > { %v916_v5 = vld [vmem:[#allocation2 + $0x68] sm:$0xff]  ;;  %v959_v19 = vadd.f32 %v1677_v43, %v915_v4  ;;  %v931_v62 = vld [vmem:[#allocation2 + $0xe0] sm:$0xff]  ;;  %v1339_v0 = vpack.c.bf16 %v998_v53, %v997_v52  ;;  %v1340_v6 = vpack.c.bf16 %v1000_v60, %v999_v59  ;;  %v1003_v7 = vmax.f32 %v971_v61, 0.0 }
 0x16f   : > { %v917_v10 = vld [vmem:[#allocation2 + $0x70] sm:$0xff]  ;;  %v960_v20 = vadd.f32 %v1679_v44, %v916_v5  ;;  %1112 = vst [vmem:[%s1779_s3 + $0x28] sm:$0xff] %v1335_v34  ;;  %v932_v63 = vld [vmem:[#allocation2 + $0xe8] sm:$0xff]  ;;  %1115 = vst [vmem:[%s1779_s3 + $0x40] sm:$0xff] %v1338_v58  ;;  %v973_v8 = vadd.f32 %v1677_v43, %v929_v56  ;;  %v974_v9 = vadd.f32 %v1679_v44, %v930_v57 }
 0x170   : > { %v918_v11 = vld [vmem:[#allocation2 + $0x78] sm:$0xff]  ;;  %v961_v24 = vadd.f32 %v1677_v43, %v917_v10  ;;  %v991_v29 = vmax.f32 %v959_v19, 0.0  ;;  %v933_v4 = vld [vmem:[#allocation2 + $0xf0] sm:$0xff]  ;;  %1116 = vst [vmem:[%s1779_s3 + $0x48] sm:$0xff] %v1339_v0  ;;  %v1341_v10 = vpack.c.bf16 %v1002_v2, %v1001_v1  ;;  %v975_v12 = vadd.f32 %v1677_v43, %v931_v62  ;;  %1117 = vst [vmem:[%s1779_s3 + $0x50] sm:$0xff] %v1340_v6 }
 0x171   : > { %v962_v25 = vadd.f32 %v1679_v44, %v918_v11  ;;  %v992_v30 = vmax.f32 %v960_v20, 0.0  ;;  %v934_v5 = vld [vmem:[#allocation2 + $0xf8] sm:$0xff]  ;;  %v1004_v11 = vmax.f32 %v972_v3, 0.0  ;;  %v976_v13 = vadd.f32 %v1679_v44, %v932_v63 }
 0x172   : > { %v993_v35 = vmax.f32 %v961_v24, 0.0  ;;  %v1005_v14 = vmax.f32 %v973_v8, 0.0  ;;  %v1006_v15 = vmax.f32 %v974_v9, 0.0  ;;  %v977_v16 = vadd.f32 %v1677_v43, %v933_v4  ;;  %1118 = vst [vmem:[%s1779_s3 + $0x58] sm:$0xff] %v1341_v10 }
 0x173   : > { %v994_v36 = vmax.f32 %v962_v25, 0.0  ;;  %v1336_v40 = vpack.c.bf16 %v992_v30, %v991_v29  ;;  %v978_v17 = vadd.f32 %v1679_v44, %v934_v5  ;;  %v1342_v18 = vpack.c.bf16 %v1004_v11, %v1003_v7 }
 0x174   : > { %v1007_v19 = vmax.f32 %v975_v12, 0.0  ;;  %v1008_v20 = vmax.f32 %v976_v13, 0.0  ;;  %v1343_v21 = vpack.c.bf16 %v1006_v15, %v1005_v14  ;;  %v1009_v22 = vmax.f32 %v977_v16, 0.0 }
 0x175   : > { %v1337_v47 = vpack.c.bf16 %v994_v36, %v993_v35  ;;  %1113 = vst [vmem:[%s1779_s3 + $0x30] sm:$0xff] %v1336_v40  ;;  %v1010_v23 = vmax.f32 %v978_v17, 0.0  ;;  %1119 = vst [vmem:[%s1779_s3 + $0x60] sm:$0xff] %v1342_v18 }
 0x176   : > { %v1344_v24 = vpack.c.bf16 %v1008_v20, %v1007_v19  ;;  %1120 = vst [vmem:[%s1779_s3 + $0x68] sm:$0xff] %v1343_v21 }
 0x177   : > { %1114 = vst [vmem:[%s1779_s3 + $0x38] sm:$0xff] %v1337_v47  ;;  %v1345_v43 = vpack.c.bf16 %v1010_v23, %v1009_v22 }
 0x178   : > { %1121 = vst [vmem:[%s1779_s3 + $0x70] sm:$0xff] %v1344_v24 }
 0x179   : > { %1122 = vst [vmem:[%s1779_s3 + $0x78] sm:$0xff] %v1345_v43 }
 0x17a PF: > { %s13_s16 = sadd.s32 1, %s1529_s16   ;;  %s1780_s12 = smov %s1517_s13 }
 0x17b   : > { %p10_p12 = scmp.ge.s32.totalorder %s13_s16, 11   ;;  %s1781_s13 = smov %s1587_s20 }
 0x17c   : > { %s1782_s14 = smov %s1525_s15  ;;  %s1783_s15 = smov %s1785_s17 }
 0x17d   :  { %12 = sbr.rel (!%p10_p12) target bundleno = 3 (0x3), region = 119 }

// kernel: _lambda_.23
= control target key start
LH: loop header
LB: loop body
LE: loop exit
PB: predicated region body
PF: predicated region fallthrough
CT: control target
= control target key end

     0   :  { %s253_s0 = inlined_call_operand.vmem [shape: bf16[8,2304], index: 0, kind: input, shape index: {}]   ;;  %s254_s1 = inlined_call_operand.vmem [shape: bf16[8,2304], index: 1, kind: input, shape index: {}]   ;;  %s255_s2 = inlined_call_operand.vmem [shape: bf16[8,2304], index: 2, kind: input, shape index: {}]   ;;  %s256_s3 = inlined_call_operand.vmem [shape: bf16[8,2304], index: 3, kind: input, shape index: {}]   ;;  %s257_s4 = inlined_call_operand.vmem [shape: bf16[8,2304], index: 4, kind: output, shape index: {}]  }
   0x1   :  { %v17_v0 = vld [vmem:[%s253_s0] sm:$0xff]  ;;  %v18_v5 = vld [vmem:[%s253_s0 + $0x8] sm:$0xff]  ;;  %v19_v11 = vld [vmem:[%s253_s0 + $0x10] sm:$0xff] }
   0x2   :  { %v26_v1 = vld [vmem:[%s254_s1] sm:$0xff]  ;;  %v27_v6 = vld [vmem:[%s254_s1 + $0x8] sm:$0xff]  ;;  %v28_v13 = vld [vmem:[%s254_s1 + $0x10] sm:$0xff] }
   0x3   :  { %v44_v2 = vld [vmem:[%s255_s2] sm:$0xff]  ;;  %v35_v3 = vmax.bf16 %v26_v1, %v17_v0  ;;  %v36_v8 = vmax.bf16 %v27_v6, %v18_v5  ;;  %v45_v9 = vld [vmem:[%s255_s2 + $0x8] sm:$0xff]  ;;  %v46_v14 = vld [vmem:[%s255_s2 + $0x10] sm:$0xff]  ;;  %v37_v17 = vmax.bf16 %v28_v13, %v19_v11 }
   0x4   :  { %v53_v4 = vld [vmem:[%s256_s3] sm:$0xff]  ;;  %v54_v10 = vld [vmem:[%s256_s3 + $0x8] sm:$0xff]  ;;  %v55_v15 = vld [vmem:[%s256_s3 + $0x10] sm:$0xff] }
   0x5   :  { %v62_v7 = vmax.bf16 %v53_v4, %v44_v2  ;;  %v63_v12 = vmax.bf16 %v54_v10, %v45_v9  ;;  %v64_v18 = vmax.bf16 %v55_v15, %v46_v14  ;;  %v20_v19 = vld [vmem:[%s253_s0 + $0x18] sm:$0xff]  ;;  %v21_v25 = vld [vmem:[%s253_s0 + $0x20] sm:$0xff]  ;;  %v22_v32 = vld [vmem:[%s253_s0 + $0x28] sm:$0xff] }
   0x6   :  { %v29_v20 = vld [vmem:[%s254_s1 + $0x18] sm:$0xff]  ;;  %v30_v26 = vld [vmem:[%s254_s1 + $0x20] sm:$0xff]  ;;  %v31_v34 = vld [vmem:[%s254_s1 + $0x28] sm:$0xff] }
   0x7   :  { %v71_v16 = vmax.bf16 %v62_v7, %v35_v3  ;;  %v47_v21 = vld [vmem:[%s255_s2 + $0x18] sm:$0xff]  ;;  %v72_v22 = vmax.bf16 %v63_v12, %v36_v8  ;;  %v38_v23 = vmax.bf16 %v29_v20, %v20_v19  ;;  %v73_v27 = vmax.bf16 %v64_v18, %v37_v17  ;;  %v48_v30 = vld [vmem:[%s255_s2 + $0x20] sm:$0xff]  ;;  %v49_v35 = vld [vmem:[%s255_s2 + $0x28] sm:$0xff] }
   0x8   :  { %v56_v24 = vld [vmem:[%s256_s3 + $0x18] sm:$0xff]  ;;  %v39_v29 = vmax.bf16 %v30_v26, %v21_v25  ;;  %v57_v31 = vld [vmem:[%s256_s3 + $0x20] sm:$0xff]  ;;  %v58_v36 = vld [vmem:[%s256_s3 + $0x28] sm:$0xff]  ;;  %v40_v38 = vmax.bf16 %v31_v34, %v22_v32 }
   0x9   :  { %80 = vst [vmem:[%s257_s4] sm:$0xff] %v71_v16  ;;  %v65_v28 = vmax.bf16 %v56_v24, %v47_v21  ;;  %81 = vst [vmem:[%s257_s4 + $0x8] sm:$0xff] %v72_v22  ;;  %v66_v33 = vmax.bf16 %v57_v31, %v48_v30  ;;  %v67_v39 = vmax.bf16 %v58_v36, %v49_v35  ;;  %v23_v40 = vld [vmem:[%s253_s0 + $0x30] sm:$0xff]  ;;  %v24_v46 = vld [vmem:[%s253_s0 + $0x38] sm:$0xff] }
   0xa   :  { %82 = vst [vmem:[%s257_s4 + $0x10] sm:$0xff] %v73_v27  ;;  %v32_v41 = vld [vmem:[%s254_s1 + $0x30] sm:$0xff]  ;;  %v33_v47 = vld [vmem:[%s254_s1 + $0x38] sm:$0xff]  ;;  %v25_v53 = vld [vmem:[%s253_s0 + $0x40] sm:$0xff] }
   0xb   :  { %v74_v37 = vmax.bf16 %v65_v28, %v38_v23  ;;  %v50_v42 = vld [vmem:[%s255_s2 + $0x30] sm:$0xff]  ;;  %v75_v43 = vmax.bf16 %v66_v33, %v39_v29  ;;  %v41_v44 = vmax.bf16 %v32_v41, %v23_v40  ;;  %v76_v48 = vmax.bf16 %v67_v39, %v40_v38  ;;  %v51_v51 = vld [vmem:[%s255_s2 + $0x38] sm:$0xff]  ;;  %v34_v55 = vld [vmem:[%s254_s1 + $0x40] sm:$0xff] }
   0xc   :  { %v59_v45 = vld [vmem:[%s256_s3 + $0x30] sm:$0xff]  ;;  %v42_v50 = vmax.bf16 %v33_v47, %v24_v46  ;;  %v60_v52 = vld [vmem:[%s256_s3 + $0x38] sm:$0xff]  ;;  %v52_v56 = vld [vmem:[%s255_s2 + $0x40] sm:$0xff]  ;;  %v43_v59 = vmax.bf16 %v34_v55, %v25_v53 }
   0xd   :  { %83 = vst [vmem:[%s257_s4 + $0x18] sm:$0xff] %v74_v37  ;;  %v68_v49 = vmax.bf16 %v59_v45, %v50_v42  ;;  %84 = vst [vmem:[%s257_s4 + $0x20] sm:$0xff] %v75_v43  ;;  %v69_v54 = vmax.bf16 %v60_v52, %v51_v51  ;;  %v61_v57 = vld [vmem:[%s256_s3 + $0x40] sm:$0xff] }
   0xe   :  { %85 = vst [vmem:[%s257_s4 + $0x28] sm:$0xff] %v76_v48  ;;  %v70_v60 = vmax.bf16 %v61_v57, %v52_v56 }
   0xf   :  { %v77_v58 = vmax.bf16 %v68_v49, %v41_v44  ;;  %v78_v61 = vmax.bf16 %v69_v54, %v42_v50 }
  0x10   :  { %v79_v62 = vmax.bf16 %v70_v60, %v43_v59 }
  0x11   :  { %86 = vst [vmem:[%s257_s4 + $0x30] sm:$0xff] %v77_v58  ;;  %87 = vst [vmem:[%s257_s4 + $0x38] sm:$0xff] %v78_v61 }
  0x12   :  { %88 = vst [vmem:[%s257_s4 + $0x40] sm:$0xff] %v79_v62 }

// kernel: _lambda_.24
= control target key start
LH: loop header
LB: loop body
LE: loop exit
PB: predicated region body
PF: predicated region fallthrough
CT: control target
= control target key end

     0   :  { %s1937_s0 = inlined_call_operand.vmem [shape: bf16[80,2304], index: 0, kind: input, shape index: {}]   ;;  %s1938_s1 = inlined_call_operand.vmem [shape: bf16[2304,512], index: 1, kind: input, shape index: {}]   ;;  %s1939_s2 = inlined_call_operand.vmem [shape: f32[1,512], index: 2, kind: input, shape index: {}]   ;;  %s1940_s3 = inlined_call_operand.vmem [shape: bf16[80,512], index: 3, kind: output, shape index: {}]  }
   0x1   :  { %1942 = sst [smem:[#allocation7_spill]] %s1937_s0 }
   0x2   :  { %1943 = sst [smem:[#allocation8_spill]] %s1938_s1 }
   0x3   :  { %s1605_s12 = smov 0   ;;  %s1607_s13 = smov 0  }
   0x4   :  { %s1609_s14 = smov 0   ;;  %s1611_s15 = smov 0  }
   0x5   :  { %s1613_s16 = smov 0   ;;  %s1615_s17 = smov 0  }
   0x6   :  { %s1617_s18 = smov 0   ;;  %s1619_s19 = smov 0  }
   0x7   :  { %s1621_s20 = smov 0   ;;  %s1623_s21 = smov 0  }
   0x8   :  { %s1625_s22 = smov 0  }
   0x9 LB: > { %s1224_s23 = sadd.s32 4294967295, %s1582_s22   ;;  %s25_s24 = sadd.s32 1, %s1574_s20  ;;  %s1582_s22 = sphi %s1625_s22, %s13_s22   ;;  %s1578_s21 = sphi %s1623_s21, %s1960_s21   ;;  %s1574_s20 = sphi %s1621_s20, %s1959_s20   ;;  %s1570_s19 = sphi %s1619_s19, %s1958_s19   ;;  %s1566_s18 = sphi %s1617_s18, %s1957_s18   ;;  %s1562_s17 = sphi %s1615_s17, %s1956_s17   ;;  %s1558_s16 = sphi %s1613_s16, %s1955_s16   ;;  %s1554_s15 = sphi %s1611_s15, %s1954_s15   ;;  %s1550_s14 = sphi %s1609_s14, %s1953_s14   ;;  %s1546_s13 = sphi %s1607_s13, %s1952_s13   ;;  %s1542_s12 = sphi %s1605_s12, %s1951_s12  }
   0xa   : > { %p26_p0 = scmp.ge.s32.totalorder %s25_s24, 9  ;;  %s28_s25 = sadd.s32 1, %s1578_s21 }
   0xb   : > { %s41_s26 = sadd.s32 1, %s1562_s17  ;;  %p48_p1 = scmp.ne.s32.totalorder %s1562_s17, %s1558_s16 }
   0xc   : > { %s1962_s24 = smov (%p26_p0, %s25_s24), 0  ;;  %s1964_s25 = smov (!%p26_p0, %s28_s25), %s1578_s21 }
   0xd   : > { %s37_s27 = ssub.s32 %s1574_s20, %s1962_s24  ;;  %p49_p2 = scmp.eq.s32.totalorder %s1582_s22, 0 }
   0xe   : > { %p30_p3 = scmp.ge.s32.totalorder %s1964_s25, 2  ;;  %p39_p4 = scmp.eq.s32.totalorder %s37_s27, 0 }
   0xf   : > { %p1672_p5 = por %p49_p2, %p48_p1  ;;  %s69_s29 = sadd.s32 1, %s1554_s15 }
  0x10   : > { %s1966_s25 = smov (%p30_p3, %s1964_s25), 0  ;;  %p76_p6 = scmp.ne.s32.totalorder %s1554_s15, %s1550_s14 }
  0x11   : > { %1945 = sst [smem:[#allocation6_spill]] %s1966_s25  ;;  %s65_s4 = ssub.s32 %s1578_s21, %s1966_s25 }
  0x12   : > { %s1680_s30 = scalar_select %p39_p4, %s1562_s17, %s41_s26  }
  0x13   : > { %s66_s5 = sor.u32 %s65_s4, %s37_s27  ;;  %p121_p7 = scmp.eq.s32.totalorder %s65_s4, 0 }
  0x14   : > { %p67_p8 = scmp.eq.s32.totalorder %s66_s5, 0  ;;  %p1686_p9 = por %p76_p6, %p49_p2 }
  0x15   : > { %s123_s7 = sadd.s32 1, %s1546_s13  ;;  %p133_p10 = scmp.ne.s32.totalorder %s1546_s13, %s1542_s12 }
  0x16   : > { %s1694_s8 = scalar_select %p67_p8, %s1554_s15, %s69_s29  }
  0x17   : > { %s1697_s9 = scalar_select %p121_p7, %s1546_s13, %s123_s7  }
  0x18   : > { %p134_p11 = scmp.eq.s32.totalorder %s1224_s23, 17  ;;  %p1227_p13 = scmp.ge.s32.totalorder %s1582_s22, 18 }
  0x1a   : > { %p1699_p12 = por %p134_p11, %p133_p10  ;;  %156 = sbr.rel (%p1227_p13) target bundleno = 75 (0x4b), region = 16 }
  0x21   : > { %159 = sbr.rel (!%p1672_p5) target bundleno = 49 (0x31), region = 20  ;;  %s161_s11 = sand.u32 (%p1672_p5), 1, %s1562_s17  }
  0x22   : > { %s1296_s26 = sshll.u32 (%p1672_p5), %s1574_s20, 3  ;;  %s1341_s27 = smul.u32 (%p1672_p5), 80, %s161_s11 }
  0x23   : > { %s1948_s0 = sld [smem:[#allocation7_spill]] (%p1672_p5) }
  0x24   : > { %s163_s23 = scalar_lea.vmem (%p1672_p5), [#allocation3], %s1341_s27 }
  0x29   : > { %s169_s5 = scalar_lea.vmem %s1948_s0, %s1296_s26 }
  0x2a   : > { %v215_v0 = vld [vmem:[%s169_s5] sm:$0xff]  ;;  %v217_v1 = vld [vmem:[%s169_s5 + $0x48] sm:$0xff]  ;;  %v219_v2 = vld [vmem:[%s169_s5 + $0x90] sm:$0xff] }
  0x2b   : > { %v221_v3 = vld [vmem:[%s169_s5 + $0xd8] sm:$0xff]  ;;  %v223_v4 = vld [vmem:[%s169_s5 + $0x120] sm:$0xff]  ;;  %v225_v5 = vld [vmem:[%s169_s5 + $0x168] sm:$0xff]  ;;  %216 = vst [vmem:[%s163_s23] sm:$0xff] %v215_v0 }
  0x2c   : > { %218 = vst [vmem:[%s163_s23 + $0x8] sm:$0xff] %v217_v1  ;;  %220 = vst [vmem:[%s163_s23 + $0x10] sm:$0xff] %v219_v2  ;;  %v227_v6 = vld [vmem:[%s169_s5 + $0x1b0] sm:$0xff]  ;;  %v229_v7 = vld [vmem:[%s169_s5 + $0x1f8] sm:$0xff] }
  0x2d   : > { %222 = vst [vmem:[%s163_s23 + $0x18] sm:$0xff] %v221_v3  ;;  %224 = vst [vmem:[%s163_s23 + $0x20] sm:$0xff] %v223_v4  ;;  %v231_v8 = vld [vmem:[%s169_s5 + $0x240] sm:$0xff]  ;;  %v233_v9 = vld [vmem:[%s169_s5 + $0x288] sm:$0xff] }
  0x2e   : > { %226 = vst [vmem:[%s163_s23 + $0x28] sm:$0xff] %v225_v5  ;;  %228 = vst [vmem:[%s163_s23 + $0x30] sm:$0xff] %v227_v6 }
  0x2f   : > { %230 = vst [vmem:[%s163_s23 + $0x38] sm:$0xff] %v229_v7  ;;  %232 = vst [vmem:[%s163_s23 + $0x40] sm:$0xff] %v231_v8 }
  0x30   : > { %234 = vst [vmem:[%s163_s23 + $0x48] sm:$0xff] %v233_v9 }
  0x31 PF: > { %240 = sbr.rel (!%p1686_p9) target bundleno = 75 (0x4b), region = 58  ;;  %s242_s28 = sand.u32 (%p1686_p9), 1, %s1554_s15  }
  0x32   : > { %s1232_s7 = sshll.u32 (%p1686_p9), %s1578_s21, 1  ;;  %s1230_s11 = sshll.u32 (%p1686_p9), %s242_s28, 8 }
  0x33   : > { %s1297_s26 = sshll.u32 (%p1686_p9), %s1574_s20, 7  ;;  %s1949_s1 = sld [smem:[#allocation8_spill]] (%p1686_p9) }
  0x34   : > { %s248_s27 = sadd.s32 (%p1686_p9), %s1297_s26, %s1232_s7  ;;  %s1724_s6 = scalar_lea.vmem (%p1686_p9), [#allocation4], %s1230_s11 }
  0x35   : > { %s1234_s29 = sshll.u32 (%p1686_p9), %s248_s27, 2 }
  0x39   : > { %s1719_s25 = scalar_lea.vmem %s1949_s1, %s1234_s29 }
  0x3a   : > { %v340_v10 = vld [vmem:[%s1719_s25] sm:$0xff]  ;;  %v342_v11 = vld [vmem:[%s1719_s25 + $0x10] sm:$0xff] }
  0x3b   : > { %v344_v12 = vld [vmem:[%s1719_s25 + $0x20] sm:$0xff]  ;;  %341 = vst [vmem:[%s1724_s6] sm:$0xff] %v340_v10  ;;  %343 = vst [vmem:[%s1724_s6 + $0x8] sm:$0xff] %v342_v11  ;;  %v346_v13 = vld [vmem:[%s1719_s25 + $0x30] sm:$0xff] }
  0x3c   : > { %345 = vst [vmem:[%s1724_s6 + $0x10] sm:$0xff] %v344_v12  ;;  %v348_v14 = vld [vmem:[%s1719_s25 + $0x40] sm:$0xff]  ;;  %v350_v15 = vld [vmem:[%s1719_s25 + $0x50] sm:$0xff]  ;;  %347 = vst [vmem:[%s1724_s6 + $0x18] sm:$0xff] %v346_v13 }
  0x3d   : > { %349 = vst [vmem:[%s1724_s6 + $0x20] sm:$0xff] %v348_v14  ;;  %351 = vst [vmem:[%s1724_s6 + $0x28] sm:$0xff] %v350_v15  ;;  %v352_v16 = vld [vmem:[%s1719_s25 + $0x60] sm:$0xff]  ;;  %v354_v17 = vld [vmem:[%s1719_s25 + $0x70] sm:$0xff] }
  0x3e   : > { %v356_v18 = vld [vmem:[%s1719_s25 + $0x80] sm:$0xff]  ;;  %353 = vst [vmem:[%s1724_s6 + $0x30] sm:$0xff] %v352_v16  ;;  %355 = vst [vmem:[%s1724_s6 + $0x38] sm:$0xff] %v354_v17  ;;  %v358_v19 = vld [vmem:[%s1719_s25 + $0x90] sm:$0xff] }
  0x3f   : > { %357 = vst [vmem:[%s1724_s6 + $0x40] sm:$0xff] %v356_v18  ;;  %v360_v20 = vld [vmem:[%s1719_s25 + $0xa0] sm:$0xff]  ;;  %v362_v21 = vld [vmem:[%s1719_s25 + $0xb0] sm:$0xff]  ;;  %359 = vst [vmem:[%s1724_s6 + $0x48] sm:$0xff] %v358_v19 }
  0x40   : > { %361 = vst [vmem:[%s1724_s6 + $0x50] sm:$0xff] %v360_v20  ;;  %363 = vst [vmem:[%s1724_s6 + $0x58] sm:$0xff] %v362_v21  ;;  %v364_v22 = vld [vmem:[%s1719_s25 + $0xc0] sm:$0xff]  ;;  %v366_v23 = vld [vmem:[%s1719_s25 + $0xd0] sm:$0xff] }
  0x41   : > { %v368_v24 = vld [vmem:[%s1719_s25 + $0xe0] sm:$0xff]  ;;  %365 = vst [vmem:[%s1724_s6 + $0x60] sm:$0xff] %v364_v22  ;;  %367 = vst [vmem:[%s1724_s6 + $0x68] sm:$0xff] %v366_v23  ;;  %v370_v25 = vld [vmem:[%s1719_s25 + $0xf0] sm:$0xff] }
  0x42   : > { %369 = vst [vmem:[%s1724_s6 + $0x70] sm:$0xff] %v368_v24  ;;  %v372_v26 = vld [vmem:[%s1719_s25 + $0x100] sm:$0xff]  ;;  %v374_v27 = vld [vmem:[%s1719_s25 + $0x110] sm:$0xff]  ;;  %371 = vst [vmem:[%s1724_s6 + $0x78] sm:$0xff] %v370_v25 }
  0x43   : > { %373 = vst [vmem:[%s1724_s6 + $0x80] sm:$0xff] %v372_v26  ;;  %375 = vst [vmem:[%s1724_s6 + $0x88] sm:$0xff] %v374_v27  ;;  %v376_v28 = vld [vmem:[%s1719_s25 + $0x120] sm:$0xff]  ;;  %v378_v29 = vld [vmem:[%s1719_s25 + $0x130] sm:$0xff] }
  0x44   : > { %v380_v30 = vld [vmem:[%s1719_s25 + $0x140] sm:$0xff]  ;;  %377 = vst [vmem:[%s1724_s6 + $0x90] sm:$0xff] %v376_v28  ;;  %379 = vst [vmem:[%s1724_s6 + $0x98] sm:$0xff] %v378_v29  ;;  %v382_v31 = vld [vmem:[%s1719_s25 + $0x150] sm:$0xff] }
  0x45   : > { %381 = vst [vmem:[%s1724_s6 + $0xa0] sm:$0xff] %v380_v30  ;;  %v384_v32 = vld [vmem:[%s1719_s25 + $0x160] sm:$0xff]  ;;  %v386_v33 = vld [vmem:[%s1719_s25 + $0x170] sm:$0xff]  ;;  %383 = vst [vmem:[%s1724_s6 + $0xa8] sm:$0xff] %v382_v31 }
  0x46   : > { %385 = vst [vmem:[%s1724_s6 + $0xb0] sm:$0xff] %v384_v32  ;;  %387 = vst [vmem:[%s1724_s6 + $0xb8] sm:$0xff] %v386_v33  ;;  %v388_v34 = vld [vmem:[%s1719_s25 + $0x180] sm:$0xff]  ;;  %v390_v35 = vld [vmem:[%s1719_s25 + $0x190] sm:$0xff] }
  0x47   : > { %v392_v36 = vld [vmem:[%s1719_s25 + $0x1a0] sm:$0xff]  ;;  %389 = vst [vmem:[%s1724_s6 + $0xc0] sm:$0xff] %v388_v34  ;;  %391 = vst [vmem:[%s1724_s6 + $0xc8] sm:$0xff] %v390_v35  ;;  %v394_v37 = vld [vmem:[%s1719_s25 + $0x1b0] sm:$0xff] }
  0x48   : > { %393 = vst [vmem:[%s1724_s6 + $0xd0] sm:$0xff] %v392_v36  ;;  %v396_v38 = vld [vmem:[%s1719_s25 + $0x1c0] sm:$0xff]  ;;  %v398_v39 = vld [vmem:[%s1719_s25 + $0x1d0] sm:$0xff]  ;;  %395 = vst [vmem:[%s1724_s6 + $0xd8] sm:$0xff] %v394_v37 }
  0x49   : > { %397 = vst [vmem:[%s1724_s6 + $0xe0] sm:$0xff] %v396_v38  ;;  %399 = vst [vmem:[%s1724_s6 + $0xe8] sm:$0xff] %v398_v39  ;;  %v400_v40 = vld [vmem:[%s1719_s25 + $0x1e0] sm:$0xff]  ;;  %v402_v41 = vld [vmem:[%s1719_s25 + $0x1f0] sm:$0xff] }
  0x4a   : > { %401 = vst [vmem:[%s1724_s6 + $0xf0] sm:$0xff] %v400_v40  ;;  %403 = vst [vmem:[%s1724_s6 + $0xf8] sm:$0xff] %v402_v41 }
  0x4b PF: > { %p1235_p0 = scmp.ge.s32.totalorder %s1582_s22, 1  ;;  %p416_p1 = scmp.lt.s32.totalorder %s1582_s22, 19 }
  0x4d   : > { %p417_p2 = pnand %p1235_p0, %p416_p1 }
  0x4e   : > { %s423_s0 = sand.u32 (!%p417_p2), 1, %s1558_s16   ;;  %s430_s5 = sand.u32 (!%p417_p2), 1, %s1550_s14  }
  0x4f   : > { %420 = sbr.rel (%p417_p2) target bundleno = 419 (0x1a3), region = 100  ;;  %s1236_s28 = sshll.u32 (!%p417_p2), %s430_s5, 8 }
  0x50   : > { %s1342_s23 = smul.u32 (!%p417_p2), 80, %s423_s0  ;;  %s457_s7 = sand.u32 (!%p417_p2), 1, %s1542_s12  }
  0x51   : > { %s1343_s25 = smul.u32 (!%p417_p2), 80, %s457_s7  ;;  %s1237_s11 = sshll.u32 (!%p417_p2), %s1570_s19, 1 }
  0x52   : > { %p465_p3 = scmp.lt.s32.totalorder (!%p417_p2), %s1237_s11, 3  ;;  %s1799_s4 = scalar_lea.vmem (!%p417_p2), [#allocation3], %s1342_s23 }
  0x53   : > { %s1801_s6 = scalar_lea.vmem (!%p417_p2), [#allocation4], %s1236_s28  ;;  %s1803_s1 = scalar_lea.vmem (!%p417_p2), [#allocation5], %s1343_s25 }
  0x54   : > { %p1238_p4 = scmp.ne.s32.totalorder (!%p417_p2), %s1566_s18, 0 }
  0x56   : > { %s1968_s11 = smov (!%p465_p3, %s1237_s11), 3  ;;  %474 = sbr.rel (%p1238_p4) target bundleno = 98 (0x62), region = 112 }
  0x57   : > { %s467_s29 = scalar_lea.vmem %s1939_s2, %s1968_s11  ;;  %v1584_v42 = vmov (!%p1238_p4), 0.0  }
  0x58   : > { %475 = vst [vmem:[#allocation2] sm:$0xff] (!%p1238_p4), %v1584_v42  ;;  %476 = vst [vmem:[#allocation2 + $0x8] sm:$0xff] (!%p1238_p4), %v1584_v42 }
  0x59   : > { %477 = vst [vmem:[#allocation2 + $0x10] sm:$0xff] (!%p1238_p4), %v1584_v42  ;;  %478 = vst [vmem:[#allocation2 + $0x18] sm:$0xff] (!%p1238_p4), %v1584_v42 }
  0x5a   : > { %479 = vst [vmem:[#allocation2 + $0x20] sm:$0xff] (!%p1238_p4), %v1584_v42  ;;  %480 = vst [vmem:[#allocation2 + $0x28] sm:$0xff] (!%p1238_p4), %v1584_v42 }
  0x5b   : > { %481 = vst [vmem:[#allocation2 + $0x30] sm:$0xff] (!%p1238_p4), %v1584_v42  ;;  %482 = vst [vmem:[#allocation2 + $0x38] sm:$0xff] (!%p1238_p4), %v1584_v42 }
  0x5c   : > { %483 = vst [vmem:[#allocation2 + $0x40] sm:$0xff] (!%p1238_p4), %v1584_v42  ;;  %484 = vst [vmem:[#allocation2 + $0x48] sm:$0xff] (!%p1238_p4), %v1584_v42 }
  0x5d   : > { %485 = vst [vmem:[#allocation2 + $0x50] sm:$0xff] %v1584_v42  ;;  %486 = vst [vmem:[#allocation2 + $0x58] sm:$0xff] %v1584_v42 }
  0x5e   : > { %487 = vst [vmem:[#allocation2 + $0x60] sm:$0xff] %v1584_v42  ;;  %488 = vst [vmem:[#allocation2 + $0x68] sm:$0xff] %v1584_v42 }
  0x5f   : > { %489 = vst [vmem:[#allocation2 + $0x70] sm:$0xff] %v1584_v42  ;;  %490 = vst [vmem:[#allocation2 + $0x78] sm:$0xff] %v1584_v42 }
  0x60   : > { %491 = vst [vmem:[#allocation2 + $0x80] sm:$0xff] %v1584_v42  ;;  %492 = vst [vmem:[#allocation2 + $0x88] sm:$0xff] %v1584_v42 }
  0x61   : > { %493 = vst [vmem:[#allocation2 + $0x90] sm:$0xff] %v1584_v42  ;;  %494 = vst [vmem:[#allocation2 + $0x98] sm:$0xff] %v1584_v42 }
  0x62 PF: > { %v1433_v43 = vld [vmem:[%s1801_s6 + $0x4] ss:$8 sps:$4 sm:$0xff]   ;;  %v1435_v44 = vld [vmem:[%s1801_s6] ss:$8 sps:$4 sm:$0xff]   ;;  %v1436_v45 = vld [vmem:[%s1801_s6 + $0x14] ss:$8 sps:$4 sm:$0xff]  }
  0x63   : > { %767 = vmatprep.subr.bf16.mxu0 %v1433_v43  ;;  %1309 = vmatprep.subr.bf16.mxu1 %v1433_v43  ;;  %v1438_v46 = vld [vmem:[%s1801_s6 + $0x10] ss:$8 sps:$4 sm:$0xff]   ;;  %v1439_v47 = vld [vmem:[%s1801_s6 + $0x24] ss:$8 sps:$4 sm:$0xff]   ;;  %v1441_v48 = vld [vmem:[%s1801_s6 + $0x20] ss:$8 sps:$4 sm:$0xff]  }
  0x64   : > { %768 = vmatpush1.bf16.msra.mxu0 %v1435_v44  ;;  %1325 = vmatpush1.bf16.msra.mxu1 %v1435_v44  ;;  %v1442_v49 = vld [vmem:[%s1801_s6 + $0x34] ss:$8 sps:$4 sm:$0xff]   ;;  %v1444_v50 = vld [vmem:[%s1801_s6 + $0x30] ss:$8 sps:$4 sm:$0xff]   ;;  %v1445_v51 = vld [vmem:[%s1801_s6 + $0x44] ss:$8 sps:$4 sm:$0xff]  }
  0x65   : > { %769 = vmatprep.subr.bf16.mxu0 %v1436_v45  ;;  %1310 = vmatprep.subr.bf16.mxu1 %v1436_v45  ;;  %v1447_v52 = vld [vmem:[%s1801_s6 + $0x40] ss:$8 sps:$4 sm:$0xff]   ;;  %v1448_v53 = vld [vmem:[%s1801_s6 + $0x54] ss:$8 sps:$4 sm:$0xff]   ;;  %v1450_v54 = vld [vmem:[%s1801_s6 + $0x50] ss:$8 sps:$4 sm:$0xff]  }
  0x66   : > { %v1451_v55 = vld [vmem:[%s1801_s6 + $0x64] ss:$8 sps:$4 sm:$0xff]   ;;  %v1453_v57 = vld [vmem:[%s1801_s6 + $0x60] ss:$8 sps:$4 sm:$0xff]   ;;  %v1454_v59 = vld [vmem:[%s1801_s6 + $0x74] ss:$8 sps:$4 sm:$0xff]  }
  0x67   : > { %v1483_v56 = vld [vmem:[%s1799_s4 + $0x4] ss:$8 sps:$4 sm:$0xff]   ;;  %v1486_v58 = vld [vmem:[%s1799_s4 + $0x34] ss:$8 sps:$4 sm:$0xff]   ;;  %v1456_v60 = vld [vmem:[%s1801_s6 + $0x70] ss:$8 sps:$4 sm:$0xff]  }
  0x68   : > { %770 = vmatpush1.bf16.msra.mxu0 %v1438_v46  ;;  %1326 = vmatpush1.bf16.msra.mxu1 %v1438_v46  ;;  %v1457_v61 = vld [vmem:[%s1801_s6 + $0x84] ss:$8 sps:$4 sm:$0xff]   ;;  %v1459_v62 = vld [vmem:[%s1801_s6 + $0x80] ss:$8 sps:$4 sm:$0xff]   ;;  %v1460_v63 = vld [vmem:[%s1801_s6 + $0x94] ss:$8 sps:$4 sm:$0xff]  }
  0x69   : > { %771 = vmatprep.subr.bf16.mxu0 %v1439_v47  ;;  %1311 = vmatprep.subr.bf16.mxu1 %v1439_v47  ;;  %v1462_v0 = vld [vmem:[%s1801_s6 + $0x90] ss:$8 sps:$4 sm:$0xff]   ;;  %v1463_v1 = vld [vmem:[%s1801_s6 + $0xa4] ss:$8 sps:$4 sm:$0xff]   ;;  %v1465_v2 = vld [vmem:[%s1801_s6 + $0xa0] ss:$8 sps:$4 sm:$0xff]  }
  0x6a   : > { %799 = vmatprep.mubr.bf16.mxu0 %v1483_v56  ;;  %829 = vmatprep.mubr.bf16.mxu1 %v1486_v58  ;;  %v1466_v3 = vld [vmem:[%s1801_s6 + $0xb4] ss:$8 sps:$4 sm:$0xff]   ;;  %v1468_v4 = vld [vmem:[%s1801_s6 + $0xb0] ss:$8 sps:$4 sm:$0xff]   ;;  %v1469_v5 = vld [vmem:[%s1801_s6 + $0xc4] ss:$8 sps:$4 sm:$0xff]  }
  0x6b   : > { %v1471_v6 = vld [vmem:[%s1801_s6 + $0xc0] ss:$8 sps:$4 sm:$0xff]   ;;  %v1472_v7 = vld [vmem:[%s1801_s6 + $0xd4] ss:$8 sps:$4 sm:$0xff]   ;;  %v1474_v8 = vld [vmem:[%s1801_s6 + $0xd0] ss:$8 sps:$4 sm:$0xff]  }
  0x6c   : > { %772 = vmatpush1.bf16.msra.mxu0 %v1441_v48  ;;  %1327 = vmatpush1.bf16.msra.mxu1 %v1441_v48  ;;  %v1475_v9 = vld [vmem:[%s1801_s6 + $0xe4] ss:$8 sps:$4 sm:$0xff]   ;;  %v1477_v10 = vld [vmem:[%s1801_s6 + $0xe0] ss:$8 sps:$4 sm:$0xff]   ;;  %v1478_v11 = vld [vmem:[%s1801_s6 + $0xf4] ss:$8 sps:$4 sm:$0xff]  }
  0x6d   : > { %773 = vmatprep.subr.bf16.mxu0 %v1442_v49  ;;  %1312 = vmatprep.subr.bf16.mxu1 %v1442_v49  ;;  %v1480_v12 = vld [vmem:[%s1801_s6 + $0xf0] ss:$8 sps:$4 sm:$0xff]   ;;  %v1487_v15 = vld [vmem:[%s1799_s4 + $0x14] ss:$8 sps:$4 sm:$0xff]   ;;  %v1490_v16 = vld [vmem:[%s1799_s4 + $0x44] ss:$8 sps:$4 sm:$0xff]  }
  0x6e   : > { %v1481_v13 = vld [vmem:[%s1799_s4] ss:$8 sps:$4 sm:$0xff]   ;;  %v1484_v14 = vld [vmem:[%s1799_s4 + $0x30] ss:$8 sps:$4 sm:$0xff]   ;;  %v1493_v19 = vld [vmem:[%s1799_s4 + $0x24] ss:$8 sps:$4 sm:$0xff]  }
  0x6f   : > { %v1489_v17 = vld [vmem:[%s1799_s4 + $0x10] ss:$8 sps:$4 sm:$0xff]   ;;  %v1492_v18 = vld [vmem:[%s1799_s4 + $0x40] ss:$8 sps:$4 sm:$0xff]   ;;  %p1281_p5 = scmp.ne.s32.totalorder %s1566_s18, 8 }
  0x70   : > { %774 = vmatpush1.bf16.msra.mxu0 %v1444_v50  ;;  %1328 = vmatpush1.bf16.msra.mxu1 %v1444_v50  ;;  %v1495_v20 = vld [vmem:[%s1799_s4 + $0x20] ss:$8 sps:$4 sm:$0xff]  }
  0x71   : > { %775 = vmatprep.subr.bf16.mxu0 %v1445_v51  ;;  %1313 = vmatprep.subr.bf16.mxu1 %v1445_v51  ;;  %v495_v21 = vld [vmem:[#allocation2] sm:$0xff]  ;;  %v496_v23 = vld [vmem:[#allocation2 + $0x8] sm:$0xff]  ;;  %v497_v26 = vld [vmem:[#allocation2 + $0x10] sm:$0xff] }
  0x72   : > { %v507_v22 = vld [vmem:[#allocation2 + $0x60] sm:$0xff]  ;;  %v508_v24 = vld [vmem:[#allocation2 + $0x68] sm:$0xff]  ;;  %v509_v28 = vld [vmem:[#allocation2 + $0x70] sm:$0xff] }
  0x73   : > { %v498_v31 = vld [vmem:[#allocation2 + $0x18] sm:$0xff]  ;;  %v499_v45 = vld [vmem:[#allocation2 + $0x20] sm:$0xff]  ;;  %v500_v47 = vld [vmem:[#allocation2 + $0x28] sm:$0xff] }
  0x74   : > { %776 = vmatpush1.bf16.msra.mxu0 %v1447_v52  ;;  %1329 = vmatpush1.bf16.msra.mxu1 %v1447_v52  ;;  %v510_v34 = vld [vmem:[#allocation2 + $0x78] sm:$0xff]  ;;  %v511_v46 = vld [vmem:[#allocation2 + $0x80] sm:$0xff]  ;;  %v512_v48 = vld [vmem:[#allocation2 + $0x88] sm:$0xff] }
  0x75   : > { %777 = vmatprep.subr.bf16.mxu0 %v1448_v53  ;;  %1314 = vmatprep.subr.bf16.mxu1 %v1448_v53  ;;  %v501_v50 = vld [vmem:[#allocation2 + $0x30] sm:$0xff]  ;;  %v514_v58 = vld [vmem:[#allocation2 + $0x98] sm:$0xff] }
  0x76   : > { %v513_v52 = vld [vmem:[#allocation2 + $0x90] sm:$0xff] }
  0x78   : > { %778 = vmatpush1.bf16.msra.mxu0 %v1450_v54  ;;  %1330 = vmatpush1.bf16.msra.mxu1 %v1450_v54 }
  0x79   : > { %779 = vmatprep.subr.bf16.mxu0 %v1451_v55  ;;  %1315 = vmatprep.subr.bf16.mxu1 %v1451_v55  ;;  %v502_v55 = vld [vmem:[#allocation2 + $0x38] sm:$0xff] }
  0x7c   : > { %780 = vmatpush1.bf16.msra.mxu0 %v1453_v57  ;;  %1331 = vmatpush1.bf16.msra.mxu1 %v1453_v57 }
  0x7d   : > { %781 = vmatprep.subr.bf16.mxu0 %v1454_v59  ;;  %1316 = vmatprep.subr.bf16.mxu1 %v1454_v59 }
  0x80   : > { %782 = vmatpush1.bf16.msra.mxu0 %v1456_v60  ;;  %1332 = vmatpush1.bf16.msra.mxu1 %v1456_v60 }
  0x81   : > { %783 = vmatprep.subr.bf16.mxu0 %v1457_v61  ;;  %1317 = vmatprep.subr.bf16.mxu1 %v1457_v61 }
  0x84   : > { %784 = vmatpush1.bf16.msra.mxu0 %v1459_v62  ;;  %1333 = vmatpush1.bf16.msra.mxu1 %v1459_v62 }
  0x85   : > { %785 = vmatprep.subr.bf16.mxu0 %v1460_v63  ;;  %1318 = vmatprep.subr.bf16.mxu1 %v1460_v63 }
  0x88   : > { %786 = vmatpush1.bf16.msra.mxu0 %v1462_v0  ;;  %1334 = vmatpush1.bf16.msra.mxu1 %v1462_v0 }
  0x89   : > { %787 = vmatprep.subr.bf16.mxu0 %v1463_v1  ;;  %1319 = vmatprep.subr.bf16.mxu1 %v1463_v1 }
  0x8c   : > { %788 = vmatpush1.bf16.msra.mxu0 %v1465_v2  ;;  %1335 = vmatpush1.bf16.msra.mxu1 %v1465_v2 }
  0x8d   : > { %789 = vmatprep.subr.bf16.mxu0 %v1466_v3  ;;  %1320 = vmatprep.subr.bf16.mxu1 %v1466_v3 }
  0x90   : > { %790 = vmatpush1.bf16.msra.mxu0 %v1468_v4  ;;  %1336 = vmatpush1.bf16.msra.mxu1 %v1468_v4 }
  0x91   : > { %791 = vmatprep.subr.bf16.mxu0 %v1469_v5  ;;  %1321 = vmatprep.subr.bf16.mxu1 %v1469_v5  ;;  %v503_v5 = vld [vmem:[#allocation2 + $0x40] sm:$0xff] }
  0x94   : > { %792 = vmatpush1.bf16.msra.mxu0 %v1471_v6  ;;  %1337 = vmatpush1.bf16.msra.mxu1 %v1471_v6  ;;  %v504_v6 = vld [vmem:[#allocation2 + $0x48] sm:$0xff] }
  0x95   : > { %793 = vmatprep.subr.bf16.mxu0 %v1472_v7  ;;  %1322 = vmatprep.subr.bf16.mxu1 %v1472_v7 }
  0x98   : > { %794 = vmatpush1.bf16.msra.mxu0 %v1474_v8  ;;  %1338 = vmatpush1.bf16.msra.mxu1 %v1474_v8  ;;  %v505_v8 = vld [vmem:[#allocation2 + $0x50] sm:$0xff] }
  0x99   : > { %795 = vmatprep.subr.bf16.mxu0 %v1475_v9  ;;  %1323 = vmatprep.subr.bf16.mxu1 %v1475_v9 }
  0x9c   : > { %796 = vmatpush1.bf16.msra.mxu0 %v1477_v10  ;;  %1339 = vmatpush1.bf16.msra.mxu1 %v1477_v10 }
  0x9d   : > { %797 = vmatprep.subr.bf16.mxu0 %v1478_v11  ;;  %1324 = vmatprep.subr.bf16.mxu1 %v1478_v11  ;;  %v506_v11 = vld [vmem:[#allocation2 + $0x58] sm:$0xff] }
  0xa0   : > { %798 = vmatpush1.bf16.msra.mxu0 %v1480_v12  ;;  %1340 = vmatpush1.bf16.msra.mxu1 %v1480_v12 }
  0xa3   : > { %800 = vmatmul.mubr.bf16.vlgmr.msra.gmra.mrb[0].mxu0 %v1481_v13  ;;  %830 = vmatmul.mubr.bf16.vlgmr.msra.gmra.mrb[0].mxu1 %v1484_v14 }
  0xa4   : > { %809 = vmatprep.mubr.bf16.mxu0 %v1487_v15  ;;  %839 = vmatprep.mubr.bf16.mxu1 %v1490_v16 }
  0xab   : > { %810 = vmatmul.mubr.bf16.gmra.mrb[4].mxu0 %v1489_v17  ;;  %840 = vmatmul.mubr.bf16.gmra.mrb[4].mxu1 %v1492_v18  ;;  %v916_v17 = vlaneseq (!%p1281_p5) }
  0xac   : > { %819 = vmatprep.mubr.bf16.mxu0 %v1493_v19  ;;  %v914_v19 = vld [vmem:[%s467_s29] sm:$0x3] (!%p1281_p5) }
  0xad   : > { %v917_v18 = vshrl.u32 (!%p1281_p5), %v916_v17, 7 }
  0xb3   : > { %820 = vmatmul.mubr.bf16.gmra.mrb[8].mxu0 %v1495_v20 }
 0x176   : > { %v801_v25 = vpop.f32.mrb[0].mxu0  ;;  %v831_v27 = vpop.f32.mrb[0].mxu1 }
 0x177   : > { %v850_v29 = vadd.f32 %v801_v25, %v495_v21  ;;  %v803_v30 = vpop.f32.mrb[1].mxu0  ;;  %v862_v32 = vadd.f32 %v831_v27, %v507_v22  ;;  %v833_v33 = vpop.f32.mrb[1].mxu1  ;;  %v918_v22 = vsub.s32 (!%p1281_p5), 0, %v917_v18 }
 0x178   : > { %v851_v35 = vadd.f32 %v803_v30, %v496_v23  ;;  %v805_v36 = vpop.f32.mrb[2].mxu0  ;;  %v863_v37 = vadd.f32 %v833_v33, %v508_v24  ;;  %v835_v38 = vpop.f32.mrb[2].mxu1  ;;  %v922_v23 = vsub.s32 (!%p1281_p5), 1, %v917_v18 }
 0x179   : > { %870 = vst [vmem:[#allocation2] sm:$0xff] %v850_v29  ;;  %v852_v39 = vadd.f32 %v805_v36, %v497_v26  ;;  %v807_v40 = vpop.f32.mrb[3].mxu0  ;;  %882 = vst [vmem:[#allocation2 + $0x60] sm:$0xff] %v862_v32  ;;  %v864_v41 = vadd.f32 %v835_v38, %v509_v28  ;;  %v837_v42 = vpop.f32.mrb[3].mxu1  ;;  %v1854_v27 = vrot.slane (!%p1281_p5), %v914_v19, %v918_v22 }
 0x17a   : > { %871 = vst [vmem:[#allocation2 + $0x8] sm:$0xff] %v851_v35  ;;  %v853_v43 = vadd.f32 %v807_v40, %v498_v31  ;;  %883 = vst [vmem:[#allocation2 + $0x68] sm:$0xff] %v863_v37  ;;  %v865_v44 = vadd.f32 %v837_v42, %v510_v34  ;;  %v1856_v28 = vrot.slane (!%p1281_p5), %v914_v19, %v922_v23 }
 0x17b   : > { %872 = vst [vmem:[#allocation2 + $0x10] sm:$0xff] %v852_v39  ;;  %884 = vst [vmem:[#allocation2 + $0x70] sm:$0xff] %v864_v41 }
 0x17c   : > { %873 = vst [vmem:[#allocation2 + $0x18] sm:$0xff] %v853_v43  ;;  %885 = vst [vmem:[#allocation2 + $0x78] sm:$0xff] %v865_v44 }
 0x17e   : > { %v811_v49 = vpop.f32.mrb[4].mxu0  ;;  %v841_v51 = vpop.f32.mrb[4].mxu1 }
 0x17f   : > { %v854_v53 = vadd.f32 %v811_v49, %v499_v45  ;;  %v813_v54 = vpop.f32.mrb[5].mxu0  ;;  %v866_v56 = vadd.f32 %v841_v51, %v511_v46  ;;  %v843_v57 = vpop.f32.mrb[5].mxu1 }
 0x180   : > { %v855_v59 = vadd.f32 %v813_v54, %v500_v47  ;;  %v815_v60 = vpop.f32.mrb[6].mxu0  ;;  %v867_v61 = vadd.f32 %v843_v57, %v512_v48  ;;  %v845_v62 = vpop.f32.mrb[6].mxu1  ;;  %v894_v20 = vld [vmem:[#allocation2] sm:$0xff] (!%p1281_p5) }
 0x181   : > { %874 = vst [vmem:[#allocation2 + $0x20] sm:$0xff] %v854_v53  ;;  %v856_v63 = vadd.f32 %v815_v60, %v501_v50  ;;  %v817_v0 = vpop.f32.mrb[7].mxu0  ;;  %886 = vst [vmem:[#allocation2 + $0x80] sm:$0xff] %v866_v56  ;;  %v868_v1 = vadd.f32 %v845_v62, %v513_v52  ;;  %v847_v2 = vpop.f32.mrb[7].mxu1  ;;  %v895_v21 = vld [vmem:[#allocation2 + $0x8] sm:$0xff] (!%p1281_p5)  ;;  %v926_v32 = vadd.f32 (!%p1281_p5), %v1854_v27, %v894_v20  ;;  %v906_v52 = vld [vmem:[#allocation2 + $0x60] sm:$0xff] (!%p1281_p5) }
 0x182   : > { %875 = vst [vmem:[#allocation2 + $0x28] sm:$0xff] %v855_v59  ;;  %v857_v3 = vadd.f32 %v817_v0, %v502_v55  ;;  %887 = vst [vmem:[#allocation2 + $0x88] sm:$0xff] %v867_v61  ;;  %v869_v4 = vadd.f32 %v847_v2, %v514_v58  ;;  %v896_v24 = vld [vmem:[#allocation2 + $0x10] sm:$0xff] (!%p1281_p5)  ;;  %v927_v33 = vadd.f32 (!%p1281_p5), %v1856_v28, %v895_v21  ;;  %v907_v53 = vld [vmem:[#allocation2 + $0x68] sm:$0xff] (!%p1281_p5) }
 0x183   : > { %876 = vst [vmem:[#allocation2 + $0x30] sm:$0xff] %v856_v63  ;;  %888 = vst [vmem:[#allocation2 + $0x90] sm:$0xff] %v868_v1  ;;  %v897_v25 = vld [vmem:[#allocation2 + $0x18] sm:$0xff] (!%p1281_p5)  ;;  %v928_v34 = vadd.f32 (!%p1281_p5), %v1854_v27, %v896_v24  ;;  %v946_v42 = vmax.f32 (!%p1281_p5), %v926_v32, 0.0  ;;  %v908_v58 = vld [vmem:[#allocation2 + $0x70] sm:$0xff] (!%p1281_p5) }
 0x184   : > { %877 = vst [vmem:[#allocation2 + $0x38] sm:$0xff] %v857_v3  ;;  %889 = vst [vmem:[#allocation2 + $0x98] sm:$0xff] %v869_v4  ;;  %v929_v35 = vadd.f32 (!%p1281_p5), %v1856_v28, %v897_v25  ;;  %v947_v43 = vmax.f32 (!%p1281_p5), %v927_v33, 0.0  ;;  %v909_v59 = vld [vmem:[#allocation2 + $0x78] sm:$0xff] (!%p1281_p5)  ;;  %v938_v3 = vadd.f32 (!%p1281_p5), %v1854_v27, %v906_v52  ;;  %v939_v4 = vadd.f32 (!%p1281_p5), %v1856_v28, %v907_v53 }
 0x185   : > { %v948_v44 = vmax.f32 (!%p1281_p5), %v928_v34, 0.0 }
 0x186   : > { %v821_v7 = vpop.f32.mrb[8].mxu0  ;;  %893 = sbr.rel (%p1281_p5) target bundleno = 411 (0x19b), region = 116  ;;  %v949_v45 = vmax.f32 (!%p1281_p5), %v929_v35, 0.0  ;;  %v1298_v54 = vpack.c.bf16 (!%p1281_p5), %v947_v43, %v946_v42 }
 0x187   : > { %v858_v9 = vadd.f32 %v821_v7, %v503_v5  ;;  %v823_v10 = vpop.f32.mrb[9].mxu0 }
 0x188   : > { %v859_v12 = vadd.f32 %v823_v10, %v504_v6  ;;  %v825_v13 = vpop.f32.mrb[10].mxu0  ;;  %v898_v26 = vld [vmem:[#allocation2 + $0x20] sm:$0xff] (!%p1281_p5)  ;;  %v1299_v55 = vpack.c.bf16 (!%p1281_p5), %v949_v45, %v948_v44  ;;  %1026 = vst [vmem:[%s1803_s1] sm:$0xff] (!%p1281_p5), %v1298_v54 }
 0x189   : > { %878 = vst [vmem:[#allocation2 + $0x40] sm:$0xff] %v858_v9  ;;  %v860_v14 = vadd.f32 %v825_v13, %v505_v8  ;;  %v827_v15 = vpop.f32.mrb[11].mxu0  ;;  %v899_v29 = vld [vmem:[#allocation2 + $0x28] sm:$0xff] (!%p1281_p5)  ;;  %v930_v36 = vadd.f32 (!%p1281_p5), %v1854_v27, %v898_v26  ;;  %v910_v0 = vld [vmem:[#allocation2 + $0x80] sm:$0xff] (!%p1281_p5)  ;;  %v940_v8 = vadd.f32 (!%p1281_p5), %v1854_v27, %v908_v58  ;;  %v941_v9 = vadd.f32 (!%p1281_p5), %v1856_v28, %v909_v59 }
 0x18a   : > { %879 = vst [vmem:[#allocation2 + $0x48] sm:$0xff] %v859_v12  ;;  %v861_v16 = vadd.f32 %v827_v15, %v506_v11  ;;  %v900_v30 = vld [vmem:[#allocation2 + $0x30] sm:$0xff] (!%p1281_p5)  ;;  %v931_v37 = vadd.f32 (!%p1281_p5), %v1856_v28, %v899_v29  ;;  %1027 = vst [vmem:[%s1803_s1 + $0x8] sm:$0xff] (!%p1281_p5), %v1299_v55  ;;  %v911_v5 = vld [vmem:[#allocation2 + $0x88] sm:$0xff] (!%p1281_p5)  ;;  %v958_v13 = vmax.f32 (!%p1281_p5), %v938_v3, 0.0  ;;  %v942_v15 = vadd.f32 (!%p1281_p5), %v1854_v27, %v910_v0 }
 0x18b   : > { %880 = vst [vmem:[#allocation2 + $0x50] sm:$0xff] %v860_v14  ;;  %v901_v31 = vld [vmem:[#allocation2 + $0x38] sm:$0xff] (!%p1281_p5)  ;;  %v932_v38 = vadd.f32 (!%p1281_p5), %v1854_v27, %v900_v30  ;;  %v950_v48 = vmax.f32 (!%p1281_p5), %v930_v36, 0.0  ;;  %v912_v10 = vld [vmem:[#allocation2 + $0x90] sm:$0xff] (!%p1281_p5)  ;;  %v959_v14 = vmax.f32 (!%p1281_p5), %v939_v4, 0.0  ;;  %v960_v17 = vmax.f32 (!%p1281_p5), %v940_v8, 0.0 }
 0x18c   : > { %881 = vst [vmem:[#allocation2 + $0x58] sm:$0xff] %v861_v16  ;;  %v933_v39 = vadd.f32 (!%p1281_p5), %v1856_v28, %v901_v31  ;;  %v951_v49 = vmax.f32 (!%p1281_p5), %v931_v37, 0.0  ;;  %v913_v11 = vld [vmem:[#allocation2 + $0x98] sm:$0xff] (!%p1281_p5)  ;;  %v961_v18 = vmax.f32 (!%p1281_p5), %v941_v9, 0.0  ;;  %v943_v19 = vadd.f32 (!%p1281_p5), %v1856_v28, %v911_v5 }
 0x18d   : > { %v952_v50 = vmax.f32 %v932_v38, 0.0  ;;  %v1304_v20 = vpack.c.bf16 %v959_v14, %v958_v13  ;;  %v962_v21 = vmax.f32 %v942_v15, 0.0  ;;  %v944_v22 = vadd.f32 %v1854_v27, %v912_v10 }
 0x18e   : > { %v953_v51 = vmax.f32 %v933_v39, 0.0  ;;  %v1300_v60 = vpack.c.bf16 %v951_v49, %v950_v48  ;;  %v945_v23 = vadd.f32 %v1856_v28, %v913_v11  ;;  %v1305_v24 = vpack.c.bf16 %v961_v18, %v960_v17 }
 0x18f   : > { %v963_v25 = vmax.f32 %v943_v19, 0.0  ;;  %1032 = vst [vmem:[%s1803_s1 + $0x30] sm:$0xff] %v1304_v20  ;;  %v964_v26 = vmax.f32 %v944_v22, 0.0 }
 0x190   : > { %v902_v40 = vld [vmem:[#allocation2 + $0x40] sm:$0xff]  ;;  %v1301_v61 = vpack.c.bf16 %v953_v51, %v952_v50  ;;  %1028 = vst [vmem:[%s1803_s1 + $0x10] sm:$0xff] %v1300_v60  ;;  %v965_v29 = vmax.f32 %v945_v23, 0.0  ;;  %1033 = vst [vmem:[%s1803_s1 + $0x38] sm:$0xff] %v1305_v24 }
 0x191   : > { %v903_v41 = vld [vmem:[#allocation2 + $0x48] sm:$0xff]  ;;  %v934_v56 = vadd.f32 %v1854_v27, %v902_v40  ;;  %v1306_v30 = vpack.c.bf16 %v963_v25, %v962_v21 }
 0x192   : > { %v904_v46 = vld [vmem:[#allocation2 + $0x50] sm:$0xff]  ;;  %v935_v57 = vadd.f32 %v1856_v28, %v903_v41  ;;  %1029 = vst [vmem:[%s1803_s1 + $0x18] sm:$0xff] %v1301_v61  ;;  %v1307_v31 = vpack.c.bf16 %v965_v29, %v964_v26 }
 0x193   : > { %v905_v47 = vld [vmem:[#allocation2 + $0x58] sm:$0xff]  ;;  %v936_v62 = vadd.f32 %v1854_v27, %v904_v46  ;;  %v954_v1 = vmax.f32 %v934_v56, 0.0  ;;  %1034 = vst [vmem:[%s1803_s1 + $0x40] sm:$0xff] %v1306_v30 }
 0x194   : > { %v937_v63 = vadd.f32 %v1856_v28, %v905_v47  ;;  %v955_v2 = vmax.f32 %v935_v57, 0.0  ;;  %1035 = vst [vmem:[%s1803_s1 + $0x48] sm:$0xff] %v1307_v31 }
 0x195   : > { %v956_v6 = vmax.f32 %v936_v62, 0.0 }
 0x196   : > { %v957_v7 = vmax.f32 %v937_v63, 0.0  ;;  %v1302_v12 = vpack.c.bf16 %v955_v2, %v954_v1 }
 0x198   : > { %v1303_v16 = vpack.c.bf16 %v957_v7, %v956_v6  ;;  %1030 = vst [vmem:[%s1803_s1 + $0x20] sm:$0xff] %v1302_v12 }
 0x19a   : > { %1031 = vst [vmem:[%s1803_s1 + $0x28] sm:$0xff] %v1303_v16 }
 0x19b PF: > { %1042 = sbr.rel (!%p1699_p12) target bundleno = 419 (0x1a3), region = 120  ;;  %s1308_s16 = sshll.u32 (%p1699_p12), %s1570_s19, 3  ;;  %v1098_v32 = vld [vmem:[%s1803_s1 + $0x10] sm:$0xff] (%p1699_p12)  ;;  %v1100_v33 = vld [vmem:[%s1803_s1 + $0x18] sm:$0xff] (%p1699_p12)  ;;  %v1110_v38 = vld [vmem:[%s1803_s1 + $0x40] sm:$0xff] (%p1699_p12) }
 0x19c   : > { %s1048_s5 = scalar_lea.vmem (%p1699_p12), %s1940_s3, %s1308_s16  ;;  %v1106_v36 = vld [vmem:[%s1803_s1 + $0x30] sm:$0xff] (%p1699_p12)  ;;  %v1108_v37 = vld [vmem:[%s1803_s1 + $0x38] sm:$0xff] (%p1699_p12)  ;;  %v1112_v39 = vld [vmem:[%s1803_s1 + $0x48] sm:$0xff] (%p1699_p12) }
 0x19d   : > { %v1094_v27 = vld [vmem:[%s1803_s1] sm:$0xff] (%p1699_p12)  ;;  %1099 = vst [vmem:[%s1048_s5 + $0x20] sm:$0xff] (%p1699_p12), %v1098_v32  ;;  %1101 = vst [vmem:[%s1048_s5 + $0x30] sm:$0xff] (%p1699_p12), %v1100_v33 }
 0x19e   : > { %1095 = vst [vmem:[%s1048_s5] sm:$0xff] (%p1699_p12), %v1094_v27  ;;  %1107 = vst [vmem:[%s1048_s5 + $0x60] sm:$0xff] (%p1699_p12), %v1106_v36 }
 0x19f   : > { %v1096_v28 = vld [vmem:[%s1803_s1 + $0x8] sm:$0xff] (%p1699_p12)  ;;  %v1102_v34 = vld [vmem:[%s1803_s1 + $0x20] sm:$0xff] (%p1699_p12)  ;;  %1109 = vst [vmem:[%s1048_s5 + $0x70] sm:$0xff] (%p1699_p12), %v1108_v37  ;;  %1111 = vst [vmem:[%s1048_s5 + $0x80] sm:$0xff] (%p1699_p12), %v1110_v38 }
 0x1a0   : > { %1097 = vst [vmem:[%s1048_s5 + $0x10] sm:$0xff] (%p1699_p12), %v1096_v28  ;;  %1103 = vst [vmem:[%s1048_s5 + $0x40] sm:$0xff] (%p1699_p12), %v1102_v34 }
 0x1a1   : > { %v1104_v35 = vld [vmem:[%s1803_s1 + $0x28] sm:$0xff] (%p1699_p12)  ;;  %1113 = vst [vmem:[%s1048_s5 + $0x90] sm:$0xff] (%p1699_p12), %v1112_v39 }
 0x1a2   : > { %1105 = vst [vmem:[%s1048_s5 + $0x50] sm:$0xff] %v1104_v35 }
 0x1a3 PF: > { %s13_s22 = sadd.s32 1, %s1582_s22   ;;  %s1950_s10 = sld [smem:[#allocation6_spill]] }
 0x1a4   : > { %p10_p6 = scmp.ge.s32.totalorder %s13_s22, 20   ;;  %s1951_s12 = smov %s1546_s13 }
 0x1a5   : > { %s1952_s13 = smov %s1697_s9  ;;  %s1953_s14 = smov %s1554_s15 }
 0x1a6   : > { %s1954_s15 = smov %s1694_s8  ;;  %s1955_s16 = smov %s1562_s17 }
 0x1a7   : > { %s1956_s17 = smov %s1680_s30  ;;  %s1957_s18 = smov %s1574_s20 }
 0x1a8   : > { %s1958_s19 = smov %s1578_s21  ;;  %s1959_s20 = smov %s1962_s24 }
 0x1a9   : > { %s1960_s21 = smov %s1950_s10  ;;  %12 = sbr.rel (!%p10_p6) target bundleno = 9 (0x9), region = 200 }

// kernel: _lambda_.25
= control target key start
LH: loop header
LB: loop body
LE: loop exit
PB: predicated region body
PF: predicated region fallthrough
CT: control target
= control target key end

     0   :  { %s2630_s0 = inlined_call_operand.vmem [shape: bf16[80,4608], index: 0, kind: input, shape index: {}]   ;;  %s2631_s1 = inlined_call_operand.vmem [shape: bf16[4608,512], index: 1, kind: input, shape index: {}]   ;;  %s2632_s2 = inlined_call_operand.vmem [shape: f32[1,512], index: 2, kind: input, shape index: {}]   ;;  %s2633_s3 = inlined_call_operand.vmem [shape: bf16[80,512], index: 3, kind: output, shape index: {}]  }
   0x1   :  { %2635 = sst [smem:[#allocation7_spill]] %s2630_s0 }
   0x2   :  { %2636 = sst [smem:[#allocation8_spill]] %s2631_s1 }
   0x3   :  { %s2148_s12 = smov 0   ;;  %s2150_s13 = smov 0  }
   0x4   :  { %s2152_s14 = smov 0   ;;  %s2154_s15 = smov 0  }
   0x5   :  { %s2156_s16 = smov 0   ;;  %s2158_s17 = smov 0  }
   0x6   :  { %s2160_s18 = smov 0   ;;  %s2162_s19 = smov 0  }
   0x7   :  { %s2164_s20 = smov 0   ;;  %s2166_s21 = smov 0  }
   0x8   :  { %s2168_s22 = smov 0  }
   0x9 LB: > { %s1674_s23 = sadd.s32 4294967295, %s2125_s22   ;;  %s25_s24 = sadd.s32 1, %s2117_s20  ;;  %s2125_s22 = sphi %s2168_s22, %s13_s22   ;;  %s2121_s21 = sphi %s2166_s21, %s2653_s21   ;;  %s2117_s20 = sphi %s2164_s20, %s2652_s20   ;;  %s2113_s19 = sphi %s2162_s19, %s2651_s19   ;;  %s2109_s18 = sphi %s2160_s18, %s2650_s18   ;;  %s2105_s17 = sphi %s2158_s17, %s2649_s17   ;;  %s2101_s16 = sphi %s2156_s16, %s2648_s16   ;;  %s2097_s15 = sphi %s2154_s15, %s2647_s15   ;;  %s2093_s14 = sphi %s2152_s14, %s2646_s14   ;;  %s2089_s13 = sphi %s2150_s13, %s2645_s13   ;;  %s2085_s12 = sphi %s2148_s12, %s2644_s12  }
   0xa   : > { %p26_p0 = scmp.ge.s32.totalorder %s25_s24, 9  ;;  %s28_s25 = sadd.s32 1, %s2121_s21 }
   0xb   : > { %s41_s26 = sadd.s32 1, %s2105_s17  ;;  %p48_p1 = scmp.ne.s32.totalorder %s2105_s17, %s2101_s16 }
   0xc   : > { %s2655_s24 = smov (%p26_p0, %s25_s24), 0  ;;  %s2657_s25 = smov (!%p26_p0, %s28_s25), %s2121_s21 }
   0xd   : > { %s37_s27 = ssub.s32 %s2117_s20, %s2655_s24  ;;  %p49_p2 = scmp.eq.s32.totalorder %s2125_s22, 0 }
   0xe   : > { %p30_p3 = scmp.ge.s32.totalorder %s2657_s25, 2  ;;  %p39_p4 = scmp.eq.s32.totalorder %s37_s27, 0 }
   0xf   : > { %p2215_p5 = por %p49_p2, %p48_p1  ;;  %s69_s29 = sadd.s32 1, %s2097_s15 }
  0x10   : > { %s2659_s25 = smov (%p30_p3, %s2657_s25), 0  ;;  %p76_p6 = scmp.ne.s32.totalorder %s2097_s15, %s2093_s14 }
  0x11   : > { %2638 = sst [smem:[#allocation6_spill]] %s2659_s25  ;;  %s65_s4 = ssub.s32 %s2121_s21, %s2659_s25 }
  0x12   : > { %s2223_s30 = scalar_select %p39_p4, %s2105_s17, %s41_s26  }
  0x13   : > { %s66_s5 = sor.u32 %s65_s4, %s37_s27  ;;  %p121_p7 = scmp.eq.s32.totalorder %s65_s4, 0 }
  0x14   : > { %p67_p8 = scmp.eq.s32.totalorder %s66_s5, 0  ;;  %p2229_p9 = por %p76_p6, %p49_p2 }
  0x15   : > { %s123_s7 = sadd.s32 1, %s2089_s13  ;;  %p133_p10 = scmp.ne.s32.totalorder %s2089_s13, %s2085_s12 }
  0x16   : > { %s2237_s8 = scalar_select %p67_p8, %s2097_s15, %s69_s29  }
  0x17   : > { %s2240_s9 = scalar_select %p121_p7, %s2089_s13, %s123_s7  }
  0x18   : > { %p134_p11 = scmp.eq.s32.totalorder %s1674_s23, 17  ;;  %p1677_p13 = scmp.ge.s32.totalorder %s2125_s22, 18 }
  0x1a   : > { %p2242_p12 = por %p134_p11, %p133_p10  ;;  %156 = sbr.rel (%p1677_p13) target bundleno = 96 (0x60), region = 16 }
  0x21   : > { %159 = sbr.rel (!%p2215_p5) target bundleno = 54 (0x36), region = 20  ;;  %s161_s11 = sand.u32 (%p2215_p5), 1, %s2105_s17  }
  0x22   : > { %s1788_s26 = sshll.u32 (%p2215_p5), %s2117_s20, 4  ;;  %s1821_s27 = smul.u32 (%p2215_p5), 160, %s161_s11 }
  0x23   : > { %s2641_s0 = sld [smem:[#allocation7_spill]] (%p2215_p5) }
  0x24   : > { %s2262_s23 = scalar_lea.vmem (%p2215_p5), [#allocation3], %s1821_s27 }
  0x29   : > { %s2254_s5 = scalar_lea.vmem %s2641_s0, %s1788_s26 }
  0x2a   : > { %v182_v0 = vld [vmem:[%s2254_s5] sm:$0xff]  ;;  %v184_v1 = vld [vmem:[%s2254_s5 + $0x8] sm:$0xff]  ;;  %v186_v2 = vld [vmem:[%s2254_s5 + $0x90] sm:$0xff] }
  0x2b   : > { %v188_v3 = vld [vmem:[%s2254_s5 + $0x98] sm:$0xff]  ;;  %v190_v4 = vld [vmem:[%s2254_s5 + $0x120] sm:$0xff]  ;;  %v192_v5 = vld [vmem:[%s2254_s5 + $0x128] sm:$0xff]  ;;  %183 = vst [vmem:[%s2262_s23] sm:$0xff] %v182_v0 }
  0x2c   : > { %185 = vst [vmem:[%s2262_s23 + $0x8] sm:$0xff] %v184_v1  ;;  %187 = vst [vmem:[%s2262_s23 + $0x10] sm:$0xff] %v186_v2  ;;  %v194_v6 = vld [vmem:[%s2254_s5 + $0x1b0] sm:$0xff]  ;;  %v196_v7 = vld [vmem:[%s2254_s5 + $0x1b8] sm:$0xff] }
  0x2d   : > { %189 = vst [vmem:[%s2262_s23 + $0x18] sm:$0xff] %v188_v3  ;;  %191 = vst [vmem:[%s2262_s23 + $0x20] sm:$0xff] %v190_v4  ;;  %v198_v8 = vld [vmem:[%s2254_s5 + $0x240] sm:$0xff]  ;;  %v200_v9 = vld [vmem:[%s2254_s5 + $0x248] sm:$0xff] }
  0x2e   : > { %193 = vst [vmem:[%s2262_s23 + $0x28] sm:$0xff] %v192_v5  ;;  %195 = vst [vmem:[%s2262_s23 + $0x30] sm:$0xff] %v194_v6  ;;  %v202_v10 = vld [vmem:[%s2254_s5 + $0x2d0] sm:$0xff]  ;;  %v204_v11 = vld [vmem:[%s2254_s5 + $0x2d8] sm:$0xff] }
  0x2f   : > { %197 = vst [vmem:[%s2262_s23 + $0x38] sm:$0xff] %v196_v7  ;;  %199 = vst [vmem:[%s2262_s23 + $0x40] sm:$0xff] %v198_v8  ;;  %v206_v12 = vld [vmem:[%s2254_s5 + $0x360] sm:$0xff]  ;;  %v208_v13 = vld [vmem:[%s2254_s5 + $0x368] sm:$0xff] }
  0x30   : > { %201 = vst [vmem:[%s2262_s23 + $0x48] sm:$0xff] %v200_v9  ;;  %203 = vst [vmem:[%s2262_s23 + $0x50] sm:$0xff] %v202_v10  ;;  %v210_v14 = vld [vmem:[%s2254_s5 + $0x3f0] sm:$0xff]  ;;  %v212_v15 = vld [vmem:[%s2254_s5 + $0x3f8] sm:$0xff] }
  0x31   : > { %205 = vst [vmem:[%s2262_s23 + $0x58] sm:$0xff] %v204_v11  ;;  %207 = vst [vmem:[%s2262_s23 + $0x60] sm:$0xff] %v206_v12  ;;  %v214_v16 = vld [vmem:[%s2254_s5 + $0x480] sm:$0xff]  ;;  %v216_v17 = vld [vmem:[%s2254_s5 + $0x488] sm:$0xff] }
  0x32   : > { %209 = vst [vmem:[%s2262_s23 + $0x68] sm:$0xff] %v208_v13  ;;  %211 = vst [vmem:[%s2262_s23 + $0x70] sm:$0xff] %v210_v14  ;;  %v218_v18 = vld [vmem:[%s2254_s5 + $0x510] sm:$0xff]  ;;  %v220_v19 = vld [vmem:[%s2254_s5 + $0x518] sm:$0xff] }
  0x33   : > { %213 = vst [vmem:[%s2262_s23 + $0x78] sm:$0xff] %v212_v15  ;;  %215 = vst [vmem:[%s2262_s23 + $0x80] sm:$0xff] %v214_v16 }
  0x34   : > { %217 = vst [vmem:[%s2262_s23 + $0x88] sm:$0xff] %v216_v17  ;;  %219 = vst [vmem:[%s2262_s23 + $0x90] sm:$0xff] %v218_v18 }
  0x35   : > { %221 = vst [vmem:[%s2262_s23 + $0x98] sm:$0xff] %v220_v19 }
  0x36 PF: > { %227 = sbr.rel (!%p2229_p9) target bundleno = 96 (0x60), region = 43  ;;  %s229_s28 = sand.u32 (%p2229_p9), 1, %s2097_s15  }
  0x37   : > { %s1682_s7 = sshll.u32 (%p2229_p9), %s2121_s21, 1  ;;  %s1680_s11 = sshll.u32 (%p2229_p9), %s229_s28, 9 }
  0x38   : > { %s1789_s26 = sshll.u32 (%p2229_p9), %s2117_s20, 8  ;;  %s2642_s1 = sld [smem:[#allocation8_spill]] (%p2229_p9) }
  0x39   : > { %s235_s27 = sadd.s32 (%p2229_p9), %s1789_s26, %s1682_s7  ;;  %s2311_s6 = scalar_lea.vmem (%p2229_p9), [#allocation4], %s1680_s11 }
  0x3a   : > { %s1684_s29 = sshll.u32 (%p2229_p9), %s235_s27, 2 }
  0x3e   : > { %s2306_s25 = scalar_lea.vmem %s2642_s1, %s1684_s29 }
  0x3f   : > { %v391_v20 = vld [vmem:[%s2306_s25] sm:$0xff]  ;;  %v393_v21 = vld [vmem:[%s2306_s25 + $0x10] sm:$0xff] }
  0x40   : > { %v395_v22 = vld [vmem:[%s2306_s25 + $0x20] sm:$0xff]  ;;  %392 = vst [vmem:[%s2311_s6] sm:$0xff] %v391_v20  ;;  %394 = vst [vmem:[%s2311_s6 + $0x8] sm:$0xff] %v393_v21  ;;  %v397_v23 = vld [vmem:[%s2306_s25 + $0x30] sm:$0xff] }
  0x41   : > { %396 = vst [vmem:[%s2311_s6 + $0x10] sm:$0xff] %v395_v22  ;;  %v399_v24 = vld [vmem:[%s2306_s25 + $0x40] sm:$0xff]  ;;  %v401_v25 = vld [vmem:[%s2306_s25 + $0x50] sm:$0xff]  ;;  %398 = vst [vmem:[%s2311_s6 + $0x18] sm:$0xff] %v397_v23 }
  0x42   : > { %400 = vst [vmem:[%s2311_s6 + $0x20] sm:$0xff] %v399_v24  ;;  %402 = vst [vmem:[%s2311_s6 + $0x28] sm:$0xff] %v401_v25  ;;  %v403_v26 = vld [vmem:[%s2306_s25 + $0x60] sm:$0xff]  ;;  %v405_v27 = vld [vmem:[%s2306_s25 + $0x70] sm:$0xff] }
  0x43   : > { %v407_v28 = vld [vmem:[%s2306_s25 + $0x80] sm:$0xff]  ;;  %404 = vst [vmem:[%s2311_s6 + $0x30] sm:$0xff] %v403_v26  ;;  %406 = vst [vmem:[%s2311_s6 + $0x38] sm:$0xff] %v405_v27  ;;  %v409_v29 = vld [vmem:[%s2306_s25 + $0x90] sm:$0xff] }
  0x44   : > { %408 = vst [vmem:[%s2311_s6 + $0x40] sm:$0xff] %v407_v28  ;;  %v411_v30 = vld [vmem:[%s2306_s25 + $0xa0] sm:$0xff]  ;;  %v413_v31 = vld [vmem:[%s2306_s25 + $0xb0] sm:$0xff]  ;;  %410 = vst [vmem:[%s2311_s6 + $0x48] sm:$0xff] %v409_v29 }
  0x45   : > { %412 = vst [vmem:[%s2311_s6 + $0x50] sm:$0xff] %v411_v30  ;;  %414 = vst [vmem:[%s2311_s6 + $0x58] sm:$0xff] %v413_v31  ;;  %v415_v32 = vld [vmem:[%s2306_s25 + $0xc0] sm:$0xff]  ;;  %v417_v33 = vld [vmem:[%s2306_s25 + $0xd0] sm:$0xff] }
  0x46   : > { %v419_v34 = vld [vmem:[%s2306_s25 + $0xe0] sm:$0xff]  ;;  %416 = vst [vmem:[%s2311_s6 + $0x60] sm:$0xff] %v415_v32  ;;  %418 = vst [vmem:[%s2311_s6 + $0x68] sm:$0xff] %v417_v33  ;;  %v421_v35 = vld [vmem:[%s2306_s25 + $0xf0] sm:$0xff] }
  0x47   : > { %420 = vst [vmem:[%s2311_s6 + $0x70] sm:$0xff] %v419_v34  ;;  %v423_v36 = vld [vmem:[%s2306_s25 + $0x100] sm:$0xff]  ;;  %v425_v37 = vld [vmem:[%s2306_s25 + $0x110] sm:$0xff]  ;;  %422 = vst [vmem:[%s2311_s6 + $0x78] sm:$0xff] %v421_v35 }
  0x48   : > { %424 = vst [vmem:[%s2311_s6 + $0x80] sm:$0xff] %v423_v36  ;;  %426 = vst [vmem:[%s2311_s6 + $0x88] sm:$0xff] %v425_v37  ;;  %v427_v38 = vld [vmem:[%s2306_s25 + $0x120] sm:$0xff]  ;;  %v429_v39 = vld [vmem:[%s2306_s25 + $0x130] sm:$0xff] }
  0x49   : > { %v431_v40 = vld [vmem:[%s2306_s25 + $0x140] sm:$0xff]  ;;  %428 = vst [vmem:[%s2311_s6 + $0x90] sm:$0xff] %v427_v38  ;;  %430 = vst [vmem:[%s2311_s6 + $0x98] sm:$0xff] %v429_v39  ;;  %v433_v41 = vld [vmem:[%s2306_s25 + $0x150] sm:$0xff] }
  0x4a   : > { %432 = vst [vmem:[%s2311_s6 + $0xa0] sm:$0xff] %v431_v40  ;;  %v435_v42 = vld [vmem:[%s2306_s25 + $0x160] sm:$0xff]  ;;  %v437_v43 = vld [vmem:[%s2306_s25 + $0x170] sm:$0xff]  ;;  %434 = vst [vmem:[%s2311_s6 + $0xa8] sm:$0xff] %v433_v41 }
  0x4b   : > { %436 = vst [vmem:[%s2311_s6 + $0xb0] sm:$0xff] %v435_v42  ;;  %438 = vst [vmem:[%s2311_s6 + $0xb8] sm:$0xff] %v437_v43  ;;  %v439_v44 = vld [vmem:[%s2306_s25 + $0x180] sm:$0xff]  ;;  %v441_v45 = vld [vmem:[%s2306_s25 + $0x190] sm:$0xff] }
  0x4c   : > { %v443_v46 = vld [vmem:[%s2306_s25 + $0x1a0] sm:$0xff]  ;;  %440 = vst [vmem:[%s2311_s6 + $0xc0] sm:$0xff] %v439_v44  ;;  %442 = vst [vmem:[%s2311_s6 + $0xc8] sm:$0xff] %v441_v45  ;;  %v445_v47 = vld [vmem:[%s2306_s25 + $0x1b0] sm:$0xff] }
  0x4d   : > { %444 = vst [vmem:[%s2311_s6 + $0xd0] sm:$0xff] %v443_v46  ;;  %v447_v48 = vld [vmem:[%s2306_s25 + $0x1c0] sm:$0xff]  ;;  %v449_v49 = vld [vmem:[%s2306_s25 + $0x1d0] sm:$0xff]  ;;  %446 = vst [vmem:[%s2311_s6 + $0xd8] sm:$0xff] %v445_v47 }
  0x4e   : > { %448 = vst [vmem:[%s2311_s6 + $0xe0] sm:$0xff] %v447_v48  ;;  %450 = vst [vmem:[%s2311_s6 + $0xe8] sm:$0xff] %v449_v49  ;;  %v451_v50 = vld [vmem:[%s2306_s25 + $0x1e0] sm:$0xff]  ;;  %v453_v51 = vld [vmem:[%s2306_s25 + $0x1f0] sm:$0xff] }
  0x4f   : > { %v455_v52 = vld [vmem:[%s2306_s25 + $0x200] sm:$0xff]  ;;  %452 = vst [vmem:[%s2311_s6 + $0xf0] sm:$0xff] %v451_v50  ;;  %454 = vst [vmem:[%s2311_s6 + $0xf8] sm:$0xff] %v453_v51  ;;  %v457_v53 = vld [vmem:[%s2306_s25 + $0x210] sm:$0xff] }
  0x50   : > { %456 = vst [vmem:[%s2311_s6 + $0x100] sm:$0xff] %v455_v52  ;;  %v459_v54 = vld [vmem:[%s2306_s25 + $0x220] sm:$0xff]  ;;  %v461_v55 = vld [vmem:[%s2306_s25 + $0x230] sm:$0xff]  ;;  %458 = vst [vmem:[%s2311_s6 + $0x108] sm:$0xff] %v457_v53 }
  0x51   : > { %460 = vst [vmem:[%s2311_s6 + $0x110] sm:$0xff] %v459_v54  ;;  %462 = vst [vmem:[%s2311_s6 + $0x118] sm:$0xff] %v461_v55  ;;  %v463_v56 = vld [vmem:[%s2306_s25 + $0x240] sm:$0xff]  ;;  %v465_v57 = vld [vmem:[%s2306_s25 + $0x250] sm:$0xff] }
  0x52   : > { %v467_v58 = vld [vmem:[%s2306_s25 + $0x260] sm:$0xff]  ;;  %464 = vst [vmem:[%s2311_s6 + $0x120] sm:$0xff] %v463_v56  ;;  %466 = vst [vmem:[%s2311_s6 + $0x128] sm:$0xff] %v465_v57  ;;  %v469_v59 = vld [vmem:[%s2306_s25 + $0x270] sm:$0xff] }
  0x53   : > { %468 = vst [vmem:[%s2311_s6 + $0x130] sm:$0xff] %v467_v58  ;;  %v471_v60 = vld [vmem:[%s2306_s25 + $0x280] sm:$0xff]  ;;  %v473_v61 = vld [vmem:[%s2306_s25 + $0x290] sm:$0xff]  ;;  %470 = vst [vmem:[%s2311_s6 + $0x138] sm:$0xff] %v469_v59 }
  0x54   : > { %472 = vst [vmem:[%s2311_s6 + $0x140] sm:$0xff] %v471_v60  ;;  %474 = vst [vmem:[%s2311_s6 + $0x148] sm:$0xff] %v473_v61  ;;  %v475_v62 = vld [vmem:[%s2306_s25 + $0x2a0] sm:$0xff]  ;;  %v477_v63 = vld [vmem:[%s2306_s25 + $0x2b0] sm:$0xff] }
  0x55   : > { %v479_v0 = vld [vmem:[%s2306_s25 + $0x2c0] sm:$0xff]  ;;  %476 = vst [vmem:[%s2311_s6 + $0x150] sm:$0xff] %v475_v62  ;;  %478 = vst [vmem:[%s2311_s6 + $0x158] sm:$0xff] %v477_v63  ;;  %v481_v1 = vld [vmem:[%s2306_s25 + $0x2d0] sm:$0xff] }
  0x56   : > { %480 = vst [vmem:[%s2311_s6 + $0x160] sm:$0xff] %v479_v0  ;;  %v483_v2 = vld [vmem:[%s2306_s25 + $0x2e0] sm:$0xff]  ;;  %v485_v3 = vld [vmem:[%s2306_s25 + $0x2f0] sm:$0xff]  ;;  %482 = vst [vmem:[%s2311_s6 + $0x168] sm:$0xff] %v481_v1 }
  0x57   : > { %484 = vst [vmem:[%s2311_s6 + $0x170] sm:$0xff] %v483_v2  ;;  %486 = vst [vmem:[%s2311_s6 + $0x178] sm:$0xff] %v485_v3  ;;  %v487_v4 = vld [vmem:[%s2306_s25 + $0x300] sm:$0xff]  ;;  %v489_v5 = vld [vmem:[%s2306_s25 + $0x310] sm:$0xff] }
  0x58   : > { %v491_v6 = vld [vmem:[%s2306_s25 + $0x320] sm:$0xff]  ;;  %488 = vst [vmem:[%s2311_s6 + $0x180] sm:$0xff] %v487_v4  ;;  %490 = vst [vmem:[%s2311_s6 + $0x188] sm:$0xff] %v489_v5  ;;  %v493_v7 = vld [vmem:[%s2306_s25 + $0x330] sm:$0xff] }
  0x59   : > { %492 = vst [vmem:[%s2311_s6 + $0x190] sm:$0xff] %v491_v6  ;;  %v495_v8 = vld [vmem:[%s2306_s25 + $0x340] sm:$0xff]  ;;  %v497_v9 = vld [vmem:[%s2306_s25 + $0x350] sm:$0xff]  ;;  %494 = vst [vmem:[%s2311_s6 + $0x198] sm:$0xff] %v493_v7 }
  0x5a   : > { %496 = vst [vmem:[%s2311_s6 + $0x1a0] sm:$0xff] %v495_v8  ;;  %498 = vst [vmem:[%s2311_s6 + $0x1a8] sm:$0xff] %v497_v9  ;;  %v499_v10 = vld [vmem:[%s2306_s25 + $0x360] sm:$0xff]  ;;  %v501_v11 = vld [vmem:[%s2306_s25 + $0x370] sm:$0xff] }
  0x5b   : > { %v503_v12 = vld [vmem:[%s2306_s25 + $0x380] sm:$0xff]  ;;  %500 = vst [vmem:[%s2311_s6 + $0x1b0] sm:$0xff] %v499_v10  ;;  %502 = vst [vmem:[%s2311_s6 + $0x1b8] sm:$0xff] %v501_v11  ;;  %v505_v13 = vld [vmem:[%s2306_s25 + $0x390] sm:$0xff] }
  0x5c   : > { %504 = vst [vmem:[%s2311_s6 + $0x1c0] sm:$0xff] %v503_v12  ;;  %v507_v14 = vld [vmem:[%s2306_s25 + $0x3a0] sm:$0xff]  ;;  %v509_v15 = vld [vmem:[%s2306_s25 + $0x3b0] sm:$0xff]  ;;  %506 = vst [vmem:[%s2311_s6 + $0x1c8] sm:$0xff] %v505_v13 }
  0x5d   : > { %508 = vst [vmem:[%s2311_s6 + $0x1d0] sm:$0xff] %v507_v14  ;;  %510 = vst [vmem:[%s2311_s6 + $0x1d8] sm:$0xff] %v509_v15  ;;  %v511_v16 = vld [vmem:[%s2306_s25 + $0x3c0] sm:$0xff]  ;;  %v513_v17 = vld [vmem:[%s2306_s25 + $0x3d0] sm:$0xff] }
  0x5e   : > { %v515_v18 = vld [vmem:[%s2306_s25 + $0x3e0] sm:$0xff]  ;;  %512 = vst [vmem:[%s2311_s6 + $0x1e0] sm:$0xff] %v511_v16  ;;  %514 = vst [vmem:[%s2311_s6 + $0x1e8] sm:$0xff] %v513_v17  ;;  %v517_v19 = vld [vmem:[%s2306_s25 + $0x3f0] sm:$0xff] }
  0x5f   : > { %516 = vst [vmem:[%s2311_s6 + $0x1f0] sm:$0xff] %v515_v18  ;;  %518 = vst [vmem:[%s2311_s6 + $0x1f8] sm:$0xff] %v517_v19 }
  0x60 PF: > { %p1685_p0 = scmp.ge.s32.totalorder %s2125_s22, 1  ;;  %p531_p1 = scmp.lt.s32.totalorder %s2125_s22, 19 }
  0x62   : > { %p532_p2 = pnand %p1685_p0, %p531_p1 }
  0x63   : > { %s538_s0 = sand.u32 (!%p532_p2), 1, %s2101_s16   ;;  %s545_s5 = sand.u32 (!%p532_p2), 1, %s2093_s14  }
  0x64   : > { %535 = sbr.rel (%p532_p2) target bundleno = 459 (0x1cb), region = 85  ;;  %s1686_s28 = sshll.u32 (!%p532_p2), %s545_s5, 9 }
  0x65   : > { %s1822_s23 = smul.u32 (!%p532_p2), 160, %s538_s0  ;;  %s572_s7 = sand.u32 (!%p532_p2), 1, %s2085_s12  }
  0x66   : > { %s1823_s11 = smul.u32 (!%p532_p2), 80, %s572_s7  ;;  %s1687_s25 = sshll.u32 (!%p532_p2), %s2113_s19, 1 }
  0x67   : > { %p580_p3 = scmp.lt.s32.totalorder (!%p532_p2), %s1687_s25, 3  ;;  %s2450_s4 = scalar_lea.vmem (!%p532_p2), [#allocation3], %s1822_s23 }
  0x68   : > { %s2452_s6 = scalar_lea.vmem (!%p532_p2), [#allocation4], %s1686_s28  ;;  %s2454_s1 = scalar_lea.vmem (!%p532_p2), [#allocation5], %s1823_s11 }
  0x69   : > { %p1688_p4 = scmp.ne.s32.totalorder (!%p532_p2), %s2109_s18, 0 }
  0x6b   : > { %s2661_s25 = smov (!%p580_p3, %s1687_s25), 3  ;;  %589 = sbr.rel (%p1688_p4) target bundleno = 119 (0x77), region = 97 }
  0x6c   : > { %s582_s29 = scalar_lea.vmem %s2632_s2, %s2661_s25  ;;  %v2127_v20 = vmov (!%p1688_p4), 0.0  }
  0x6d   : > { %590 = vst [vmem:[#allocation2] sm:$0xff] (!%p1688_p4), %v2127_v20  ;;  %591 = vst [vmem:[#allocation2 + $0x8] sm:$0xff] (!%p1688_p4), %v2127_v20 }
  0x6e   : > { %592 = vst [vmem:[#allocation2 + $0x10] sm:$0xff] (!%p1688_p4), %v2127_v20  ;;  %593 = vst [vmem:[#allocation2 + $0x18] sm:$0xff] (!%p1688_p4), %v2127_v20 }
  0x6f   : > { %594 = vst [vmem:[#allocation2 + $0x20] sm:$0xff] (!%p1688_p4), %v2127_v20  ;;  %595 = vst [vmem:[#allocation2 + $0x28] sm:$0xff] (!%p1688_p4), %v2127_v20 }
  0x70   : > { %596 = vst [vmem:[#allocation2 + $0x30] sm:$0xff] (!%p1688_p4), %v2127_v20  ;;  %597 = vst [vmem:[#allocation2 + $0x38] sm:$0xff] (!%p1688_p4), %v2127_v20 }
  0x71   : > { %598 = vst [vmem:[#allocation2 + $0x40] sm:$0xff] (!%p1688_p4), %v2127_v20  ;;  %599 = vst [vmem:[#allocation2 + $0x48] sm:$0xff] (!%p1688_p4), %v2127_v20 }
  0x72   : > { %600 = vst [vmem:[#allocation2 + $0x50] sm:$0xff] %v2127_v20  ;;  %601 = vst [vmem:[#allocation2 + $0x58] sm:$0xff] %v2127_v20 }
  0x73   : > { %602 = vst [vmem:[#allocation2 + $0x60] sm:$0xff] %v2127_v20  ;;  %603 = vst [vmem:[#allocation2 + $0x68] sm:$0xff] %v2127_v20 }
  0x74   : > { %604 = vst [vmem:[#allocation2 + $0x70] sm:$0xff] %v2127_v20  ;;  %605 = vst [vmem:[#allocation2 + $0x78] sm:$0xff] %v2127_v20 }
  0x75   : > { %606 = vst [vmem:[#allocation2 + $0x80] sm:$0xff] %v2127_v20  ;;  %607 = vst [vmem:[#allocation2 + $0x88] sm:$0xff] %v2127_v20 }
  0x76   : > { %608 = vst [vmem:[#allocation2 + $0x90] sm:$0xff] %v2127_v20  ;;  %609 = vst [vmem:[#allocation2 + $0x98] sm:$0xff] %v2127_v20 }
  0x77 PF: > { %v1913_v21 = vld [vmem:[%s2452_s6 + $0x4] ss:$8 sps:$4 sm:$0xff]   ;;  %v1917_v23 = vld [vmem:[%s2452_s6] ss:$8 sps:$4 sm:$0xff]   ;;  %v1919_v25 = vld [vmem:[%s2452_s6 + $0x14] ss:$8 sps:$4 sm:$0xff]  }
  0x78   : > { %v1915_v22 = vld [vmem:[%s2452_s6 + $0x104] ss:$8 sps:$4 sm:$0xff]   ;;  %1134 = vmatprep.subr.bf16.mxu1 %v1913_v21  ;;  %v1918_v24 = vld [vmem:[%s2452_s6 + $0x100] ss:$8 sps:$4 sm:$0xff]   ;;  %v1921_v26 = vld [vmem:[%s2452_s6 + $0x114] ss:$8 sps:$4 sm:$0xff]  }
  0x79   : > { %1217 = vmatprep.subr.bf16.mxu0 %v1915_v22  ;;  %1135 = vmatpush1.bf16.msra.mxu1 %v1917_v23  ;;  %v1923_v27 = vld [vmem:[%s2452_s6 + $0x10] ss:$8 sps:$4 sm:$0xff]   ;;  %v1925_v29 = vld [vmem:[%s2452_s6 + $0x24] ss:$8 sps:$4 sm:$0xff]   ;;  %v1929_v31 = vld [vmem:[%s2452_s6 + $0x20] ss:$8 sps:$4 sm:$0xff]  }
  0x7a   : > { %1218 = vmatpush1.bf16.msra.mxu0 %v1918_v24  ;;  %1136 = vmatprep.subr.bf16.mxu1 %v1919_v25  ;;  %v1924_v28 = vld [vmem:[%s2452_s6 + $0x110] ss:$8 sps:$4 sm:$0xff]   ;;  %v1927_v30 = vld [vmem:[%s2452_s6 + $0x124] ss:$8 sps:$4 sm:$0xff]   ;;  %v1930_v32 = vld [vmem:[%s2452_s6 + $0x120] ss:$8 sps:$4 sm:$0xff]  }
  0x7b   : > { %1219 = vmatprep.subr.bf16.mxu0 %v1921_v26  ;;  %v1931_v33 = vld [vmem:[%s2452_s6 + $0x34] ss:$8 sps:$4 sm:$0xff]   ;;  %v1935_v35 = vld [vmem:[%s2452_s6 + $0x30] ss:$8 sps:$4 sm:$0xff]   ;;  %v1937_v37 = vld [vmem:[%s2452_s6 + $0x44] ss:$8 sps:$4 sm:$0xff]  }
  0x7c   : > { %v1933_v34 = vld [vmem:[%s2452_s6 + $0x134] ss:$8 sps:$4 sm:$0xff]   ;;  %v1936_v36 = vld [vmem:[%s2452_s6 + $0x130] ss:$8 sps:$4 sm:$0xff]   ;;  %v1939_v38 = vld [vmem:[%s2452_s6 + $0x144] ss:$8 sps:$4 sm:$0xff]  }
  0x7d   : > { %1137 = vmatpush1.bf16.msra.mxu1 %v1923_v27  ;;  %v1941_v39 = vld [vmem:[%s2452_s6 + $0x40] ss:$8 sps:$4 sm:$0xff]   ;;  %v1943_v41 = vld [vmem:[%s2452_s6 + $0x54] ss:$8 sps:$4 sm:$0xff]   ;;  %v1947_v43 = vld [vmem:[%s2452_s6 + $0x50] ss:$8 sps:$4 sm:$0xff]  }
  0x7e   : > { %1220 = vmatpush1.bf16.msra.mxu0 %v1924_v28  ;;  %1138 = vmatprep.subr.bf16.mxu1 %v1925_v29  ;;  %v1942_v40 = vld [vmem:[%s2452_s6 + $0x140] ss:$8 sps:$4 sm:$0xff]   ;;  %v1945_v42 = vld [vmem:[%s2452_s6 + $0x154] ss:$8 sps:$4 sm:$0xff]   ;;  %v1948_v44 = vld [vmem:[%s2452_s6 + $0x150] ss:$8 sps:$4 sm:$0xff]  }
  0x7f   : > { %1221 = vmatprep.subr.bf16.mxu0 %v1927_v30  ;;  %v1949_v45 = vld [vmem:[%s2452_s6 + $0x64] ss:$8 sps:$4 sm:$0xff]   ;;  %v1953_v47 = vld [vmem:[%s2452_s6 + $0x60] ss:$8 sps:$4 sm:$0xff]   ;;  %v1955_v49 = vld [vmem:[%s2452_s6 + $0x74] ss:$8 sps:$4 sm:$0xff]  }
  0x80   : > { %v1951_v46 = vld [vmem:[%s2452_s6 + $0x164] ss:$8 sps:$4 sm:$0xff]   ;;  %v1954_v48 = vld [vmem:[%s2452_s6 + $0x160] ss:$8 sps:$4 sm:$0xff]   ;;  %v1957_v50 = vld [vmem:[%s2452_s6 + $0x174] ss:$8 sps:$4 sm:$0xff]  }
  0x81   : > { %1139 = vmatpush1.bf16.msra.mxu1 %v1929_v31  ;;  %v1959_v51 = vld [vmem:[%s2452_s6 + $0x70] ss:$8 sps:$4 sm:$0xff]   ;;  %v1961_v53 = vld [vmem:[%s2452_s6 + $0x84] ss:$8 sps:$4 sm:$0xff]   ;;  %v1965_v55 = vld [vmem:[%s2452_s6 + $0x80] ss:$8 sps:$4 sm:$0xff]  }
  0x82   : > { %1222 = vmatpush1.bf16.msra.mxu0 %v1930_v32  ;;  %1140 = vmatprep.subr.bf16.mxu1 %v1931_v33  ;;  %v1960_v52 = vld [vmem:[%s2452_s6 + $0x170] ss:$8 sps:$4 sm:$0xff]   ;;  %v1963_v54 = vld [vmem:[%s2452_s6 + $0x184] ss:$8 sps:$4 sm:$0xff]   ;;  %v1966_v56 = vld [vmem:[%s2452_s6 + $0x180] ss:$8 sps:$4 sm:$0xff]  }
  0x83   : > { %1223 = vmatprep.subr.bf16.mxu0 %v1933_v34  ;;  %v1967_v57 = vld [vmem:[%s2452_s6 + $0x94] ss:$8 sps:$4 sm:$0xff]   ;;  %v1971_v59 = vld [vmem:[%s2452_s6 + $0x90] ss:$8 sps:$4 sm:$0xff]   ;;  %v1973_v61 = vld [vmem:[%s2452_s6 + $0xa4] ss:$8 sps:$4 sm:$0xff]  }
  0x84   : > { %v1969_v58 = vld [vmem:[%s2452_s6 + $0x194] ss:$8 sps:$4 sm:$0xff]   ;;  %v1972_v60 = vld [vmem:[%s2452_s6 + $0x190] ss:$8 sps:$4 sm:$0xff]   ;;  %v1975_v62 = vld [vmem:[%s2452_s6 + $0x1a4] ss:$8 sps:$4 sm:$0xff]  }
  0x85   : > { %1141 = vmatpush1.bf16.msra.mxu1 %v1935_v35  ;;  %v1977_v63 = vld [vmem:[%s2452_s6 + $0xa0] ss:$8 sps:$4 sm:$0xff]   ;;  %v1979_v1 = vld [vmem:[%s2452_s6 + $0xb4] ss:$8 sps:$4 sm:$0xff]   ;;  %v1983_v3 = vld [vmem:[%s2452_s6 + $0xb0] ss:$8 sps:$4 sm:$0xff]  }
  0x86   : > { %1224 = vmatpush1.bf16.msra.mxu0 %v1936_v36  ;;  %1142 = vmatprep.subr.bf16.mxu1 %v1937_v37  ;;  %v1978_v0 = vld [vmem:[%s2452_s6 + $0x1a0] ss:$8 sps:$4 sm:$0xff]   ;;  %v1981_v2 = vld [vmem:[%s2452_s6 + $0x1b4] ss:$8 sps:$4 sm:$0xff]   ;;  %v1984_v4 = vld [vmem:[%s2452_s6 + $0x1b0] ss:$8 sps:$4 sm:$0xff]  }
  0x87   : > { %1225 = vmatprep.subr.bf16.mxu0 %v1939_v38  ;;  %v1985_v5 = vld [vmem:[%s2452_s6 + $0xc4] ss:$8 sps:$4 sm:$0xff]   ;;  %v1989_v9 = vld [vmem:[%s2452_s6 + $0xc0] ss:$8 sps:$4 sm:$0xff]   ;;  %v1991_v11 = vld [vmem:[%s2452_s6 + $0xd4] ss:$8 sps:$4 sm:$0xff]  }
  0x88   : > { %v2011_v6 = vld [vmem:[%s2450_s4 + $0x4] ss:$16 sps:$4 sm:$0xff]   ;;  %v2014_v8 = vld [vmem:[%s2450_s4 + $0xc] ss:$16 sps:$4 sm:$0xff]   ;;  %v1990_v10 = vld [vmem:[%s2452_s6 + $0x1c0] ss:$8 sps:$4 sm:$0xff]  }
  0x89   : > { %1143 = vmatpush1.bf16.msra.mxu1 %v1941_v39  ;;  %v1987_v7 = vld [vmem:[%s2452_s6 + $0x1c4] ss:$8 sps:$4 sm:$0xff]   ;;  %1166 = vmatprep.mubr.bf16.mxu1 %v2011_v6  ;;  %v1993_v12 = vld [vmem:[%s2452_s6 + $0x1d4] ss:$8 sps:$4 sm:$0xff]   ;;  %v1995_v13 = vld [vmem:[%s2452_s6 + $0xd0] ss:$8 sps:$4 sm:$0xff]  }
  0x8a   : > { %1226 = vmatpush1.bf16.msra.mxu0 %v1942_v40  ;;  %1144 = vmatprep.subr.bf16.mxu1 %v1943_v41  ;;  %v1996_v14 = vld [vmem:[%s2452_s6 + $0x1d0] ss:$8 sps:$4 sm:$0xff]   ;;  %v1997_v15 = vld [vmem:[%s2452_s6 + $0xe4] ss:$8 sps:$4 sm:$0xff]   ;;  %v2001_v17 = vld [vmem:[%s2452_s6 + $0xe0] ss:$8 sps:$4 sm:$0xff]  }
  0x8b   : > { %1227 = vmatprep.subr.bf16.mxu0 %v1945_v42  ;;  %1249 = vmatprep.mubr.bf16.mxu0 %v2014_v8  ;;  %v1999_v16 = vld [vmem:[%s2452_s6 + $0x1e4] ss:$8 sps:$4 sm:$0xff]   ;;  %v2002_v18 = vld [vmem:[%s2452_s6 + $0x1e0] ss:$8 sps:$4 sm:$0xff]   ;;  %v2003_v19 = vld [vmem:[%s2452_s6 + $0xf4] ss:$8 sps:$4 sm:$0xff]  }
  0x8c   : > { %v2005_v20 = vld [vmem:[%s2452_s6 + $0x1f4] ss:$8 sps:$4 sm:$0xff]   ;;  %v2007_v21 = vld [vmem:[%s2452_s6 + $0xf0] ss:$8 sps:$4 sm:$0xff]   ;;  %v610_v42 = vld [vmem:[#allocation2] sm:$0xff]  ;;  %p1773_p5 = scmp.ne.s32.totalorder %s2109_s18, 8 }
  0x8d   : > { %1145 = vmatpush1.bf16.msra.mxu1 %v1947_v43  ;;  %v2008_v22 = vld [vmem:[%s2452_s6 + $0x1f0] ss:$8 sps:$4 sm:$0xff]   ;;  %v2015_v25 = vld [vmem:[%s2450_s4 + $0x24] ss:$16 sps:$4 sm:$0xff]   ;;  %v2017_v26 = vld [vmem:[%s2450_s4 + $0x2c] ss:$16 sps:$4 sm:$0xff]  }
  0x8e   : > { %1228 = vmatpush1.bf16.msra.mxu0 %v1948_v44  ;;  %1146 = vmatprep.subr.bf16.mxu1 %v1949_v45  ;;  %v2009_v23 = vld [vmem:[%s2450_s4] ss:$16 sps:$4 sm:$0xff]   ;;  %v2012_v24 = vld [vmem:[%s2450_s4 + $0x8] ss:$16 sps:$4 sm:$0xff]   ;;  %v2021_v29 = vld [vmem:[%s2450_s4 + $0x44] ss:$16 sps:$4 sm:$0xff]  }
  0x8f   : > { %1229 = vmatprep.subr.bf16.mxu0 %v1951_v46  ;;  %v2019_v27 = vld [vmem:[%s2450_s4 + $0x20] ss:$16 sps:$4 sm:$0xff]   ;;  %v2020_v28 = vld [vmem:[%s2450_s4 + $0x28] ss:$16 sps:$4 sm:$0xff]   ;;  %v2023_v30 = vld [vmem:[%s2450_s4 + $0x4c] ss:$16 sps:$4 sm:$0xff]  }
  0x90   : > { %v2025_v31 = vld [vmem:[%s2450_s4 + $0x40] ss:$16 sps:$4 sm:$0xff]   ;;  %v2026_v32 = vld [vmem:[%s2450_s4 + $0x48] ss:$16 sps:$4 sm:$0xff]   ;;  %v2027_v33 = vld [vmem:[%s2450_s4 + $0x64] ss:$16 sps:$4 sm:$0xff]  }
  0x91   : > { %1147 = vmatpush1.bf16.msra.mxu1 %v1953_v47  ;;  %v2029_v34 = vld [vmem:[%s2450_s4 + $0x6c] ss:$16 sps:$4 sm:$0xff]   ;;  %v2031_v35 = vld [vmem:[%s2450_s4 + $0x60] ss:$16 sps:$4 sm:$0xff]   ;;  %v2032_v36 = vld [vmem:[%s2450_s4 + $0x68] ss:$16 sps:$4 sm:$0xff]  }
  0x92   : > { %1230 = vmatpush1.bf16.msra.mxu0 %v1954_v48  ;;  %1148 = vmatprep.subr.bf16.mxu1 %v1955_v49  ;;  %v2033_v37 = vld [vmem:[%s2450_s4 + $0x84] ss:$16 sps:$4 sm:$0xff]   ;;  %v2035_v38 = vld [vmem:[%s2450_s4 + $0x8c] ss:$16 sps:$4 sm:$0xff]   ;;  %v2037_v39 = vld [vmem:[%s2450_s4 + $0x80] ss:$16 sps:$4 sm:$0xff]  }
  0x93   : > { %1231 = vmatprep.subr.bf16.mxu0 %v1957_v50  ;;  %v2038_v40 = vld [vmem:[%s2450_s4 + $0x88] ss:$16 sps:$4 sm:$0xff]   ;;  %v612_v50 = vld [vmem:[#allocation2 + $0x10] sm:$0xff] }
  0x94   : > { %v611_v46 = vld [vmem:[#allocation2 + $0x8] sm:$0xff]  ;;  %v616_v6 = vld [vmem:[#allocation2 + $0x30] sm:$0xff] }
  0x95   : > { %1149 = vmatpush1.bf16.msra.mxu1 %v1959_v51 }
  0x96   : > { %1232 = vmatpush1.bf16.msra.mxu0 %v1960_v52  ;;  %1150 = vmatprep.subr.bf16.mxu1 %v1961_v53 }
  0x97   : > { %1233 = vmatprep.subr.bf16.mxu0 %v1963_v54 }
  0x99   : > { %1151 = vmatpush1.bf16.msra.mxu1 %v1965_v55  ;;  %v613_v55 = vld [vmem:[#allocation2 + $0x18] sm:$0xff] }
  0x9a   : > { %1234 = vmatpush1.bf16.msra.mxu0 %v1966_v56  ;;  %1152 = vmatprep.subr.bf16.mxu1 %v1967_v57 }
  0x9b   : > { %1235 = vmatprep.subr.bf16.mxu0 %v1969_v58 }
  0x9d   : > { %1153 = vmatpush1.bf16.msra.mxu1 %v1971_v59 }
  0x9e   : > { %1236 = vmatpush1.bf16.msra.mxu0 %v1972_v60  ;;  %1154 = vmatprep.subr.bf16.mxu1 %v1973_v61 }
  0x9f   : > { %1237 = vmatprep.subr.bf16.mxu0 %v1975_v62  ;;  %v614_v62 = vld [vmem:[#allocation2 + $0x20] sm:$0xff] }
  0xa1   : > { %1155 = vmatpush1.bf16.msra.mxu1 %v1977_v63 }
  0xa2   : > { %1238 = vmatpush1.bf16.msra.mxu0 %v1978_v0  ;;  %1156 = vmatprep.subr.bf16.mxu1 %v1979_v1 }
  0xa3   : > { %1239 = vmatprep.subr.bf16.mxu0 %v1981_v2  ;;  %v615_v2 = vld [vmem:[#allocation2 + $0x28] sm:$0xff] }
  0xa5   : > { %1157 = vmatpush1.bf16.msra.mxu1 %v1983_v3 }
  0xa6   : > { %1240 = vmatpush1.bf16.msra.mxu0 %v1984_v4  ;;  %1158 = vmatprep.subr.bf16.mxu1 %v1985_v5 }
  0xa7   : > { %1241 = vmatprep.subr.bf16.mxu0 %v1987_v7 }
  0xa9   : > { %1159 = vmatpush1.bf16.msra.mxu1 %v1989_v9 }
  0xaa   : > { %1242 = vmatpush1.bf16.msra.mxu0 %v1990_v10  ;;  %1160 = vmatprep.subr.bf16.mxu1 %v1991_v11  ;;  %v617_v11 = vld [vmem:[#allocation2 + $0x38] sm:$0xff] }
  0xab   : > { %1243 = vmatprep.subr.bf16.mxu0 %v1993_v12 }
  0xad   : > { %1161 = vmatpush1.bf16.msra.mxu1 %v1995_v13 }
  0xae   : > { %1244 = vmatpush1.bf16.msra.mxu0 %v1996_v14  ;;  %1162 = vmatprep.subr.bf16.mxu1 %v1997_v15 }
  0xaf   : > { %1245 = vmatprep.subr.bf16.mxu0 %v1999_v16 }
  0xb1   : > { %1163 = vmatpush1.bf16.msra.mxu1 %v2001_v17 }
  0xb2   : > { %1246 = vmatpush1.bf16.msra.mxu0 %v2002_v18  ;;  %1164 = vmatprep.subr.bf16.mxu1 %v2003_v19  ;;  %v618_v18 = vld [vmem:[#allocation2 + $0x40] sm:$0xff] }
  0xb3   : > { %1247 = vmatprep.subr.bf16.mxu0 %v2005_v20 }
  0xb5   : > { %1165 = vmatpush1.bf16.msra.mxu1 %v2007_v21 }
  0xb6   : > { %1248 = vmatpush1.bf16.msra.mxu0 %v2008_v22  ;;  %v619_v22 = vld [vmem:[#allocation2 + $0x48] sm:$0xff] }
  0xb8   : > { %1167 = vmatmul.mubr.bf16.vlgmr.msra.gmra.mrb[0].mxu1 %v2009_v23 }
  0xb9   : > { %1250 = vmatmul.mubr.bf16.vlgmr.msra.gmra.mrb[0].mxu0 %v2012_v24  ;;  %1176 = vmatprep.mubr.bf16.mxu1 %v2015_v25 }
  0xba   : > { %1259 = vmatprep.mubr.bf16.mxu0 %v2017_v26  ;;  %v620_v26 = vld [vmem:[#allocation2 + $0x50] sm:$0xff] }
  0xc0   : > { %1177 = vmatmul.mubr.bf16.gmra.mrb[4].mxu1 %v2019_v27 }
  0xc1   : > { %1260 = vmatmul.mubr.bf16.gmra.mrb[4].mxu0 %v2020_v28  ;;  %1186 = vmatprep.mubr.bf16.mxu1 %v2021_v29 }
  0xc2   : > { %1269 = vmatprep.mubr.bf16.mxu0 %v2023_v30 }
  0xc8   : > { %1187 = vmatmul.mubr.bf16.gmra.mrb[8].mxu1 %v2025_v31  ;;  %v621_v31 = vld [vmem:[#allocation2 + $0x58] sm:$0xff] }
  0xc9   : > { %1270 = vmatmul.mubr.bf16.gmra.mrb[8].mxu0 %v2026_v32  ;;  %1196 = vmatprep.mubr.bf16.mxu1 %v2027_v33 }
  0xca   : > { %1279 = vmatprep.mubr.bf16.mxu0 %v2029_v34 }
  0xd0   : > { %1197 = vmatmul.mubr.bf16.gmra.mrb[12].mxu1 %v2031_v35 }
  0xd1   : > { %1280 = vmatmul.mubr.bf16.gmra.mrb[12].mxu0 %v2032_v36  ;;  %1206 = vmatprep.mubr.bf16.mxu1 %v2033_v37 }
  0xd2   : > { %1289 = vmatprep.mubr.bf16.mxu0 %v2035_v38  ;;  %v622_v38 = vld [vmem:[#allocation2 + $0x60] sm:$0xff] }
  0xd8   : > { %1207 = vmatmul.mubr.bf16.gmra.mrb[16].mxu1 %v2037_v39 }
  0xd9   : > { %1290 = vmatmul.mubr.bf16.gmra.mrb[16].mxu0 %v2038_v40 }
 0x18b   : > { %v1168_v41 = vpop.f32.mrb[0].mxu1 }
 0x18c   : > { %v1251_v43 = vpop.f32.mrb[0].mxu0  ;;  %v1170_v45 = vpop.f32.mrb[1].mxu1 }
 0x18d   : > { %v1252_v44 = vadd.f32 %v1251_v43, %v1168_v41  ;;  %v1253_v47 = vpop.f32.mrb[1].mxu0  ;;  %v1172_v49 = vpop.f32.mrb[2].mxu1 }
 0x18e   : > { %v1254_v48 = vadd.f32 %v1253_v47, %v1170_v45  ;;  %v1255_v51 = vpop.f32.mrb[2].mxu0  ;;  %v1174_v54 = vpop.f32.mrb[3].mxu1 }
 0x18f   : > { %v1300_v52 = vadd.f32 %v1252_v44, %v610_v42  ;;  %v1256_v53 = vadd.f32 %v1255_v51, %v1172_v49  ;;  %v1257_v56 = vpop.f32.mrb[3].mxu0  ;;  %v623_v42 = vld [vmem:[#allocation2 + $0x68] sm:$0xff]  ;;  %v625_v51 = vld [vmem:[#allocation2 + $0x78] sm:$0xff] }
 0x190   : > { %v1301_v57 = vadd.f32 %v1254_v48, %v611_v46  ;;  %v1258_v58 = vadd.f32 %v1257_v56, %v1174_v54  ;;  %v624_v46 = vld [vmem:[#allocation2 + $0x70] sm:$0xff] }
 0x191   : > { %1320 = vst [vmem:[#allocation2] sm:$0xff] %v1300_v52  ;;  %v1302_v59 = vadd.f32 %v1256_v53, %v612_v50 }
 0x192   : > { %1321 = vst [vmem:[#allocation2 + $0x8] sm:$0xff] %v1301_v57  ;;  %v1303_v60 = vadd.f32 %v1258_v58, %v613_v55  ;;  %v626_v58 = vld [vmem:[#allocation2 + $0x80] sm:$0xff] }
 0x193   : > { %1322 = vst [vmem:[#allocation2 + $0x10] sm:$0xff] %v1302_v59  ;;  %v1178_v61 = vpop.f32.mrb[4].mxu1 }
 0x194   : > { %1323 = vst [vmem:[#allocation2 + $0x18] sm:$0xff] %v1303_v60  ;;  %v1261_v63 = vpop.f32.mrb[4].mxu0  ;;  %v1180_v1 = vpop.f32.mrb[5].mxu1 }
 0x195   : > { %v1262_v0 = vadd.f32 %v1261_v63, %v1178_v61  ;;  %v1263_v3 = vpop.f32.mrb[5].mxu0  ;;  %v1182_v5 = vpop.f32.mrb[6].mxu1 }
 0x196   : > { %v1264_v4 = vadd.f32 %v1263_v3, %v1180_v1  ;;  %v1265_v7 = vpop.f32.mrb[6].mxu0  ;;  %v1184_v10 = vpop.f32.mrb[7].mxu1 }
 0x197   : > { %v1304_v8 = vadd.f32 %v1262_v0, %v614_v62  ;;  %v1266_v9 = vadd.f32 %v1265_v7, %v1182_v5  ;;  %v1267_v12 = vpop.f32.mrb[7].mxu0  ;;  %v627_v62 = vld [vmem:[#allocation2 + $0x88] sm:$0xff]  ;;  %v629_v7 = vld [vmem:[#allocation2 + $0x98] sm:$0xff] }
 0x198   : > { %v1305_v13 = vadd.f32 %v1264_v4, %v615_v2  ;;  %v1268_v14 = vadd.f32 %v1267_v12, %v1184_v10  ;;  %v628_v2 = vld [vmem:[#allocation2 + $0x90] sm:$0xff] }
 0x199   : > { %1324 = vst [vmem:[#allocation2 + $0x20] sm:$0xff] %v1304_v8  ;;  %v1306_v15 = vadd.f32 %v1266_v9, %v616_v6 }
 0x19a   : > { %1325 = vst [vmem:[#allocation2 + $0x28] sm:$0xff] %v1305_v13  ;;  %v1307_v16 = vadd.f32 %v1268_v14, %v617_v11  ;;  %v1366_v13 = vlaneseq (!%p1773_p5) }
 0x19b   : > { %1326 = vst [vmem:[#allocation2 + $0x30] sm:$0xff] %v1306_v15  ;;  %v1188_v17 = vpop.f32.mrb[8].mxu1  ;;  %v1364_v15 = vld [vmem:[%s582_s29] sm:$0x3] (!%p1773_p5) }
 0x19c   : > { %1327 = vst [vmem:[#allocation2 + $0x38] sm:$0xff] %v1307_v16  ;;  %v1271_v19 = vpop.f32.mrb[8].mxu0  ;;  %v1190_v21 = vpop.f32.mrb[9].mxu1  ;;  %v1367_v14 = vshrl.u32 (!%p1773_p5), %v1366_v13, 7  ;;  %v1344_v16 = vld [vmem:[#allocation2] sm:$0xff] (!%p1773_p5) }
 0x19d   : > { %v1272_v20 = vadd.f32 %v1271_v19, %v1188_v17  ;;  %v1273_v23 = vpop.f32.mrb[9].mxu0  ;;  %v1192_v25 = vpop.f32.mrb[10].mxu1  ;;  %v1345_v17 = vld [vmem:[#allocation2 + $0x8] sm:$0xff] (!%p1773_p5) }
 0x19e   : > { %v1274_v24 = vadd.f32 %v1273_v23, %v1190_v21  ;;  %v1275_v27 = vpop.f32.mrb[10].mxu0  ;;  %v1194_v30 = vpop.f32.mrb[11].mxu1  ;;  %v1372_v19 = vsub.s32 (!%p1773_p5), 1, %v1367_v14  ;;  %v1347_v21 = vld [vmem:[#allocation2 + $0x18] sm:$0xff] (!%p1773_p5) }
 0x19f   : > { %v1308_v28 = vadd.f32 %v1272_v20, %v618_v18  ;;  %v1276_v29 = vadd.f32 %v1275_v27, %v1192_v25  ;;  %v1277_v32 = vpop.f32.mrb[11].mxu0  ;;  %v1368_v18 = vsub.s32 (!%p1773_p5), 0, %v1367_v14  ;;  %v1346_v20 = vld [vmem:[#allocation2 + $0x10] sm:$0xff] (!%p1773_p5) }
 0x1a0   : > { %v1309_v33 = vadd.f32 %v1274_v24, %v619_v22  ;;  %v1278_v34 = vadd.f32 %v1277_v32, %v1194_v30  ;;  %v1348_v22 = vld [vmem:[#allocation2 + $0x20] sm:$0xff] (!%p1773_p5)  ;;  %v2549_v24 = vrot.slane (!%p1773_p5), %v1364_v15, %v1372_v19 }
 0x1a1   : > { %1328 = vst [vmem:[#allocation2 + $0x40] sm:$0xff] %v1308_v28  ;;  %v1310_v35 = vadd.f32 %v1276_v29, %v620_v26  ;;  %v2547_v23 = vrot.slane (!%p1773_p5), %v1364_v15, %v1368_v18  ;;  %v1349_v25 = vld [vmem:[#allocation2 + $0x28] sm:$0xff] (!%p1773_p5) }
 0x1a2   : > { %1329 = vst [vmem:[#allocation2 + $0x48] sm:$0xff] %v1309_v33  ;;  %v1311_v36 = vadd.f32 %v1278_v34, %v621_v31  ;;  %v1350_v26 = vld [vmem:[#allocation2 + $0x30] sm:$0xff] (!%p1773_p5)  ;;  %v1377_v29 = vadd.f32 (!%p1773_p5), %v2549_v24, %v1345_v17  ;;  %v1379_v31 = vadd.f32 (!%p1773_p5), %v2549_v24, %v1347_v21  ;;  %v1381_v33 = vadd.f32 (!%p1773_p5), %v2549_v24, %v1349_v25 }
 0x1a3   : > { %1330 = vst [vmem:[#allocation2 + $0x50] sm:$0xff] %v1310_v35  ;;  %v1198_v37 = vpop.f32.mrb[12].mxu1  ;;  %v1351_v27 = vld [vmem:[#allocation2 + $0x38] sm:$0xff] (!%p1773_p5)  ;;  %v1376_v28 = vadd.f32 (!%p1773_p5), %v2547_v23, %v1344_v16  ;;  %v1378_v30 = vadd.f32 (!%p1773_p5), %v2547_v23, %v1346_v20  ;;  %v1380_v32 = vadd.f32 (!%p1773_p5), %v2547_v23, %v1348_v22  ;;  %v1382_v34 = vadd.f32 (!%p1773_p5), %v2547_v23, %v1350_v26 }
 0x1a4   : > { %1331 = vst [vmem:[#allocation2 + $0x58] sm:$0xff] %v1311_v36  ;;  %v1281_v39 = vpop.f32.mrb[12].mxu0  ;;  %v1200_v41 = vpop.f32.mrb[13].mxu1  ;;  %v1383_v35 = vadd.f32 (!%p1773_p5), %v2549_v24, %v1351_v27 }
 0x1a5   : > { %v1282_v40 = vadd.f32 %v1281_v39, %v1198_v37  ;;  %v1283_v43 = vpop.f32.mrb[13].mxu0  ;;  %v1202_v45 = vpop.f32.mrb[14].mxu1  ;;  %v1397_v39 = vmax.f32 (!%p1773_p5), %v1377_v29, 0.0 }
 0x1a6   : > { %v1284_v44 = vadd.f32 %v1283_v43, %v1200_v41  ;;  %v1285_v47 = vpop.f32.mrb[14].mxu0  ;;  %v1204_v50 = vpop.f32.mrb[15].mxu1  ;;  %v1399_v41 = vmax.f32 (!%p1773_p5), %v1379_v31, 0.0 }
 0x1a7   : > { %v1312_v48 = vadd.f32 %v1282_v40, %v622_v38  ;;  %v1286_v49 = vadd.f32 %v1285_v47, %v1202_v45  ;;  %v1287_v52 = vpop.f32.mrb[15].mxu0  ;;  %v1396_v38 = vmax.f32 (!%p1773_p5), %v1376_v28, 0.0  ;;  %v1398_v40 = vmax.f32 (!%p1773_p5), %v1378_v30, 0.0 }
 0x1a8   : > { %v1313_v53 = vadd.f32 %v1284_v44, %v623_v42  ;;  %v1288_v54 = vadd.f32 %v1287_v52, %v1204_v50  ;;  %v1352_v36 = vld [vmem:[#allocation2 + $0x40] sm:$0xff] (!%p1773_p5)  ;;  %v1400_v44 = vmax.f32 (!%p1773_p5), %v1380_v32, 0.0  ;;  %v1401_v45 = vmax.f32 (!%p1773_p5), %v1381_v33, 0.0 }
 0x1a9   : > { %1332 = vst [vmem:[#allocation2 + $0x60] sm:$0xff] %v1312_v48  ;;  %v1314_v55 = vadd.f32 %v1286_v49, %v624_v46  ;;  %v1353_v37 = vld [vmem:[#allocation2 + $0x48] sm:$0xff] (!%p1773_p5)  ;;  %v1402_v46 = vmax.f32 (!%p1773_p5), %v1382_v34, 0.0  ;;  %v1403_v47 = vmax.f32 (!%p1773_p5), %v1383_v35, 0.0  ;;  %v1790_v50 = vpack.c.bf16 (!%p1773_p5), %v1397_v39, %v1396_v38 }
 0x1aa   : > { %1333 = vst [vmem:[#allocation2 + $0x68] sm:$0xff] %v1313_v53  ;;  %v1315_v56 = vadd.f32 %v1288_v54, %v625_v51  ;;  %v1354_v42 = vld [vmem:[#allocation2 + $0x50] sm:$0xff] (!%p1773_p5)  ;;  %v1791_v51 = vpack.c.bf16 (!%p1773_p5), %v1399_v41, %v1398_v40  ;;  %v1384_v52 = vadd.f32 (!%p1773_p5), %v2547_v23, %v1352_v36  ;;  %v1385_v53 = vadd.f32 (!%p1773_p5), %v2549_v24, %v1353_v37 }
 0x1ab   : > { %1334 = vst [vmem:[#allocation2 + $0x70] sm:$0xff] %v1314_v55  ;;  %v1208_v57 = vpop.f32.mrb[16].mxu1  ;;  %v1355_v43 = vld [vmem:[#allocation2 + $0x58] sm:$0xff] (!%p1773_p5)  ;;  %1476 = vst [vmem:[%s2454_s1] sm:$0xff] (!%p1773_p5), %v1790_v50 }
 0x1ac   : > { %1335 = vst [vmem:[#allocation2 + $0x78] sm:$0xff] %v1315_v56  ;;  %v1291_v59 = vpop.f32.mrb[16].mxu0  ;;  %v1210_v61 = vpop.f32.mrb[17].mxu1  ;;  %v1792_v56 = vpack.c.bf16 (!%p1773_p5), %v1401_v45, %v1400_v44  ;;  %1477 = vst [vmem:[%s2454_s1 + $0x8] sm:$0xff] (!%p1773_p5), %v1791_v51 }
 0x1ad   : > { %v1292_v60 = vadd.f32 %v1291_v59, %v1208_v57  ;;  %v1293_v63 = vpop.f32.mrb[17].mxu0  ;;  %v1212_v1 = vpop.f32.mrb[18].mxu1  ;;  %v1793_v57 = vpack.c.bf16 (!%p1773_p5), %v1403_v47, %v1402_v46  ;;  %v1387_v59 = vadd.f32 (!%p1773_p5), %v2549_v24, %v1355_v43 }
 0x1ae   : > { %v1294_v0 = vadd.f32 %v1293_v63, %v1210_v61  ;;  %v1295_v3 = vpop.f32.mrb[18].mxu0  ;;  %v1214_v6 = vpop.f32.mrb[19].mxu1  ;;  %1343 = sbr.rel (%p1773_p5) target bundleno = 451 (0x1c3), region = 101  ;;  %v1404_v61 = vmax.f32 (!%p1773_p5), %v1384_v52, 0.0  ;;  %1478 = vst [vmem:[%s2454_s1 + $0x10] sm:$0xff] (!%p1773_p5), %v1792_v56 }
 0x1af   : > { %v1316_v4 = vadd.f32 %v1292_v60, %v626_v58  ;;  %v1296_v5 = vadd.f32 %v1295_v3, %v1212_v1  ;;  %v1297_v8 = vpop.f32.mrb[19].mxu0  ;;  %v1386_v58 = vadd.f32 (!%p1773_p5), %v2547_v23, %v1354_v42  ;;  %1479 = vst [vmem:[%s2454_s1 + $0x18] sm:$0xff] (!%p1773_p5), %v1793_v57  ;;  %v1407_v3 = vmax.f32 (!%p1773_p5), %v1387_v59, 0.0 }
 0x1b0   : > { %v1317_v9 = vadd.f32 %v1294_v0, %v627_v62  ;;  %v1298_v10 = vadd.f32 %v1297_v8, %v1214_v6  ;;  %v1356_v48 = vld [vmem:[#allocation2 + $0x60] sm:$0xff] (!%p1773_p5)  ;;  %v1405_v62 = vmax.f32 (!%p1773_p5), %v1385_v53, 0.0 }
 0x1b1   : > { %1336 = vst [vmem:[#allocation2 + $0x80] sm:$0xff] %v1316_v4  ;;  %v1318_v11 = vadd.f32 %v1296_v5, %v628_v2  ;;  %v1357_v49 = vld [vmem:[#allocation2 + $0x68] sm:$0xff] (!%p1773_p5)  ;;  %v1388_v63 = vadd.f32 (!%p1773_p5), %v2547_v23, %v1356_v48  ;;  %v1406_v2 = vmax.f32 (!%p1773_p5), %v1386_v58, 0.0 }
 0x1b2   : > { %1337 = vst [vmem:[#allocation2 + $0x88] sm:$0xff] %v1317_v9  ;;  %v1319_v12 = vadd.f32 %v1298_v10, %v629_v7  ;;  %v1358_v54 = vld [vmem:[#allocation2 + $0x70] sm:$0xff] (!%p1773_p5)  ;;  %v1389_v0 = vadd.f32 (!%p1773_p5), %v2549_v24, %v1357_v49  ;;  %v1794_v8 = vpack.c.bf16 (!%p1773_p5), %v1405_v62, %v1404_v61 }
 0x1b3   : > { %1338 = vst [vmem:[#allocation2 + $0x90] sm:$0xff] %v1318_v11  ;;  %v1359_v55 = vld [vmem:[#allocation2 + $0x78] sm:$0xff] (!%p1773_p5)  ;;  %v1390_v4 = vadd.f32 (!%p1773_p5), %v2547_v23, %v1358_v54  ;;  %v1408_v9 = vmax.f32 (!%p1773_p5), %v1388_v63, 0.0 }
 0x1b4   : > { %1339 = vst [vmem:[#allocation2 + $0x98] sm:$0xff] %v1319_v12  ;;  %v1391_v5 = vadd.f32 (!%p1773_p5), %v2549_v24, %v1359_v55  ;;  %v1409_v10 = vmax.f32 (!%p1773_p5), %v1389_v0, 0.0  ;;  %v1795_v12 = vpack.c.bf16 (!%p1773_p5), %v1407_v3, %v1406_v2  ;;  %1480 = vst [vmem:[%s2454_s1 + $0x20] sm:$0xff] (!%p1773_p5), %v1794_v8 }
 0x1b5   : > { %v1410_v13 = vmax.f32 %v1390_v4, 0.0 }
 0x1b6   : > { %v1411_v14 = vmax.f32 %v1391_v5, 0.0  ;;  %v1796_v16 = vpack.c.bf16 %v1409_v10, %v1408_v9  ;;  %1481 = vst [vmem:[%s2454_s1 + $0x28] sm:$0xff] %v1795_v12 }
 0x1b8   : > { %v1360_v60 = vld [vmem:[#allocation2 + $0x80] sm:$0xff]  ;;  %v1797_v20 = vpack.c.bf16 %v1411_v14, %v1410_v13  ;;  %1482 = vst [vmem:[%s2454_s1 + $0x30] sm:$0xff] %v1796_v16 }
 0x1b9   : > { %v1361_v1 = vld [vmem:[#allocation2 + $0x88] sm:$0xff]  ;;  %v1392_v11 = vadd.f32 %v2547_v23, %v1360_v60 }
 0x1ba   : > { %v1362_v6 = vld [vmem:[#allocation2 + $0x90] sm:$0xff]  ;;  %v1393_v15 = vadd.f32 %v2549_v24, %v1361_v1  ;;  %1483 = vst [vmem:[%s2454_s1 + $0x38] sm:$0xff] %v1797_v20 }
 0x1bb   : > { %v1363_v7 = vld [vmem:[#allocation2 + $0x98] sm:$0xff]  ;;  %v1412_v17 = vmax.f32 %v1392_v11, 0.0  ;;  %v1394_v18 = vadd.f32 %v2547_v23, %v1362_v6 }
 0x1bc   : > { %v1395_v19 = vadd.f32 %v2549_v24, %v1363_v7  ;;  %v1413_v21 = vmax.f32 %v1393_v15, 0.0 }
 0x1bd   : > { %v1414_v22 = vmax.f32 %v1394_v18, 0.0 }
 0x1be   : > { %v1415_v25 = vmax.f32 %v1395_v19, 0.0  ;;  %v1798_v26 = vpack.c.bf16 %v1413_v21, %v1412_v17 }
 0x1c0   : > { %v1799_v27 = vpack.c.bf16 %v1415_v25, %v1414_v22  ;;  %1484 = vst [vmem:[%s2454_s1 + $0x40] sm:$0xff] %v1798_v26 }
 0x1c2   : > { %1485 = vst [vmem:[%s2454_s1 + $0x48] sm:$0xff] %v1799_v27 }
 0x1c3 PF: > { %1492 = sbr.rel (!%p2242_p12) target bundleno = 459 (0x1cb), region = 105  ;;  %s1800_s16 = sshll.u32 (%p2242_p12), %s2113_s19, 3  ;;  %v1544_v23 = vld [vmem:[%s2454_s1] sm:$0xff] (%p2242_p12)  ;;  %v1546_v24 = vld [vmem:[%s2454_s1 + $0x8] sm:$0xff] (%p2242_p12)  ;;  %v1548_v28 = vld [vmem:[%s2454_s1 + $0x10] sm:$0xff] (%p2242_p12) }
 0x1c4   : > { %s1498_s5 = scalar_lea.vmem (%p2242_p12), %s2633_s3, %s1800_s16  ;;  %v1550_v29 = vld [vmem:[%s2454_s1 + $0x18] sm:$0xff] (%p2242_p12)  ;;  %v1554_v31 = vld [vmem:[%s2454_s1 + $0x28] sm:$0xff] (%p2242_p12)  ;;  %v1556_v32 = vld [vmem:[%s2454_s1 + $0x30] sm:$0xff] (%p2242_p12) }
 0x1c5   : > { %1545 = vst [vmem:[%s1498_s5] sm:$0xff] (%p2242_p12), %v1544_v23  ;;  %1547 = vst [vmem:[%s1498_s5 + $0x10] sm:$0xff] (%p2242_p12), %v1546_v24  ;;  %v1558_v33 = vld [vmem:[%s2454_s1 + $0x38] sm:$0xff] (%p2242_p12) }
 0x1c6   : > { %1549 = vst [vmem:[%s1498_s5 + $0x20] sm:$0xff] (%p2242_p12), %v1548_v28  ;;  %1551 = vst [vmem:[%s1498_s5 + $0x30] sm:$0xff] (%p2242_p12), %v1550_v29 }
 0x1c7   : > { %1555 = vst [vmem:[%s1498_s5 + $0x50] sm:$0xff] (%p2242_p12), %v1554_v31  ;;  %v1560_v34 = vld [vmem:[%s2454_s1 + $0x40] sm:$0xff] (%p2242_p12)  ;;  %1557 = vst [vmem:[%s1498_s5 + $0x60] sm:$0xff] (%p2242_p12), %v1556_v32 }
 0x1c8   : > { %1559 = vst [vmem:[%s1498_s5 + $0x70] sm:$0xff] (%p2242_p12), %v1558_v33  ;;  %1561 = vst [vmem:[%s1498_s5 + $0x80] sm:$0xff] (%p2242_p12), %v1560_v34 }
 0x1c9   : > { %v1552_v30 = vld [vmem:[%s2454_s1 + $0x20] sm:$0xff] (%p2242_p12)  ;;  %v1562_v35 = vld [vmem:[%s2454_s1 + $0x48] sm:$0xff] (%p2242_p12) }
 0x1ca   : > { %1553 = vst [vmem:[%s1498_s5 + $0x40] sm:$0xff] %v1552_v30  ;;  %1563 = vst [vmem:[%s1498_s5 + $0x90] sm:$0xff] %v1562_v35 }
 0x1cb PF: > { %s13_s22 = sadd.s32 1, %s2125_s22   ;;  %s2643_s10 = sld [smem:[#allocation6_spill]] }
 0x1cc   : > { %p10_p6 = scmp.ge.s32.totalorder %s13_s22, 20   ;;  %s2644_s12 = smov %s2089_s13 }
 0x1cd   : > { %s2645_s13 = smov %s2240_s9  ;;  %s2646_s14 = smov %s2097_s15 }
 0x1ce   : > { %s2647_s15 = smov %s2237_s8  ;;  %s2648_s16 = smov %s2105_s17 }
 0x1cf   : > { %s2649_s17 = smov %s2223_s30  ;;  %s2650_s18 = smov %s2117_s20 }
 0x1d0   : > { %s2651_s19 = smov %s2121_s21  ;;  %s2652_s20 = smov %s2655_s24 }
 0x1d1   : > { %s2653_s21 = smov %s2643_s10  ;;  %12 = sbr.rel (!%p10_p6) target bundleno = 9 (0x9), region = 185 }

// kernel: _lambda_.26
= control target key start
LH: loop header
LB: loop body
LE: loop exit
PB: predicated region body
PF: predicated region fallthrough
CT: control target
= control target key end

     0   :  { %s506_s0 = inlined_call_operand.vmem [shape: bf16[8,5120], index: 0, kind: input, shape index: {}]   ;;  %s507_s1 = inlined_call_operand.vmem [shape: bf16[8,5120], index: 1, kind: input, shape index: {}]   ;;  %s508_s2 = inlined_call_operand.vmem [shape: bf16[8,5120], index: 2, kind: input, shape index: {}]   ;;  %s509_s3 = inlined_call_operand.vmem [shape: bf16[8,5120], index: 3, kind: input, shape index: {}]   ;;  %s510_s4 = inlined_call_operand.vmem [shape: bf16[8,5120], index: 4, kind: output, shape index: {}]  }
   0x1   :  { %v17_v0 = vld [vmem:[%s506_s0] sm:$0xff]  ;;  %v18_v5 = vld [vmem:[%s506_s0 + $0x8] sm:$0xff]  ;;  %v19_v11 = vld [vmem:[%s506_s0 + $0x10] sm:$0xff] }
   0x2   :  { %v37_v1 = vld [vmem:[%s507_s1] sm:$0xff]  ;;  %v38_v6 = vld [vmem:[%s507_s1 + $0x8] sm:$0xff]  ;;  %v39_v13 = vld [vmem:[%s507_s1 + $0x10] sm:$0xff] }
   0x3   :  { %v77_v2 = vld [vmem:[%s508_s2] sm:$0xff]  ;;  %v57_v3 = vmax.bf16 %v37_v1, %v17_v0  ;;  %v58_v8 = vmax.bf16 %v38_v6, %v18_v5  ;;  %v78_v9 = vld [vmem:[%s508_s2 + $0x8] sm:$0xff]  ;;  %v79_v14 = vld [vmem:[%s508_s2 + $0x10] sm:$0xff]  ;;  %v59_v17 = vmax.bf16 %v39_v13, %v19_v11 }
   0x4   :  { %v97_v4 = vld [vmem:[%s509_s3] sm:$0xff]  ;;  %v98_v10 = vld [vmem:[%s509_s3 + $0x8] sm:$0xff]  ;;  %v99_v15 = vld [vmem:[%s509_s3 + $0x10] sm:$0xff] }
   0x5   :  { %v117_v7 = vmax.bf16 %v97_v4, %v77_v2  ;;  %v118_v12 = vmax.bf16 %v98_v10, %v78_v9  ;;  %v119_v18 = vmax.bf16 %v99_v15, %v79_v14  ;;  %v20_v19 = vld [vmem:[%s506_s0 + $0x18] sm:$0xff]  ;;  %v21_v25 = vld [vmem:[%s506_s0 + $0x20] sm:$0xff]  ;;  %v22_v32 = vld [vmem:[%s506_s0 + $0x28] sm:$0xff] }
   0x6   :  { %v40_v20 = vld [vmem:[%s507_s1 + $0x18] sm:$0xff]  ;;  %v41_v26 = vld [vmem:[%s507_s1 + $0x20] sm:$0xff]  ;;  %v42_v34 = vld [vmem:[%s507_s1 + $0x28] sm:$0xff] }
   0x7   :  { %v137_v16 = vmax.bf16 %v117_v7, %v57_v3  ;;  %v80_v21 = vld [vmem:[%s508_s2 + $0x18] sm:$0xff]  ;;  %v138_v22 = vmax.bf16 %v118_v12, %v58_v8  ;;  %v60_v23 = vmax.bf16 %v40_v20, %v20_v19  ;;  %v139_v27 = vmax.bf16 %v119_v18, %v59_v17  ;;  %v81_v30 = vld [vmem:[%s508_s2 + $0x20] sm:$0xff]  ;;  %v82_v35 = vld [vmem:[%s508_s2 + $0x28] sm:$0xff] }
   0x8   :  { %v100_v24 = vld [vmem:[%s509_s3 + $0x18] sm:$0xff]  ;;  %v61_v29 = vmax.bf16 %v41_v26, %v21_v25  ;;  %v101_v31 = vld [vmem:[%s509_s3 + $0x20] sm:$0xff]  ;;  %v102_v36 = vld [vmem:[%s509_s3 + $0x28] sm:$0xff]  ;;  %v62_v38 = vmax.bf16 %v42_v34, %v22_v32 }
   0x9   :  { %157 = vst [vmem:[%s510_s4] sm:$0xff] %v137_v16  ;;  %v120_v28 = vmax.bf16 %v100_v24, %v80_v21  ;;  %158 = vst [vmem:[%s510_s4 + $0x8] sm:$0xff] %v138_v22  ;;  %v121_v33 = vmax.bf16 %v101_v31, %v81_v30  ;;  %v122_v39 = vmax.bf16 %v102_v36, %v82_v35  ;;  %v23_v40 = vld [vmem:[%s506_s0 + $0x30] sm:$0xff]  ;;  %v24_v46 = vld [vmem:[%s506_s0 + $0x38] sm:$0xff] }
   0xa   :  { %159 = vst [vmem:[%s510_s4 + $0x10] sm:$0xff] %v139_v27  ;;  %v43_v41 = vld [vmem:[%s507_s1 + $0x30] sm:$0xff]  ;;  %v44_v47 = vld [vmem:[%s507_s1 + $0x38] sm:$0xff]  ;;  %v25_v53 = vld [vmem:[%s506_s0 + $0x40] sm:$0xff] }
   0xb   :  { %v140_v37 = vmax.bf16 %v120_v28, %v60_v23  ;;  %v83_v42 = vld [vmem:[%s508_s2 + $0x30] sm:$0xff]  ;;  %v141_v43 = vmax.bf16 %v121_v33, %v61_v29  ;;  %v63_v44 = vmax.bf16 %v43_v41, %v23_v40  ;;  %v142_v48 = vmax.bf16 %v122_v39, %v62_v38  ;;  %v84_v51 = vld [vmem:[%s508_s2 + $0x38] sm:$0xff]  ;;  %v45_v55 = vld [vmem:[%s507_s1 + $0x40] sm:$0xff] }
   0xc   :  { %v103_v45 = vld [vmem:[%s509_s3 + $0x30] sm:$0xff]  ;;  %v64_v50 = vmax.bf16 %v44_v47, %v24_v46  ;;  %v104_v52 = vld [vmem:[%s509_s3 + $0x38] sm:$0xff]  ;;  %v85_v56 = vld [vmem:[%s508_s2 + $0x40] sm:$0xff]  ;;  %v65_v59 = vmax.bf16 %v45_v55, %v25_v53 }
   0xd   :  { %160 = vst [vmem:[%s510_s4 + $0x18] sm:$0xff] %v140_v37  ;;  %v123_v49 = vmax.bf16 %v103_v45, %v83_v42  ;;  %161 = vst [vmem:[%s510_s4 + $0x20] sm:$0xff] %v141_v43  ;;  %v124_v54 = vmax.bf16 %v104_v52, %v84_v51  ;;  %v105_v57 = vld [vmem:[%s509_s3 + $0x40] sm:$0xff]  ;;  %v26_v61 = vld [vmem:[%s506_s0 + $0x48] sm:$0xff] }
   0xe   :  { %162 = vst [vmem:[%s510_s4 + $0x28] sm:$0xff] %v142_v48  ;;  %v125_v60 = vmax.bf16 %v105_v57, %v85_v56  ;;  %v46_v62 = vld [vmem:[%s507_s1 + $0x48] sm:$0xff]  ;;  %v27_v3 = vld [vmem:[%s506_s0 + $0x50] sm:$0xff]  ;;  %v28_v10 = vld [vmem:[%s506_s0 + $0x58] sm:$0xff] }
   0xf   :  { %v143_v58 = vmax.bf16 %v123_v49, %v63_v44  ;;  %v86_v63 = vld [vmem:[%s508_s2 + $0x48] sm:$0xff]  ;;  %v144_v0 = vmax.bf16 %v124_v54, %v64_v50  ;;  %v66_v1 = vmax.bf16 %v46_v62, %v26_v61  ;;  %v47_v4 = vld [vmem:[%s507_s1 + $0x50] sm:$0xff]  ;;  %v48_v12 = vld [vmem:[%s507_s1 + $0x58] sm:$0xff] }
  0x10   :  { %v106_v2 = vld [vmem:[%s509_s3 + $0x48] sm:$0xff]  ;;  %v145_v5 = vmax.bf16 %v125_v60, %v65_v59  ;;  %v67_v7 = vmax.bf16 %v47_v4, %v27_v3  ;;  %v87_v8 = vld [vmem:[%s508_s2 + $0x50] sm:$0xff]  ;;  %v88_v13 = vld [vmem:[%s508_s2 + $0x58] sm:$0xff]  ;;  %v68_v16 = vmax.bf16 %v48_v12, %v28_v10 }
  0x11   :  { %163 = vst [vmem:[%s510_s4 + $0x30] sm:$0xff] %v143_v58  ;;  %v126_v6 = vmax.bf16 %v106_v2, %v86_v63  ;;  %v107_v9 = vld [vmem:[%s509_s3 + $0x50] sm:$0xff]  ;;  %164 = vst [vmem:[%s510_s4 + $0x38] sm:$0xff] %v144_v0  ;;  %v108_v14 = vld [vmem:[%s509_s3 + $0x58] sm:$0xff] }
  0x12   :  { %v127_v11 = vmax.bf16 %v107_v9, %v87_v8  ;;  %165 = vst [vmem:[%s510_s4 + $0x40] sm:$0xff] %v145_v5  ;;  %v128_v17 = vmax.bf16 %v108_v14, %v88_v13  ;;  %v29_v18 = vld [vmem:[%s506_s0 + $0x60] sm:$0xff]  ;;  %v30_v24 = vld [vmem:[%s506_s0 + $0x68] sm:$0xff]  ;;  %v31_v31 = vld [vmem:[%s506_s0 + $0x70] sm:$0xff] }
  0x13   :  { %v146_v15 = vmax.bf16 %v126_v6, %v66_v1  ;;  %v49_v19 = vld [vmem:[%s507_s1 + $0x60] sm:$0xff]  ;;  %v50_v25 = vld [vmem:[%s507_s1 + $0x68] sm:$0xff]  ;;  %v51_v33 = vld [vmem:[%s507_s1 + $0x70] sm:$0xff] }
  0x14   :  { %v89_v20 = vld [vmem:[%s508_s2 + $0x60] sm:$0xff]  ;;  %v147_v21 = vmax.bf16 %v127_v11, %v67_v7  ;;  %v69_v22 = vmax.bf16 %v49_v19, %v29_v18  ;;  %v148_v26 = vmax.bf16 %v128_v17, %v68_v16  ;;  %v70_v28 = vmax.bf16 %v50_v25, %v30_v24  ;;  %v90_v29 = vld [vmem:[%s508_s2 + $0x68] sm:$0xff]  ;;  %v91_v34 = vld [vmem:[%s508_s2 + $0x70] sm:$0xff] }
  0x15   :  { %v109_v23 = vld [vmem:[%s509_s3 + $0x60] sm:$0xff]  ;;  %166 = vst [vmem:[%s510_s4 + $0x48] sm:$0xff] %v146_v15  ;;  %v110_v30 = vld [vmem:[%s509_s3 + $0x68] sm:$0xff]  ;;  %v111_v35 = vld [vmem:[%s509_s3 + $0x70] sm:$0xff]  ;;  %v71_v37 = vmax.bf16 %v51_v33, %v31_v31 }
  0x16   :  { %v129_v27 = vmax.bf16 %v109_v23, %v89_v20  ;;  %167 = vst [vmem:[%s510_s4 + $0x50] sm:$0xff] %v147_v21  ;;  %v130_v32 = vmax.bf16 %v110_v30, %v90_v29  ;;  %168 = vst [vmem:[%s510_s4 + $0x58] sm:$0xff] %v148_v26  ;;  %v131_v38 = vmax.bf16 %v111_v35, %v91_v34  ;;  %v32_v39 = vld [vmem:[%s506_s0 + $0x78] sm:$0xff]  ;;  %v33_v45 = vld [vmem:[%s506_s0 + $0x80] sm:$0xff] }
  0x17   :  { %v52_v40 = vld [vmem:[%s507_s1 + $0x78] sm:$0xff]  ;;  %v53_v46 = vld [vmem:[%s507_s1 + $0x80] sm:$0xff]  ;;  %v34_v52 = vld [vmem:[%s506_s0 + $0x88] sm:$0xff] }
  0x18   :  { %v149_v36 = vmax.bf16 %v129_v27, %v69_v22  ;;  %v92_v41 = vld [vmem:[%s508_s2 + $0x78] sm:$0xff]  ;;  %v150_v42 = vmax.bf16 %v130_v32, %v70_v28  ;;  %v72_v43 = vmax.bf16 %v52_v40, %v32_v39  ;;  %v151_v47 = vmax.bf16 %v131_v38, %v71_v37  ;;  %v93_v50 = vld [vmem:[%s508_s2 + $0x80] sm:$0xff]  ;;  %v54_v54 = vld [vmem:[%s507_s1 + $0x88] sm:$0xff] }
  0x19   :  { %v112_v44 = vld [vmem:[%s509_s3 + $0x78] sm:$0xff]  ;;  %v73_v49 = vmax.bf16 %v53_v46, %v33_v45  ;;  %v113_v51 = vld [vmem:[%s509_s3 + $0x80] sm:$0xff]  ;;  %v94_v55 = vld [vmem:[%s508_s2 + $0x88] sm:$0xff]  ;;  %v74_v58 = vmax.bf16 %v54_v54, %v34_v52 }
  0x1a   :  { %169 = vst [vmem:[%s510_s4 + $0x60] sm:$0xff] %v149_v36  ;;  %v132_v48 = vmax.bf16 %v112_v44, %v92_v41  ;;  %170 = vst [vmem:[%s510_s4 + $0x68] sm:$0xff] %v150_v42  ;;  %v133_v53 = vmax.bf16 %v113_v51, %v93_v50  ;;  %v114_v56 = vld [vmem:[%s509_s3 + $0x88] sm:$0xff]  ;;  %v35_v60 = vld [vmem:[%s506_s0 + $0x90] sm:$0xff] }
  0x1b   :  { %171 = vst [vmem:[%s510_s4 + $0x70] sm:$0xff] %v151_v47  ;;  %v134_v59 = vmax.bf16 %v114_v56, %v94_v55  ;;  %v55_v61 = vld [vmem:[%s507_s1 + $0x90] sm:$0xff]  ;;  %v36_v2 = vld [vmem:[%s506_s0 + $0x98] sm:$0xff] }
  0x1c   :  { %v152_v57 = vmax.bf16 %v132_v48, %v72_v43  ;;  %v95_v62 = vld [vmem:[%s508_s2 + $0x90] sm:$0xff]  ;;  %v153_v63 = vmax.bf16 %v133_v53, %v73_v49  ;;  %v75_v0 = vmax.bf16 %v55_v61, %v35_v60  ;;  %v56_v3 = vld [vmem:[%s507_s1 + $0x98] sm:$0xff] }
  0x1d   :  { %v115_v1 = vld [vmem:[%s509_s3 + $0x90] sm:$0xff]  ;;  %v154_v4 = vmax.bf16 %v134_v59, %v74_v58  ;;  %v76_v6 = vmax.bf16 %v56_v3, %v36_v2  ;;  %v96_v7 = vld [vmem:[%s508_s2 + $0x98] sm:$0xff] }
  0x1e   :  { %172 = vst [vmem:[%s510_s4 + $0x78] sm:$0xff] %v152_v57  ;;  %v135_v5 = vmax.bf16 %v115_v1, %v95_v62  ;;  %v116_v8 = vld [vmem:[%s509_s3 + $0x98] sm:$0xff]  ;;  %173 = vst [vmem:[%s510_s4 + $0x80] sm:$0xff] %v153_v63 }
  0x1f   :  { %v136_v9 = vmax.bf16 %v116_v8, %v96_v7  ;;  %174 = vst [vmem:[%s510_s4 + $0x88] sm:$0xff] %v154_v4 }
  0x20   :  { %v155_v10 = vmax.bf16 %v135_v5, %v75_v0 }
  0x21   :  { %v156_v11 = vmax.bf16 %v136_v9, %v76_v6 }
  0x22   :  { %175 = vst [vmem:[%s510_s4 + $0x90] sm:$0xff] %v155_v10 }
  0x23   :  { %176 = vst [vmem:[%s510_s4 + $0x98] sm:$0xff] %v156_v11 }

// kernel: _lambda_.27
= control target key start
LH: loop header
LB: loop body
LE: loop exit
PB: predicated region body
PF: predicated region fallthrough
CT: control target
= control target key end

     0   :  { %s2179_s0 = inlined_call_operand.vmem [shape: bf16[32,2048], index: 0, kind: input, shape index: {}]   ;;  %s2180_s1 = inlined_call_operand.vmem [shape: bf16[2048,512], index: 1, kind: input, shape index: {}]   ;;  %s2181_s2 = inlined_call_operand.vmem [shape: f32[1,512], index: 2, kind: input, shape index: {}]   ;;  %s2182_s3 = inlined_call_operand.vmem [shape: bf16[32,512], index: 3, kind: output, shape index: {}]  }
   0x1   :  { %2184 = sst [smem:[#allocation7_spill]] %s2179_s0 }
   0x2   :  { %2185 = sst [smem:[#allocation8_spill]] %s2180_s1 }
   0x3   :  { %s1789_s12 = smov 0   ;;  %s1791_s13 = smov 0  }
   0x4   :  { %s1793_s14 = smov 0   ;;  %s1795_s15 = smov 0  }
   0x5   :  { %s1797_s16 = smov 0   ;;  %s1799_s17 = smov 0  }
   0x6   :  { %s1801_s18 = smov 0   ;;  %s1803_s19 = smov 0  }
   0x7   :  { %s1805_s20 = smov 0   ;;  %s1807_s21 = smov 0  }
   0x8   :  { %s1809_s22 = smov 0  }
   0x9 LB: > { %s1368_s23 = sadd.s32 4294967295, %s1766_s22   ;;  %s25_s24 = sadd.s32 1, %s1758_s20  ;;  %s1766_s22 = sphi %s1809_s22, %s13_s22   ;;  %s1762_s21 = sphi %s1807_s21, %s2202_s21   ;;  %s1758_s20 = sphi %s1805_s20, %s2201_s20   ;;  %s1754_s19 = sphi %s1803_s19, %s2200_s19   ;;  %s1750_s18 = sphi %s1801_s18, %s2199_s18   ;;  %s1746_s17 = sphi %s1799_s17, %s2198_s17   ;;  %s1742_s16 = sphi %s1797_s16, %s2197_s16   ;;  %s1738_s15 = sphi %s1795_s15, %s2196_s15   ;;  %s1734_s14 = sphi %s1793_s14, %s2195_s14   ;;  %s1730_s13 = sphi %s1791_s13, %s2194_s13   ;;  %s1726_s12 = sphi %s1789_s12, %s2193_s12  }
   0xa   : > { %p26_p0 = scmp.ge.s32.totalorder %s25_s24, 4  ;;  %s28_s25 = sadd.s32 1, %s1762_s21 }
   0xb   : > { %s41_s26 = sadd.s32 1, %s1746_s17  ;;  %p48_p1 = scmp.ne.s32.totalorder %s1746_s17, %s1742_s16 }
   0xc   : > { %s2204_s24 = smov (%p26_p0, %s25_s24), 0  ;;  %s2206_s25 = smov (!%p26_p0, %s28_s25), %s1762_s21 }
   0xd   : > { %s37_s27 = ssub.s32 %s1758_s20, %s2204_s24  ;;  %p49_p2 = scmp.eq.s32.totalorder %s1766_s22, 0 }
   0xe   : > { %p30_p3 = scmp.ge.s32.totalorder %s2206_s25, 2  ;;  %p39_p4 = scmp.eq.s32.totalorder %s37_s27, 0 }
   0xf   : > { %p1856_p5 = por %p49_p2, %p48_p1  ;;  %s69_s29 = sadd.s32 1, %s1738_s15 }
  0x10   : > { %s2208_s25 = smov (%p30_p3, %s2206_s25), 0  ;;  %p76_p6 = scmp.ne.s32.totalorder %s1738_s15, %s1734_s14 }
  0x11   : > { %2187 = sst [smem:[#allocation6_spill]] %s2208_s25  ;;  %s65_s4 = ssub.s32 %s1762_s21, %s2208_s25 }
  0x12   : > { %s1864_s30 = scalar_select %p39_p4, %s1746_s17, %s41_s26  }
  0x13   : > { %s66_s5 = sor.u32 %s65_s4, %s37_s27  ;;  %p121_p7 = scmp.eq.s32.totalorder %s65_s4, 0 }
  0x14   : > { %p67_p8 = scmp.eq.s32.totalorder %s66_s5, 0  ;;  %p1870_p9 = por %p76_p6, %p49_p2 }
  0x15   : > { %s123_s7 = sadd.s32 1, %s1730_s13  ;;  %p133_p10 = scmp.ne.s32.totalorder %s1730_s13, %s1726_s12 }
  0x16   : > { %s1878_s8 = scalar_select %p67_p8, %s1738_s15, %s69_s29  }
  0x17   : > { %s1881_s9 = scalar_select %p121_p7, %s1730_s13, %s123_s7  }
  0x18   : > { %p134_p11 = scmp.eq.s32.totalorder %s1368_s23, 7  ;;  %p1371_p13 = scmp.ge.s32.totalorder %s1766_s22, 8 }
  0x1a   : > { %p1883_p12 = por %p134_p11, %p133_p10  ;;  %156 = sbr.rel (%p1371_p13) target bundleno = 89 (0x59), region = 16 }
  0x21   : > { %159 = sbr.rel (!%p1856_p5) target bundleno = 47 (0x2f), region = 20  ;;  %s161_s11 = sand.u32 (%p1856_p5), 1, %s1746_s17  }
  0x22   : > { %s1468_s26 = sshll.u32 (%p1856_p5), %s1758_s20, 4  ;;  %s1372_s27 = sshll.u32 (%p1856_p5), %s161_s11, 6 }
  0x23   : > { %s2190_s0 = sld [smem:[#allocation7_spill]] (%p1856_p5)  ;;  %s163_s23 = scalar_lea.vmem (%p1856_p5), [#allocation3], %s1372_s27 }
  0x29   : > { %s169_s5 = scalar_lea.vmem %s2190_s0, %s1468_s26 }
  0x2a   : > { %v182_v0 = vld [vmem:[%s169_s5] sm:$0xff]  ;;  %v184_v1 = vld [vmem:[%s169_s5 + $0x8] sm:$0xff] }
  0x2b   : > { %v186_v2 = vld [vmem:[%s169_s5 + $0x40] sm:$0xff]  ;;  %183 = vst [vmem:[%s163_s23] sm:$0xff] %v182_v0  ;;  %185 = vst [vmem:[%s163_s23 + $0x8] sm:$0xff] %v184_v1  ;;  %v188_v3 = vld [vmem:[%s169_s5 + $0x48] sm:$0xff] }
  0x2c   : > { %187 = vst [vmem:[%s163_s23 + $0x10] sm:$0xff] %v186_v2  ;;  %v190_v4 = vld [vmem:[%s169_s5 + $0x80] sm:$0xff]  ;;  %v192_v5 = vld [vmem:[%s169_s5 + $0x88] sm:$0xff]  ;;  %189 = vst [vmem:[%s163_s23 + $0x18] sm:$0xff] %v188_v3 }
  0x2d   : > { %191 = vst [vmem:[%s163_s23 + $0x20] sm:$0xff] %v190_v4  ;;  %193 = vst [vmem:[%s163_s23 + $0x28] sm:$0xff] %v192_v5  ;;  %v194_v6 = vld [vmem:[%s169_s5 + $0xc0] sm:$0xff]  ;;  %v196_v7 = vld [vmem:[%s169_s5 + $0xc8] sm:$0xff] }
  0x2e   : > { %195 = vst [vmem:[%s163_s23 + $0x30] sm:$0xff] %v194_v6  ;;  %197 = vst [vmem:[%s163_s23 + $0x38] sm:$0xff] %v196_v7 }
  0x2f PF: > { %203 = sbr.rel (!%p1870_p9) target bundleno = 89 (0x59), region = 43  ;;  %s205_s28 = sand.u32 (%p1870_p9), 1, %s1738_s15  }
  0x30   : > { %s1377_s7 = sshll.u32 (%p1870_p9), %s1762_s21, 1  ;;  %s1375_s11 = sshll.u32 (%p1870_p9), %s205_s28, 9 }
  0x31   : > { %s1469_s26 = sshll.u32 (%p1870_p9), %s1758_s20, 8  ;;  %s2191_s1 = sld [smem:[#allocation8_spill]] (%p1870_p9) }
  0x32   : > { %s211_s27 = sadd.s32 (%p1870_p9), %s1469_s26, %s1377_s7  ;;  %s1908_s6 = scalar_lea.vmem (%p1870_p9), [#allocation4], %s1375_s11 }
  0x33   : > { %s1379_s29 = sshll.u32 (%p1870_p9), %s211_s27, 2 }
  0x37   : > { %s1903_s25 = scalar_lea.vmem %s2191_s1, %s1379_s29 }
  0x38   : > { %v367_v8 = vld [vmem:[%s1903_s25] sm:$0xff]  ;;  %v369_v9 = vld [vmem:[%s1903_s25 + $0x10] sm:$0xff] }
  0x39   : > { %v371_v10 = vld [vmem:[%s1903_s25 + $0x20] sm:$0xff]  ;;  %368 = vst [vmem:[%s1908_s6] sm:$0xff] %v367_v8  ;;  %370 = vst [vmem:[%s1908_s6 + $0x8] sm:$0xff] %v369_v9  ;;  %v373_v11 = vld [vmem:[%s1903_s25 + $0x30] sm:$0xff] }
  0x3a   : > { %372 = vst [vmem:[%s1908_s6 + $0x10] sm:$0xff] %v371_v10  ;;  %v375_v12 = vld [vmem:[%s1903_s25 + $0x40] sm:$0xff]  ;;  %v377_v13 = vld [vmem:[%s1903_s25 + $0x50] sm:$0xff]  ;;  %374 = vst [vmem:[%s1908_s6 + $0x18] sm:$0xff] %v373_v11 }
  0x3b   : > { %376 = vst [vmem:[%s1908_s6 + $0x20] sm:$0xff] %v375_v12  ;;  %378 = vst [vmem:[%s1908_s6 + $0x28] sm:$0xff] %v377_v13  ;;  %v379_v14 = vld [vmem:[%s1903_s25 + $0x60] sm:$0xff]  ;;  %v381_v15 = vld [vmem:[%s1903_s25 + $0x70] sm:$0xff] }
  0x3c   : > { %v383_v16 = vld [vmem:[%s1903_s25 + $0x80] sm:$0xff]  ;;  %380 = vst [vmem:[%s1908_s6 + $0x30] sm:$0xff] %v379_v14  ;;  %382 = vst [vmem:[%s1908_s6 + $0x38] sm:$0xff] %v381_v15  ;;  %v385_v17 = vld [vmem:[%s1903_s25 + $0x90] sm:$0xff] }
  0x3d   : > { %384 = vst [vmem:[%s1908_s6 + $0x40] sm:$0xff] %v383_v16  ;;  %v387_v18 = vld [vmem:[%s1903_s25 + $0xa0] sm:$0xff]  ;;  %v389_v19 = vld [vmem:[%s1903_s25 + $0xb0] sm:$0xff]  ;;  %386 = vst [vmem:[%s1908_s6 + $0x48] sm:$0xff] %v385_v17 }
  0x3e   : > { %388 = vst [vmem:[%s1908_s6 + $0x50] sm:$0xff] %v387_v18  ;;  %390 = vst [vmem:[%s1908_s6 + $0x58] sm:$0xff] %v389_v19  ;;  %v391_v20 = vld [vmem:[%s1903_s25 + $0xc0] sm:$0xff]  ;;  %v393_v21 = vld [vmem:[%s1903_s25 + $0xd0] sm:$0xff] }
  0x3f   : > { %v395_v22 = vld [vmem:[%s1903_s25 + $0xe0] sm:$0xff]  ;;  %392 = vst [vmem:[%s1908_s6 + $0x60] sm:$0xff] %v391_v20  ;;  %394 = vst [vmem:[%s1908_s6 + $0x68] sm:$0xff] %v393_v21  ;;  %v397_v23 = vld [vmem:[%s1903_s25 + $0xf0] sm:$0xff] }
  0x40   : > { %396 = vst [vmem:[%s1908_s6 + $0x70] sm:$0xff] %v395_v22  ;;  %v399_v24 = vld [vmem:[%s1903_s25 + $0x100] sm:$0xff]  ;;  %v401_v25 = vld [vmem:[%s1903_s25 + $0x110] sm:$0xff]  ;;  %398 = vst [vmem:[%s1908_s6 + $0x78] sm:$0xff] %v397_v23 }
  0x41   : > { %400 = vst [vmem:[%s1908_s6 + $0x80] sm:$0xff] %v399_v24  ;;  %402 = vst [vmem:[%s1908_s6 + $0x88] sm:$0xff] %v401_v25  ;;  %v403_v26 = vld [vmem:[%s1903_s25 + $0x120] sm:$0xff]  ;;  %v405_v27 = vld [vmem:[%s1903_s25 + $0x130] sm:$0xff] }
  0x42   : > { %v407_v28 = vld [vmem:[%s1903_s25 + $0x140] sm:$0xff]  ;;  %404 = vst [vmem:[%s1908_s6 + $0x90] sm:$0xff] %v403_v26  ;;  %406 = vst [vmem:[%s1908_s6 + $0x98] sm:$0xff] %v405_v27  ;;  %v409_v29 = vld [vmem:[%s1903_s25 + $0x150] sm:$0xff] }
  0x43   : > { %408 = vst [vmem:[%s1908_s6 + $0xa0] sm:$0xff] %v407_v28  ;;  %v411_v30 = vld [vmem:[%s1903_s25 + $0x160] sm:$0xff]  ;;  %v413_v31 = vld [vmem:[%s1903_s25 + $0x170] sm:$0xff]  ;;  %410 = vst [vmem:[%s1908_s6 + $0xa8] sm:$0xff] %v409_v29 }
  0x44   : > { %412 = vst [vmem:[%s1908_s6 + $0xb0] sm:$0xff] %v411_v30  ;;  %414 = vst [vmem:[%s1908_s6 + $0xb8] sm:$0xff] %v413_v31  ;;  %v415_v32 = vld [vmem:[%s1903_s25 + $0x180] sm:$0xff]  ;;  %v417_v33 = vld [vmem:[%s1903_s25 + $0x190] sm:$0xff] }
  0x45   : > { %v419_v34 = vld [vmem:[%s1903_s25 + $0x1a0] sm:$0xff]  ;;  %416 = vst [vmem:[%s1908_s6 + $0xc0] sm:$0xff] %v415_v32  ;;  %418 = vst [vmem:[%s1908_s6 + $0xc8] sm:$0xff] %v417_v33  ;;  %v421_v35 = vld [vmem:[%s1903_s25 + $0x1b0] sm:$0xff] }
  0x46   : > { %420 = vst [vmem:[%s1908_s6 + $0xd0] sm:$0xff] %v419_v34  ;;  %v423_v36 = vld [vmem:[%s1903_s25 + $0x1c0] sm:$0xff]  ;;  %v425_v37 = vld [vmem:[%s1903_s25 + $0x1d0] sm:$0xff]  ;;  %422 = vst [vmem:[%s1908_s6 + $0xd8] sm:$0xff] %v421_v35 }
  0x47   : > { %424 = vst [vmem:[%s1908_s6 + $0xe0] sm:$0xff] %v423_v36  ;;  %426 = vst [vmem:[%s1908_s6 + $0xe8] sm:$0xff] %v425_v37  ;;  %v427_v38 = vld [vmem:[%s1903_s25 + $0x1e0] sm:$0xff]  ;;  %v429_v39 = vld [vmem:[%s1903_s25 + $0x1f0] sm:$0xff] }
  0x48   : > { %v431_v40 = vld [vmem:[%s1903_s25 + $0x200] sm:$0xff]  ;;  %428 = vst [vmem:[%s1908_s6 + $0xf0] sm:$0xff] %v427_v38  ;;  %430 = vst [vmem:[%s1908_s6 + $0xf8] sm:$0xff] %v429_v39  ;;  %v433_v41 = vld [vmem:[%s1903_s25 + $0x210] sm:$0xff] }
  0x49   : > { %432 = vst [vmem:[%s1908_s6 + $0x100] sm:$0xff] %v431_v40  ;;  %v435_v42 = vld [vmem:[%s1903_s25 + $0x220] sm:$0xff]  ;;  %v437_v43 = vld [vmem:[%s1903_s25 + $0x230] sm:$0xff]  ;;  %434 = vst [vmem:[%s1908_s6 + $0x108] sm:$0xff] %v433_v41 }
  0x4a   : > { %436 = vst [vmem:[%s1908_s6 + $0x110] sm:$0xff] %v435_v42  ;;  %438 = vst [vmem:[%s1908_s6 + $0x118] sm:$0xff] %v437_v43  ;;  %v439_v44 = vld [vmem:[%s1903_s25 + $0x240] sm:$0xff]  ;;  %v441_v45 = vld [vmem:[%s1903_s25 + $0x250] sm:$0xff] }
  0x4b   : > { %v443_v46 = vld [vmem:[%s1903_s25 + $0x260] sm:$0xff]  ;;  %440 = vst [vmem:[%s1908_s6 + $0x120] sm:$0xff] %v439_v44  ;;  %442 = vst [vmem:[%s1908_s6 + $0x128] sm:$0xff] %v441_v45  ;;  %v445_v47 = vld [vmem:[%s1903_s25 + $0x270] sm:$0xff] }
  0x4c   : > { %444 = vst [vmem:[%s1908_s6 + $0x130] sm:$0xff] %v443_v46  ;;  %v447_v48 = vld [vmem:[%s1903_s25 + $0x280] sm:$0xff]  ;;  %v449_v49 = vld [vmem:[%s1903_s25 + $0x290] sm:$0xff]  ;;  %446 = vst [vmem:[%s1908_s6 + $0x138] sm:$0xff] %v445_v47 }
  0x4d   : > { %448 = vst [vmem:[%s1908_s6 + $0x140] sm:$0xff] %v447_v48  ;;  %450 = vst [vmem:[%s1908_s6 + $0x148] sm:$0xff] %v449_v49  ;;  %v451_v50 = vld [vmem:[%s1903_s25 + $0x2a0] sm:$0xff]  ;;  %v453_v51 = vld [vmem:[%s1903_s25 + $0x2b0] sm:$0xff] }
  0x4e   : > { %v455_v52 = vld [vmem:[%s1903_s25 + $0x2c0] sm:$0xff]  ;;  %452 = vst [vmem:[%s1908_s6 + $0x150] sm:$0xff] %v451_v50  ;;  %454 = vst [vmem:[%s1908_s6 + $0x158] sm:$0xff] %v453_v51  ;;  %v457_v53 = vld [vmem:[%s1903_s25 + $0x2d0] sm:$0xff] }
  0x4f   : > { %456 = vst [vmem:[%s1908_s6 + $0x160] sm:$0xff] %v455_v52  ;;  %v459_v54 = vld [vmem:[%s1903_s25 + $0x2e0] sm:$0xff]  ;;  %v461_v55 = vld [vmem:[%s1903_s25 + $0x2f0] sm:$0xff]  ;;  %458 = vst [vmem:[%s1908_s6 + $0x168] sm:$0xff] %v457_v53 }
  0x50   : > { %460 = vst [vmem:[%s1908_s6 + $0x170] sm:$0xff] %v459_v54  ;;  %462 = vst [vmem:[%s1908_s6 + $0x178] sm:$0xff] %v461_v55  ;;  %v463_v56 = vld [vmem:[%s1903_s25 + $0x300] sm:$0xff]  ;;  %v465_v57 = vld [vmem:[%s1903_s25 + $0x310] sm:$0xff] }
  0x51   : > { %v467_v58 = vld [vmem:[%s1903_s25 + $0x320] sm:$0xff]  ;;  %464 = vst [vmem:[%s1908_s6 + $0x180] sm:$0xff] %v463_v56  ;;  %466 = vst [vmem:[%s1908_s6 + $0x188] sm:$0xff] %v465_v57  ;;  %v469_v59 = vld [vmem:[%s1903_s25 + $0x330] sm:$0xff] }
  0x52   : > { %468 = vst [vmem:[%s1908_s6 + $0x190] sm:$0xff] %v467_v58  ;;  %v471_v60 = vld [vmem:[%s1903_s25 + $0x340] sm:$0xff]  ;;  %v473_v61 = vld [vmem:[%s1903_s25 + $0x350] sm:$0xff]  ;;  %470 = vst [vmem:[%s1908_s6 + $0x198] sm:$0xff] %v469_v59 }
  0x53   : > { %472 = vst [vmem:[%s1908_s6 + $0x1a0] sm:$0xff] %v471_v60  ;;  %474 = vst [vmem:[%s1908_s6 + $0x1a8] sm:$0xff] %v473_v61  ;;  %v475_v62 = vld [vmem:[%s1903_s25 + $0x360] sm:$0xff]  ;;  %v477_v63 = vld [vmem:[%s1903_s25 + $0x370] sm:$0xff] }
  0x54   : > { %v479_v0 = vld [vmem:[%s1903_s25 + $0x380] sm:$0xff]  ;;  %476 = vst [vmem:[%s1908_s6 + $0x1b0] sm:$0xff] %v475_v62  ;;  %478 = vst [vmem:[%s1908_s6 + $0x1b8] sm:$0xff] %v477_v63  ;;  %v481_v1 = vld [vmem:[%s1903_s25 + $0x390] sm:$0xff] }
  0x55   : > { %480 = vst [vmem:[%s1908_s6 + $0x1c0] sm:$0xff] %v479_v0  ;;  %v483_v2 = vld [vmem:[%s1903_s25 + $0x3a0] sm:$0xff]  ;;  %v485_v3 = vld [vmem:[%s1903_s25 + $0x3b0] sm:$0xff]  ;;  %482 = vst [vmem:[%s1908_s6 + $0x1c8] sm:$0xff] %v481_v1 }
  0x56   : > { %484 = vst [vmem:[%s1908_s6 + $0x1d0] sm:$0xff] %v483_v2  ;;  %486 = vst [vmem:[%s1908_s6 + $0x1d8] sm:$0xff] %v485_v3  ;;  %v487_v4 = vld [vmem:[%s1903_s25 + $0x3c0] sm:$0xff]  ;;  %v489_v5 = vld [vmem:[%s1903_s25 + $0x3d0] sm:$0xff] }
  0x57   : > { %v491_v6 = vld [vmem:[%s1903_s25 + $0x3e0] sm:$0xff]  ;;  %488 = vst [vmem:[%s1908_s6 + $0x1e0] sm:$0xff] %v487_v4  ;;  %490 = vst [vmem:[%s1908_s6 + $0x1e8] sm:$0xff] %v489_v5  ;;  %v493_v7 = vld [vmem:[%s1903_s25 + $0x3f0] sm:$0xff] }
  0x58   : > { %492 = vst [vmem:[%s1908_s6 + $0x1f0] sm:$0xff] %v491_v6  ;;  %494 = vst [vmem:[%s1908_s6 + $0x1f8] sm:$0xff] %v493_v7 }
  0x59 PF: > { %p1380_p0 = scmp.ge.s32.totalorder %s1766_s22, 1  ;;  %p507_p1 = scmp.lt.s32.totalorder %s1766_s22, 9 }
  0x5b   : > { %p508_p2 = pnand %p1380_p0, %p507_p1 }
  0x5c   : > { %s514_s0 = sand.u32 (!%p508_p2), 1, %s1742_s16   ;;  %s521_s5 = sand.u32 (!%p508_p2), 1, %s1734_s14  }
  0x5d   : > { %511 = sbr.rel (%p508_p2) target bundleno = 423 (0x1a7), region = 85  ;;  %s1381_s23 = sshll.u32 (!%p508_p2), %s514_s0, 6 }
  0x5e   : > { %s1382_s28 = sshll.u32 (!%p508_p2), %s521_s5, 9  ;;  %s548_s7 = sand.u32 (!%p508_p2), 1, %s1726_s12  }
  0x5f   : > { %s1384_s11 = sshll.u32 (!%p508_p2), %s1754_s19, 1  ;;  %s1383_s25 = sshll.u32 (!%p508_p2), %s548_s7, 5 }
  0x60   : > { %p556_p3 = scmp.lt.s32.totalorder (!%p508_p2), %s1384_s11, 3  ;;  %s2047_s4 = scalar_lea.vmem (!%p508_p2), [#allocation3], %s1381_s23 }
  0x61   : > { %s2049_s6 = scalar_lea.vmem (!%p508_p2), [#allocation4], %s1382_s28  ;;  %s2051_s1 = scalar_lea.vmem (!%p508_p2), [#allocation5], %s1383_s25 }
  0x62   : > { %p1385_p4 = scmp.ne.s32.totalorder (!%p508_p2), %s1750_s18, 0 }
  0x64   : > { %s2210_s11 = smov (!%p556_p3, %s1384_s11), 3  ;;  %565 = sbr.rel (%p1385_p4) target bundleno = 107 (0x6b), region = 97 }
  0x65   : > { %s558_s29 = scalar_lea.vmem %s2181_s2, %s2210_s11  ;;  %v1768_v8 = vmov (!%p1385_p4), 0.0  }
  0x66   : > { %566 = vst [vmem:[#allocation2] sm:$0xff] (!%p1385_p4), %v1768_v8  ;;  %567 = vst [vmem:[#allocation2 + $0x8] sm:$0xff] (!%p1385_p4), %v1768_v8 }
  0x67   : > { %568 = vst [vmem:[#allocation2 + $0x10] sm:$0xff] (!%p1385_p4), %v1768_v8  ;;  %569 = vst [vmem:[#allocation2 + $0x18] sm:$0xff] (!%p1385_p4), %v1768_v8 }
  0x68   : > { %570 = vst [vmem:[#allocation2 + $0x20] sm:$0xff] (!%p1385_p4), %v1768_v8  ;;  %571 = vst [vmem:[#allocation2 + $0x28] sm:$0xff] (!%p1385_p4), %v1768_v8 }
  0x69   : > { %572 = vst [vmem:[#allocation2 + $0x30] sm:$0xff] (!%p1385_p4), %v1768_v8  ;;  %573 = vst [vmem:[#allocation2 + $0x38] sm:$0xff] (!%p1385_p4), %v1768_v8 }
  0x6b PF: > { %v1572_v9 = vld [vmem:[%s2049_s6 + $0x4] ss:$8 sps:$4 sm:$0xff]   ;;  %v1576_v11 = vld [vmem:[%s2049_s6] ss:$8 sps:$4 sm:$0xff]   ;;  %v1578_v13 = vld [vmem:[%s2049_s6 + $0x14] ss:$8 sps:$4 sm:$0xff]  }
  0x6c   : > { %v1574_v10 = vld [vmem:[%s2049_s6 + $0x104] ss:$8 sps:$4 sm:$0xff]   ;;  %1014 = vmatprep.subr.bf16.mxu1 %v1572_v9  ;;  %v1577_v12 = vld [vmem:[%s2049_s6 + $0x100] ss:$8 sps:$4 sm:$0xff]   ;;  %v1580_v14 = vld [vmem:[%s2049_s6 + $0x114] ss:$8 sps:$4 sm:$0xff]  }
  0x6d   : > { %1067 = vmatprep.subr.bf16.mxu0 %v1574_v10  ;;  %1015 = vmatpush1.bf16.msra.mxu1 %v1576_v11  ;;  %v1582_v15 = vld [vmem:[%s2049_s6 + $0x10] ss:$8 sps:$4 sm:$0xff]   ;;  %v1584_v17 = vld [vmem:[%s2049_s6 + $0x24] ss:$8 sps:$4 sm:$0xff]   ;;  %v1588_v19 = vld [vmem:[%s2049_s6 + $0x20] ss:$8 sps:$4 sm:$0xff]  }
  0x6e   : > { %1068 = vmatpush1.bf16.msra.mxu0 %v1577_v12  ;;  %1016 = vmatprep.subr.bf16.mxu1 %v1578_v13  ;;  %v1583_v16 = vld [vmem:[%s2049_s6 + $0x110] ss:$8 sps:$4 sm:$0xff]   ;;  %v1586_v18 = vld [vmem:[%s2049_s6 + $0x124] ss:$8 sps:$4 sm:$0xff]   ;;  %v1589_v20 = vld [vmem:[%s2049_s6 + $0x120] ss:$8 sps:$4 sm:$0xff]  }
  0x6f   : > { %1069 = vmatprep.subr.bf16.mxu0 %v1580_v14  ;;  %v1590_v21 = vld [vmem:[%s2049_s6 + $0x34] ss:$8 sps:$4 sm:$0xff]   ;;  %v1594_v23 = vld [vmem:[%s2049_s6 + $0x30] ss:$8 sps:$4 sm:$0xff]   ;;  %v1596_v25 = vld [vmem:[%s2049_s6 + $0x44] ss:$8 sps:$4 sm:$0xff]  }
  0x70   : > { %v1592_v22 = vld [vmem:[%s2049_s6 + $0x134] ss:$8 sps:$4 sm:$0xff]   ;;  %v1595_v24 = vld [vmem:[%s2049_s6 + $0x130] ss:$8 sps:$4 sm:$0xff]   ;;  %v1598_v26 = vld [vmem:[%s2049_s6 + $0x144] ss:$8 sps:$4 sm:$0xff]  }
  0x71   : > { %1017 = vmatpush1.bf16.msra.mxu1 %v1582_v15  ;;  %v1600_v27 = vld [vmem:[%s2049_s6 + $0x40] ss:$8 sps:$4 sm:$0xff]   ;;  %v1602_v29 = vld [vmem:[%s2049_s6 + $0x54] ss:$8 sps:$4 sm:$0xff]   ;;  %v1606_v31 = vld [vmem:[%s2049_s6 + $0x50] ss:$8 sps:$4 sm:$0xff]  }
  0x72   : > { %1070 = vmatpush1.bf16.msra.mxu0 %v1583_v16  ;;  %1018 = vmatprep.subr.bf16.mxu1 %v1584_v17  ;;  %v1601_v28 = vld [vmem:[%s2049_s6 + $0x140] ss:$8 sps:$4 sm:$0xff]   ;;  %v1604_v30 = vld [vmem:[%s2049_s6 + $0x154] ss:$8 sps:$4 sm:$0xff]   ;;  %v1607_v32 = vld [vmem:[%s2049_s6 + $0x150] ss:$8 sps:$4 sm:$0xff]  }
  0x73   : > { %1071 = vmatprep.subr.bf16.mxu0 %v1586_v18  ;;  %v1608_v33 = vld [vmem:[%s2049_s6 + $0x64] ss:$8 sps:$4 sm:$0xff]   ;;  %v1612_v35 = vld [vmem:[%s2049_s6 + $0x60] ss:$8 sps:$4 sm:$0xff]   ;;  %v1614_v37 = vld [vmem:[%s2049_s6 + $0x74] ss:$8 sps:$4 sm:$0xff]  }
  0x74   : > { %v1610_v34 = vld [vmem:[%s2049_s6 + $0x164] ss:$8 sps:$4 sm:$0xff]   ;;  %v1613_v36 = vld [vmem:[%s2049_s6 + $0x160] ss:$8 sps:$4 sm:$0xff]   ;;  %v1616_v38 = vld [vmem:[%s2049_s6 + $0x174] ss:$8 sps:$4 sm:$0xff]  }
  0x75   : > { %1019 = vmatpush1.bf16.msra.mxu1 %v1588_v19  ;;  %v1618_v39 = vld [vmem:[%s2049_s6 + $0x70] ss:$8 sps:$4 sm:$0xff]   ;;  %v1620_v41 = vld [vmem:[%s2049_s6 + $0x84] ss:$8 sps:$4 sm:$0xff]   ;;  %v1624_v43 = vld [vmem:[%s2049_s6 + $0x80] ss:$8 sps:$4 sm:$0xff]  }
  0x76   : > { %1072 = vmatpush1.bf16.msra.mxu0 %v1589_v20  ;;  %1020 = vmatprep.subr.bf16.mxu1 %v1590_v21  ;;  %v1619_v40 = vld [vmem:[%s2049_s6 + $0x170] ss:$8 sps:$4 sm:$0xff]   ;;  %v1622_v42 = vld [vmem:[%s2049_s6 + $0x184] ss:$8 sps:$4 sm:$0xff]   ;;  %v1625_v44 = vld [vmem:[%s2049_s6 + $0x180] ss:$8 sps:$4 sm:$0xff]  }
  0x77   : > { %1073 = vmatprep.subr.bf16.mxu0 %v1592_v22  ;;  %v1626_v45 = vld [vmem:[%s2049_s6 + $0x94] ss:$8 sps:$4 sm:$0xff]   ;;  %v1630_v47 = vld [vmem:[%s2049_s6 + $0x90] ss:$8 sps:$4 sm:$0xff]   ;;  %v1632_v49 = vld [vmem:[%s2049_s6 + $0xa4] ss:$8 sps:$4 sm:$0xff]  }
  0x78   : > { %v1628_v46 = vld [vmem:[%s2049_s6 + $0x194] ss:$8 sps:$4 sm:$0xff]   ;;  %v1631_v48 = vld [vmem:[%s2049_s6 + $0x190] ss:$8 sps:$4 sm:$0xff]   ;;  %v1634_v50 = vld [vmem:[%s2049_s6 + $0x1a4] ss:$8 sps:$4 sm:$0xff]  }
  0x79   : > { %1021 = vmatpush1.bf16.msra.mxu1 %v1594_v23  ;;  %v1636_v51 = vld [vmem:[%s2049_s6 + $0xa0] ss:$8 sps:$4 sm:$0xff]   ;;  %v1638_v53 = vld [vmem:[%s2049_s6 + $0xb4] ss:$8 sps:$4 sm:$0xff]   ;;  %v1642_v55 = vld [vmem:[%s2049_s6 + $0xb0] ss:$8 sps:$4 sm:$0xff]  }
  0x7a   : > { %1074 = vmatpush1.bf16.msra.mxu0 %v1595_v24  ;;  %1022 = vmatprep.subr.bf16.mxu1 %v1596_v25  ;;  %v1637_v52 = vld [vmem:[%s2049_s6 + $0x1a0] ss:$8 sps:$4 sm:$0xff]   ;;  %v1640_v54 = vld [vmem:[%s2049_s6 + $0x1b4] ss:$8 sps:$4 sm:$0xff]   ;;  %v1643_v56 = vld [vmem:[%s2049_s6 + $0x1b0] ss:$8 sps:$4 sm:$0xff]  }
  0x7b   : > { %1075 = vmatprep.subr.bf16.mxu0 %v1598_v26  ;;  %v1644_v57 = vld [vmem:[%s2049_s6 + $0xc4] ss:$8 sps:$4 sm:$0xff]   ;;  %v1648_v61 = vld [vmem:[%s2049_s6 + $0xc0] ss:$8 sps:$4 sm:$0xff]   ;;  %v1650_v63 = vld [vmem:[%s2049_s6 + $0xd4] ss:$8 sps:$4 sm:$0xff]  }
  0x7c   : > { %v1670_v58 = vld [vmem:[%s2047_s4 + $0x4] ss:$16 sps:$4 sm:$0xff]   ;;  %v1673_v60 = vld [vmem:[%s2047_s4 + $0xc] ss:$16 sps:$4 sm:$0xff]   ;;  %v1649_v62 = vld [vmem:[%s2049_s6 + $0x1c0] ss:$8 sps:$4 sm:$0xff]  }
  0x7d   : > { %1023 = vmatpush1.bf16.msra.mxu1 %v1600_v27  ;;  %v1646_v59 = vld [vmem:[%s2049_s6 + $0x1c4] ss:$8 sps:$4 sm:$0xff]   ;;  %1046 = vmatprep.mubr.bf16.mxu1 %v1670_v58  ;;  %v1652_v0 = vld [vmem:[%s2049_s6 + $0x1d4] ss:$8 sps:$4 sm:$0xff]   ;;  %v1654_v1 = vld [vmem:[%s2049_s6 + $0xd0] ss:$8 sps:$4 sm:$0xff]  }
  0x7e   : > { %1076 = vmatpush1.bf16.msra.mxu0 %v1601_v28  ;;  %1024 = vmatprep.subr.bf16.mxu1 %v1602_v29  ;;  %v1655_v2 = vld [vmem:[%s2049_s6 + $0x1d0] ss:$8 sps:$4 sm:$0xff]   ;;  %v1656_v3 = vld [vmem:[%s2049_s6 + $0xe4] ss:$8 sps:$4 sm:$0xff]   ;;  %v1660_v5 = vld [vmem:[%s2049_s6 + $0xe0] ss:$8 sps:$4 sm:$0xff]  }
  0x7f   : > { %1077 = vmatprep.subr.bf16.mxu0 %v1604_v30  ;;  %1099 = vmatprep.mubr.bf16.mxu0 %v1673_v60  ;;  %v1658_v4 = vld [vmem:[%s2049_s6 + $0x1e4] ss:$8 sps:$4 sm:$0xff]   ;;  %v1661_v6 = vld [vmem:[%s2049_s6 + $0x1e0] ss:$8 sps:$4 sm:$0xff]   ;;  %v1662_v7 = vld [vmem:[%s2049_s6 + $0xf4] ss:$8 sps:$4 sm:$0xff]  }
  0x80   : > { %v1664_v8 = vld [vmem:[%s2049_s6 + $0x1f4] ss:$8 sps:$4 sm:$0xff]   ;;  %v1666_v9 = vld [vmem:[%s2049_s6 + $0xf0] ss:$8 sps:$4 sm:$0xff]   ;;  %v574_v18 = vld [vmem:[#allocation2] sm:$0xff]  ;;  %p1458_p5 = scmp.ne.s32.totalorder %s1750_s18, 3 }
  0x81   : > { %1025 = vmatpush1.bf16.msra.mxu1 %v1606_v31  ;;  %v1667_v10 = vld [vmem:[%s2049_s6 + $0x1f0] ss:$8 sps:$4 sm:$0xff]   ;;  %v1674_v13 = vld [vmem:[%s2047_s4 + $0x24] ss:$16 sps:$4 sm:$0xff]   ;;  %v1676_v14 = vld [vmem:[%s2047_s4 + $0x2c] ss:$16 sps:$4 sm:$0xff]  }
  0x82   : > { %1078 = vmatpush1.bf16.msra.mxu0 %v1607_v32  ;;  %1026 = vmatprep.subr.bf16.mxu1 %v1608_v33  ;;  %v1668_v11 = vld [vmem:[%s2047_s4] ss:$16 sps:$4 sm:$0xff]   ;;  %v1671_v12 = vld [vmem:[%s2047_s4 + $0x8] ss:$16 sps:$4 sm:$0xff]  }
  0x83   : > { %1079 = vmatprep.subr.bf16.mxu0 %v1610_v34  ;;  %v1678_v15 = vld [vmem:[%s2047_s4 + $0x20] ss:$16 sps:$4 sm:$0xff]   ;;  %v1679_v16 = vld [vmem:[%s2047_s4 + $0x28] ss:$16 sps:$4 sm:$0xff]  }
  0x84   : > { %v575_v22 = vld [vmem:[#allocation2 + $0x8] sm:$0xff]  ;;  %v576_v26 = vld [vmem:[#allocation2 + $0x10] sm:$0xff]  ;;  %v577_v31 = vld [vmem:[#allocation2 + $0x18] sm:$0xff] }
  0x85   : > { %1027 = vmatpush1.bf16.msra.mxu1 %v1612_v35 }
  0x86   : > { %1080 = vmatpush1.bf16.msra.mxu0 %v1613_v36  ;;  %1028 = vmatprep.subr.bf16.mxu1 %v1614_v37 }
  0x87   : > { %1081 = vmatprep.subr.bf16.mxu0 %v1616_v38  ;;  %v578_v38 = vld [vmem:[#allocation2 + $0x20] sm:$0xff] }
  0x89   : > { %1029 = vmatpush1.bf16.msra.mxu1 %v1618_v39 }
  0x8a   : > { %1082 = vmatpush1.bf16.msra.mxu0 %v1619_v40  ;;  %1030 = vmatprep.subr.bf16.mxu1 %v1620_v41 }
  0x8b   : > { %1083 = vmatprep.subr.bf16.mxu0 %v1622_v42  ;;  %v579_v42 = vld [vmem:[#allocation2 + $0x28] sm:$0xff] }
  0x8d   : > { %1031 = vmatpush1.bf16.msra.mxu1 %v1624_v43 }
  0x8e   : > { %1084 = vmatpush1.bf16.msra.mxu0 %v1625_v44  ;;  %1032 = vmatprep.subr.bf16.mxu1 %v1626_v45 }
  0x8f   : > { %1085 = vmatprep.subr.bf16.mxu0 %v1628_v46  ;;  %v580_v46 = vld [vmem:[#allocation2 + $0x30] sm:$0xff] }
  0x91   : > { %1033 = vmatpush1.bf16.msra.mxu1 %v1630_v47 }
  0x92   : > { %1086 = vmatpush1.bf16.msra.mxu0 %v1631_v48  ;;  %1034 = vmatprep.subr.bf16.mxu1 %v1632_v49 }
  0x93   : > { %1087 = vmatprep.subr.bf16.mxu0 %v1634_v50 }
  0x95   : > { %1035 = vmatpush1.bf16.msra.mxu1 %v1636_v51  ;;  %v581_v51 = vld [vmem:[#allocation2 + $0x38] sm:$0xff] }
  0x96   : > { %1088 = vmatpush1.bf16.msra.mxu0 %v1637_v52  ;;  %1036 = vmatprep.subr.bf16.mxu1 %v1638_v53 }
  0x97   : > { %1089 = vmatprep.subr.bf16.mxu0 %v1640_v54 }
  0x99   : > { %1037 = vmatpush1.bf16.msra.mxu1 %v1642_v55 }
  0x9a   : > { %1090 = vmatpush1.bf16.msra.mxu0 %v1643_v56  ;;  %1038 = vmatprep.subr.bf16.mxu1 %v1644_v57  ;;  %v1150_v57 = vlaneseq (!%p1458_p5) }
  0x9b   : > { %1091 = vmatprep.subr.bf16.mxu0 %v1646_v59  ;;  %v1148_v59 = vld [vmem:[%s558_s29] sm:$0x3] (!%p1458_p5) }
  0x9c   : > { %v1151_v58 = vshrl.u32 (!%p1458_p5), %v1150_v57, 7 }
  0x9d   : > { %1039 = vmatpush1.bf16.msra.mxu1 %v1648_v61 }
  0x9e   : > { %1092 = vmatpush1.bf16.msra.mxu0 %v1649_v62  ;;  %1040 = vmatprep.subr.bf16.mxu1 %v1650_v63  ;;  %v1152_v62 = vsub.s32 (!%p1458_p5), 0, %v1151_v58  ;;  %v1156_v63 = vsub.s32 (!%p1458_p5), 1, %v1151_v58 }
  0x9f   : > { %1093 = vmatprep.subr.bf16.mxu0 %v1652_v0 }
  0xa1   : > { %1041 = vmatpush1.bf16.msra.mxu1 %v1654_v1 }
  0xa2   : > { %1094 = vmatpush1.bf16.msra.mxu0 %v1655_v2  ;;  %1042 = vmatprep.subr.bf16.mxu1 %v1656_v3  ;;  %v1153_v3 = vrot.slane (!%p1458_p5), %v1148_v59, %v1152_v62 }
  0xa3   : > { %1095 = vmatprep.subr.bf16.mxu0 %v1658_v4  ;;  %v1157_v4 = vrot.slane (!%p1458_p5), %v1148_v59, %v1156_v63 }
  0xa5   : > { %1043 = vmatpush1.bf16.msra.mxu1 %v1660_v5 }
  0xa6   : > { %1096 = vmatpush1.bf16.msra.mxu0 %v1661_v6  ;;  %1044 = vmatprep.subr.bf16.mxu1 %v1662_v7 }
  0xa7   : > { %1097 = vmatprep.subr.bf16.mxu0 %v1664_v8 }
  0xa9   : > { %1045 = vmatpush1.bf16.msra.mxu1 %v1666_v9 }
  0xaa   : > { %1098 = vmatpush1.bf16.msra.mxu0 %v1667_v10 }
  0xac   : > { %1047 = vmatmul.mubr.bf16.vlgmr.msra.gmra.mrb[0].mxu1 %v1668_v11 }
  0xad   : > { %1100 = vmatmul.mubr.bf16.vlgmr.msra.gmra.mrb[0].mxu0 %v1671_v12  ;;  %1056 = vmatprep.mubr.bf16.mxu1 %v1674_v13 }
  0xae   : > { %1109 = vmatprep.mubr.bf16.mxu0 %v1676_v14 }
  0xb4   : > { %1057 = vmatmul.mubr.bf16.gmra.mrb[4].mxu1 %v1678_v15 }
  0xb5   : > { %1110 = vmatmul.mubr.bf16.gmra.mrb[4].mxu0 %v1679_v16 }
 0x17f   : > { %v1048_v17 = vpop.f32.mrb[0].mxu1 }
 0x180   : > { %v1101_v19 = vpop.f32.mrb[0].mxu0  ;;  %v1050_v21 = vpop.f32.mrb[1].mxu1 }
 0x181   : > { %v1102_v20 = vadd.f32 %v1101_v19, %v1048_v17  ;;  %v1103_v23 = vpop.f32.mrb[1].mxu0  ;;  %v1052_v25 = vpop.f32.mrb[2].mxu1 }
 0x182   : > { %v1104_v24 = vadd.f32 %v1103_v23, %v1050_v21  ;;  %v1105_v27 = vpop.f32.mrb[2].mxu0  ;;  %v1054_v30 = vpop.f32.mrb[3].mxu1 }
 0x183   : > { %v1120_v28 = vadd.f32 %v1102_v20, %v574_v18  ;;  %v1106_v29 = vadd.f32 %v1105_v27, %v1052_v25  ;;  %v1107_v32 = vpop.f32.mrb[3].mxu0 }
 0x184   : > { %v1121_v33 = vadd.f32 %v1104_v24, %v575_v22  ;;  %v1108_v34 = vadd.f32 %v1107_v32, %v1054_v30 }
 0x185   : > { %1128 = vst [vmem:[#allocation2] sm:$0xff] %v1120_v28  ;;  %v1122_v35 = vadd.f32 %v1106_v29, %v576_v26 }
 0x186   : > { %1129 = vst [vmem:[#allocation2 + $0x8] sm:$0xff] %v1121_v33  ;;  %v1123_v36 = vadd.f32 %v1108_v34, %v577_v31 }
 0x187   : > { %1130 = vst [vmem:[#allocation2 + $0x10] sm:$0xff] %v1122_v35  ;;  %v1058_v37 = vpop.f32.mrb[4].mxu1 }
 0x188   : > { %1131 = vst [vmem:[#allocation2 + $0x18] sm:$0xff] %v1123_v36  ;;  %v1111_v39 = vpop.f32.mrb[4].mxu0  ;;  %v1060_v41 = vpop.f32.mrb[5].mxu1 }
 0x189   : > { %v1112_v40 = vadd.f32 %v1111_v39, %v1058_v37  ;;  %v1113_v43 = vpop.f32.mrb[5].mxu0  ;;  %v1062_v45 = vpop.f32.mrb[6].mxu1 }
 0x18a   : > { %v1114_v44 = vadd.f32 %v1113_v43, %v1060_v41  ;;  %v1115_v47 = vpop.f32.mrb[6].mxu0  ;;  %v1064_v50 = vpop.f32.mrb[7].mxu1  ;;  %1139 = sbr.rel (%p1458_p5) target bundleno = 415 (0x19f), region = 101 }
 0x18b   : > { %v1124_v48 = vadd.f32 %v1112_v40, %v578_v38  ;;  %v1116_v49 = vadd.f32 %v1115_v47, %v1062_v45  ;;  %v1117_v52 = vpop.f32.mrb[7].mxu0 }
 0x18c   : > { %v1125_v53 = vadd.f32 %v1114_v44, %v579_v42  ;;  %v1118_v54 = vadd.f32 %v1117_v52, %v1064_v50  ;;  %v1140_v60 = vld [vmem:[#allocation2] sm:$0xff] (!%p1458_p5) }
 0x18d   : > { %1132 = vst [vmem:[#allocation2 + $0x20] sm:$0xff] %v1124_v48  ;;  %v1126_v55 = vadd.f32 %v1116_v49, %v580_v46  ;;  %v1141_v61 = vld [vmem:[#allocation2 + $0x8] sm:$0xff] (!%p1458_p5)  ;;  %v1160_v8 = vadd.f32 (!%p1458_p5), %v1153_v3, %v1140_v60 }
 0x18e   : > { %1133 = vst [vmem:[#allocation2 + $0x28] sm:$0xff] %v1125_v53  ;;  %v1127_v56 = vadd.f32 %v1118_v54, %v581_v51  ;;  %v1142_v0 = vld [vmem:[#allocation2 + $0x10] sm:$0xff] (!%p1458_p5)  ;;  %v1161_v9 = vadd.f32 (!%p1458_p5), %v1157_v4, %v1141_v61 }
 0x18f   : > { %1134 = vst [vmem:[#allocation2 + $0x30] sm:$0xff] %v1126_v55  ;;  %v1143_v1 = vld [vmem:[#allocation2 + $0x18] sm:$0xff] (!%p1458_p5)  ;;  %v1162_v10 = vadd.f32 (!%p1458_p5), %v1153_v3, %v1142_v0  ;;  %v1168_v16 = vmax.f32 (!%p1458_p5), %v1160_v8, 0.0 }
 0x190   : > { %1135 = vst [vmem:[#allocation2 + $0x38] sm:$0xff] %v1127_v56  ;;  %v1163_v11 = vadd.f32 (!%p1458_p5), %v1157_v4, %v1143_v1  ;;  %v1169_v17 = vmax.f32 (!%p1458_p5), %v1161_v9, 0.0 }
 0x191   : > { %v1170_v18 = vmax.f32 %v1162_v10, 0.0 }
 0x192   : > { %v1171_v19 = vmax.f32 %v1163_v11, 0.0  ;;  %v1470_v24 = vpack.c.bf16 %v1169_v17, %v1168_v16 }
 0x194   : > { %v1144_v2 = vld [vmem:[#allocation2 + $0x20] sm:$0xff]  ;;  %v1471_v25 = vpack.c.bf16 %v1171_v19, %v1170_v18  ;;  %1200 = vst [vmem:[%s2051_s1] sm:$0xff] %v1470_v24 }
 0x195   : > { %v1145_v5 = vld [vmem:[#allocation2 + $0x28] sm:$0xff]  ;;  %v1164_v12 = vadd.f32 %v1153_v3, %v1144_v2 }
 0x196   : > { %v1146_v6 = vld [vmem:[#allocation2 + $0x30] sm:$0xff]  ;;  %v1165_v13 = vadd.f32 %v1157_v4, %v1145_v5  ;;  %1201 = vst [vmem:[%s2051_s1 + $0x8] sm:$0xff] %v1471_v25 }
 0x197   : > { %v1147_v7 = vld [vmem:[#allocation2 + $0x38] sm:$0xff]  ;;  %v1166_v14 = vadd.f32 %v1153_v3, %v1146_v6  ;;  %v1172_v20 = vmax.f32 %v1164_v12, 0.0 }
 0x198   : > { %v1167_v15 = vadd.f32 %v1157_v4, %v1147_v7  ;;  %v1173_v21 = vmax.f32 %v1165_v13, 0.0 }
 0x199   : > { %v1174_v22 = vmax.f32 %v1166_v14, 0.0 }
 0x19a   : > { %v1175_v23 = vmax.f32 %v1167_v15, 0.0  ;;  %v1472_v26 = vpack.c.bf16 %v1173_v21, %v1172_v20 }
 0x19c   : > { %v1473_v27 = vpack.c.bf16 %v1175_v23, %v1174_v22  ;;  %1202 = vst [vmem:[%s2051_s1 + $0x10] sm:$0xff] %v1472_v26 }
 0x19e   : > { %1203 = vst [vmem:[%s2051_s1 + $0x18] sm:$0xff] %v1473_v27 }
 0x19f PF: > { %1210 = sbr.rel (!%p1883_p12) target bundleno = 423 (0x1a7), region = 105  ;;  %s1474_s16 = sshll.u32 (%p1883_p12), %s1754_s19, 3  ;;  %v1250_v28 = vld [vmem:[%s2051_s1] sm:$0xff] (%p1883_p12)  ;;  %v1252_v29 = vld [vmem:[%s2051_s1 + $0x8] sm:$0xff] (%p1883_p12) }
 0x1a0   : > { %s1216_s5 = scalar_lea.vmem (%p1883_p12), %s2182_s3, %s1474_s16 }
 0x1a1   : > { %1251 = vst [vmem:[%s1216_s5] sm:$0xff] (%p1883_p12), %v1250_v28  ;;  %1253 = vst [vmem:[%s1216_s5 + $0x10] sm:$0xff] (%p1883_p12), %v1252_v29 }
 0x1a3   : > { %v1254_v30 = vld [vmem:[%s2051_s1 + $0x10] sm:$0xff] (%p1883_p12) }
 0x1a4   : > { %1255 = vst [vmem:[%s1216_s5 + $0x20] sm:$0xff] (%p1883_p12), %v1254_v30 }
 0x1a5   : > { %v1256_v31 = vld [vmem:[%s2051_s1 + $0x18] sm:$0xff] (%p1883_p12) }
 0x1a6   : > { %1257 = vst [vmem:[%s1216_s5 + $0x30] sm:$0xff] %v1256_v31 }
 0x1a7 PF: > { %s13_s22 = sadd.s32 1, %s1766_s22   ;;  %s2192_s10 = sld [smem:[#allocation6_spill]] }
 0x1a8   : > { %p10_p6 = scmp.ge.s32.totalorder %s13_s22, 10   ;;  %s2193_s12 = smov %s1730_s13 }
 0x1a9   : > { %s2194_s13 = smov %s1881_s9  ;;  %s2195_s14 = smov %s1738_s15 }
 0x1aa   : > { %s2196_s15 = smov %s1878_s8  ;;  %s2197_s16 = smov %s1746_s17 }
 0x1ab   : > { %s2198_s17 = smov %s1864_s30  ;;  %s2199_s18 = smov %s1758_s20 }
 0x1ac   : > { %s2200_s19 = smov %s1762_s21  ;;  %s2201_s20 = smov %s2204_s24 }
 0x1ad   : > { %s2202_s21 = smov %s2192_s10  ;;  %12 = sbr.rel (!%p10_p6) target bundleno = 9 (0x9), region = 185 }

// kernel: _lambda_.28
= control target key start
LH: loop header
LB: loop body
LE: loop exit
PB: predicated region body
PF: predicated region fallthrough
CT: control target
= control target key end

     0   :  { %s1082_s1 = inlined_call_operand.vmem [shape: bf16[512,256], index: 1, kind: input, shape index: {}]   ;;  %s1083_s0 = inlined_call_operand.vmem [shape: bf16[32,512], index: 0, kind: input, shape index: {}]   ;;  %s1084_s2 = inlined_call_operand.vmem [shape: f32[1,256], index: 2, kind: input, shape index: {}]   ;;  %s1085_s3 = inlined_call_operand.vmem [shape: f32[32,256], index: 3, kind: output, shape index: {}]  }
   0x1   :  { %v711_v0 = vld [vmem:[%s1082_s1 + $0x4] ss:$8 sps:$4 sm:$0xff]   ;;  %v715_v2 = vld [vmem:[%s1082_s1] ss:$8 sps:$4 sm:$0xff]   ;;  %v717_v4 = vld [vmem:[%s1082_s1 + $0x14] ss:$8 sps:$4 sm:$0xff]  }
   0x2   :  { %v713_v1 = vld [vmem:[%s1082_s1 + $0x104] ss:$8 sps:$4 sm:$0xff]   ;;  %466 = vmatprep.subr.bf16.mxu1 %v711_v0  ;;  %v716_v3 = vld [vmem:[%s1082_s1 + $0x100] ss:$8 sps:$4 sm:$0xff]   ;;  %v719_v5 = vld [vmem:[%s1082_s1 + $0x114] ss:$8 sps:$4 sm:$0xff]  }
   0x3   :  { %519 = vmatprep.subr.bf16.mxu0 %v713_v1  ;;  %467 = vmatpush1.bf16.msra.mxu1 %v715_v2  ;;  %v721_v6 = vld [vmem:[%s1082_s1 + $0x10] ss:$8 sps:$4 sm:$0xff]   ;;  %v723_v8 = vld [vmem:[%s1082_s1 + $0x24] ss:$8 sps:$4 sm:$0xff]   ;;  %v727_v10 = vld [vmem:[%s1082_s1 + $0x20] ss:$8 sps:$4 sm:$0xff]  }
   0x4   :  { %520 = vmatpush1.bf16.msra.mxu0 %v716_v3  ;;  %468 = vmatprep.subr.bf16.mxu1 %v717_v4  ;;  %v722_v7 = vld [vmem:[%s1082_s1 + $0x110] ss:$8 sps:$4 sm:$0xff]   ;;  %v725_v9 = vld [vmem:[%s1082_s1 + $0x124] ss:$8 sps:$4 sm:$0xff]   ;;  %v728_v11 = vld [vmem:[%s1082_s1 + $0x120] ss:$8 sps:$4 sm:$0xff]  }
   0x5   :  { %521 = vmatprep.subr.bf16.mxu0 %v719_v5  ;;  %v729_v12 = vld [vmem:[%s1082_s1 + $0x34] ss:$8 sps:$4 sm:$0xff]   ;;  %v733_v14 = vld [vmem:[%s1082_s1 + $0x30] ss:$8 sps:$4 sm:$0xff]   ;;  %v735_v16 = vld [vmem:[%s1082_s1 + $0x44] ss:$8 sps:$4 sm:$0xff]  }
   0x6   :  { %v731_v13 = vld [vmem:[%s1082_s1 + $0x134] ss:$8 sps:$4 sm:$0xff]   ;;  %v734_v15 = vld [vmem:[%s1082_s1 + $0x130] ss:$8 sps:$4 sm:$0xff]   ;;  %v737_v17 = vld [vmem:[%s1082_s1 + $0x144] ss:$8 sps:$4 sm:$0xff]  }
   0x7   :  { %469 = vmatpush1.bf16.msra.mxu1 %v721_v6  ;;  %v739_v18 = vld [vmem:[%s1082_s1 + $0x40] ss:$8 sps:$4 sm:$0xff]   ;;  %v741_v20 = vld [vmem:[%s1082_s1 + $0x54] ss:$8 sps:$4 sm:$0xff]   ;;  %v745_v22 = vld [vmem:[%s1082_s1 + $0x50] ss:$8 sps:$4 sm:$0xff]  }
   0x8   :  { %522 = vmatpush1.bf16.msra.mxu0 %v722_v7  ;;  %470 = vmatprep.subr.bf16.mxu1 %v723_v8  ;;  %v740_v19 = vld [vmem:[%s1082_s1 + $0x140] ss:$8 sps:$4 sm:$0xff]   ;;  %v743_v21 = vld [vmem:[%s1082_s1 + $0x154] ss:$8 sps:$4 sm:$0xff]   ;;  %v746_v23 = vld [vmem:[%s1082_s1 + $0x150] ss:$8 sps:$4 sm:$0xff]   ;;  %v601_v8 = vlaneseq }
   0x9   :  { %523 = vmatprep.subr.bf16.mxu0 %v725_v9  ;;  %v747_v24 = vld [vmem:[%s1082_s1 + $0x64] ss:$8 sps:$4 sm:$0xff]   ;;  %v751_v26 = vld [vmem:[%s1082_s1 + $0x60] ss:$8 sps:$4 sm:$0xff]   ;;  %v753_v28 = vld [vmem:[%s1082_s1 + $0x74] ss:$8 sps:$4 sm:$0xff]  }
   0xa   :  { %v749_v25 = vld [vmem:[%s1082_s1 + $0x164] ss:$8 sps:$4 sm:$0xff]   ;;  %v752_v27 = vld [vmem:[%s1082_s1 + $0x160] ss:$8 sps:$4 sm:$0xff]   ;;  %v755_v29 = vld [vmem:[%s1082_s1 + $0x174] ss:$8 sps:$4 sm:$0xff]  }
   0xb   :  { %471 = vmatpush1.bf16.msra.mxu1 %v727_v10  ;;  %v757_v30 = vld [vmem:[%s1082_s1 + $0x70] ss:$8 sps:$4 sm:$0xff]   ;;  %v759_v32 = vld [vmem:[%s1082_s1 + $0x84] ss:$8 sps:$4 sm:$0xff]   ;;  %v763_v34 = vld [vmem:[%s1082_s1 + $0x80] ss:$8 sps:$4 sm:$0xff]  }
   0xc   :  { %524 = vmatpush1.bf16.msra.mxu0 %v728_v11  ;;  %472 = vmatprep.subr.bf16.mxu1 %v729_v12  ;;  %v758_v31 = vld [vmem:[%s1082_s1 + $0x170] ss:$8 sps:$4 sm:$0xff]   ;;  %v761_v33 = vld [vmem:[%s1082_s1 + $0x184] ss:$8 sps:$4 sm:$0xff]   ;;  %v764_v35 = vld [vmem:[%s1082_s1 + $0x180] ss:$8 sps:$4 sm:$0xff]  }
   0xd   :  { %525 = vmatprep.subr.bf16.mxu0 %v731_v13  ;;  %v765_v36 = vld [vmem:[%s1082_s1 + $0x94] ss:$8 sps:$4 sm:$0xff]   ;;  %v769_v38 = vld [vmem:[%s1082_s1 + $0x90] ss:$8 sps:$4 sm:$0xff]   ;;  %v771_v40 = vld [vmem:[%s1082_s1 + $0xa4] ss:$8 sps:$4 sm:$0xff]  }
   0xe   :  { %v767_v37 = vld [vmem:[%s1082_s1 + $0x194] ss:$8 sps:$4 sm:$0xff]   ;;  %v770_v39 = vld [vmem:[%s1082_s1 + $0x190] ss:$8 sps:$4 sm:$0xff]   ;;  %v773_v41 = vld [vmem:[%s1082_s1 + $0x1a4] ss:$8 sps:$4 sm:$0xff]  }
   0xf   :  { %473 = vmatpush1.bf16.msra.mxu1 %v733_v14  ;;  %v775_v42 = vld [vmem:[%s1082_s1 + $0xa0] ss:$8 sps:$4 sm:$0xff]   ;;  %v777_v44 = vld [vmem:[%s1082_s1 + $0xb4] ss:$8 sps:$4 sm:$0xff]   ;;  %v781_v46 = vld [vmem:[%s1082_s1 + $0xb0] ss:$8 sps:$4 sm:$0xff]  }
  0x10   :  { %526 = vmatpush1.bf16.msra.mxu0 %v734_v15  ;;  %474 = vmatprep.subr.bf16.mxu1 %v735_v16  ;;  %v776_v43 = vld [vmem:[%s1082_s1 + $0x1a0] ss:$8 sps:$4 sm:$0xff]   ;;  %v779_v45 = vld [vmem:[%s1082_s1 + $0x1b4] ss:$8 sps:$4 sm:$0xff]   ;;  %v782_v47 = vld [vmem:[%s1082_s1 + $0x1b0] ss:$8 sps:$4 sm:$0xff]  }
  0x11   :  { %527 = vmatprep.subr.bf16.mxu0 %v737_v17  ;;  %v783_v48 = vld [vmem:[%s1082_s1 + $0xc4] ss:$8 sps:$4 sm:$0xff]   ;;  %v787_v52 = vld [vmem:[%s1082_s1 + $0xc0] ss:$8 sps:$4 sm:$0xff]   ;;  %v789_v54 = vld [vmem:[%s1082_s1 + $0xd4] ss:$8 sps:$4 sm:$0xff]  }
  0x12   :  { %v809_v49 = vld [vmem:[%s1083_s0 + $0x4] ss:$16 sps:$4 sm:$0xff]   ;;  %v812_v51 = vld [vmem:[%s1083_s0 + $0xc] ss:$16 sps:$4 sm:$0xff]   ;;  %v788_v53 = vld [vmem:[%s1082_s1 + $0x1c0] ss:$8 sps:$4 sm:$0xff]  }
  0x13   :  { %475 = vmatpush1.bf16.msra.mxu1 %v739_v18  ;;  %v785_v50 = vld [vmem:[%s1082_s1 + $0x1c4] ss:$8 sps:$4 sm:$0xff]   ;;  %498 = vmatprep.mubr.bf16.mxu1 %v809_v49  ;;  %v791_v55 = vld [vmem:[%s1082_s1 + $0x1d4] ss:$8 sps:$4 sm:$0xff]   ;;  %v793_v56 = vld [vmem:[%s1082_s1 + $0xd0] ss:$8 sps:$4 sm:$0xff]  }
  0x14   :  { %528 = vmatpush1.bf16.msra.mxu0 %v740_v19  ;;  %476 = vmatprep.subr.bf16.mxu1 %v741_v20  ;;  %v794_v57 = vld [vmem:[%s1082_s1 + $0x1d0] ss:$8 sps:$4 sm:$0xff]   ;;  %v795_v58 = vld [vmem:[%s1082_s1 + $0xe4] ss:$8 sps:$4 sm:$0xff]   ;;  %v799_v60 = vld [vmem:[%s1082_s1 + $0xe0] ss:$8 sps:$4 sm:$0xff]  }
  0x15   :  { %529 = vmatprep.subr.bf16.mxu0 %v743_v21  ;;  %551 = vmatprep.mubr.bf16.mxu0 %v812_v51  ;;  %v797_v59 = vld [vmem:[%s1082_s1 + $0x1e4] ss:$8 sps:$4 sm:$0xff]   ;;  %v800_v61 = vld [vmem:[%s1082_s1 + $0x1e0] ss:$8 sps:$4 sm:$0xff]   ;;  %v801_v62 = vld [vmem:[%s1082_s1 + $0xf4] ss:$8 sps:$4 sm:$0xff]  }
  0x16   :  { %v803_v63 = vld [vmem:[%s1082_s1 + $0x1f4] ss:$8 sps:$4 sm:$0xff]   ;;  %v805_v0 = vld [vmem:[%s1082_s1 + $0xf0] ss:$8 sps:$4 sm:$0xff]   ;;  %v602_v9 = vshrl.u32 %v601_v8, 7 }
  0x17   :  { %477 = vmatpush1.bf16.msra.mxu1 %v745_v22  ;;  %v806_v1 = vld [vmem:[%s1082_s1 + $0x1f0] ss:$8 sps:$4 sm:$0xff]   ;;  %v813_v4 = vld [vmem:[%s1083_s0 + $0x24] ss:$16 sps:$4 sm:$0xff]   ;;  %v815_v5 = vld [vmem:[%s1083_s0 + $0x2c] ss:$16 sps:$4 sm:$0xff]  }
  0x18   :  { %530 = vmatpush1.bf16.msra.mxu0 %v746_v23  ;;  %478 = vmatprep.subr.bf16.mxu1 %v747_v24  ;;  %v807_v2 = vld [vmem:[%s1083_s0] ss:$16 sps:$4 sm:$0xff]   ;;  %v810_v3 = vld [vmem:[%s1083_s0 + $0x8] ss:$16 sps:$4 sm:$0xff]   ;;  %v603_v10 = vsub.s32 0, %v602_v9  ;;  %v607_v12 = vsub.s32 1, %v602_v9 }
  0x19   :  { %531 = vmatprep.subr.bf16.mxu0 %v749_v25  ;;  %v817_v6 = vld [vmem:[%s1083_s0 + $0x20] ss:$16 sps:$4 sm:$0xff]   ;;  %v818_v7 = vld [vmem:[%s1083_s0 + $0x28] ss:$16 sps:$4 sm:$0xff]  }
  0x1a   :  { %v599_v11 = vld [vmem:[%s1084_s2] sm:$0x3] }
  0x1b   :  { %479 = vmatpush1.bf16.msra.mxu1 %v751_v26  ;;  %v604_v13 = vrot.slane %v599_v11, %v603_v10  ;;  %v608_v16 = vrot.slane %v599_v11, %v607_v12 }
  0x1c   :  { %532 = vmatpush1.bf16.msra.mxu0 %v752_v27  ;;  %480 = vmatprep.subr.bf16.mxu1 %v753_v28 }
  0x1d   :  { %533 = vmatprep.subr.bf16.mxu0 %v755_v29 }
  0x1f   :  { %481 = vmatpush1.bf16.msra.mxu1 %v757_v30 }
  0x20   :  { %534 = vmatpush1.bf16.msra.mxu0 %v758_v31  ;;  %482 = vmatprep.subr.bf16.mxu1 %v759_v32 }
  0x21   :  { %535 = vmatprep.subr.bf16.mxu0 %v761_v33 }
  0x23   :  { %483 = vmatpush1.bf16.msra.mxu1 %v763_v34 }
  0x24   :  { %536 = vmatpush1.bf16.msra.mxu0 %v764_v35  ;;  %484 = vmatprep.subr.bf16.mxu1 %v765_v36 }
  0x25   :  { %537 = vmatprep.subr.bf16.mxu0 %v767_v37 }
  0x27   :  { %485 = vmatpush1.bf16.msra.mxu1 %v769_v38 }
  0x28   :  { %538 = vmatpush1.bf16.msra.mxu0 %v770_v39  ;;  %486 = vmatprep.subr.bf16.mxu1 %v771_v40 }
  0x29   :  { %539 = vmatprep.subr.bf16.mxu0 %v773_v41 }
  0x2b   :  { %487 = vmatpush1.bf16.msra.mxu1 %v775_v42 }
  0x2c   :  { %540 = vmatpush1.bf16.msra.mxu0 %v776_v43  ;;  %488 = vmatprep.subr.bf16.mxu1 %v777_v44 }
  0x2d   :  { %541 = vmatprep.subr.bf16.mxu0 %v779_v45 }
  0x2f   :  { %489 = vmatpush1.bf16.msra.mxu1 %v781_v46 }
  0x30   :  { %542 = vmatpush1.bf16.msra.mxu0 %v782_v47  ;;  %490 = vmatprep.subr.bf16.mxu1 %v783_v48 }
  0x31   :  { %543 = vmatprep.subr.bf16.mxu0 %v785_v50 }
  0x33   :  { %491 = vmatpush1.bf16.msra.mxu1 %v787_v52 }
  0x34   :  { %544 = vmatpush1.bf16.msra.mxu0 %v788_v53  ;;  %492 = vmatprep.subr.bf16.mxu1 %v789_v54 }
  0x35   :  { %545 = vmatprep.subr.bf16.mxu0 %v791_v55 }
  0x37   :  { %493 = vmatpush1.bf16.msra.mxu1 %v793_v56 }
  0x38   :  { %546 = vmatpush1.bf16.msra.mxu0 %v794_v57  ;;  %494 = vmatprep.subr.bf16.mxu1 %v795_v58 }
  0x39   :  { %547 = vmatprep.subr.bf16.mxu0 %v797_v59 }
  0x3b   :  { %495 = vmatpush1.bf16.msra.mxu1 %v799_v60 }
  0x3c   :  { %548 = vmatpush1.bf16.msra.mxu0 %v800_v61  ;;  %496 = vmatprep.subr.bf16.mxu1 %v801_v62 }
  0x3d   :  { %549 = vmatprep.subr.bf16.mxu0 %v803_v63 }
  0x3f   :  { %497 = vmatpush1.bf16.msra.mxu1 %v805_v0 }
  0x40   :  { %550 = vmatpush1.bf16.msra.mxu0 %v806_v1 }
  0x42   :  { %499 = vmatmul.mubr.bf16.vlgmr.msra.gmra.mrb[0].mxu1 %v807_v2 }
  0x43   :  { %552 = vmatmul.mubr.bf16.vlgmr.msra.gmra.mrb[0].mxu0 %v810_v3  ;;  %508 = vmatprep.mubr.bf16.mxu1 %v813_v4 }
  0x44   :  { %561 = vmatprep.mubr.bf16.mxu0 %v815_v5 }
  0x4a   :  { %509 = vmatmul.mubr.bf16.gmra.mrb[4].mxu1 %v817_v6 }
  0x4b   :  { %562 = vmatmul.mubr.bf16.gmra.mrb[4].mxu0 %v818_v7 }
 0x115   :  { %v500_v14 = vpop.f32.mrb[0].mxu1 }
 0x116   :  { %v553_v15 = vpop.f32.mrb[0].mxu0  ;;  %v502_v18 = vpop.f32.mrb[1].mxu1 }
 0x117   :  { %v554_v17 = vadd.f32 %v553_v15, %v500_v14  ;;  %v555_v19 = vpop.f32.mrb[1].mxu0  ;;  %v504_v21 = vpop.f32.mrb[2].mxu1 }
 0x118   :  { %v556_v20 = vadd.f32 %v555_v19, %v502_v18  ;;  %v557_v22 = vpop.f32.mrb[2].mxu0  ;;  %v506_v25 = vpop.f32.mrb[3].mxu1 }
 0x119   :  { %v611_v23 = vadd.f32 %v604_v13, %v554_v17  ;;  %v558_v24 = vadd.f32 %v557_v22, %v504_v21  ;;  %v559_v26 = vpop.f32.mrb[3].mxu0 }
 0x11a   :  { %v612_v27 = vadd.f32 %v608_v16, %v556_v20  ;;  %v560_v28 = vadd.f32 %v559_v26, %v506_v25 }
 0x11b   :  { %619 = vst [vmem:[%s1085_s3] sm:$0xff] %v611_v23  ;;  %v613_v29 = vadd.f32 %v604_v13, %v558_v24 }
 0x11c   :  { %620 = vst [vmem:[%s1085_s3 + $0x8] sm:$0xff] %v612_v27  ;;  %v614_v30 = vadd.f32 %v608_v16, %v560_v28 }
 0x11d   :  { %621 = vst [vmem:[%s1085_s3 + $0x10] sm:$0xff] %v613_v29  ;;  %v510_v31 = vpop.f32.mrb[4].mxu1 }
 0x11e   :  { %622 = vst [vmem:[%s1085_s3 + $0x18] sm:$0xff] %v614_v30  ;;  %v563_v32 = vpop.f32.mrb[4].mxu0  ;;  %v512_v34 = vpop.f32.mrb[5].mxu1 }
 0x11f   :  { %v564_v33 = vadd.f32 %v563_v32, %v510_v31  ;;  %v565_v35 = vpop.f32.mrb[5].mxu0  ;;  %v514_v37 = vpop.f32.mrb[6].mxu1 }
 0x120   :  { %v566_v36 = vadd.f32 %v565_v35, %v512_v34  ;;  %v567_v38 = vpop.f32.mrb[6].mxu0  ;;  %v516_v41 = vpop.f32.mrb[7].mxu1 }
 0x121   :  { %v615_v39 = vadd.f32 %v604_v13, %v564_v33  ;;  %v568_v40 = vadd.f32 %v567_v38, %v514_v37  ;;  %v569_v42 = vpop.f32.mrb[7].mxu0 }
 0x122   :  { %v616_v43 = vadd.f32 %v608_v16, %v566_v36  ;;  %v570_v44 = vadd.f32 %v569_v42, %v516_v41 }
 0x123   :  { %623 = vst [vmem:[%s1085_s3 + $0x20] sm:$0xff] %v615_v39  ;;  %v617_v45 = vadd.f32 %v604_v13, %v568_v40 }
 0x124   :  { %624 = vst [vmem:[%s1085_s3 + $0x28] sm:$0xff] %v616_v43  ;;  %v618_v46 = vadd.f32 %v608_v16, %v570_v44 }
 0x125   :  { %625 = vst [vmem:[%s1085_s3 + $0x30] sm:$0xff] %v617_v45 }
 0x126   :  { %626 = vst [vmem:[%s1085_s3 + $0x38] sm:$0xff] %v618_v46 }

// kernel: _lambda_.30
= control target key start
LH: loop header
LB: loop body
LE: loop exit
PB: predicated region body
PF: predicated region fallthrough
CT: control target
= control target key end

     0   :  { %s306_s1 = inlined_call_operand.vmem [shape: bf16[128,128], index: 1, kind: input, shape index: {}]   ;;  %s307_s0 = inlined_call_operand.vmem [shape: bf16[32,128], index: 0, kind: input, shape index: {}]   ;;  %s308_s2 = inlined_call_operand.vmem [shape: f32[1,128], index: 2, kind: input, shape index: {}]   ;;  %s309_s3 = inlined_call_operand.vmem [shape: f32[32,128], index: 3, kind: output, shape index: {}]  }
   0x1   :  { %v231_v0 = vld [vmem:[%s306_s1] sm:$0xff]   ;;  %v232_v1 = vld [vmem:[%s306_s1 + $0x8] sm:$0xff]   ;;  %v233_v2 = vld [vmem:[%s306_s1 + $0x10] sm:$0xff]  }
   0x2   :  { %211 = vmatprep.subr.bf16.mxu0 %v231_v0  ;;  %v234_v3 = vld [vmem:[%s306_s1 + $0x18] sm:$0xff]   ;;  %v239_v4 = vld [vmem:[%s307_s0] sm:$0xff]   ;;  %v236_v6 = vld [vmem:[%s306_s1 + $0x28] sm:$0xff]  }
   0x3   :  { %212 = vmatpush3.bf16.msra.mxu0 %v231_v0  ;;  %227 = vmatprep.mubr.bf16.mxu0 %v239_v4  ;;  %v235_v5 = vld [vmem:[%s306_s1 + $0x20] sm:$0xff]   ;;  %v237_v7 = vld [vmem:[%s306_s1 + $0x30] sm:$0xff]   ;;  %v238_v8 = vld [vmem:[%s306_s1 + $0x38] sm:$0xff]  }
   0x4   :  { %213 = vmatprep.subr.bf16.mxu0 %v232_v1  ;;  %v240_v9 = vld [vmem:[%s307_s0 + $0x8] sm:$0xff]   ;;  %v200_v10 = vld [vmem:[%s308_s2] ss:$0 sm:$0xff] }
   0x7   :  { %214 = vmatpush3.bf16.msra.mxu0 %v232_v1 }
   0x8   :  { %215 = vmatprep.subr.bf16.mxu0 %v233_v2 }
   0xb   :  { %216 = vmatpush3.bf16.msra.mxu0 %v233_v2 }
   0xc   :  { %217 = vmatprep.subr.bf16.mxu0 %v234_v3 }
   0xf   :  { %218 = vmatpush3.bf16.msra.mxu0 %v234_v3 }
  0x10   :  { %219 = vmatprep.subr.bf16.mxu0 %v235_v5 }
  0x13   :  { %220 = vmatpush3.bf16.msra.mxu0 %v235_v5 }
  0x14   :  { %221 = vmatprep.subr.bf16.mxu0 %v236_v6 }
  0x17   :  { %222 = vmatpush3.bf16.msra.mxu0 %v236_v6 }
  0x18   :  { %223 = vmatprep.subr.bf16.mxu0 %v237_v7 }
  0x1b   :  { %224 = vmatpush3.bf16.msra.mxu0 %v237_v7 }
  0x1c   :  { %225 = vmatprep.subr.bf16.mxu0 %v238_v8 }
  0x1f   :  { %226 = vmatpush3.bf16.msra.mxu0 %v238_v8 }
  0x22   :  { %228 = vmatmul.mubr.bf16.vlgmr.msra.gmra.mrb[0].mxu0 %v240_v9 }
  0xf5   :  { %v229_v11 = vpop.f32.mrb[0].mxu0 }
  0xf6   :  { %v180_v12 = vadd.f32 %v229_v11, %v200_v10  ;;  %v141_v13 = vpop.f32.mrb[1].mxu0 }
  0xf7   :  { %v178_v14 = vadd.f32 %v200_v10, %v141_v13  ;;  %v230_v15 = vpop.f32.mrb[2].mxu0 }
  0xf8   :  { %184 = vst [vmem:[%s309_s3 + $0x10] sm:$0xff] %v180_v12  ;;  %v181_v16 = vadd.f32 %v230_v15, %v200_v10  ;;  %v144_v17 = vpop.f32.mrb[3].mxu0 }
  0xf9   :  { %182 = vst [vmem:[%s309_s3] sm:$0xff] %v178_v14  ;;  %v179_v18 = vadd.f32 %v200_v10, %v144_v17 }
  0xfa   :  { %185 = vst [vmem:[%s309_s3 + $0x18] sm:$0xff] %v181_v16 }
  0xfb   :  { %183 = vst [vmem:[%s309_s3 + $0x8] sm:$0xff] %v179_v18 }

// kernel: _lambda_.29
= control target key start
LH: loop header
LB: loop body
LE: loop exit
PB: predicated region body
PF: predicated region fallthrough
CT: control target
= control target key end

     0   :  { %s1736_s9 = smov 0   ;;  %s2015_s0 = inlined_call_operand.vmem [shape: f32[2,9,2,128], index: 0, kind: input, shape index: {}]   ;;  %s2016_s1 = inlined_call_operand.vmem [shape: f32[2,32,128], index: 1, kind: input, shape index: {}]   ;;  %s2017_s2 = inlined_call_operand.vmem [shape: f32[2,9,2,32], index: 2, kind: output, shape index: {}]  }
   0x1 LB: > { %s1742_s10 = sadd.s32 4294967295, %s1713_s9   ;;  %p1386_p0 = scmp.ge.s32.totalorder %s1713_s9, 1  ;;  %s1713_s9 = sphi %s1736_s9, %s12_s9  }
   0x2   : > { %p122_p1 = scmp.lt.s32.totalorder %s1713_s9, 3 }
   0x4   : > { %p123_p2 = pnand %p1386_p0, %p122_p1 }
   0x5   : > { %p149_p3 = scmp.lt.s32.totalorder (!%p123_p2), %s1742_s10, 1  ;;  %vm164_vm0 = vcmask (!%p123_p2), 254976   ;;  %v1715_v0 = vmov (!%p123_p2), 0.0|0.0   ;;  %vm1716_vm1 = vmmov (!%p123_p2), 0   ;;  %v1717_v1 = vmov (!%p123_p2), 0.0   ;;  %p167_p4 = scmp.eq.s32.totalorder (!%p123_p2), %s1742_s10, 0 }
   0x6   : > { %126 = sbr.rel (%p123_p2) target bundleno = 6410 (0x190a), region = 28  ;;  %1566 = vmatprep.subr.bf16.mxu0 (!%p123_p2), %v1715_v0  ;;  %1475 = vmatprep.mubr.msk.f32.mxu0 (!%p123_p2), %vm1716_vm1, %v1717_v1  ;;  %165 = vst.msk [vmem:[#allocation2] sm:$0x3] (!%p123_p2), %vm164_vm0, %v1717_v1  ;;  %166 = vst.msk [vmem:[#allocation3] sm:$0x3] (!%p123_p2), %vm164_vm0, %v1717_v1  ;;  %vm177_vm2 = vcmask (!%p123_p2), 261120  }
   0x7   : > { %1572 = vmatprep.subr.bf16.mxu1 (!%p123_p2), %v1715_v0  ;;  %1486 = vmatprep.mubr.msk.f32.mxu1 (!%p123_p2), %vm1716_vm1, %v1717_v1  ;;  %s1718_s23 = smov (!%p123_p2), 64   ;;  %s1719_s24 = smov (!%p123_p2), 32  }
   0x8   : > { %s1720_s25 = smov (!%p123_p2), 96  }
   0xd   : > { %s1755_s11 = scalar_select %p149_p3, %s1742_s10, 1  ;;  %v172_v8 = vld [vmem:[#allocation2] sm:$0x3]  ;;  %v259_v14 = vld [vmem:[#allocation3] sm:$0x3] }
   0xe   : > { %s1786_s16 = scalar_select %p167_p4, 0, 8 }
   0xf   : > { %s1421_s12 = sshll.u32 %s1755_s11, 5  ;;  %s1620_s17 = smul.u32 18, %s1755_s11 }
  0x10   : > { %s158_s15 = scalar_lea.vmem %s2016_s1, %s1421_s12  ;;  %s1391_s21 = sshll.u32 %s1786_s16, 1 }
  0x11   : > { %v173_v2 = vld [vmem:[%s158_s15] sm:$0xff]  ;;  %v174_v3 = vld [vmem:[%s158_s15 + $0x8] sm:$0xff]  ;;  %v175_v4 = vld [vmem:[%s158_s15 + $0x10] sm:$0xff]  ;;  %s1794_s20 = scalar_lea.vmem %s2015_s0, %s1620_s17  ;;  %s1813_s28 = scalar_lea.vmem %s2017_s2, %s1620_s17 }
  0x12   : > { %v1764_v5 = vpack.c.bf16 %v174_v3, %v173_v2  ;;  %v176_v6 = vld [vmem:[%s158_s15 + $0x18] sm:$0xff]  ;;  %s170_s22 = scalar_lea.vmem %s1794_s20, %s1391_s21  ;;  %s291_s29 = scalar_lea.vmem %s1813_s28, %s1391_s21 }
  0x13   : > { %v1767_v7 = vpack.c.bf16 %v176_v6, %v175_v4  ;;  %v171_v9 = vld [vmem:[%s170_s22] sm:$0x3]  ;;  %s1829_s30 = scalar_select %p167_p4, 1, 7 }
  0x14   : > { %1568 = vmatpush3.bf16.msra.mxu0 %v1764_v5  ;;  %1574 = vmatpush3.bf16.msra.mxu1 %v1764_v5  ;;  %s1856_s6 = scalar_select %p167_p4, 2, 6 }
  0x15   : > { %1569 = vmatprep.subr.bf16.mxu0 %v1715_v0  ;;  %1575 = vmatprep.subr.bf16.mxu1 %v1715_v0  ;;  %s1394_s3 = sshll.u32 %s1829_s30, 1 }
  0x16   : > { %s295_s4 = scalar_lea.vmem %s1794_s20, %s1394_s3  ;;  %s415_s5 = scalar_lea.vmem %s1813_s28, %s1394_s3 }
  0x17   : > { %v296_v32 = vld [vmem:[%s295_s4] sm:$0x3]  ;;  %s1397_s7 = sshll.u32 %s1856_s6, 1 }
  0x18   : > { %1571 = vmatpush3.bf16.msra.mxu0 %v1767_v7  ;;  %1577 = vmatpush3.bf16.msra.mxu1 %v1767_v7  ;;  %s419_s8 = scalar_lea.vmem %s1794_s20, %s1397_s7  ;;  %s539_s11 = scalar_lea.vmem %s1813_s28, %s1397_s7 }
  0x19   : > { %1578 = vmatprep.subr.bf16.mxu0 %v1715_v0  ;;  %1584 = vmatprep.subr.bf16.mxu1 %v1715_v0  ;;  %v420_v54 = vld [vmem:[%s419_s8] sm:$0x3]  ;;  %s1883_s12 = scalar_select %p167_p4, 3, 5 }
  0x1a   : > { %s1927_s16 = scalar_select %p167_p4, 5, 3 }
  0x1b   : > { %1476 = vmatmul.mubr.msk.f32.vlgmr.msra.gmra.mrb[0].mxu0 %vm177_vm2, %v172_v8  ;;  %s1400_s13 = sshll.u32 %s1883_s12, 1 }
  0x1c   : > { %1580 = vmatpush3.bf16.msra.mxu0 %v1764_v5  ;;  %1497 = vmatprep.mubr.msk.f32.mxu0 %vm1716_vm1, %v1717_v1  ;;  %s543_s14 = scalar_lea.vmem %s1794_s20, %s1400_s13  ;;  %s663_s15 = scalar_lea.vmem %s1813_s28, %s1400_s13 }
  0x1d   : > { %1581 = vmatprep.subr.bf16.mxu0 %v1715_v0  ;;  %s1407_s17 = sshll.u32 %s1927_s16, 1 }
  0x1e   : > { %s789_s18 = scalar_lea.vmem %s1794_s20, %s1407_s17  ;;  %s909_s19 = scalar_lea.vmem %s1813_s28, %s1407_s17 }
  0x1f   : > { %s1953_s21 = scalar_select %p167_p4, 6, 2 }
  0x20   : > { %1583 = vmatpush3.bf16.msra.mxu0 %v1767_v7 }
  0x21   : > { %1590 = vmatprep.subr.bf16.mxu0 %v1715_v0  ;;  %s1410_s22 = sshll.u32 %s1953_s21, 1 }
  0x22   : > { %s913_s26 = scalar_lea.vmem %s1794_s20, %s1410_s22  ;;  %s1033_s27 = scalar_lea.vmem %s1813_s28, %s1410_s22 }
  0xee   : > { %v247_v10 = vpop.f32.mrb[0].mxu0 }
  0xef   : > { %v251_v11 = vadd.f32 %v247_v10, %v171_v9  ;;  %v1477_v12 = vpop.f32.mrb[1].mxu0 }
  0xf1   : > { %1635 = vtanh.f32 %v251_v11  ;;  %v1393_v15 = vmul.f32 -1.442695, %v251_v11 }
  0xf3   : > { %1637 = vpow2.f32 %v1393_v15 }
  0xfb   : > { %v1636_v13 = vpop.eup %1635 }
  0xfc   : > { %266 = vrot.lane.b32.xlu0 %v1636_v13, %s1718_s23 }
  0xfd   : > { %v1638_v16 = vpop.eup %1637 }
  0xfe   : > { %v255_v17 = vadd.f32 1.0, %v1638_v16  ;;  %v544_v16 = vld [vmem:[%s543_s14] sm:$0x3] }
 0x100   : > { %261 = vrot.lane.b32.xlu0 %v259_v14, %s1719_s24  ;;  %1639 = vrcp.f32 %v255_v17 }
 0x10a   : > { %v1640_v18 = vpop.eup %1639 }
 0x16e   : > { %v267_v19 = vpop.permute.xlu0 %266 }
 0x16f   : > { %v269_v20 = vmul.f32 %v1640_v18, %v267_v19 }
 0x171   : > { %271 = vrot.lane.b32.xlu1 %v269_v20, %s1719_s24 }
 0x172   : > { %v262_v21 = vpop.permute.xlu0 %261 }
 0x173   : > { %v264_v22 = vmul.f32 %v1640_v18, %v262_v21 }
 0x1e3   : > { %v272_v23 = vpop.permute.xlu1 %271 }
 0x1e4   : > { %v274_v24 = vadd.f32 %v272_v23, %v264_v22 }
 0x1e6   : > { %1641 = vtanh.f32 %v274_v24 }
 0x1f0   : > { %v1642_v25 = vpop.eup %1641 }
 0x1f1   : > { %277 = vrot.lane.b32.xlu1 %v1642_v25, %s1718_s23 }
 0x1f5   : > { %282 = vrot.lane.b32.xlu1 %v274_v24, %s1720_s25 }
 0x263   : > { %v278_v26 = vpop.permute.xlu1 %277 }
 0x264   : > { %v280_v27 = vmul.f32 %v1640_v18, %v278_v26 }
 0x266   : > { %287 = vrot.lane.b32.xlu0 %v280_v27, %s1719_s24 }
 0x267   : > { %v283_v28 = vpop.permute.xlu1 %282 }
 0x268   : > { %285 = vst.msk [vmem:[#allocation3] sm:$0x3] %vm164_vm0, %v283_v28 }
 0x26f   : > { %v383_v29 = vld [vmem:[#allocation3] sm:$0x3] }
 0x270   : > { %385 = vrot.lane.b32.xlu1 %v383_v29, %s1719_s24 }
 0x2d8   : > { %v288_v30 = vpop.permute.xlu0 %287 }
 0x2d9   : > { %290 = vst.msk [vmem:[#allocation2] sm:$0x3] %vm164_vm0, %v288_v30  ;;  %292 = vst.msk [vmem:[%s291_s29] sm:$0x3] %vm164_vm0, %v288_v30  ;;  %s1974_s29 = scalar_select %p167_p4, 7, 1 }
 0x2db   : > { %s1413_s30 = sshll.u32 %s1974_s29, 1 }
 0x2dc   : > { %s1037_s3 = scalar_lea.vmem %s1794_s20, %s1413_s30  ;;  %s1157_s4 = scalar_lea.vmem %s1813_s28, %s1413_s30 }
 0x2e0   : > { %v297_v31 = vld [vmem:[#allocation2] sm:$0x3] }
 0x2e1   : > { %1487 = vmatmul.mubr.msk.f32.vlgmr.msra.gmra.mrb[0].mxu1 %vm177_vm2, %v297_v31 }
 0x2e2   : > { %1586 = vmatpush3.bf16.msra.mxu1 %v1764_v5  ;;  %1508 = vmatprep.mubr.msk.f32.mxu1 %vm1716_vm1, %v1717_v1  ;;  %v386_v43 = vpop.permute.xlu1 %385 }
 0x2e3   : > { %1587 = vmatprep.subr.bf16.mxu1 %v1715_v0 }
 0x2e6   : > { %1589 = vmatpush3.bf16.msra.mxu1 %v1767_v7 }
 0x2e7   : > { %1596 = vmatprep.subr.bf16.mxu1 %v1715_v0 }
 0x3b4   : > { %v371_v33 = vpop.f32.mrb[0].mxu1 }
 0x3b5   : > { %v375_v34 = vadd.f32 %v371_v33, %v296_v32  ;;  %v1488_v35 = vpop.f32.mrb[1].mxu1 }
 0x3b7   : > { %1643 = vtanh.f32 %v375_v34  ;;  %v1396_v37 = vmul.f32 -1.442695, %v375_v34 }
 0x3b9   : > { %1645 = vpow2.f32 %v1396_v37 }
 0x3c1   : > { %v1644_v36 = vpop.eup %1643 }
 0x3c2   : > { %390 = vrot.lane.b32.xlu0 %v1644_v36, %s1718_s23 }
 0x3c3   : > { %v1646_v38 = vpop.eup %1645 }
 0x3c4   : > { %v379_v39 = vadd.f32 1.0, %v1646_v38  ;;  %v1403_v38 = vld [vmem:[%s1794_s20 + $0x8] sm:$0x3] }
 0x3c6   : > { %1647 = vrcp.f32 %v379_v39 }
 0x3d0   : > { %v1648_v40 = vpop.eup %1647 }
 0x3d1   : > { %v388_v44 = vmul.f32 %v1648_v40, %v386_v43 }
 0x434   : > { %v391_v41 = vpop.permute.xlu0 %390 }
 0x435   : > { %v393_v42 = vmul.f32 %v1648_v40, %v391_v41 }
 0x437   : > { %395 = vrot.lane.b32.xlu0 %v393_v42, %s1719_s24 }
 0x4a9   : > { %v396_v45 = vpop.permute.xlu0 %395 }
 0x4aa   : > { %v398_v46 = vadd.f32 %v396_v45, %v388_v44 }
 0x4ac   : > { %1649 = vtanh.f32 %v398_v46 }
 0x4b6   : > { %v1650_v47 = vpop.eup %1649 }
 0x4b7   : > { %401 = vrot.lane.b32.xlu1 %v1650_v47, %s1718_s23 }
 0x4bb   : > { %406 = vrot.lane.b32.xlu1 %v398_v46, %s1720_s25 }
 0x529   : > { %v402_v48 = vpop.permute.xlu1 %401 }
 0x52a   : > { %v404_v49 = vmul.f32 %v1648_v40, %v402_v48 }
 0x52c   : > { %411 = vrot.lane.b32.xlu0 %v404_v49, %s1719_s24 }
 0x52d   : > { %v407_v50 = vpop.permute.xlu1 %406 }
 0x52e   : > { %409 = vst.msk [vmem:[#allocation3] sm:$0x3] %vm164_vm0, %v407_v50 }
 0x535   : > { %v507_v51 = vld [vmem:[#allocation3] sm:$0x3] }
 0x536   : > { %509 = vrot.lane.b32.xlu1 %v507_v51, %s1719_s24 }
 0x59e   : > { %v412_v52 = vpop.permute.xlu0 %411 }
 0x59f   : > { %414 = vst.msk [vmem:[#allocation2] sm:$0x3] %vm164_vm0, %v412_v52  ;;  %416 = vst.msk [vmem:[%s415_s5] sm:$0x3] %vm164_vm0, %v412_v52  ;;  %s1995_s5 = scalar_select %p167_p4, 8, 0 }
 0x5a1   : > { %s1416_s6 = sshll.u32 %s1995_s5, 1 }
 0x5a2   : > { %s1161_s7 = scalar_lea.vmem %s1794_s20, %s1416_s6  ;;  %s1281_s10 = scalar_lea.vmem %s1813_s28, %s1416_s6 }
 0x5a6   : > { %v421_v53 = vld [vmem:[#allocation2] sm:$0x3] }
 0x5a7   : > { %1498 = vmatmul.mubr.msk.f32.vlgmr.msra.gmra.mrb[2].mxu0 %vm177_vm2, %v421_v53 }
 0x5a8   : > { %1592 = vmatpush3.bf16.msra.mxu0 %v1764_v5  ;;  %1519 = vmatprep.mubr.msk.f32.mxu0 %vm1716_vm1, %v1717_v1  ;;  %v510_v3 = vpop.permute.xlu1 %509 }
 0x5a9   : > { %1593 = vmatprep.subr.bf16.mxu0 %v1715_v0 }
 0x5ac   : > { %1595 = vmatpush3.bf16.msra.mxu0 %v1767_v7 }
 0x5ad   : > { %1602 = vmatprep.subr.bf16.mxu0 %v1715_v0 }
 0x67a   : > { %v495_v55 = vpop.f32.mrb[2].mxu0 }
 0x67b   : > { %v499_v56 = vadd.f32 %v495_v55, %v420_v54  ;;  %v1499_v57 = vpop.f32.mrb[3].mxu0 }
 0x67d   : > { %1651 = vtanh.f32 %v499_v56  ;;  %v1399_v59 = vmul.f32 -1.442695, %v499_v56 }
 0x67f   : > { %1653 = vpow2.f32 %v1399_v59 }
 0x687   : > { %v1652_v58 = vpop.eup %1651 }
 0x688   : > { %514 = vrot.lane.b32.xlu0 %v1652_v58, %s1718_s23 }
 0x689   : > { %v1654_v60 = vpop.eup %1653 }
 0x68a   : > { %v503_v61 = vadd.f32 1.0, %v1654_v60  ;;  %v790_v60 = vld [vmem:[%s789_s18] sm:$0x3] }
 0x68c   : > { %1655 = vrcp.f32 %v503_v61 }
 0x696   : > { %v1656_v62 = vpop.eup %1655 }
 0x697   : > { %v512_v4 = vmul.f32 %v1656_v62, %v510_v3 }
 0x6fa   : > { %v515_v63 = vpop.permute.xlu0 %514 }
 0x6fb   : > { %v517_v2 = vmul.f32 %v1656_v62, %v515_v63 }
 0x6fd   : > { %519 = vrot.lane.b32.xlu0 %v517_v2, %s1719_s24 }
 0x76f   : > { %v520_v6 = vpop.permute.xlu0 %519 }
 0x770   : > { %v522_v8 = vadd.f32 %v520_v6, %v512_v4 }
 0x772   : > { %1657 = vtanh.f32 %v522_v8 }
 0x77c   : > { %v1658_v9 = vpop.eup %1657 }
 0x77d   : > { %525 = vrot.lane.b32.xlu1 %v1658_v9, %s1718_s23 }
 0x781   : > { %530 = vrot.lane.b32.xlu1 %v522_v8, %s1720_s25 }
 0x7ef   : > { %v526_v10 = vpop.permute.xlu1 %525 }
 0x7f0   : > { %v528_v11 = vmul.f32 %v1656_v62, %v526_v10 }
 0x7f2   : > { %535 = vrot.lane.b32.xlu0 %v528_v11, %s1719_s24 }
 0x7f3   : > { %v531_v12 = vpop.permute.xlu1 %530 }
 0x7f4   : > { %533 = vst.msk [vmem:[#allocation3] sm:$0x3] %vm164_vm0, %v531_v12 }
 0x7fb   : > { %v631_v13 = vld [vmem:[#allocation3] sm:$0x3] }
 0x7fc   : > { %633 = vrot.lane.b32.xlu1 %v631_v13, %s1719_s24 }
 0x864   : > { %v536_v14 = vpop.permute.xlu0 %535 }
 0x865   : > { %538 = vst.msk [vmem:[#allocation2] sm:$0x3] %vm164_vm0, %v536_v14  ;;  %540 = vst.msk [vmem:[%s539_s11] sm:$0x3] %vm164_vm0, %v536_v14 }
 0x86c   : > { %v545_v15 = vld [vmem:[#allocation2] sm:$0x3] }
 0x86d   : > { %1509 = vmatmul.mubr.msk.f32.vlgmr.msra.gmra.mrb[2].mxu1 %vm177_vm2, %v545_v15 }
 0x86e   : > { %1598 = vmatpush3.bf16.msra.mxu1 %v1764_v5  ;;  %1530 = vmatprep.mubr.msk.f32.mxu1 %vm1716_vm1, %v1717_v1  ;;  %v634_v27 = vpop.permute.xlu1 %633 }
 0x86f   : > { %1599 = vmatprep.subr.bf16.mxu1 %v1715_v0 }
 0x872   : > { %1601 = vmatpush3.bf16.msra.mxu1 %v1767_v7 }
 0x873   : > { %1608 = vmatprep.subr.bf16.mxu1 %v1715_v0 }
 0x940   : > { %v619_v17 = vpop.f32.mrb[2].mxu1 }
 0x941   : > { %v623_v18 = vadd.f32 %v619_v17, %v544_v16  ;;  %v1510_v19 = vpop.f32.mrb[3].mxu1 }
 0x943   : > { %1659 = vtanh.f32 %v623_v18  ;;  %v1402_v21 = vmul.f32 -1.442695, %v623_v18 }
 0x945   : > { %1661 = vpow2.f32 %v1402_v21 }
 0x94d   : > { %v1660_v20 = vpop.eup %1659 }
 0x94e   : > { %638 = vrot.lane.b32.xlu0 %v1660_v20, %s1718_s23 }
 0x94f   : > { %v1662_v22 = vpop.eup %1661 }
 0x950   : > { %v627_v23 = vadd.f32 1.0, %v1662_v22  ;;  %v914_v22 = vld [vmem:[%s913_s26] sm:$0x3] }
 0x952   : > { %1663 = vrcp.f32 %v627_v23 }
 0x95c   : > { %v1664_v24 = vpop.eup %1663 }
 0x95d   : > { %v636_v28 = vmul.f32 %v1664_v24, %v634_v27 }
 0x9c0   : > { %v639_v25 = vpop.permute.xlu0 %638 }
 0x9c1   : > { %v641_v26 = vmul.f32 %v1664_v24, %v639_v25 }
 0x9c3   : > { %643 = vrot.lane.b32.xlu0 %v641_v26, %s1719_s24 }
 0xa35   : > { %v644_v29 = vpop.permute.xlu0 %643 }
 0xa36   : > { %v646_v30 = vadd.f32 %v644_v29, %v636_v28 }
 0xa38   : > { %1665 = vtanh.f32 %v646_v30 }
 0xa42   : > { %v1666_v31 = vpop.eup %1665 }
 0xa43   : > { %649 = vrot.lane.b32.xlu1 %v1666_v31, %s1718_s23 }
 0xa47   : > { %654 = vrot.lane.b32.xlu1 %v646_v30, %s1720_s25 }
 0xab5   : > { %v650_v32 = vpop.permute.xlu1 %649 }
 0xab6   : > { %v652_v33 = vmul.f32 %v1664_v24, %v650_v32 }
 0xab8   : > { %659 = vrot.lane.b32.xlu0 %v652_v33, %s1719_s24 }
 0xab9   : > { %v655_v34 = vpop.permute.xlu1 %654 }
 0xaba   : > { %657 = vst.msk [vmem:[#allocation3] sm:$0x3] %vm164_vm0, %v655_v34 }
 0xac1   : > { %v753_v35 = vld [vmem:[#allocation3] sm:$0x3] }
 0xac2   : > { %755 = vrot.lane.b32.xlu1 %v753_v35, %s1719_s24 }
 0xb2a   : > { %v660_v36 = vpop.permute.xlu0 %659 }
 0xb2b   : > { %662 = vst.msk [vmem:[#allocation2] sm:$0x3] %vm164_vm0, %v660_v36  ;;  %664 = vst.msk [vmem:[%s663_s15] sm:$0x3] %vm164_vm0, %v660_v36 }
 0xb32   : > { %v667_v37 = vld [vmem:[#allocation2] sm:$0x3] }
 0xb33   : > { %1520 = vmatmul.mubr.msk.f32.vlgmr.msra.gmra.mrb[4].mxu0 %vm177_vm2, %v667_v37 }
 0xb34   : > { %1604 = vmatpush3.bf16.msra.mxu0 %v1764_v5  ;;  %1541 = vmatprep.mubr.msk.f32.mxu0 %vm1716_vm1, %v1717_v1  ;;  %v756_v49 = vpop.permute.xlu1 %755 }
 0xb35   : > { %1605 = vmatprep.subr.bf16.mxu0 %v1715_v0 }
 0xb38   : > { %1607 = vmatpush3.bf16.msra.mxu0 %v1767_v7 }
 0xb39   : > { %1614 = vmatprep.subr.bf16.mxu0 %v1715_v0 }
 0xc06   : > { %v741_v39 = vpop.f32.mrb[4].mxu0 }
 0xc07   : > { %v745_v40 = vadd.f32 %v1403_v38, %v741_v39  ;;  %v1521_v41 = vpop.f32.mrb[5].mxu0 }
 0xc09   : > { %1667 = vtanh.f32 %v745_v40  ;;  %v1405_v43 = vmul.f32 -1.442695, %v745_v40  ;;  %v1038_v40 = vld [vmem:[%s1037_s3] sm:$0x3] }
 0xc0b   : > { %1669 = vpow2.f32 %v1405_v43 }
 0xc13   : > { %v1668_v42 = vpop.eup %1667 }
 0xc14   : > { %760 = vrot.lane.b32.xlu0 %v1668_v42, %s1718_s23 }
 0xc15   : > { %v1670_v44 = vpop.eup %1669 }
 0xc16   : > { %v749_v45 = vadd.f32 1.0, %v1670_v44 }
 0xc18   : > { %1671 = vrcp.f32 %v749_v45 }
 0xc22   : > { %v1672_v46 = vpop.eup %1671 }
 0xc23   : > { %v758_v50 = vmul.f32 %v1672_v46, %v756_v49 }
 0xc86   : > { %v761_v47 = vpop.permute.xlu0 %760 }
 0xc87   : > { %v763_v48 = vmul.f32 %v1672_v46, %v761_v47 }
 0xc89   : > { %765 = vrot.lane.b32.xlu0 %v763_v48, %s1719_s24 }
 0xcfb   : > { %v766_v51 = vpop.permute.xlu0 %765 }
 0xcfc   : > { %v768_v52 = vadd.f32 %v766_v51, %v758_v50 }
 0xcfe   : > { %1673 = vtanh.f32 %v768_v52 }
 0xd08   : > { %v1674_v53 = vpop.eup %1673 }
 0xd09   : > { %771 = vrot.lane.b32.xlu1 %v1674_v53, %s1718_s23 }
 0xd0d   : > { %776 = vrot.lane.b32.xlu1 %v768_v52, %s1720_s25 }
 0xd7b   : > { %v772_v54 = vpop.permute.xlu1 %771 }
 0xd7c   : > { %v774_v55 = vmul.f32 %v1672_v46, %v772_v54 }
 0xd7e   : > { %781 = vrot.lane.b32.xlu0 %v774_v55, %s1719_s24 }
 0xd7f   : > { %v777_v56 = vpop.permute.xlu1 %776 }
 0xd80   : > { %779 = vst.msk [vmem:[#allocation3] sm:$0x3] %vm164_vm0, %v777_v56 }
 0xd87   : > { %v877_v57 = vld [vmem:[#allocation3] sm:$0x3] }
 0xd88   : > { %879 = vrot.lane.b32.xlu1 %v877_v57, %s1719_s24 }
 0xdf0   : > { %v782_v58 = vpop.permute.xlu0 %781 }
 0xdf1   : > { %784 = vst.msk [vmem:[#allocation2] sm:$0x3] %vm164_vm0, %v782_v58  ;;  %1406 = vst.msk [vmem:[%s1813_s28 + $0x8] sm:$0x3] %vm164_vm0, %v782_v58 }
 0xdf8   : > { %v791_v59 = vld [vmem:[#allocation2] sm:$0x3] }
 0xdf9   : > { %1531 = vmatmul.mubr.msk.f32.vlgmr.msra.gmra.mrb[4].mxu1 %vm177_vm2, %v791_v59 }
 0xdfa   : > { %1610 = vmatpush3.bf16.msra.mxu1 %v1764_v5  ;;  %1552 = vmatprep.mubr.msk.f32.mxu1 %vm1716_vm1, %v1717_v1  ;;  %v880_v11 = vpop.permute.xlu1 %879 }
 0xdfb   : > { %1611 = vmatprep.subr.bf16.mxu1 %v1715_v0 }
 0xdfe   : > { %1613 = vmatpush3.bf16.msra.mxu1 %v1767_v7 }
 0xecc   : > { %v865_v61 = vpop.f32.mrb[4].mxu1 }
 0xecd   : > { %v869_v62 = vadd.f32 %v865_v61, %v790_v60  ;;  %v1532_v63 = vpop.f32.mrb[5].mxu1 }
 0xecf   : > { %1675 = vtanh.f32 %v869_v62  ;;  %v1409_v3 = vmul.f32 -1.442695, %v869_v62  ;;  %v1162_v62 = vld [vmem:[%s1161_s7] sm:$0x3] }
 0xed1   : > { %1677 = vpow2.f32 %v1409_v3 }
 0xed9   : > { %v1676_v2 = vpop.eup %1675 }
 0xeda   : > { %884 = vrot.lane.b32.xlu0 %v1676_v2, %s1718_s23 }
 0xedb   : > { %v1678_v4 = vpop.eup %1677 }
 0xedc   : > { %v873_v6 = vadd.f32 1.0, %v1678_v4 }
 0xede   : > { %1679 = vrcp.f32 %v873_v6 }
 0xee8   : > { %v1680_v8 = vpop.eup %1679 }
 0xee9   : > { %v882_v12 = vmul.f32 %v1680_v8, %v880_v11 }
 0xf4c   : > { %v885_v9 = vpop.permute.xlu0 %884 }
 0xf4d   : > { %v887_v10 = vmul.f32 %v1680_v8, %v885_v9 }
 0xf4f   : > { %889 = vrot.lane.b32.xlu0 %v887_v10, %s1719_s24 }
 0xfc1   : > { %v890_v13 = vpop.permute.xlu0 %889 }
 0xfc2   : > { %v892_v14 = vadd.f32 %v890_v13, %v882_v12 }
 0xfc4   : > { %1681 = vtanh.f32 %v892_v14 }
 0xfce   : > { %v1682_v15 = vpop.eup %1681 }
 0xfcf   : > { %895 = vrot.lane.b32.xlu1 %v1682_v15, %s1718_s23 }
 0xfd3   : > { %900 = vrot.lane.b32.xlu1 %v892_v14, %s1720_s25 }
0x1041   : > { %v896_v16 = vpop.permute.xlu1 %895 }
0x1042   : > { %v898_v17 = vmul.f32 %v1680_v8, %v896_v16 }
0x1044   : > { %905 = vrot.lane.b32.xlu0 %v898_v17, %s1719_s24 }
0x1045   : > { %v901_v18 = vpop.permute.xlu1 %900 }
0x1046   : > { %903 = vst.msk [vmem:[#allocation3] sm:$0x3] %vm164_vm0, %v901_v18 }
0x104d   : > { %v1001_v19 = vld [vmem:[#allocation3] sm:$0x3] }
0x104e   : > { %1003 = vrot.lane.b32.xlu1 %v1001_v19, %s1719_s24 }
0x10b6   : > { %v906_v20 = vpop.permute.xlu0 %905 }
0x10b7   : > { %908 = vst.msk [vmem:[#allocation2] sm:$0x3] %vm164_vm0, %v906_v20  ;;  %910 = vst.msk [vmem:[%s909_s19] sm:$0x3] %vm164_vm0, %v906_v20 }
0x10be   : > { %v915_v21 = vld [vmem:[#allocation2] sm:$0x3] }
0x10bf   : > { %1542 = vmatmul.mubr.msk.f32.vlgmr.msra.gmra.mrb[6].mxu0 %vm177_vm2, %v915_v21 }
0x10c0   : > { %1616 = vmatpush3.bf16.msra.mxu0 %v1764_v5  ;;  %1563 = vmatprep.mubr.msk.f32.mxu0 %vm1716_vm1, %v1717_v1  ;;  %v1004_v29 = vpop.permute.xlu1 %1003 }
0x10c1   : > { %1617 = vmatprep.subr.bf16.mxu0 %v1715_v0 }
0x10c4   : > { %1619 = vmatpush3.bf16.msra.mxu0 %v1767_v7 }
0x1192   : > { %v989_v23 = vpop.f32.mrb[6].mxu0 }
0x1193   : > { %v993_v24 = vadd.f32 %v989_v23, %v914_v22  ;;  %v1543_v25 = vpop.f32.mrb[7].mxu0 }
0x1195   : > { %1683 = vtanh.f32 %v993_v24  ;;  %v1412_v1 = vmul.f32 -1.442695, %v993_v24 }
0x1197   : > { %1685 = vpow2.f32 %v1412_v1 }
0x119f   : > { %v1684_v5 = vpop.eup %1683 }
0x11a0   : > { %1008 = vrot.lane.b32.xlu0 %v1684_v5, %s1718_s23 }
0x11a1   : > { %v1686_v0 = vpop.eup %1685 }
0x11a2   : > { %v997_v7 = vadd.f32 1.0, %v1686_v0 }
0x11a4   : > { %1687 = vrcp.f32 %v997_v7 }
0x11ae   : > { %v1688_v26 = vpop.eup %1687 }
0x11af   : > { %v1006_v30 = vmul.f32 %v1688_v26, %v1004_v29 }
0x1212   : > { %v1009_v27 = vpop.permute.xlu0 %1008 }
0x1213   : > { %v1011_v28 = vmul.f32 %v1688_v26, %v1009_v27 }
0x1215   : > { %1013 = vrot.lane.b32.xlu0 %v1011_v28, %s1719_s24 }
0x1287   : > { %v1014_v31 = vpop.permute.xlu0 %1013 }
0x1288   : > { %v1016_v32 = vadd.f32 %v1014_v31, %v1006_v30 }
0x128a   : > { %1689 = vtanh.f32 %v1016_v32 }
0x1294   : > { %v1690_v33 = vpop.eup %1689 }
0x1295   : > { %1019 = vrot.lane.b32.xlu1 %v1690_v33, %s1718_s23 }
0x1299   : > { %1024 = vrot.lane.b32.xlu1 %v1016_v32, %s1720_s25 }
0x1307   : > { %v1020_v34 = vpop.permute.xlu1 %1019 }
0x1308   : > { %v1022_v35 = vmul.f32 %v1688_v26, %v1020_v34 }
0x130a   : > { %1029 = vrot.lane.b32.xlu0 %v1022_v35, %s1719_s24 }
0x130b   : > { %v1025_v36 = vpop.permute.xlu1 %1024 }
0x130c   : > { %1027 = vst.msk [vmem:[#allocation3] sm:$0x3] %vm164_vm0, %v1025_v36 }
0x1313   : > { %v1125_v37 = vld [vmem:[#allocation3] sm:$0x3] }
0x1314   : > { %1127 = vrot.lane.b32.xlu1 %v1125_v37, %s1719_s24 }
0x137c   : > { %v1030_v38 = vpop.permute.xlu0 %1029 }
0x137d   : > { %1032 = vst.msk [vmem:[#allocation2] sm:$0x3] %vm164_vm0, %v1030_v38  ;;  %1034 = vst.msk [vmem:[%s1033_s27] sm:$0x3] %vm164_vm0, %v1030_v38 }
0x1384   : > { %v1039_v39 = vld [vmem:[#allocation2] sm:$0x3] }
0x1385   : > { %1553 = vmatmul.mubr.msk.f32.vlgmr.msra.gmra.mrb[6].mxu1 %vm177_vm2, %v1039_v39 }
0x1386   : > { %v1128_v51 = vpop.permute.xlu1 %1127 }
0x1458   : > { %v1113_v41 = vpop.f32.mrb[6].mxu1 }
0x1459   : > { %v1117_v42 = vadd.f32 %v1113_v41, %v1038_v40  ;;  %v1554_v43 = vpop.f32.mrb[7].mxu1 }
0x145b   : > { %1691 = vtanh.f32 %v1117_v42  ;;  %v1415_v45 = vmul.f32 -1.442695, %v1117_v42 }
0x145d   : > { %1693 = vpow2.f32 %v1415_v45 }
0x1465   : > { %v1692_v44 = vpop.eup %1691 }
0x1466   : > { %1132 = vrot.lane.b32.xlu0 %v1692_v44, %s1718_s23 }
0x1467   : > { %v1694_v46 = vpop.eup %1693 }
0x1468   : > { %v1121_v47 = vadd.f32 1.0, %v1694_v46 }
0x146a   : > { %1695 = vrcp.f32 %v1121_v47 }
0x1474   : > { %v1696_v48 = vpop.eup %1695 }
0x1475   : > { %v1130_v52 = vmul.f32 %v1696_v48, %v1128_v51 }
0x14d8   : > { %v1133_v49 = vpop.permute.xlu0 %1132 }
0x14d9   : > { %v1135_v50 = vmul.f32 %v1696_v48, %v1133_v49 }
0x14db   : > { %1137 = vrot.lane.b32.xlu0 %v1135_v50, %s1719_s24 }
0x154d   : > { %v1138_v53 = vpop.permute.xlu0 %1137 }
0x154e   : > { %v1140_v54 = vadd.f32 %v1138_v53, %v1130_v52 }
0x1550   : > { %1697 = vtanh.f32 %v1140_v54 }
0x155a   : > { %v1698_v55 = vpop.eup %1697 }
0x155b   : > { %1143 = vrot.lane.b32.xlu1 %v1698_v55, %s1718_s23 }
0x155f   : > { %1148 = vrot.lane.b32.xlu1 %v1140_v54, %s1720_s25 }
0x15cd   : > { %v1144_v56 = vpop.permute.xlu1 %1143 }
0x15ce   : > { %v1146_v57 = vmul.f32 %v1696_v48, %v1144_v56 }
0x15d0   : > { %1153 = vrot.lane.b32.xlu0 %v1146_v57, %s1719_s24 }
0x15d1   : > { %v1149_v58 = vpop.permute.xlu1 %1148 }
0x15d2   : > { %1151 = vst.msk [vmem:[#allocation3] sm:$0x3] %vm164_vm0, %v1149_v58 }
0x15d9   : > { %v1249_v59 = vld [vmem:[#allocation3] sm:$0x3] }
0x15da   : > { %1251 = vrot.lane.b32.xlu1 %v1249_v59, %s1719_s24 }
0x1642   : > { %v1154_v60 = vpop.permute.xlu0 %1153 }
0x1643   : > { %1156 = vst.msk [vmem:[#allocation2] sm:$0x3] %vm164_vm0, %v1154_v60  ;;  %1158 = vst.msk [vmem:[%s1157_s4] sm:$0x3] %vm164_vm0, %v1154_v60 }
0x164a   : > { %v1163_v61 = vld [vmem:[#allocation2] sm:$0x3] }
0x164b   : > { %1564 = vmatmul.mubr.msk.f32.vlgmr.msra.gmra.mrb[8].mxu0 %vm177_vm2, %v1163_v61 }
0x164c   : > { %v1252_v13 = vpop.permute.xlu1 %1251 }
0x171e   : > { %v1237_v63 = vpop.f32.mrb[8].mxu0 }
0x171f   : > { %v1241_v2 = vadd.f32 %v1237_v63, %v1162_v62  ;;  %v1565_v3 = vpop.f32.mrb[9].mxu0 }
0x1721   : > { %1699 = vtanh.f32 %v1241_v2  ;;  %v1418_v6 = vmul.f32 -1.442695, %v1241_v2 }
0x1723   : > { %1701 = vpow2.f32 %v1418_v6 }
0x172b   : > { %v1700_v4 = vpop.eup %1699 }
0x172c   : > { %1256 = vrot.lane.b32.xlu0 %v1700_v4, %s1718_s23 }
0x172d   : > { %v1702_v8 = vpop.eup %1701 }
0x172e   : > { %v1245_v9 = vadd.f32 1.0, %v1702_v8 }
0x1730   : > { %1703 = vrcp.f32 %v1245_v9 }
0x173a   : > { %v1704_v10 = vpop.eup %1703 }
0x173b   : > { %v1254_v14 = vmul.f32 %v1704_v10, %v1252_v13 }
0x179e   : > { %v1257_v11 = vpop.permute.xlu0 %1256 }
0x179f   : > { %v1259_v12 = vmul.f32 %v1704_v10, %v1257_v11 }
0x17a1   : > { %1261 = vrot.lane.b32.xlu0 %v1259_v12, %s1719_s24 }
0x1813   : > { %v1262_v15 = vpop.permute.xlu0 %1261 }
0x1814   : > { %v1264_v16 = vadd.f32 %v1262_v15, %v1254_v14 }
0x1816   : > { %1705 = vtanh.f32 %v1264_v16  ;;  %1272 = vrot.lane.b32.xlu0 %v1264_v16, %s1720_s25 }
0x1820   : > { %v1706_v17 = vpop.eup %1705 }
0x1821   : > { %1267 = vrot.lane.b32.xlu1 %v1706_v17, %s1718_s23 }
0x1888   : > { %v1273_v18 = vpop.permute.xlu0 %1272 }
0x1889   : > { %1275 = vst.msk [vmem:[#allocation3] sm:$0x3] %vm164_vm0, %v1273_v18 }
0x1893   : > { %v1268_v19 = vpop.permute.xlu1 %1267 }
0x1894   : > { %v1270_v20 = vmul.f32 %v1704_v10, %v1268_v19 }
0x1896   : > { %1277 = vrot.lane.b32.xlu1 %v1270_v20, %s1719_s24 }
0x1908   : > { %v1278_v21 = vpop.permute.xlu1 %1277 }
0x1909   : > { %1280 = vst.msk [vmem:[#allocation2] sm:$0x3] %vm164_vm0, %v1278_v21  ;;  %1282 = vst.msk [vmem:[%s1281_s10] sm:$0x3] %vm164_vm0, %v1278_v21 }
0x190a PF: > { %s12_s9 = sadd.s32 1, %s1713_s9  }
0x190b   : > { %p9_p5 = scmp.ge.s32.totalorder %s12_s9, 4  }
0x190d   :  { %11 = sbr.rel (!%p9_p5) target bundleno = 1 (0x1), region = 79 }

// kernel: _lambda_.31
= control target key start
LH: loop header
LB: loop body
LE: loop exit
PB: predicated region body
PF: predicated region fallthrough
CT: control target
= control target key end

     0   :  { %v320_v1 = vmov 0   ;;  %v229_v19 = vlaneseq  ;;  %s422_s1 = inlined_call_operand.vmem [shape: bf16[128,256], index: 1, kind: input, shape index: {}]   ;;  %s423_s0 = inlined_call_operand.vmem [shape: bf16[32,128], index: 0, kind: input, shape index: {}]   ;;  %s424_s2 = inlined_call_operand.vmem [shape: f32[1,256], index: 2, kind: input, shape index: {}]   ;;  %s425_s3 = inlined_call_operand.vmem [shape: f32[32,256], index: 3, kind: output, shape index: {}]  }
   0x1   :  { %v294_v0 = vld [vmem:[%s422_s1 + $0x4] ss:$8 sps:$4 sm:$0xff]   ;;  %179 = vmatprep.mubr.bf16.mxu0 %v320_v1  ;;  %189 = vmatprep.mubr.bf16.mxu1 %v320_v1  ;;  %v296_v2 = vld [vmem:[%s422_s1] ss:$8 sps:$4 sm:$0xff]   ;;  %v297_v3 = vld [vmem:[%s422_s1 + $0x14] ss:$8 sps:$4 sm:$0xff]  }
   0x2   :  { %147 = vmatprep.subr.bf16.mxu0 %v294_v0  ;;  %277 = vmatprep.subr.bf16.mxu1 %v294_v0  ;;  %v299_v4 = vld [vmem:[%s422_s1 + $0x10] ss:$8 sps:$4 sm:$0xff]   ;;  %v300_v5 = vld [vmem:[%s422_s1 + $0x24] ss:$8 sps:$4 sm:$0xff]   ;;  %v302_v6 = vld [vmem:[%s422_s1 + $0x20] ss:$8 sps:$4 sm:$0xff]  }
   0x3   :  { %148 = vmatpush1.bf16.msra.mxu0 %v296_v2  ;;  %285 = vmatpush1.bf16.msra.mxu1 %v296_v2  ;;  %v303_v7 = vld [vmem:[%s422_s1 + $0x34] ss:$8 sps:$4 sm:$0xff]   ;;  %v305_v8 = vld [vmem:[%s422_s1 + $0x30] ss:$8 sps:$4 sm:$0xff]   ;;  %v306_v9 = vld [vmem:[%s422_s1 + $0x44] ss:$8 sps:$4 sm:$0xff]  }
   0x4   :  { %149 = vmatprep.subr.bf16.mxu0 %v297_v3  ;;  %278 = vmatprep.subr.bf16.mxu1 %v297_v3  ;;  %v308_v10 = vld [vmem:[%s422_s1 + $0x40] ss:$8 sps:$4 sm:$0xff]   ;;  %v309_v11 = vld [vmem:[%s422_s1 + $0x54] ss:$8 sps:$4 sm:$0xff]   ;;  %v311_v12 = vld [vmem:[%s422_s1 + $0x50] ss:$8 sps:$4 sm:$0xff]  }
   0x5   :  { %v312_v13 = vld [vmem:[%s422_s1 + $0x64] ss:$8 sps:$4 sm:$0xff]   ;;  %v314_v14 = vld [vmem:[%s422_s1 + $0x60] ss:$8 sps:$4 sm:$0xff]   ;;  %v315_v15 = vld [vmem:[%s422_s1 + $0x74] ss:$8 sps:$4 sm:$0xff]  }
   0x6   :  { %v317_v16 = vld [vmem:[%s422_s1 + $0x70] ss:$8 sps:$4 sm:$0xff]   ;;  %v318_v17 = vld [vmem:[%s423_s0] sm:$0xff]   ;;  %v319_v18 = vld [vmem:[%s423_s0 + $0x8] sm:$0xff]   ;;  %v230_v20 = vshrl.u32 %v229_v19, 7 }
   0x7   :  { %150 = vmatpush1.bf16.msra.mxu0 %v299_v4  ;;  %286 = vmatpush1.bf16.msra.mxu1 %v299_v4  ;;  %v227_v22 = vld [vmem:[%s424_s2] sm:$0x3] }
   0x8   :  { %151 = vmatprep.subr.bf16.mxu0 %v300_v5  ;;  %279 = vmatprep.subr.bf16.mxu1 %v300_v5  ;;  %v231_v21 = vsub.s32 0, %v230_v20  ;;  %v235_v23 = vsub.s32 1, %v230_v20 }
   0xa   :  { %v232_v24 = vrot.slane %v227_v22, %v231_v21  ;;  %v236_v25 = vrot.slane %v227_v22, %v235_v23 }
   0xb   :  { %152 = vmatpush1.bf16.msra.mxu0 %v302_v6  ;;  %287 = vmatpush1.bf16.msra.mxu1 %v302_v6 }
   0xc   :  { %153 = vmatprep.subr.bf16.mxu0 %v303_v7  ;;  %280 = vmatprep.subr.bf16.mxu1 %v303_v7 }
   0xf   :  { %154 = vmatpush1.bf16.msra.mxu0 %v305_v8  ;;  %288 = vmatpush1.bf16.msra.mxu1 %v305_v8 }
  0x10   :  { %155 = vmatprep.subr.bf16.mxu0 %v306_v9  ;;  %281 = vmatprep.subr.bf16.mxu1 %v306_v9 }
  0x13   :  { %156 = vmatpush1.bf16.msra.mxu0 %v308_v10  ;;  %289 = vmatpush1.bf16.msra.mxu1 %v308_v10 }
  0x14   :  { %157 = vmatprep.subr.bf16.mxu0 %v309_v11  ;;  %282 = vmatprep.subr.bf16.mxu1 %v309_v11 }
  0x17   :  { %158 = vmatpush1.bf16.msra.mxu0 %v311_v12  ;;  %290 = vmatpush1.bf16.msra.mxu1 %v311_v12 }
  0x18   :  { %159 = vmatprep.subr.bf16.mxu0 %v312_v13  ;;  %283 = vmatprep.subr.bf16.mxu1 %v312_v13 }
  0x1b   :  { %160 = vmatpush1.bf16.msra.mxu0 %v314_v14  ;;  %291 = vmatpush1.bf16.msra.mxu1 %v314_v14 }
  0x1c   :  { %161 = vmatprep.subr.bf16.mxu0 %v315_v15  ;;  %284 = vmatprep.subr.bf16.mxu1 %v315_v15 }
  0x1f   :  { %162 = vmatpush1.bf16.msra.mxu0 %v317_v16  ;;  %292 = vmatpush1.bf16.msra.mxu1 %v317_v16 }
  0x22   :  { %180 = vmatmul.mubr.bf16.vlgmr.msra.gmra.mrb[0].mxu0 %v318_v17  ;;  %190 = vmatmul.mubr.bf16.vlgmr.msra.gmra.mrb[0].mxu1 %v319_v18 }
  0xf5   :  { %v181_v26 = vpop.f32.mrb[0].mxu0  ;;  %v191_v27 = vpop.f32.mrb[0].mxu1 }
  0xf6   :  { %v239_v28 = vadd.f32 %v232_v24, %v181_v26  ;;  %v243_v29 = vadd.f32 %v232_v24, %v191_v27  ;;  %v183_v30 = vpop.f32.mrb[1].mxu0  ;;  %v193_v31 = vpop.f32.mrb[1].mxu1 }
  0xf7   :  { %v240_v32 = vadd.f32 %v236_v25, %v183_v30  ;;  %v244_v33 = vadd.f32 %v236_v25, %v193_v31  ;;  %v185_v34 = vpop.f32.mrb[2].mxu0  ;;  %v195_v35 = vpop.f32.mrb[2].mxu1 }
  0xf8   :  { %247 = vst [vmem:[%s425_s3] sm:$0xff] %v239_v28  ;;  %251 = vst [vmem:[%s425_s3 + $0x20] sm:$0xff] %v243_v29  ;;  %v241_v36 = vadd.f32 %v232_v24, %v185_v34  ;;  %v245_v37 = vadd.f32 %v232_v24, %v195_v35  ;;  %v187_v38 = vpop.f32.mrb[3].mxu0  ;;  %v197_v39 = vpop.f32.mrb[3].mxu1 }
  0xf9   :  { %248 = vst [vmem:[%s425_s3 + $0x8] sm:$0xff] %v240_v32  ;;  %252 = vst [vmem:[%s425_s3 + $0x28] sm:$0xff] %v244_v33  ;;  %v242_v40 = vadd.f32 %v236_v25, %v187_v38  ;;  %v246_v41 = vadd.f32 %v236_v25, %v197_v39 }
  0xfa   :  { %249 = vst [vmem:[%s425_s3 + $0x10] sm:$0xff] %v241_v36  ;;  %253 = vst [vmem:[%s425_s3 + $0x30] sm:$0xff] %v245_v37 }
  0xfb   :  { %250 = vst [vmem:[%s425_s3 + $0x18] sm:$0xff] %v242_v40  ;;  %254 = vst [vmem:[%s425_s3 + $0x38] sm:$0xff] %v246_v41 }

</bundles_post_ra>
